<compile_context>
chip_gen: v7x
topology: tpu7x:2x2x1
jax: 0.10.0
libtpu: 0.0.40
codegen_flags: <defaults>
</compile_context>

<pallas_src>
import math

import numpy as np
import jax
import jax.numpy as jnp
from jax.experimental import pallas as pl
from jax.experimental.pallas import tpu as pltpu


# ----------------------------------------------------------------------------
# Static geometry of the network for an HxW input
# ----------------------------------------------------------------------------
def _geometry(H, W):
    Hc, Wc = H - 2, W - 2              # conv1 VALID output
    Hp, Wp = Hc // 2, Wc // 2          # 2x2 max-pool output (floor, like PyTorch)
    Hg, Wg = Hp + 2, Wp + 2            # zero-padded grid used by conv2/conv3 (pad=1)
    R = Hg * Wg                        # rows per image in the flattened padded grid
    Rp = ((R + 7) // 8) * 8            # sublane-aligned per-image padded-grid rows
    PR = ((Hc * Wc + 7) // 8) * 8      # sublane-aligned per-image im2col rows
    Kp = 2 * (Hp - 1) * Wc + 2 * (Wp - 1) + 1   # pooling-selector columns
    margin = ((Wg + 1 + 7) // 8) * 8   # head/tail guard rows (>= Wg+1, 8-aligned)
    return dict(Hc=Hc, Wc=Wc, Hp=Hp, Wp=Wp, Hg=Hg, Wg=Wg,
                R=R, Rp=Rp, PR=PR, Kp=Kp, margin=margin)


# ----------------------------------------------------------------------------
# Static helper matrices (become jit constants): pooling selector + interior mask
# ----------------------------------------------------------------------------
def _build_static_mats(dims, Nb):
    Hp, Wp, Wg, Wc = dims["Hp"], dims["Wp"], dims["Wg"], dims["Wc"]
    Rp, Kp = dims["Rp"], dims["Kp"]

    # sel @ wm places pooled pixel (p,q) at padded-grid row (p+1)*Wg+(q+1); every other
    # row (zero-padding ring + alignment filler) comes out exactly 0.
    sel = np.zeros((Rp, Kp), np.float32)
    for p in range(Hp):
        for q in range(Wp):
            sel[(p + 1) * Wg + (q + 1), 2 * p * Wc + 2 * q] = 1.0

    # 1.0 on interior rows of the padded grid, 0.0 on ring/filler; tiled over Nb images.
    mask1 = np.zeros((Rp, 1), np.float32)
    for h in range(1, Hp + 1):
        for w in range(1, Wp + 1):
            mask1[h * Wg + w, 0] = 1.0
    mask = np.tile(mask1, (Nb, 1))
    return sel, mask


# ----------------------------------------------------------------------------
# Fused kernel: conv1+bias+maxpool+relu -> conv2+BN+relu -> conv3+BN+relu+globalmax
# Activation layout: row = n*Rp + h*Wg + w (padded grid), lane = channel.
# ----------------------------------------------------------------------------
def make_fused_kernel(Nb, dims):
    Wc, Wg = dims["Wc"], dims["Wg"]
    Rp, PR, Kp, margin = dims["Rp"], dims["PR"], dims["Kp"], dims["margin"]
    taps = [(kh, kw) for kh in range(3) for kw in range(3)]
    shifts23 = [(kh - 1) * Wg + (kw - 1) for kh, kw in taps]   # conv2/conv3 (pad=1)
    T = Nb * PR            # fused conv1 rows (all Nb images)
    RW = Nb * Rp           # fused conv2/conv3 rows (all Nb padded grids)

    def kernel(xp_ref, sel_ref, mask_ref, w1_ref, b1_ref,
               w2_ref, sc2_ref, sh2_ref, w3_ref, sc3_ref, sh3_ref,
               o_ref, p2_ref, p3_ref):
        C1 = p2_ref.shape[1]
        C2 = p3_ref.shape[1]

        # Hoisted small reads (read once; never re-broadcast inside loops).
        sel = sel_ref[...]                        # (Rp, Kp) bf16, 0/1 entries
        keep = mask_ref[...] > 0.5                # (Nb*Rp, 1) interior-row mask
        b1 = b1_ref[...]                          # (1, C1)
        sc2, sh2 = sc2_ref[...], sh2_ref[...]     # (1, C2)
        sc3, sh3 = sc3_ref[...], sh3_ref[...]     # (1, C3)

        # Only the head/tail guard strips are never rewritten by compute; keep them
        # defined (everything they feed is masked out downstream anyway).
        zero1 = jnp.zeros((margin, C1), p2_ref.dtype)
        zero2 = jnp.zeros((margin, C2), p3_ref.dtype)
        p2_ref[pl.ds(0, margin), :] = zero1
        p2_ref[pl.ds(margin + RW, margin), :] = zero1
        p3_ref[pl.ds(0, margin), :] = zero2
        p3_ref[pl.ds(margin + RW, margin), :] = zero2

        # ---- stage 1: conv1 (im2col, ONE K=27 dot over all Nb images) + bias,
        #      2x2 max-pool, ReLU, scatter into zero-padded grid via selection matmul.
        acc1 = jnp.dot(xp_ref[...], w1_ref[...],
                       preferred_element_type=jnp.float32) + b1          # (T, C1)
        hm = jnp.maximum(acc1[0:T - Wc, :], acc1[Wc:T, :])               # vertical pair max
        wm = jnp.maximum(hm[0:T - Wc - 1, :], hm[1:T - Wc, :])           # horizontal pair max
        wm = wm.astype(jnp.bfloat16)
        for n in range(Nb):                                              # tiny per-image dots
            wm_n = wm[n * PR:n * PR + Kp, :]                             # (Kp, C1)
            placed = jnp.dot(sel, wm_n, preferred_element_type=jnp.float32)
            placed = jnp.maximum(placed, 0.0)                            # ReLU
            p2_ref[pl.ds(margin + n * Rp, Rp), :] = placed.astype(p2_ref.dtype)

        # ---- stage 2: conv2(pad=1) + folded BN + ReLU, all images in ONE K=9*C1 dot.
        lhs2 = jnp.concatenate(
            [p2_ref[pl.ds(margin + s, RW), :] for s in shifts23], axis=-1)   # (RW, 9*C1)
        acc2 = jnp.dot(lhs2, w2_ref[...], preferred_element_type=jnp.float32)
        y2 = jnp.maximum(acc2 * sc2 + sh2, 0.0)
        y2 = jnp.where(keep, y2, 0.0)                                    # zero ring/filler
        p3_ref[pl.ds(margin, RW), :] = y2.astype(p3_ref.dtype)

        # ---- stage 3: conv3(pad=1) + folded BN + ReLU + per-image global max pool.
        lhs3 = jnp.concatenate(
            [p3_ref[pl.ds(margin + s, RW), :] for s in shifts23], axis=-1)   # (RW, 9*C2)
        acc3 = jnp.dot(lhs3, w3_ref[...], preferred_element_type=jnp.float32)
        y3 = jnp.maximum(acc3 * sc3 + sh3, 0.0)
        y3 = jnp.where(keep, y3, 0.0)                                    # safe: ReLU >= 0
        o_ref[0] = jnp.max(y3.reshape(Nb, Rp, -1), axis=1)               # (Nb, C3)

    return kernel


# ----------------------------------------------------------------------------
# Full forward (matches MyModel.forward: cnn(x) then flatten -> (N, 256))
# ----------------------------------------------------------------------------
def mymodel_forward(x_nchw, params, *, batch_block=4):
    N, Cin, H, W = x_nchw.shape
    assert Cin == 3 and H >= 6 and W >= 6, "input too small for conv3x3 + 2x2 pool"
    dims = _geometry(H, W)
    Hc, Wc = dims["Hc"], dims["Wc"]
    Rp, PR, Kp, margin = dims["Rp"], dims["PR"], dims["Kp"], dims["margin"]

    w1, b1 = params["w1"], params["b1"]
    w2, sc2, sh2 = params["w2"], params["scale2"], params["shift2"]
    w3, sc3, sh3 = params["w3"], params["scale3"], params["shift3"]
    C1, C2, C3 = w1.shape[-1], w2.shape[-1], w3.shape[-1]

    # Images per grid step.  G >= 2 (with "parallel" semantics) keeps both v7x
    # TensorCores busy; on single-core v5e/v6e pass batch_block=N to maximize M per dot.
    Nb = max(1, min(batch_block, N))
    G = -(-N // Nb)
    Npad = G * Nb

    # Wrapper-side layout plumbing (no compute hoisting): NCHW->NHWC and conv1 im2col,
    # so stage 1 becomes one K=27 MXU dot in-kernel.
    x = jnp.transpose(x_nchw, (0, 2, 3, 1)).astype(jnp.float32)           # (N,H,W,3)
    pat = jnp.concatenate(
        [x[:, kh:kh + Hc, kw:kw + Wc, :] for kh in range(3) for kw in range(3)],
        axis=-1)                                                           # (N,Hc,Wc,27)
    pat = pat.reshape(N, Hc * Wc, 9 * Cin)
    pat = jnp.pad(pat, ((0, Npad - N), (0, PR - Hc * Wc), (0, 0)))
    pat = pat.reshape(Npad * PR, 9 * Cin)                                  # f32 (stage 1 stays f32)

    # 3x3 taps folded into the contraction dim; bf16 MXU operands for the big convs.
    w1r = w1.reshape(9 * Cin, C1).astype(jnp.float32)
    w2r = w2.reshape(9 * C1, C2).astype(jnp.bfloat16)
    w3r = w3.reshape(9 * C2, C3).astype(jnp.bfloat16)

    sel_np, mask_np = _build_static_mats(dims, Nb)
    sel = jnp.asarray(sel_np, dtype=jnp.bfloat16)
    mask = jnp.asarray(mask_np)

    kernel = make_fused_kernel(Nb, dims)
    out = pl.pallas_call(
        kernel,
        out_shape=jax.ShapeDtypeStruct((G, Nb, C3), jnp.float32),
        grid=(G,),
        in_specs=[
            pl.BlockSpec((Nb * PR, 9 * Cin), lambda b: (b, 0)),   # im2col patches
            pl.BlockSpec((Rp, Kp), lambda b: (0, 0)),             # pooling selector
            pl.BlockSpec((Nb * Rp, 1), lambda b: (0, 0)),         # interior-row mask
            pl.BlockSpec((9 * Cin, C1), lambda b: (0, 0)),        # w1 (27, 64)
            pl.BlockSpec((1, C1), lambda b: (0, 0)),              # conv1 bias
            pl.BlockSpec((9 * C1, C2), lambda b: (0, 0)),         # w2 (576, 128)
            pl.BlockSpec((1, C2), lambda b: (0, 0)),              # BN2 scale
            pl.BlockSpec((1, C2), lambda b: (0, 0)),              # BN2 shift
            pl.BlockSpec((9 * C2, C3), lambda b: (0, 0)),         # w3 (1152, 256)
            pl.BlockSpec((1, C3), lambda b: (0, 0)),              # BN3 scale
            pl.BlockSpec((1, C3), lambda b: (0, 0)),              # BN3 shift
        ],
        out_specs=pl.BlockSpec((1, Nb, C3), lambda b: (b, 0, 0)),
        scratch_shapes=[
            pltpu.VMEM((2 * margin + Nb * Rp, C1), jnp.bfloat16),  # pooled conv1 grid
            pltpu.VMEM((2 * margin + Nb * Rp, C2), jnp.bfloat16),  # conv2 output grid
        ],
        compiler_params=pltpu.CompilerParams(
            dimension_semantics=("parallel",)),
    )(pat, sel, mask, w1r, b1, w2r, sc2, sh2, w3r, sc3, sh3)

    return out.reshape(Npad, C3)[:N]


# ----------------------------------------------------------------------------
# Deterministic parameter init (shapes from MyModel.__init__)
# ----------------------------------------------------------------------------
def init_params(key, eps=1e-5):
    ks = jax.random.split(key, 14)
    u = lambda k, s, lo, hi: jax.random.uniform(k, s, jnp.float32, lo, hi)
    p = {}
    f1 = 1.0 / math.sqrt(3 * 9)
    p["w1"] = u(ks[0], (3, 3, 3, 64), -f1, f1)
    p["b1"] = u(ks[1], (1, 64), -0.1, 0.1)
    f2 = 1.0 / math.sqrt(64 * 9)
    p["w2"] = u(ks[2], (3, 3, 64, 128), -f2, f2)
    p["b2"] = u(ks[3], (1, 128), -0.05, 0.05)
    p["gamma2"] = u(ks[4], (1, 128), 0.8, 1.2)
    p["beta2"] = u(ks[5], (1, 128), -0.1, 0.1)
    p["mean2"] = u(ks[6], (1, 128), -0.05, 0.05)
    p["var2"] = u(ks[7], (1, 128), 0.5, 1.5)
    f3 = 1.0 / math.sqrt(128 * 9)
    p["w3"] = u(ks[8], (3, 3, 128, 256), -f3, f3)
    p["b3"] = u(ks[9], (1, 256), -0.05, 0.05)
    p["gamma3"] = u(ks[10], (1, 256), 0.8, 1.2)
    p["beta3"] = u(ks[11], (1, 256), -0.1, 0.1)
    p["mean3"] = u(ks[12], (1, 256), -0.05, 0.05)
    p["var3"] = u(ks[13], (1, 256), 0.5, 1.5)
    # Fold conv bias + BN running stats into per-channel scale/shift (eval-mode BN).
    p["scale2"] = p["gamma2"] / jnp.sqrt(p["var2"] + eps)
    p["shift2"] = p["beta2"] + (p["b2"] - p["mean2"]) * p["scale2"]
    p["scale3"] = p["gamma3"] / jnp.sqrt(p["var3"] + eps)
    p["shift3"] = p["beta3"] + (p["b3"] - p["mean3"]) * p["scale3"]
    return p


# ----------------------------------------------------------------------------
# Pure-JAX reference (for correctness check)
# ----------------------------------------------------------------------------
def ref_forward(x_nchw, p, eps=1e-5):
    x = jnp.transpose(x_nchw, (0, 2, 3, 1)).astype(jnp.float32)
    conv = lambda a, w, pad: jax.lax.conv_general_dilated(
        a, w, (1, 1), pad, dimension_numbers=("NHWC", "HWIO", "NHWC"),
        precision=jax.lax.Precision.HIGHEST)
    bc = lambda v: v.reshape(1, 1, 1, -1)
    y = conv(x, p["w1"], "VALID") + bc(p["b1"])
    y = jax.lax.reduce_window(y, -jnp.inf, jax.lax.max,
                              (1, 2, 2, 1), (1, 2, 2, 1), "VALID")
    y = jnp.maximum(y, 0.0)
    y = conv(y, p["w2"], "SAME") + bc(p["b2"])
    y = (y - bc(p["mean2"])) / jnp.sqrt(bc(p["var2"]) + eps) * bc(p["gamma2"]) + bc(p["beta2"])
    y = jnp.maximum(y, 0.0)
    y = conv(y, p["w3"], "SAME") + bc(p["b3"])
    y = (y - bc(p["mean3"])) / jnp.sqrt(bc(p["var3"]) + eps) * bc(p["gamma3"]) + bc(p["beta3"])
    y = jnp.maximum(y, 0.0)
    return jnp.max(y, axis=(1, 2))          # AdaptiveMaxPool2d((1,1)) + flatten


if __name__ == "__main__":
    key = jax.random.PRNGKey(0)
    kx, kp = jax.random.split(key)
    N, C, H, W = 8, 3, 16, 16               # PyTorch-style NCHW input
    x = jax.random.normal(kx, (N, C, H, W), jnp.float32)
    params = init_params(kp)

    fwd = jax.jit(lambda a: mymodel_forward(a, params, batch_block=4))
    out = jax.block_until_ready(fwd(x))
    assert out.shape == (N, 256), out.shape

    ref = ref_forward(x, params)
    if not bool(jnp.allclose(out, ref, rtol=1e-2, atol=1e-2)):
        err = float(jnp.max(jnp.abs(out - ref)))
        raise AssertionError(f"Pallas output does not match JAX reference (max err {err})")

    print("KERNEL_OK")
</pallas_src>

<mosaic_0001>
module attributes {stable_mosaic.version = 11 : i64} {
  func.func @kernel(%arg0: i32, %arg1: memref<800x27xf32, #tpu.memory_space<vmem>>, %arg2: memref<88x181xbf16, #tpu.memory_space<vmem>>, %arg3: memref<352x1xf32, #tpu.memory_space<vmem>>, %arg4: memref<27x64xf32, #tpu.memory_space<vmem>>, %arg5: memref<1x64xf32, #tpu.memory_space<vmem>>, %arg6: memref<576x128xbf16, #tpu.memory_space<vmem>>, %arg7: memref<1x128xf32, #tpu.memory_space<vmem>>, %arg8: memref<1x128xf32, #tpu.memory_space<vmem>>, %arg9: memref<1152x256xbf16, #tpu.memory_space<vmem>>, %arg10: memref<1x256xf32, #tpu.memory_space<vmem>>, %arg11: memref<1x256xf32, #tpu.memory_space<vmem>>, %arg12: memref<1x4x256xf32, #tpu.memory_space<vmem>>, %arg13: memref<384x64xbf16, #tpu.memory_space<vmem>>, %arg14: memref<384x128xbf16, #tpu.memory_space<vmem>>) attributes {dimension_semantics = [#tpu.dimension_semantics<parallel>], iteration_bounds = array<i64: 2>, scalar_prefetch = 0 : i64, scratch_operands = 2 : i64, tpu.core_type = #tpu.core_type<tc>, window_params = [{transform_indices = @transform_0, window_bounds = array<i64: 800, 27>}, {pipeline_mode = #tpu.pipeline_mode<synchronous>, transform_indices = @transform_1, window_bounds = array<i64: 88, 181>}, {pipeline_mode = #tpu.pipeline_mode<synchronous>, transform_indices = @transform_2, window_bounds = array<i64: 352, 1>}, {pipeline_mode = #tpu.pipeline_mode<synchronous>, transform_indices = @transform_3, window_bounds = array<i64: 27, 64>}, {pipeline_mode = #tpu.pipeline_mode<synchronous>, transform_indices = @transform_4, window_bounds = array<i64: 1, 64>}, {pipeline_mode = #tpu.pipeline_mode<synchronous>, transform_indices = @transform_5, window_bounds = array<i64: 576, 128>}, {pipeline_mode = #tpu.pipeline_mode<synchronous>, transform_indices = @transform_6, window_bounds = array<i64: 1, 128>}, {pipeline_mode = #tpu.pipeline_mode<synchronous>, transform_indices = @transform_7, window_bounds = array<i64: 1, 128>}, {pipeline_mode = #tpu.pipeline_mode<synchronous>, transform_indices = @transform_8, window_bounds = array<i64: 1152, 256>}, {pipeline_mode = #tpu.pipeline_mode<synchronous>, transform_indices = @transform_9, window_bounds = array<i64: 1, 256>}, {pipeline_mode = #tpu.pipeline_mode<synchronous>, transform_indices = @transform_10, window_bounds = array<i64: 1, 256>}, {transform_indices = @transform_11, window_bounds = array<i64: 1, 4, 256>}]} {
    %c0 = arith.constant 0 : index
    %c0_0 = arith.constant 0 : index
    %0 = vector.load %arg2[%c0, %c0_0] : memref<88x181xbf16, #tpu.memory_space<vmem>>, vector<88x181xbf16>
    %c0_1 = arith.constant 0 : index
    %c0_2 = arith.constant 0 : index
    %1 = vector.load %arg3[%c0_1, %c0_2] : memref<352x1xf32, #tpu.memory_space<vmem>>, vector<352x1xf32>
    %cst = arith.constant 5.000000e-01 : f32
    %2 = vector.broadcast %cst : f32 to vector<352x1xf32>
    %3 = arith.cmpf ogt, %1, %2 : vector<352x1xf32>
    %c0_3 = arith.constant 0 : index
    %c0_4 = arith.constant 0 : index
    %4 = vector.load %arg5[%c0_3, %c0_4] : memref<1x64xf32, #tpu.memory_space<vmem>>, vector<1x64xf32>
    %c0_5 = arith.constant 0 : index
    %c0_6 = arith.constant 0 : index
    %5 = vector.load %arg7[%c0_5, %c0_6] : memref<1x128xf32, #tpu.memory_space<vmem>>, vector<1x128xf32>
    %c0_7 = arith.constant 0 : index
    %c0_8 = arith.constant 0 : index
    %6 = vector.load %arg8[%c0_7, %c0_8] : memref<1x128xf32, #tpu.memory_space<vmem>>, vector<1x128xf32>
    %c0_9 = arith.constant 0 : index
    %c0_10 = arith.constant 0 : index
    %7 = vector.load %arg10[%c0_9, %c0_10] : memref<1x256xf32, #tpu.memory_space<vmem>>, vector<1x256xf32>
    %c0_11 = arith.constant 0 : index
    %c0_12 = arith.constant 0 : index
    %8 = vector.load %arg11[%c0_11, %c0_12] : memref<1x256xf32, #tpu.memory_space<vmem>>, vector<1x256xf32>
    %cst_13 = arith.constant 0.000000e+00 : bf16
    %9 = vector.broadcast %cst_13 : bf16 to vector<16x64xbf16>
    %cst_14 = arith.constant 0.000000e+00 : bf16
    %10 = vector.broadcast %cst_14 : bf16 to vector<16x128xbf16>
    %c0_15 = arith.constant 0 : index
    %c0_16 = arith.constant 0 : index
    %11 = vector.load %arg13[%c0_15, %c0_16] : memref<384x64xbf16, #tpu.memory_space<vmem>>, vector<16x64xbf16>
    tpu.vector_store %arg13[%c0_15, %c0_16], %9 {strides = array<i32>} : memref<384x64xbf16, #tpu.memory_space<vmem>>, vector<16x64xbf16>,
    %c368 = arith.constant 368 : index
    %c0_17 = arith.constant 0 : index
    %12 = vector.load %arg13[%c368, %c0_17] : memref<384x64xbf16, #tpu.memory_space<vmem>>, vector<16x64xbf16>
    tpu.vector_store %arg13[%c368, %c0_17], %9 {strides = array<i32>} : memref<384x64xbf16, #tpu.memory_space<vmem>>, vector<16x64xbf16>,
    %c0_18 = arith.constant 0 : index
    %c0_19 = arith.constant 0 : index
    %13 = vector.load %arg14[%c0_18, %c0_19] : memref<384x128xbf16, #tpu.memory_space<vmem>>, vector<16x128xbf16>
    tpu.vector_store %arg14[%c0_18, %c0_19], %10 {strides = array<i32>} : memref<384x128xbf16, #tpu.memory_space<vmem>>, vector<16x128xbf16>,
    %c368_20 = arith.constant 368 : index
    %c0_21 = arith.constant 0 : index
    %14 = vector.load %arg14[%c368_20, %c0_21] : memref<384x128xbf16, #tpu.memory_space<vmem>>, vector<16x128xbf16>
    tpu.vector_store %arg14[%c368_20, %c0_21], %10 {strides = array<i32>} : memref<384x128xbf16, #tpu.memory_space<vmem>>, vector<16x128xbf16>,
    %c0_22 = arith.constant 0 : index
    %c0_23 = arith.constant 0 : index
    %15 = vector.load %arg1[%c0_22, %c0_23] : memref<800x27xf32, #tpu.memory_space<vmem>>, vector<800x27xf32>
    %c0_24 = arith.constant 0 : index
    %c0_25 = arith.constant 0 : index
    %16 = vector.load %arg4[%c0_24, %c0_25] : memref<27x64xf32, #tpu.memory_space<vmem>>, vector<27x64xf32>
    %cst_26 = arith.constant dense<0.000000e+00> : vector<800x64xf32>
    %17 = tpu.matmul %15, %16, %cst_26 {dimension_numbers = #tpu.dot_dimension_numbers<[1], [0], [0], [1], [0, 0, 1, 1], [], []>} : vector<800x27xf32>, vector<27x64xf32>, vector<800x64xf32> -> vector<800x64xf32>
    %18 = vector.broadcast %4 : vector<1x64xf32> to vector<800x64xf32>
    %19 = arith.addf %17, %18 : vector<800x64xf32>
    %20 = vector.extract_strided_slice %19 {offsets = [0, 0], sizes = [786, 64], strides = [1, 1]} : vector<800x64xf32> to vector<786x64xf32>
    %21 = vector.extract_strided_slice %19 {offsets = [14, 0], sizes = [786, 64], strides = [1, 1]} : vector<800x64xf32> to vector<786x64xf32>
    %22 = arith.maximumf %20, %21 : vector<786x64xf32>
    %23 = vector.extract_strided_slice %22 {offsets = [0, 0], sizes = [785, 64], strides = [1, 1]} : vector<786x64xf32> to vector<785x64xf32>
    %24 = vector.extract_strided_slice %22 {offsets = [1, 0], sizes = [785, 64], strides = [1, 1]} : vector<786x64xf32> to vector<785x64xf32>
    %25 = arith.maximumf %23, %24 : vector<785x64xf32>
    %26 = arith.truncf %25 : vector<785x64xf32> to vector<785x64xbf16>
    %27 = vector.extract_strided_slice %26 {offsets = [0, 0], sizes = [181, 64], strides = [1, 1]} : vector<785x64xbf16> to vector<181x64xbf16>
    %cst_27 = arith.constant dense<0.000000e+00> : vector<88x64xf32>
    %28 = tpu.matmul %0, %27, %cst_27 {dimension_numbers = #tpu.dot_dimension_numbers<[1], [0], [0], [1], [0, 0, 1, 1], [], []>} : vector<88x181xbf16>, vector<181x64xbf16>, vector<88x64xf32> -> vector<88x64xf32>
    %cst_28 = arith.constant 0.000000e+00 : f32
    %29 = vector.broadcast %cst_28 : f32 to vector<88x64xf32>
    %30 = arith.maximumf %28, %29 : vector<88x64xf32>
    %31 = arith.truncf %30 : vector<88x64xf32> to vector<88x64xbf16>
    %c16 = arith.constant 16 : index
    %c0_29 = arith.constant 0 : index
    %32 = vector.load %arg13[%c16, %c0_29] : memref<384x64xbf16, #tpu.memory_space<vmem>>, vector<88x64xbf16>
    tpu.vector_store %arg13[%c16, %c0_29], %31 {strides = array<i32>} : memref<384x64xbf16, #tpu.memory_space<vmem>>, vector<88x64xbf16>,
    %33 = vector.extract_strided_slice %26 {offsets = [200, 0], sizes = [181, 64], strides = [1, 1]} : vector<785x64xbf16> to vector<181x64xbf16>
    %cst_30 = arith.constant dense<0.000000e+00> : vector<88x64xf32>
    %34 = tpu.matmul %0, %33, %cst_30 {dimension_numbers = #tpu.dot_dimension_numbers<[1], [0], [0], [1], [0, 0, 1, 1], [], []>} : vector<88x181xbf16>, vector<181x64xbf16>, vector<88x64xf32> -> vector<88x64xf32>
    %cst_31 = arith.constant 0.000000e+00 : f32
    %35 = vector.broadcast %cst_31 : f32 to vector<88x64xf32>
    %36 = arith.maximumf %34, %35 : vector<88x64xf32>
    %37 = arith.truncf %36 : vector<88x64xf32> to vector<88x64xbf16>
    %c104 = arith.constant 104 : index
    %c0_32 = arith.constant 0 : index
    %38 = vector.load %arg13[%c104, %c0_32] : memref<384x64xbf16, #tpu.memory_space<vmem>>, vector<88x64xbf16>
    tpu.vector_store %arg13[%c104, %c0_32], %37 {strides = array<i32>} : memref<384x64xbf16, #tpu.memory_space<vmem>>, vector<88x64xbf16>,
    %39 = vector.extract_strided_slice %26 {offsets = [400, 0], sizes = [181, 64], strides = [1, 1]} : vector<785x64xbf16> to vector<181x64xbf16>
    %cst_33 = arith.constant dense<0.000000e+00> : vector<88x64xf32>
    %40 = tpu.matmul %0, %39, %cst_33 {dimension_numbers = #tpu.dot_dimension_numbers<[1], [0], [0], [1], [0, 0, 1, 1], [], []>} : vector<88x181xbf16>, vector<181x64xbf16>, vector<88x64xf32> -> vector<88x64xf32>
    %cst_34 = arith.constant 0.000000e+00 : f32
    %41 = vector.broadcast %cst_34 : f32 to vector<88x64xf32>
    %42 = arith.maximumf %40, %41 : vector<88x64xf32>
    %43 = arith.truncf %42 : vector<88x64xf32> to vector<88x64xbf16>
    %c192 = arith.constant 192 : index
    %c0_35 = arith.constant 0 : index
    %44 = vector.load %arg13[%c192, %c0_35] : memref<384x64xbf16, #tpu.memory_space<vmem>>, vector<88x64xbf16>
    tpu.vector_store %arg13[%c192, %c0_35], %43 {strides = array<i32>} : memref<384x64xbf16, #tpu.memory_space<vmem>>, vector<88x64xbf16>,
    %45 = vector.extract_strided_slice %26 {offsets = [600, 0], sizes = [181, 64], strides = [1, 1]} : vector<785x64xbf16> to vector<181x64xbf16>
    %cst_36 = arith.constant dense<0.000000e+00> : vector<88x64xf32>
    %46 = tpu.matmul %0, %45, %cst_36 {dimension_numbers = #tpu.dot_dimension_numbers<[1], [0], [0], [1], [0, 0, 1, 1], [], []>} : vector<88x181xbf16>, vector<181x64xbf16>, vector<88x64xf32> -> vector<88x64xf32>
    %cst_37 = arith.constant 0.000000e+00 : f32
    %47 = vector.broadcast %cst_37 : f32 to vector<88x64xf32>
    %48 = arith.maximumf %46, %47 : vector<88x64xf32>
    %49 = arith.truncf %48 : vector<88x64xf32> to vector<88x64xbf16>
    %c280 = arith.constant 280 : index
    %c0_38 = arith.constant 0 : index
    %50 = vector.load %arg13[%c280, %c0_38] : memref<384x64xbf16, #tpu.memory_space<vmem>>, vector<88x64xbf16>
    tpu.vector_store %arg13[%c280, %c0_38], %49 {strides = array<i32>} : memref<384x64xbf16, #tpu.memory_space<vmem>>, vector<88x64xbf16>,
    %c6 = arith.constant 6 : index
    %c0_39 = arith.constant 0 : index
    %51 = vector.load %arg13[%c6, %c0_39] : memref<384x64xbf16, #tpu.memory_space<vmem>>, vector<352x64xbf16>
    %c7 = arith.constant 7 : index
    %c0_40 = arith.constant 0 : index
    %52 = vector.load %arg13[%c7, %c0_40] : memref<384x64xbf16, #tpu.memory_space<vmem>>, vector<352x64xbf16>
    %c8 = arith.constant 8 : index
    %c0_41 = arith.constant 0 : index
    %53 = vector.load %arg13[%c8, %c0_41] : memref<384x64xbf16, #tpu.memory_space<vmem>>, vector<352x64xbf16>
    %c15 = arith.constant 15 : index
    %c0_42 = arith.constant 0 : index
    %54 = vector.load %arg13[%c15, %c0_42] : memref<384x64xbf16, #tpu.memory_space<vmem>>, vector<352x64xbf16>
    %c16_43 = arith.constant 16 : index
    %c0_44 = arith.constant 0 : index
    %55 = vector.load %arg13[%c16_43, %c0_44] : memref<384x64xbf16, #tpu.memory_space<vmem>>, vector<352x64xbf16>
    %c17 = arith.constant 17 : index
    %c0_45 = arith.constant 0 : index
    %56 = vector.load %arg13[%c17, %c0_45] : memref<384x64xbf16, #tpu.memory_space<vmem>>, vector<352x64xbf16>
    %c24 = arith.constant 24 : index
    %c0_46 = arith.constant 0 : index
    %57 = vector.load %arg13[%c24, %c0_46] : memref<384x64xbf16, #tpu.memory_space<vmem>>, vector<352x64xbf16>
    %c25 = arith.constant 25 : index
    %c0_47 = arith.constant 0 : index
    %58 = vector.load %arg13[%c25, %c0_47] : memref<384x64xbf16, #tpu.memory_space<vmem>>, vector<352x64xbf16>
    %c26 = arith.constant 26 : index
    %c0_48 = arith.constant 0 : index
    %59 = vector.load %arg13[%c26, %c0_48] : memref<384x64xbf16, #tpu.memory_space<vmem>>, vector<352x64xbf16>
    %60 = tpu.concatenate %51, %52, %53, %54, %55, %56, %57, %58, %59 in 1 : vector<352x64xbf16>, vector<352x64xbf16>, vector<352x64xbf16>, vector<352x64xbf16>, vector<352x64xbf16>, vector<352x64xbf16>, vector<352x64xbf16>, vector<352x64xbf16>, vector<352x64xbf16> -> vector<352x576xbf16>
    %c0_49 = arith.constant 0 : index
    %c0_50 = arith.constant 0 : index
    %61 = vector.load %arg6[%c0_49, %c0_50] : memref<576x128xbf16, #tpu.memory_space<vmem>>, vector<576x128xbf16>
    %cst_51 = arith.constant dense<0.000000e+00> : vector<352x128xf32>
    %62 = tpu.matmul %60, %61, %cst_51 {dimension_numbers = #tpu.dot_dimension_numbers<[1], [0], [0], [1], [0, 0, 1, 1], [], []>} : vector<352x576xbf16>, vector<576x128xbf16>, vector<352x128xf32> -> vector<352x128xf32>
    %63 = vector.broadcast %5 : vector<1x128xf32> to vector<352x128xf32>
    %64 = arith.mulf %62, %63 : vector<352x128xf32>
    %65 = vector.broadcast %6 : vector<1x128xf32> to vector<352x128xf32>
    %66 = arith.addf %64, %65 : vector<352x128xf32>
    %cst_52 = arith.constant 0.000000e+00 : f32
    %67 = vector.broadcast %cst_52 : f32 to vector<352x128xf32>
    %68 = arith.maximumf %66, %67 : vector<352x128xf32>
    %cst_53 = arith.constant 0.000000e+00 : f32
    %69 = vector.shape_cast %3 : vector<352x1xi1> to vector<352x1xi1>
    %70 = vector.broadcast %69 : vector<352x1xi1> to vector<352x128xi1>
    %71 = vector.broadcast %cst_53 : f32 to vector<352x128xf32>
    %72 = arith.select %70, %68, %71 : vector<352x128xi1>, vector<352x128xf32>
    %73 = arith.truncf %72 : vector<352x128xf32> to vector<352x128xbf16>
    %c16_54 = arith.constant 16 : index
    %c0_55 = arith.constant 0 : index
    %74 = vector.load %arg14[%c16_54, %c0_55] : memref<384x128xbf16, #tpu.memory_space<vmem>>, vector<352x128xbf16>
    tpu.vector_store %arg14[%c16_54, %c0_55], %73 {strides = array<i32>} : memref<384x128xbf16, #tpu.memory_space<vmem>>, vector<352x128xbf16>,
    %c6_56 = arith.constant 6 : index
    %c0_57 = arith.constant 0 : index
    %75 = vector.load %arg14[%c6_56, %c0_57] : memref<384x128xbf16, #tpu.memory_space<vmem>>, vector<352x128xbf16>
    %c7_58 = arith.constant 7 : index
    %c0_59 = arith.constant 0 : index
    %76 = vector.load %arg14[%c7_58, %c0_59] : memref<384x128xbf16, #tpu.memory_space<vmem>>, vector<352x128xbf16>
    %c8_60 = arith.constant 8 : index
    %c0_61 = arith.constant 0 : index
    %77 = vector.load %arg14[%c8_60, %c0_61] : memref<384x128xbf16, #tpu.memory_space<vmem>>, vector<352x128xbf16>
    %c15_62 = arith.constant 15 : index
    %c0_63 = arith.constant 0 : index
    %78 = vector.load %arg14[%c15_62, %c0_63] : memref<384x128xbf16, #tpu.memory_space<vmem>>, vector<352x128xbf16>
    %c16_64 = arith.constant 16 : index
    %c0_65 = arith.constant 0 : index
    %79 = vector.load %arg14[%c16_64, %c0_65] : memref<384x128xbf16, #tpu.memory_space<vmem>>, vector<352x128xbf16>
    %c17_66 = arith.constant 17 : index
    %c0_67 = arith.constant 0 : index
    %80 = vector.load %arg14[%c17_66, %c0_67] : memref<384x128xbf16, #tpu.memory_space<vmem>>, vector<352x128xbf16>
    %c24_68 = arith.constant 24 : index
    %c0_69 = arith.constant 0 : index
    %81 = vector.load %arg14[%c24_68, %c0_69] : memref<384x128xbf16, #tpu.memory_space<vmem>>, vector<352x128xbf16>
    %c25_70 = arith.constant 25 : index
    %c0_71 = arith.constant 0 : index
    %82 = vector.load %arg14[%c25_70, %c0_71] : memref<384x128xbf16, #tpu.memory_space<vmem>>, vector<352x128xbf16>
    %c26_72 = arith.constant 26 : index
    %c0_73 = arith.constant 0 : index
    %83 = vector.load %arg14[%c26_72, %c0_73] : memref<384x128xbf16, #tpu.memory_space<vmem>>, vector<352x128xbf16>
    %84 = tpu.concatenate %75, %76, %77, %78, %79, %80, %81, %82, %83 in 1 : vector<352x128xbf16>, vector<352x128xbf16>, vector<352x128xbf16>, vector<352x128xbf16>, vector<352x128xbf16>, vector<352x128xbf16>, vector<352x128xbf16>, vector<352x128xbf16>, vector<352x128xbf16> -> vector<352x1152xbf16>
    %c0_74 = arith.constant 0 : index
    %c0_75 = arith.constant 0 : index
    %85 = vector.load %arg9[%c0_74, %c0_75] : memref<1152x256xbf16, #tpu.memory_space<vmem>>, vector<1152x256xbf16>
    %cst_76 = arith.constant dense<0.000000e+00> : vector<352x256xf32>
    %86 = tpu.matmul %84, %85, %cst_76 {dimension_numbers = #tpu.dot_dimension_numbers<[1], [0], [0], [1], [0, 0, 1, 1], [], []>} : vector<352x1152xbf16>, vector<1152x256xbf16>, vector<352x256xf32> -> vector<352x256xf32>
    %87 = vector.broadcast %7 : vector<1x256xf32> to vector<352x256xf32>
    %88 = arith.mulf %86, %87 : vector<352x256xf32>
    %89 = vector.broadcast %8 : vector<1x256xf32> to vector<352x256xf32>
    %90 = arith.addf %88, %89 : vector<352x256xf32>
    %cst_77 = arith.constant 0.000000e+00 : f32
    %91 = vector.broadcast %cst_77 : f32 to vector<352x256xf32>
    %92 = arith.maximumf %90, %91 : vector<352x256xf32>
    %cst_78 = arith.constant 0.000000e+00 : f32
    %93 = vector.shape_cast %3 : vector<352x1xi1> to vector<352x1xi1>
    %94 = vector.broadcast %93 : vector<352x1xi1> to vector<352x256xi1>
    %95 = vector.broadcast %cst_78 : f32 to vector<352x256xf32>
    %96 = arith.select %94, %92, %95 : vector<352x256xi1>, vector<352x256xf32>
    %97 = vector.shape_cast %96 : vector<352x256xf32> to vector<4x88x256xf32>
    %cst_79 = arith.constant dense<0xFF800000> : vector<4x256xf32>
    %98 = vector.multi_reduction <maximumf>, %97, %cst_79 [1] : vector<4x88x256xf32> to vector<4x256xf32>
    %c0_80 = arith.constant 0 : index
    %c0_81 = arith.constant 0 : index
    %c0_82 = arith.constant 0 : index
    %99 = vector.load %arg12[%c0_80, %c0_81, %c0_82] : memref<1x4x256xf32, #tpu.memory_space<vmem>>, vector<1x4x256xf32>
    %100 = vector.shape_cast %99 : vector<1x4x256xf32> to vector<4x256xf32>
    %101 = vector.shape_cast %98 : vector<4x256xf32> to vector<1x4x256xf32>
    tpu.vector_store %arg12[%c0_80, %c0_81, %c0_82], %101 {strides = array<i32>} : memref<1x4x256xf32, #tpu.memory_space<vmem>>, vector<1x4x256xf32>,
    return
  }
  func.func @transform_0(%arg0: i32) -> (i32, i32) {
    %c0_i32 = arith.constant 0 : i32
    %c0_i32_0 = arith.constant 0 : i32
    return %arg0, %c0_i32 : i32, i32
  }
  func.func @transform_1(%arg0: i32) -> (i32, i32) {
    %c0_i32 = arith.constant 0 : i32
    %c0_i32_0 = arith.constant 0 : i32
    %c0_i32_1 = arith.constant 0 : i32
    return %c0_i32, %c0_i32_0 : i32, i32
  }
  func.func @transform_2(%arg0: i32) -> (i32, i32) {
    %c0_i32 = arith.constant 0 : i32
    %c0_i32_0 = arith.constant 0 : i32
    %c0_i32_1 = arith.constant 0 : i32
    return %c0_i32, %c0_i32_0 : i32, i32
  }
  func.func @transform_3(%arg0: i32) -> (i32, i32) {
    %c0_i32 = arith.constant 0 : i32
    %c0_i32_0 = arith.constant 0 : i32
    %c0_i32_1 = arith.constant 0 : i32
    return %c0_i32, %c0_i32_0 : i32, i32
  }
  func.func @transform_4(%arg0: i32) -> (i32, i32) {
    %c0_i32 = arith.constant 0 : i32
    %c0_i32_0 = arith.constant 0 : i32
    %c0_i32_1 = arith.constant 0 : i32
    return %c0_i32, %c0_i32_0 : i32, i32
  }
  func.func @transform_5(%arg0: i32) -> (i32, i32) {
    %c0_i32 = arith.constant 0 : i32
    %c0_i32_0 = arith.constant 0 : i32
    %c0_i32_1 = arith.constant 0 : i32
    return %c0_i32, %c0_i32_0 : i32, i32
  }
  func.func @transform_6(%arg0: i32) -> (i32, i32) {
    %c0_i32 = arith.constant 0 : i32
    %c0_i32_0 = arith.constant 0 : i32
    %c0_i32_1 = arith.constant 0 : i32
    return %c0_i32, %c0_i32_0 : i32, i32
  }
  func.func @transform_7(%arg0: i32) -> (i32, i32) {
    %c0_i32 = arith.constant 0 : i32
    %c0_i32_0 = arith.constant 0 : i32
    %c0_i32_1 = arith.constant 0 : i32
    return %c0_i32, %c0_i32_0 : i32, i32
  }
  func.func @transform_8(%arg0: i32) -> (i32, i32) {
    %c0_i32 = arith.constant 0 : i32
    %c0_i32_0 = arith.constant 0 : i32
    %c0_i32_1 = arith.constant 0 : i32
    return %c0_i32, %c0_i32_0 : i32, i32
  }
  func.func @transform_9(%arg0: i32) -> (i32, i32) {
    %c0_i32 = arith.constant 0 : i32
    %c0_i32_0 = arith.constant 0 : i32
    %c0_i32_1 = arith.constant 0 : i32
    return %c0_i32, %c0_i32_0 : i32, i32
  }
  func.func @transform_10(%arg0: i32) -> (i32, i32) {
    %c0_i32 = arith.constant 0 : i32
    %c0_i32_0 = arith.constant 0 : i32
    %c0_i32_1 = arith.constant 0 : i32
    return %c0_i32, %c0_i32_0 : i32, i32
  }
  func.func @transform_11(%arg0: i32) -> (i32, i32, i32) {
    %c0_i32 = arith.constant 0 : i32
    %c0_i32_0 = arith.constant 0 : i32
    %c0_i32_1 = arith.constant 0 : i32
    return %arg0, %c0_i32, %c0_i32_0 : i32, i32, i32
  }
}

</mosaic_0001>

<bundles_post_ra>
// kernel: _lambda_.1
= control target key start
LH: loop header
LB: loop body
LE: loop exit
PB: predicated region body
PF: predicated region fallthrough
CT: control target
= control target key end

     0   :  { %s11914_s17 = smov 0   ;;  %s18195_s0 = inlined_call_operand.vmem [shape: f32[1600,27], index: 0, kind: input, shape index: {}]   ;;  %s18196_s1 = inlined_call_operand.vmem [shape: bf16[88,181], index: 1, kind: input, shape index: {}]   ;;  %s18197_s2 = inlined_call_operand.vmem [shape: f32[352,1], index: 2, kind: input, shape index: {}]   ;;  %s18198_s3 = inlined_call_operand.vmem [shape: f32[27,64], index: 3, kind: input, shape index: {}]   ;;  %s18199_s4 = inlined_call_operand.vmem [shape: f32[1,64], index: 4, kind: input, shape index: {}]   ;;  %s18200_s5 = inlined_call_operand.vmem [shape: bf16[576,128], index: 5, kind: input, shape index: {}]   ;;  %s18201_s6 = inlined_call_operand.vmem [shape: f32[1,128], index: 6, kind: input, shape index: {}]   ;;  %s18202_s7 = inlined_call_operand.vmem [shape: f32[1,128], index: 7, kind: input, shape index: {}]   ;;  %s18203_s8 = inlined_call_operand.vmem [shape: bf16[1152,256], index: 8, kind: input, shape index: {}]   ;;  %s18204_s9 = inlined_call_operand.vmem [shape: f32[1,256], index: 9, kind: input, shape index: {}]   ;;  %s18205_s10 = inlined_call_operand.vmem [shape: f32[1,256], index: 10, kind: input, shape index: {}]   ;;  %s18206_s11 = inlined_call_operand.vmem [shape: f32[2,4,256], index: 11, kind: output, shape index: {}]  }
   0x1 LB: > { %s11920_s18 = sadd.s32 4294967295, %s11848_s17   ;;  %p10266_p0 = scmp.ge.s32.totalorder %s11848_s17, 1  ;;  %s11848_s17 = sphi %s11914_s17, %s21_s17  }
   0x2   : > { %p338_p1 = scmp.lt.s32.totalorder %s11848_s17, 3 }
   0x4   : > { %p339_p2 = pnand %p10266_p0, %p338_p1 }
   0x6   : > { %342 = sbr.rel (%p339_p2) target bundleno = 1935 (0x78f), region = 64 }
   0xd   : > { %v599_v0 = vld [vmem:[%s18198_s3] sm:$0xff]  ;;  %v600_v1 = vld [vmem:[%s18198_s3 + $0x8] sm:$0xff]  ;;  %v601_v2 = vld [vmem:[%s18198_s3 + $0x10] sm:$0xff]  ;;  %vm910_vm0 = vcmask 1042432   ;;  %s378_s25 = smul.u32 100, %s11920_s18  ;;  %vm11850_vm1 = vmmov 1  }
   0xe   : > { %v10955_v3 = vpack.c.bf16 %v600_v1, %v599_v0  ;;  %v602_v4 = vld [vmem:[%s18198_s3 + $0x18] sm:$0x7]  ;;  %vm10960_vm2 = vmpackc.low %vm910_vm0, %vm11850_vm1  ;;  %vm609_vm3 = vcmask 220160   ;;  %v11851_v63 = vmov 0   ;;  %vm2555_vm4 = vcmask 433152   ;;  %p384_p4 = scmp.lt.s32.totalorder %s11920_s18, 1 }
   0xf   : > { %v10959_v5 = vpack.c.bf16 %v602_v4, %v601_v2  ;;  %p379_p3 = scmp.lt.s32.totalorder %s378_s25, 199  ;;  %2579 = vmatprep.subr.bf16.mxu1 %v11851_v63  ;;  %497 = vst [vmem:[#allocation3] sm:$0xff] %v11851_v63  ;;  %498 = vst [vmem:[#allocation3 + $0xb8] sm:$0xff] %v11851_v63  ;;  %11450 = vset.pattern.permute.xlu1 %v11851_v63  ;;  %vm1578_vm5 = vcmask 1041408   ;;  %vm2069_vm6 = vcmask 1046528   ;;  %vm2695_vm7 = vcmask 1043456  }
  0x10   : > { %10956 = vmatprep.subr.bf16.mxu0 %v10955_v3  ;;  %11449 = vset.pattern.permute.xlu0 %v11851_v63  ;;  %vm494_vm8 = vcmask 523264   ;;  %vm3173_vm9 = vsmask.f32 7424  ;;  %vm3472_vm10 = vsmask.f32 3328  ;;  %vm3958_vm11 = vcmask 1045504  }
  0x11   : > { %10958 = vmatpush3.bf16.msra.mxu0 %v10955_v3  ;;  %s19069_s25 = smov (!%p379_p3, %s378_s25), 199  ;;  %vm3661_vm12 = vsmask.f32 2304  ;;  %vm4403_vm13 = vcmask 1044480   ;;  %vm3808_vm14 = vsmask.f32 6400 }
  0x12   : > { %10961 = vmatprep.subr.msk.bf16.mxu0 %vm10960_vm2, %v10959_v5  ;;  %s10267_s28 = sshll.u32 %s19069_s25, 3  ;;  %vm2681_vm15 = vcmask 519168   ;;  %vm2853_vm1 = vcmask 523268   ;;  %s19071_s18 = smov (!%p384_p4, %s11920_s18), 1 }
  0x13   : > { %s11941_s12 = scalar_lea.vmem %s18195_s0, %s10267_s28  ;;  %s10614_s27 = sshll.u32 %s19071_s18, 3 }
  0x14   : > { %v499_v6 = vld [vmem:[%s11941_s12] sm:$0xff]  ;;  %v500_v7 = vld [vmem:[%s11941_s12 + $0x8] sm:$0xff]  ;;  %v501_v8 = vld [vmem:[%s11941_s12 + $0x10] sm:$0xff]  ;;  %s388_s29 = scalar_lea.vmem %s18206_s11, %s10614_s27 }
  0x15   : > { %10964 = vmatpush3.bf16.msk.msra.mxu0 %vm10960_vm2, %v10959_v5  ;;  %10753 = vmatprep.mubr.msk.f32.mxu0 %vm609_vm3, %v499_v6  ;;  %v502_v9 = vld [vmem:[%s11941_s12 + $0x18] sm:$0xff]  ;;  %v503_v10 = vld [vmem:[%s11941_s12 + $0x20] sm:$0xff]  ;;  %v504_v11 = vld [vmem:[%s11941_s12 + $0x28] sm:$0xff] }
  0x16   : > { %v505_v12 = vld [vmem:[%s11941_s12 + $0x30] sm:$0xff]  ;;  %v506_v13 = vld [vmem:[%s11941_s12 + $0x38] sm:$0xff]  ;;  %v507_v14 = vld [vmem:[%s11941_s12 + $0x40] sm:$0xff]  ;;  %4999 = vmatprep.subr.bf16.mxu0 %v11851_v63 }
  0x17   : > { %v508_v15 = vld [vmem:[%s11941_s12 + $0x48] sm:$0xff]  ;;  %v509_v16 = vld [vmem:[%s11941_s12 + $0x50] sm:$0xff]  ;;  %v510_v17 = vld [vmem:[%s11941_s12 + $0x58] sm:$0xff] }
  0x18   : > { %10754 = vmatmul.mubr.msk.f32.vlgmr.msra.gmra.mrb[0].mxu0 %vm609_vm3, %v500_v7  ;;  %v511_v18 = vld [vmem:[%s11941_s12 + $0x60] sm:$0xff]  ;;  %v512_v19 = vld [vmem:[%s11941_s12 + $0x68] sm:$0xff]  ;;  %v513_v20 = vld [vmem:[%s11941_s12 + $0x70] sm:$0xff] }
  0x19   : > { %10756 = vmatprep.mubr.msk.f32.mxu0 %vm609_vm3, %v501_v8  ;;  %v514_v21 = vld [vmem:[%s11941_s12 + $0x78] sm:$0xff]  ;;  %v515_v22 = vld [vmem:[%s11941_s12 + $0x80] sm:$0xff]  ;;  %v516_v23 = vld [vmem:[%s11941_s12 + $0x88] sm:$0xff] }
  0x1a   : > { %v517_v24 = vld [vmem:[%s11941_s12 + $0x90] sm:$0xff]  ;;  %v518_v25 = vld [vmem:[%s11941_s12 + $0x98] sm:$0xff]  ;;  %v519_v26 = vld [vmem:[%s11941_s12 + $0xa0] sm:$0xff] }
  0x1b   : > { %v520_v27 = vld [vmem:[%s11941_s12 + $0xa8] sm:$0xff]  ;;  %v521_v28 = vld [vmem:[%s11941_s12 + $0xb0] sm:$0xff]  ;;  %v522_v29 = vld [vmem:[%s11941_s12 + $0xb8] sm:$0xff] }
  0x1c   : > { %10757 = vmatmul.mubr.msk.f32.gmra.mrb[2].mxu0 %vm609_vm3, %v502_v9  ;;  %v523_v30 = vld [vmem:[%s11941_s12 + $0xc0] sm:$0xff]  ;;  %v524_v31 = vld [vmem:[%s11941_s12 + $0xc8] sm:$0xff]  ;;  %v525_v32 = vld [vmem:[%s11941_s12 + $0xd0] sm:$0xff] }
  0x1d   : > { %10759 = vmatprep.mubr.msk.f32.mxu0 %vm609_vm3, %v503_v10  ;;  %v526_v33 = vld [vmem:[%s11941_s12 + $0xd8] sm:$0xff]  ;;  %v527_v34 = vld [vmem:[%s11941_s12 + $0xe0] sm:$0xff]  ;;  %v528_v35 = vld [vmem:[%s11941_s12 + $0xe8] sm:$0xff] }
  0x1e   : > { %v529_v36 = vld [vmem:[%s11941_s12 + $0xf0] sm:$0xff]  ;;  %v530_v37 = vld [vmem:[%s11941_s12 + $0xf8] sm:$0xff]  ;;  %v531_v38 = vld [vmem:[%s11941_s12 + $0x100] sm:$0xff] }
  0x1f   : > { %v532_v39 = vld [vmem:[%s11941_s12 + $0x108] sm:$0xff]  ;;  %v533_v40 = vld [vmem:[%s11941_s12 + $0x110] sm:$0xff]  ;;  %v534_v41 = vld [vmem:[%s11941_s12 + $0x118] sm:$0xff] }
  0x20   : > { %10760 = vmatmul.mubr.msk.f32.gmra.mrb[4].mxu0 %vm609_vm3, %v504_v11  ;;  %v535_v42 = vld [vmem:[%s11941_s12 + $0x120] sm:$0xff]  ;;  %v536_v43 = vld [vmem:[%s11941_s12 + $0x128] sm:$0xff]  ;;  %v537_v44 = vld [vmem:[%s11941_s12 + $0x130] sm:$0xff] }
  0x21   : > { %10762 = vmatprep.mubr.msk.f32.mxu0 %vm609_vm3, %v505_v12  ;;  %v538_v45 = vld [vmem:[%s11941_s12 + $0x138] sm:$0xff]  ;;  %v539_v46 = vld [vmem:[%s11941_s12 + $0x140] sm:$0xff]  ;;  %v540_v47 = vld [vmem:[%s11941_s12 + $0x148] sm:$0xff] }
  0x22   : > { %v541_v48 = vld [vmem:[%s11941_s12 + $0x150] sm:$0xff]  ;;  %v542_v49 = vld [vmem:[%s11941_s12 + $0x158] sm:$0xff]  ;;  %v543_v50 = vld [vmem:[%s11941_s12 + $0x160] sm:$0xff] }
  0x23   : > { %v544_v51 = vld [vmem:[%s11941_s12 + $0x168] sm:$0xff]  ;;  %v545_v52 = vld [vmem:[%s11941_s12 + $0x170] sm:$0xff]  ;;  %v546_v53 = vld [vmem:[%s11941_s12 + $0x178] sm:$0xff] }
  0x24   : > { %10763 = vmatmul.mubr.msk.f32.gmra.mrb[6].mxu0 %vm609_vm3, %v506_v13  ;;  %v547_v54 = vld [vmem:[%s11941_s12 + $0x180] sm:$0xff]  ;;  %v548_v55 = vld [vmem:[%s11941_s12 + $0x188] sm:$0xff]  ;;  %v549_v56 = vld [vmem:[%s11941_s12 + $0x190] sm:$0xff] }
  0x25   : > { %10765 = vmatprep.mubr.msk.f32.mxu0 %vm609_vm3, %v507_v14  ;;  %v550_v57 = vld [vmem:[%s11941_s12 + $0x198] sm:$0xff]  ;;  %v551_v58 = vld [vmem:[%s11941_s12 + $0x1a0] sm:$0xff]  ;;  %v552_v59 = vld [vmem:[%s11941_s12 + $0x1a8] sm:$0xff] }
  0x26   : > { %v553_v60 = vld [vmem:[%s11941_s12 + $0x1b0] sm:$0xff]  ;;  %v554_v61 = vld [vmem:[%s11941_s12 + $0x1b8] sm:$0xff]  ;;  %v555_v62 = vld [vmem:[%s11941_s12 + $0x1c0] sm:$0xff] }
  0x27   : > { %v556_v0 = vld [vmem:[%s11941_s12 + $0x1c8] sm:$0xff]  ;;  %v557_v1 = vld [vmem:[%s11941_s12 + $0x1d0] sm:$0xff]  ;;  %v558_v2 = vld [vmem:[%s11941_s12 + $0x1d8] sm:$0xff] }
  0x28   : > { %10766 = vmatmul.mubr.msk.f32.gmra.mrb[8].mxu0 %vm609_vm3, %v508_v15  ;;  %v559_v3 = vld [vmem:[%s11941_s12 + $0x1e0] sm:$0xff]  ;;  %v560_v4 = vld [vmem:[%s11941_s12 + $0x1e8] sm:$0xff]  ;;  %v561_v5 = vld [vmem:[%s11941_s12 + $0x1f0] sm:$0xff] }
  0x29   : > { %10768 = vmatprep.mubr.msk.f32.mxu0 %vm609_vm3, %v509_v16  ;;  %v562_v6 = vld [vmem:[%s11941_s12 + $0x1f8] sm:$0xff]  ;;  %v563_v7 = vld [vmem:[%s11941_s12 + $0x200] sm:$0xff]  ;;  %v564_v8 = vld [vmem:[%s11941_s12 + $0x208] sm:$0xff] }
  0x2a   : > { %v565_v9 = vld [vmem:[%s11941_s12 + $0x210] sm:$0xff]  ;;  %v566_v10 = vld [vmem:[%s11941_s12 + $0x218] sm:$0xff]  ;;  %v567_v11 = vld [vmem:[%s11941_s12 + $0x220] sm:$0xff] }
  0x2b   : > { %v568_v12 = vld [vmem:[%s11941_s12 + $0x228] sm:$0xff]  ;;  %v569_v13 = vld [vmem:[%s11941_s12 + $0x230] sm:$0xff]  ;;  %v570_v14 = vld [vmem:[%s11941_s12 + $0x238] sm:$0xff] }
  0x2c   : > { %10769 = vmatmul.mubr.msk.f32.gmra.mrb[10].mxu0 %vm609_vm3, %v510_v17  ;;  %v571_v15 = vld [vmem:[%s11941_s12 + $0x240] sm:$0xff]  ;;  %v572_v16 = vld [vmem:[%s11941_s12 + $0x248] sm:$0xff]  ;;  %v573_v17 = vld [vmem:[%s11941_s12 + $0x250] sm:$0xff] }
  0x2d   : > { %10771 = vmatprep.mubr.msk.f32.mxu0 %vm609_vm3, %v511_v18  ;;  %v574_v18 = vld [vmem:[%s11941_s12 + $0x258] sm:$0xff] }
  0x30   : > { %10772 = vmatmul.mubr.msk.f32.gmra.mrb[12].mxu0 %vm609_vm3, %v512_v19  ;;  %v575_v19 = vld [vmem:[%s11941_s12 + $0x260] sm:$0xff] }
  0x31   : > { %10774 = vmatprep.mubr.msk.f32.mxu0 %vm609_vm3, %v513_v20  ;;  %v576_v20 = vld [vmem:[%s11941_s12 + $0x268] sm:$0xff] }
  0x34   : > { %10775 = vmatmul.mubr.msk.f32.gmra.mrb[14].mxu0 %vm609_vm3, %v514_v21  ;;  %v577_v21 = vld [vmem:[%s11941_s12 + $0x270] sm:$0xff] }
  0x35   : > { %10777 = vmatprep.mubr.msk.f32.mxu0 %vm609_vm3, %v515_v22  ;;  %v578_v22 = vld [vmem:[%s11941_s12 + $0x278] sm:$0xff] }
  0x38   : > { %10778 = vmatmul.mubr.msk.f32.gmra.mrb[16].mxu0 %vm609_vm3, %v516_v23  ;;  %v579_v23 = vld [vmem:[%s11941_s12 + $0x280] sm:$0xff] }
  0x39   : > { %10780 = vmatprep.mubr.msk.f32.mxu0 %vm609_vm3, %v517_v24  ;;  %v580_v24 = vld [vmem:[%s11941_s12 + $0x288] sm:$0xff] }
  0x3c   : > { %10781 = vmatmul.mubr.msk.f32.gmra.mrb[18].mxu0 %vm609_vm3, %v518_v25  ;;  %v11451_v25 = vld [vmem:[%s18196_s1 + $0x4] ss:$8 sps:$4 sm:$0xff]  }
  0x3d   : > { %10783 = vmatprep.mubr.msk.f32.mxu0 %vm609_vm3, %v519_v26  ;;  %v581_v26 = vld [vmem:[%s11941_s12 + $0x290] sm:$0xff]  ;;  %10384 = vmatprep.mubr.msk.bf16.mxu1 %vm2555_vm4, %v11451_v25 }
  0x40   : > { %10784 = vmatmul.mubr.msk.f32.gmra.mrb[20].mxu0 %vm609_vm3, %v520_v27  ;;  %v582_v27 = vld [vmem:[%s11941_s12 + $0x298] sm:$0xff] }
  0x41   : > { %10786 = vmatprep.mubr.msk.f32.mxu0 %vm609_vm3, %v521_v28  ;;  %v583_v28 = vld [vmem:[%s11941_s12 + $0x2a0] sm:$0xff] }
  0x44   : > { %10787 = vmatmul.mubr.msk.f32.gmra.mrb[22].mxu0 %vm609_vm3, %v522_v29  ;;  %v584_v29 = vld [vmem:[%s11941_s12 + $0x2a8] sm:$0xff] }
  0x45   : > { %10789 = vmatprep.mubr.msk.f32.mxu0 %vm609_vm3, %v523_v30  ;;  %v585_v30 = vld [vmem:[%s11941_s12 + $0x2b0] sm:$0xff] }
  0x48   : > { %10790 = vmatmul.mubr.msk.f32.gmra.mrb[24].mxu0 %vm609_vm3, %v524_v31  ;;  %v586_v31 = vld [vmem:[%s11941_s12 + $0x2b8] sm:$0xff] }
  0x49   : > { %10792 = vmatprep.mubr.msk.f32.mxu0 %vm609_vm3, %v525_v32  ;;  %v587_v32 = vld [vmem:[%s11941_s12 + $0x2c0] sm:$0xff] }
  0x4c   : > { %10793 = vmatmul.mubr.msk.f32.gmra.mrb[26].mxu0 %vm609_vm3, %v526_v33  ;;  %v588_v33 = vld [vmem:[%s11941_s12 + $0x2c8] sm:$0xff] }
  0x4d   : > { %10795 = vmatprep.mubr.msk.f32.mxu0 %vm609_vm3, %v527_v34  ;;  %v589_v34 = vld [vmem:[%s11941_s12 + $0x2d0] sm:$0xff] }
  0x50   : > { %10796 = vmatmul.mubr.msk.f32.gmra.mrb[28].mxu0 %vm609_vm3, %v528_v35  ;;  %v590_v35 = vld [vmem:[%s11941_s12 + $0x2d8] sm:$0xff] }
  0x51   : > { %10798 = vmatprep.mubr.msk.f32.mxu0 %vm609_vm3, %v529_v36  ;;  %v591_v36 = vld [vmem:[%s11941_s12 + $0x2e0] sm:$0xff] }
  0x54   : > { %10799 = vmatmul.mubr.msk.f32.gmra.mrb[30].mxu0 %vm609_vm3, %v530_v37  ;;  %v592_v37 = vld [vmem:[%s11941_s12 + $0x2e8] sm:$0xff] }
  0x55   : > { %10801 = vmatprep.mubr.msk.f32.mxu0 %vm609_vm3, %v531_v38  ;;  %v593_v38 = vld [vmem:[%s11941_s12 + $0x2f0] sm:$0xff] }
  0x58   : > { %10802 = vmatmul.mubr.msk.f32.gmra.mrb[32].mxu0 %vm609_vm3, %v532_v39  ;;  %v594_v39 = vld [vmem:[%s11941_s12 + $0x2f8] sm:$0xff] }
  0x59   : > { %10804 = vmatprep.mubr.msk.f32.mxu0 %vm609_vm3, %v533_v40  ;;  %v595_v40 = vld [vmem:[%s11941_s12 + $0x300] sm:$0xff] }
  0x5c   : > { %10805 = vmatmul.mubr.msk.f32.gmra.mrb[34].mxu0 %vm609_vm3, %v534_v41  ;;  %v596_v41 = vld [vmem:[%s11941_s12 + $0x308] sm:$0xff] }
  0x5d   : > { %10807 = vmatprep.mubr.msk.f32.mxu0 %vm609_vm3, %v535_v42  ;;  %v597_v42 = vld [vmem:[%s11941_s12 + $0x310] sm:$0xff] }
  0x60   : > { %10808 = vmatmul.mubr.msk.f32.gmra.mrb[36].mxu0 %vm609_vm3, %v536_v43  ;;  %v598_v43 = vld [vmem:[%s11941_s12 + $0x318] sm:$0xff]  ;;  %s11853_s12 = smov 64  }
  0x61   : > { %10810 = vmatprep.mubr.msk.f32.mxu0 %vm609_vm3, %v537_v44 }
  0x64   : > { %10811 = vmatmul.mubr.msk.f32.gmra.mrb[38].mxu0 %vm609_vm3, %v538_v45  ;;  %v12156_v45 = vld [vmem:[%s18199_s4] ss:$0 sm:$0xff] }
  0x65   : > { %10813 = vmatprep.mubr.msk.f32.mxu0 %vm609_vm3, %v539_v46 }
  0x68   : > { %10814 = vmatmul.mubr.msk.f32.gmra.mrb[40].mxu0 %vm609_vm3, %v540_v47 }
  0x69   : > { %10816 = vmatprep.mubr.msk.f32.mxu0 %vm609_vm3, %v541_v48 }
  0x6c   : > { %10817 = vmatmul.mubr.msk.f32.gmra.mrb[42].mxu0 %vm609_vm3, %v542_v49 }
  0x6d   : > { %10819 = vmatprep.mubr.msk.f32.mxu0 %vm609_vm3, %v543_v50 }
  0x70   : > { %10820 = vmatmul.mubr.msk.f32.gmra.mrb[44].mxu0 %vm609_vm3, %v544_v51 }
  0x71   : > { %10822 = vmatprep.mubr.msk.f32.mxu0 %vm609_vm3, %v545_v52 }
  0x74   : > { %10823 = vmatmul.mubr.msk.f32.gmra.mrb[46].mxu0 %vm609_vm3, %v546_v53 }
  0x75   : > { %10825 = vmatprep.mubr.msk.f32.mxu0 %vm609_vm3, %v547_v54 }
  0x78   : > { %10826 = vmatmul.mubr.msk.f32.gmra.mrb[48].mxu0 %vm609_vm3, %v548_v55 }
  0x79   : > { %10828 = vmatprep.mubr.msk.f32.mxu0 %vm609_vm3, %v549_v56 }
  0x7c   : > { %10829 = vmatmul.mubr.msk.f32.gmra.mrb[50].mxu0 %vm609_vm3, %v550_v57 }
  0x7d   : > { %10831 = vmatprep.mubr.msk.f32.mxu0 %vm609_vm3, %v551_v58 }
  0x80   : > { %10832 = vmatmul.mubr.msk.f32.gmra.mrb[52].mxu0 %vm609_vm3, %v552_v59 }
  0x81   : > { %10834 = vmatprep.mubr.msk.f32.mxu0 %vm609_vm3, %v553_v60 }
  0x84   : > { %10835 = vmatmul.mubr.msk.f32.gmra.mrb[54].mxu0 %vm609_vm3, %v554_v61 }
  0x85   : > { %10837 = vmatprep.mubr.msk.f32.mxu0 %vm609_vm3, %v555_v62 }
  0x88   : > { %10838 = vmatmul.mubr.msk.f32.gmra.mrb[56].mxu0 %vm609_vm3, %v556_v0 }
  0x89   : > { %10840 = vmatprep.mubr.msk.f32.mxu0 %vm609_vm3, %v557_v1 }
  0x8c   : > { %10841 = vmatmul.mubr.msk.f32.gmra.mrb[58].mxu0 %vm609_vm3, %v558_v2 }
  0x8d   : > { %10843 = vmatprep.mubr.msk.f32.mxu0 %vm609_vm3, %v559_v3 }
  0x90   : > { %10844 = vmatmul.mubr.msk.f32.gmra.mrb[60].mxu0 %vm609_vm3, %v560_v4 }
  0x91   : > { %10846 = vmatprep.mubr.msk.f32.mxu0 %vm609_vm3, %v561_v5 }
  0x94   : > { %10847 = vmatmul.mubr.msk.f32.gmra.mrb[62].mxu0 %vm609_vm3, %v562_v6 }
  0x95   : > { %10849 = vmatprep.mubr.msk.f32.mxu0 %vm609_vm3, %v563_v7 }
  0x98   : > { %10850 = vmatmul.mubr.msk.f32.gmra.mrb[64].mxu0 %vm609_vm3, %v564_v8 }
  0x99   : > { %10852 = vmatprep.mubr.msk.f32.mxu0 %vm609_vm3, %v565_v9 }
  0x9c   : > { %10853 = vmatmul.mubr.msk.f32.gmra.mrb[66].mxu0 %vm609_vm3, %v566_v10 }
  0x9d   : > { %10855 = vmatprep.mubr.msk.f32.mxu0 %vm609_vm3, %v567_v11 }
  0xa0   : > { %10856 = vmatmul.mubr.msk.f32.gmra.mrb[68].mxu0 %vm609_vm3, %v568_v12 }
  0xa1   : > { %10858 = vmatprep.mubr.msk.f32.mxu0 %vm609_vm3, %v569_v13 }
  0xa4   : > { %10859 = vmatmul.mubr.msk.f32.gmra.mrb[70].mxu0 %vm609_vm3, %v570_v14 }
  0xa5   : > { %10861 = vmatprep.mubr.msk.f32.mxu0 %vm609_vm3, %v571_v15 }
  0xa8   : > { %10862 = vmatmul.mubr.msk.f32.gmra.mrb[72].mxu0 %vm609_vm3, %v572_v16 }
  0xa9   : > { %10864 = vmatprep.mubr.msk.f32.mxu0 %vm609_vm3, %v573_v17 }
  0xac   : > { %10865 = vmatmul.mubr.msk.f32.gmra.mrb[74].mxu0 %vm609_vm3, %v574_v18 }
  0xad   : > { %10867 = vmatprep.mubr.msk.f32.mxu0 %vm609_vm3, %v575_v19 }
  0xb0   : > { %10868 = vmatmul.mubr.msk.f32.gmra.mrb[76].mxu0 %vm609_vm3, %v576_v20 }
  0xb1   : > { %10870 = vmatprep.mubr.msk.f32.mxu0 %vm609_vm3, %v577_v21 }
  0xb4   : > { %10871 = vmatmul.mubr.msk.f32.gmra.mrb[78].mxu0 %vm609_vm3, %v578_v22 }
  0xb5   : > { %10873 = vmatprep.mubr.msk.f32.mxu0 %vm609_vm3, %v579_v23 }
  0xb8   : > { %10874 = vmatmul.mubr.msk.f32.gmra.mrb[80].mxu0 %vm609_vm3, %v580_v24 }
  0xb9   : > { %10876 = vmatprep.mubr.msk.f32.mxu0 %vm609_vm3, %v581_v26 }
  0xbc   : > { %10877 = vmatmul.mubr.msk.f32.gmra.mrb[82].mxu0 %vm609_vm3, %v582_v27 }
  0xbd   : > { %10879 = vmatprep.mubr.msk.f32.mxu0 %vm609_vm3, %v583_v28 }
  0xc0   : > { %10880 = vmatmul.mubr.msk.f32.gmra.mrb[84].mxu0 %vm609_vm3, %v584_v29 }
  0xc1   : > { %10882 = vmatprep.mubr.msk.f32.mxu0 %vm609_vm3, %v585_v30 }
  0xc4   : > { %10883 = vmatmul.mubr.msk.f32.gmra.mrb[86].mxu0 %vm609_vm3, %v586_v31 }
  0xc5   : > { %10885 = vmatprep.mubr.msk.f32.mxu0 %vm609_vm3, %v587_v32 }
  0xc8   : > { %10886 = vmatmul.mubr.msk.f32.gmra.mrb[88].mxu0 %vm609_vm3, %v588_v33 }
  0xc9   : > { %10888 = vmatprep.mubr.msk.f32.mxu0 %vm609_vm3, %v589_v34 }
  0xcc   : > { %10889 = vmatmul.mubr.msk.f32.gmra.mrb[90].mxu0 %vm609_vm3, %v590_v35 }
  0xcd   : > { %10891 = vmatprep.mubr.msk.f32.mxu0 %vm609_vm3, %v591_v36 }
  0xd0   : > { %10892 = vmatmul.mubr.msk.f32.gmra.mrb[92].mxu0 %vm609_vm3, %v592_v37 }
  0xd1   : > { %10894 = vmatprep.mubr.msk.f32.mxu0 %vm609_vm3, %v593_v38 }
  0xd4   : > { %10895 = vmatmul.mubr.msk.f32.gmra.mrb[94].mxu0 %vm609_vm3, %v594_v39 }
  0xd5   : > { %10897 = vmatprep.mubr.msk.f32.mxu0 %vm609_vm3, %v595_v40 }
  0xd8   : > { %10898 = vmatmul.mubr.msk.f32.gmra.mrb[96].mxu0 %vm609_vm3, %v596_v41 }
  0xd9   : > { %10900 = vmatprep.mubr.msk.f32.mxu0 %vm609_vm3, %v597_v42 }
  0xdc   : > { %10901 = vmatmul.mubr.msk.f32.gmra.mrb[98].mxu0 %vm609_vm3, %v598_v43 }
  0xeb   : > { %v10755_v44 = vpop.f32.mrb[0].mxu0 }
  0xec   : > { %v980_v46 = vpop.f32.mrb[1].mxu0  ;;  %v986_v47 = vadd.f32 %v10755_v44, %v12156_v45 }
  0xed   : > { %v981_v56 = vadd.f32 %v12156_v45, %v980_v46 }
  0xee   : > { %v1579_v53 = vrot.slane %v986_v47, 6 }
  0xef   : > { %v10758_v48 = vpop.f32.mrb[2].mxu0 }
  0xf0   : > { %v996_v49 = vadd.f32 %v10758_v48, %v12156_v45  ;;  %v990_v50 = vpop.f32.mrb[3].mxu0 }
  0xf1   : > { %v991_v51 = vadd.f32 %v12156_v45, %v990_v50 }
  0xf2   : > { %v1582_v52 = vrot.slane %v996_v49, 6 }
  0xf3   : > { %v1580_v54 = vrot.slane %v991_v51, 6  ;;  %v10761_v55 = vpop.f32.mrb[4].mxu0 }
  0xf4   : > { %v1006_v57 = vadd.f32 %v10761_v55, %v12156_v45  ;;  %v1000_v58 = vpop.f32.mrb[5].mxu0 }
  0xf5   : > { %v1001_v59 = vadd.f32 %v12156_v45, %v1000_v58  ;;  %v1581_v60 = vsel %vm1578_vm5, %v1579_v53, %v1580_v54  ;;  %v1583_v61 = vsel %vm1578_vm5, %v1580_v54, %v1582_v52 }
  0xf6   : > { %v1586_v62 = vrot.slane %v1006_v57, 6  ;;  %v1873_v0 = vmax.f32 %v981_v56, %v1581_v60  ;;  %v1874_v1 = vmax.f32 %v986_v47, %v1583_v61 }
  0xf7   : > { %v1584_v2 = vrot.slane %v1001_v59, 6  ;;  %v10764_v3 = vpop.f32.mrb[6].mxu0 }
  0xf8   : > { %v1016_v4 = vadd.f32 %v10764_v3, %v12156_v45  ;;  %v1010_v5 = vpop.f32.mrb[7].mxu0  ;;  %v2070_v6 = vrot.slane %v1873_v0, 1  ;;  %v2071_v7 = vrot.slane %v1874_v1, 1 }
  0xf9   : > { %v1585_v8 = vsel %vm1578_vm5, %v1582_v52, %v1584_v2  ;;  %v1011_v9 = vadd.f32 %v12156_v45, %v1010_v5  ;;  %v1587_v10 = vsel %vm1578_vm5, %v1584_v2, %v1586_v62 }
  0xfa   : > { %v1590_v11 = vrot.slane %v1016_v4, 6  ;;  %v1875_v12 = vmax.f32 %v991_v51, %v1585_v8  ;;  %v2072_v13 = vsel %vm2069_vm6, %v2070_v6, %v2071_v7  ;;  %v1876_v14 = vmax.f32 %v996_v49, %v1587_v10 }
  0xfb   : > { %v1588_v15 = vrot.slane %v1011_v9, 6  ;;  %v10767_v16 = vpop.f32.mrb[8].mxu0  ;;  %v2360_v17 = vmax.f32 %v1873_v0, %v2072_v13 }
  0xfc   : > { %v1026_v18 = vadd.f32 %v10767_v16, %v12156_v45  ;;  %v1020_v19 = vpop.f32.mrb[9].mxu0  ;;  %v2073_v20 = vrot.slane %v1875_v12, 1  ;;  %v2075_v21 = vrot.slane %v1876_v14, 1 }
  0xfd   : > { %v1589_v22 = vsel %vm1578_vm5, %v1586_v62, %v1588_v15  ;;  %v1021_v23 = vadd.f32 %v12156_v45, %v1020_v19  ;;  %v1591_v24 = vsel %vm1578_vm5, %v1588_v15, %v1590_v11 }
  0xfe   : > { %v1877_v25 = vmax.f32 %v1001_v59, %v1589_v22  ;;  %v1594_v26 = vrot.slane %v1026_v18, 6  ;;  %v2074_v27 = vsel %vm2069_vm6, %v2071_v7, %v2073_v20  ;;  %v2076_v28 = vsel %vm2069_vm6, %v2073_v20, %v2075_v21 }
  0xff   : > { %v1592_v29 = vrot.slane %v1021_v23, 6  ;;  %v10770_v30 = vpop.f32.mrb[10].mxu0  ;;  %v2361_v31 = vmax.f32 %v1874_v1, %v2074_v27  ;;  %v2362_v32 = vmax.f32 %v1875_v12, %v2076_v28  ;;  %v1878_v33 = vmax.f32 %v1006_v57, %v1591_v24 }
 0x100   : > { %v1036_v34 = vadd.f32 %v10770_v30, %v12156_v45  ;;  %v1030_v35 = vpop.f32.mrb[11].mxu0  ;;  %v2077_v36 = vrot.slane %v1877_v25, 1 }
 0x101   : > { %v1593_v37 = vsel %vm1578_vm5, %v1590_v11, %v1592_v29  ;;  %v1031_v38 = vadd.f32 %v12156_v45, %v1030_v35  ;;  %v2456_v39 = vpack.c.bf16 %v2361_v31, %v2360_v17  ;;  %v2079_v40 = vrot.slane %v1878_v33, 1 }
 0x102   : > { %v1879_v41 = vmax.f32 %v1011_v9, %v1593_v37  ;;  %v1598_v42 = vrot.slane %v1036_v34, 6  ;;  %v2078_v43 = vsel %vm2069_vm6, %v2075_v21, %v2077_v36  ;;  %v1595_v44 = vsel %vm1578_vm5, %v1592_v29, %v1594_v26 }
 0x103   : > { %v1596_v46 = vrot.slane %v1031_v38, 6  ;;  %v10773_v47 = vpop.f32.mrb[12].mxu0  ;;  %2580 = vmatpush1.bf16.msra.mxu1 %v2456_v39  ;;  %v2363_v48 = vmax.f32 %v1876_v14, %v2078_v43  ;;  %v2080_v49 = vsel %vm2069_vm6, %v2077_v36, %v2079_v40  ;;  %v1880_v50 = vmax.f32 %v1016_v4, %v1595_v44 }
 0x104   : > { %v1046_v51 = vadd.f32 %v10773_v47, %v12156_v45  ;;  %v1040_v52 = vpop.f32.mrb[13].mxu0  ;;  %2581 = vmatprep.subr.bf16.mxu1 %v11851_v63  ;;  %v2081_v53 = vrot.slane %v1879_v41, 1  ;;  %v2364_v54 = vmax.f32 %v1877_v25, %v2080_v49 }
 0x105   : > { %v1597_v55 = vsel %vm1578_vm5, %v1594_v26, %v1596_v46  ;;  %v1041_v56 = vadd.f32 %v12156_v45, %v1040_v52  ;;  %v2457_v57 = vpack.c.bf16 %v2363_v48, %v2362_v32  ;;  %v2083_v58 = vrot.slane %v1880_v50, 1 }
 0x106   : > { %v1881_v59 = vmax.f32 %v1021_v23, %v1597_v55  ;;  %v1602_v60 = vrot.slane %v1046_v51, 6  ;;  %v2082_v61 = vsel %vm2069_vm6, %v2079_v40, %v2081_v53  ;;  %v1599_v62 = vsel %vm1578_vm5, %v1596_v46, %v1598_v42 }
 0x107   : > { %v1600_v0 = vrot.slane %v1041_v56, 6  ;;  %v10776_v1 = vpop.f32.mrb[14].mxu0  ;;  %2582 = vmatpush1.bf16.msra.mxu1 %v2457_v57  ;;  %v2365_v2 = vmax.f32 %v1878_v33, %v2082_v61  ;;  %v2084_v3 = vsel %vm2069_vm6, %v2081_v53, %v2083_v58  ;;  %v1882_v4 = vmax.f32 %v1026_v18, %v1599_v62 }
 0x108   : > { %v1056_v5 = vadd.f32 %v10776_v1, %v12156_v45  ;;  %v1050_v6 = vpop.f32.mrb[15].mxu0  ;;  %2583 = vmatprep.subr.bf16.mxu1 %v11851_v63  ;;  %v2085_v7 = vrot.slane %v1881_v59, 1  ;;  %v2366_v8 = vmax.f32 %v1879_v41, %v2084_v3 }
 0x109   : > { %v1601_v9 = vsel %vm1578_vm5, %v1598_v42, %v1600_v0  ;;  %v1051_v10 = vadd.f32 %v12156_v45, %v1050_v6  ;;  %v2458_v11 = vpack.c.bf16 %v2365_v2, %v2364_v54  ;;  %v2087_v12 = vrot.slane %v1882_v4, 1 }
 0x10a   : > { %v1883_v13 = vmax.f32 %v1031_v38, %v1601_v9  ;;  %v1606_v14 = vrot.slane %v1056_v5, 6  ;;  %v2086_v15 = vsel %vm2069_vm6, %v2083_v58, %v2085_v7  ;;  %v1603_v16 = vsel %vm1578_vm5, %v1600_v0, %v1602_v60 }
 0x10b   : > { %v1604_v17 = vrot.slane %v1051_v10, 6  ;;  %v10779_v18 = vpop.f32.mrb[16].mxu0  ;;  %2584 = vmatpush1.bf16.msra.mxu1 %v2458_v11  ;;  %v2367_v19 = vmax.f32 %v1880_v50, %v2086_v15  ;;  %v2088_v20 = vsel %vm2069_vm6, %v2085_v7, %v2087_v12  ;;  %v1884_v21 = vmax.f32 %v1036_v34, %v1603_v16 }
 0x10c   : > { %v1066_v22 = vadd.f32 %v10779_v18, %v12156_v45  ;;  %v1060_v23 = vpop.f32.mrb[17].mxu0  ;;  %2585 = vmatprep.subr.bf16.mxu1 %v11851_v63  ;;  %v2089_v24 = vrot.slane %v1883_v13, 1  ;;  %v2368_v25 = vmax.f32 %v1881_v59, %v2088_v20 }
 0x10d   : > { %v1605_v26 = vsel %vm1578_vm5, %v1602_v60, %v1604_v17  ;;  %v1061_v27 = vadd.f32 %v12156_v45, %v1060_v23  ;;  %v2459_v28 = vpack.c.bf16 %v2367_v19, %v2366_v8  ;;  %v2091_v29 = vrot.slane %v1884_v21, 1 }
 0x10e   : > { %v1885_v30 = vmax.f32 %v1041_v56, %v1605_v26  ;;  %v1610_v31 = vrot.slane %v1066_v22, 6  ;;  %v2090_v32 = vsel %vm2069_vm6, %v2087_v12, %v2089_v24  ;;  %v1607_v33 = vsel %vm1578_vm5, %v1604_v17, %v1606_v14 }
 0x10f   : > { %v1608_v34 = vrot.slane %v1061_v27, 6  ;;  %v10782_v35 = vpop.f32.mrb[18].mxu0  ;;  %2586 = vmatpush1.bf16.msra.mxu1 %v2459_v28  ;;  %v2369_v36 = vmax.f32 %v1882_v4, %v2090_v32  ;;  %v2092_v37 = vsel %vm2069_vm6, %v2089_v24, %v2091_v29  ;;  %v1886_v38 = vmax.f32 %v1046_v51, %v1607_v33 }
 0x110   : > { %v1076_v39 = vadd.f32 %v10782_v35, %v12156_v45  ;;  %v1070_v40 = vpop.f32.mrb[19].mxu0  ;;  %2587 = vmatprep.subr.bf16.mxu1 %v11851_v63  ;;  %v2093_v41 = vrot.slane %v1885_v30, 1  ;;  %v2370_v42 = vmax.f32 %v1883_v13, %v2092_v37 }
 0x111   : > { %v1609_v43 = vsel %vm1578_vm5, %v1606_v14, %v1608_v34  ;;  %v1071_v44 = vadd.f32 %v12156_v45, %v1070_v40  ;;  %v2460_v46 = vpack.c.bf16 %v2369_v36, %v2368_v25  ;;  %v2095_v47 = vrot.slane %v1886_v38, 1 }
 0x112   : > { %v1887_v48 = vmax.f32 %v1051_v10, %v1609_v43  ;;  %v1614_v49 = vrot.slane %v1076_v39, 6  ;;  %v2094_v50 = vsel %vm2069_vm6, %v2091_v29, %v2093_v41  ;;  %v1611_v52 = vsel %vm1578_vm5, %v1608_v34, %v1610_v31 }
 0x113   : > { %v1612_v51 = vrot.slane %v1071_v44, 6  ;;  %v10785_v53 = vpop.f32.mrb[20].mxu0  ;;  %2588 = vmatpush1.bf16.msra.mxu1 %v2460_v46  ;;  %v2371_v54 = vmax.f32 %v1884_v21, %v2094_v50  ;;  %v2096_v55 = vsel %vm2069_vm6, %v2093_v41, %v2095_v47  ;;  %v1888_v56 = vmax.f32 %v1056_v5, %v1611_v52 }
 0x114   : > { %v1086_v57 = vadd.f32 %v10785_v53, %v12156_v45  ;;  %v1080_v58 = vpop.f32.mrb[21].mxu0  ;;  %2589 = vmatprep.subr.bf16.mxu1 %v11851_v63  ;;  %v2097_v59 = vrot.slane %v1887_v48, 1  ;;  %v2372_v60 = vmax.f32 %v1885_v30, %v2096_v55  ;;  %v11852_v50 = vmov 65535  }
 0x115   : > { %v1613_v61 = vsel %vm1578_vm5, %v1610_v31, %v1612_v51  ;;  %v1081_v62 = vadd.f32 %v12156_v45, %v1080_v58  ;;  %v2461_v0 = vpack.c.bf16 %v2371_v54, %v2370_v42  ;;  %v2099_v1 = vrot.slane %v1888_v56, 1 }
 0x116   : > { %v1889_v2 = vmax.f32 %v1061_v27, %v1613_v61  ;;  %v1618_v3 = vrot.slane %v1086_v57, 6  ;;  %v2098_v4 = vsel %vm2069_vm6, %v2095_v47, %v2097_v59  ;;  %v1615_v6 = vsel %vm1578_vm5, %v1612_v51, %v1614_v49 }
 0x117   : > { %v1616_v5 = vrot.slane %v1081_v62, 6  ;;  %v10788_v7 = vpop.f32.mrb[22].mxu0  ;;  %2590 = vmatpush1.bf16.msra.mxu1 %v2461_v0  ;;  %v2373_v8 = vmax.f32 %v1886_v38, %v2098_v4  ;;  %v2100_v9 = vsel %vm2069_vm6, %v2097_v59, %v2099_v1  ;;  %v1890_v10 = vmax.f32 %v1066_v22, %v1615_v6 }
 0x118   : > { %v1096_v11 = vadd.f32 %v10788_v7, %v12156_v45  ;;  %v1090_v12 = vpop.f32.mrb[23].mxu0  ;;  %2591 = vmatprep.subr.bf16.mxu1 %v11851_v63  ;;  %v2101_v13 = vrot.slane %v1889_v2, 1  ;;  %v2374_v14 = vmax.f32 %v1887_v48, %v2100_v9  ;;  %v2574_v52 = vsel %vm1578_vm5, 4294967295, %v11852_v50 }
 0x119   : > { %v1617_v15 = vsel %vm1578_vm5, %v1614_v49, %v1616_v5  ;;  %v1091_v16 = vadd.f32 %v12156_v45, %v1090_v12  ;;  %v2462_v17 = vpack.c.bf16 %v2373_v8, %v2372_v60  ;;  %v2103_v18 = vrot.slane %v1890_v10, 1 }
 0x11a   : > { %v1891_v19 = vmax.f32 %v1071_v44, %v1617_v15  ;;  %v1622_v20 = vrot.slane %v1096_v11, 6  ;;  %v2102_v21 = vsel %vm2069_vm6, %v2099_v1, %v2101_v13  ;;  %v1619_v23 = vsel %vm1578_vm5, %v1616_v5, %v1618_v3 }
 0x11b   : > { %v1620_v22 = vrot.slane %v1091_v16, 6  ;;  %v10791_v24 = vpop.f32.mrb[24].mxu0  ;;  %2592 = vmatpush1.bf16.msra.mxu1 %v2462_v17  ;;  %v2375_v25 = vmax.f32 %v1888_v56, %v2102_v21  ;;  %v2104_v26 = vsel %vm2069_vm6, %v2101_v13, %v2103_v18  ;;  %v1892_v27 = vmax.f32 %v1076_v39, %v1619_v23 }
 0x11c   : > { %v1106_v28 = vadd.f32 %v10791_v24, %v12156_v45  ;;  %v1100_v29 = vpop.f32.mrb[25].mxu0  ;;  %2593 = vmatprep.subr.bf16.mxu1 %v11851_v63  ;;  %v2105_v30 = vrot.slane %v1891_v19, 1  ;;  %v2376_v31 = vmax.f32 %v1889_v2, %v2104_v26  ;;  %v12246_v6 = vsel %vm910_vm0, %v2574_v52, 0 }
 0x11d   : > { %v1621_v32 = vsel %vm1578_vm5, %v1618_v3, %v1620_v22  ;;  %v1101_v33 = vadd.f32 %v12156_v45, %v1100_v29  ;;  %v2463_v34 = vpack.c.bf16 %v2375_v25, %v2374_v14  ;;  %v2107_v35 = vrot.slane %v1892_v27, 1 }
 0x11e   : > { %v1893_v36 = vmax.f32 %v1081_v62, %v1621_v32  ;;  %v1626_v37 = vrot.slane %v1106_v28, 6  ;;  %v2106_v38 = vsel %vm2069_vm6, %v2103_v18, %v2105_v30  ;;  %v1623_v40 = vsel %vm1578_vm5, %v1620_v22, %v1622_v20 }
 0x11f   : > { %v1624_v39 = vrot.slane %v1101_v33, 6  ;;  %v10794_v41 = vpop.f32.mrb[26].mxu0  ;;  %2594 = vmatpush1.bf16.msra.mxu1 %v2463_v34  ;;  %v2377_v42 = vmax.f32 %v1890_v10, %v2106_v38  ;;  %v2108_v43 = vsel %vm2069_vm6, %v2105_v30, %v2107_v35  ;;  %v1894_v44 = vmax.f32 %v1086_v57, %v1623_v40  ;;  %v400_v10 = vld [vmem:[%s18196_s1 + $0x50] sm:$0xff] }
 0x120   : > { %v1116_v46 = vadd.f32 %v10794_v41, %v12156_v45  ;;  %v1110_v47 = vpop.f32.mrb[27].mxu0  ;;  %2595 = vmatprep.subr.bf16.mxu1 %v11851_v63  ;;  %v2109_v48 = vrot.slane %v1893_v36, 1  ;;  %v2378_v49 = vmax.f32 %v1891_v19, %v2108_v43  ;;  %v12263_v24 = vcombine.high %v400_v10, %v400_v10 }
 0x121   : > { %v1625_v51 = vsel %vm1578_vm5, %v1622_v20, %v1624_v39  ;;  %v1627_v53 = vsel %vm1578_vm5, %v1624_v39, %v1626_v37  ;;  %v1111_v54 = vadd.f32 %v12156_v45, %v1110_v47  ;;  %v2464_v55 = vpack.c.bf16 %v2377_v42, %v2376_v31 }
 0x122   : > { %v12238_v56 = vmax.f32 %v1091_v16, %v1625_v51  ;;  %v1630_v57 = vrot.slane %v1116_v46, 6  ;;  %v2110_v58 = vsel %vm2069_vm6, %v2107_v35, %v2109_v48  ;;  %v2111_v59 = vrot.slane %v1894_v44, 1 }
 0x123   : > { %v1628_v60 = vrot.slane %v1111_v54, 6  ;;  %v10797_v61 = vpop.f32.mrb[28].mxu0  ;;  %2596 = vmatpush1.bf16.msra.mxu1 %v2464_v55  ;;  %v2379_v62 = vmax.f32 %v1892_v27, %v2110_v58  ;;  %v1896_v0 = vmax.f32 %v1096_v11, %v1627_v53 }
 0x124   : > { %v1126_v1 = vadd.f32 %v10797_v61, %v12156_v45  ;;  %v1120_v2 = vpop.f32.mrb[29].mxu0  ;;  %2597 = vmatprep.subr.bf16.mxu1 %v11851_v63  ;;  %v2112_v3 = vsel %vm2069_vm6, %v2109_v48, %v2111_v59  ;;  %v2113_v4 = vrot.slane %v12238_v56, 1 }
 0x125   : > { %v1629_v5 = vsel %vm1578_vm5, %v1626_v37, %v1628_v60  ;;  %v1631_v7 = vsel %vm1578_vm5, %v1628_v60, %v1630_v57  ;;  %v1121_v8 = vadd.f32 %v12156_v45, %v1120_v2  ;;  %v2465_v9 = vpack.c.bf16 %v2379_v62, %v2378_v49  ;;  %v12296_v2 = vld [vmem:[%s18196_s1] ss:$8 sps:$4 sm:$0xff]  }
 0x126   : > { %v12254_v11 = vmax.f32 %v1101_v33, %v1629_v5  ;;  %v12256_v12 = vmax.f32 %v1106_v28, %v1631_v7  ;;  %v1634_v13 = vrot.slane %v1126_v1, 6  ;;  %v2114_v14 = vsel %vm2069_vm6, %v2111_v59, %v2113_v4 }
 0x127   : > { %v1632_v15 = vrot.slane %v1121_v8, 6  ;;  %v10800_v16 = vpop.f32.mrb[30].mxu0  ;;  %2598 = vmatpush1.bf16.msra.mxu1 %v2465_v9  ;;  %v2380_v17 = vmax.f32 %v1893_v36, %v2112_v3  ;;  %v2381_v18 = vmax.f32 %v1894_v44, %v2114_v14  ;;  %v2115_v19 = vrot.slane %v1896_v0, 1  ;;  %v12307_v9 = vld [vmem:[%s18196_s1 + $0x14] ss:$8 sps:$4 sm:$0xff]  }
 0x128   : > { %v2117_v20 = vrot.slane %v12254_v11, 1  ;;  %v2119_v21 = vrot.slane %v12256_v12, 1  ;;  %v1136_v23 = vadd.f32 %v10800_v16, %v12156_v45  ;;  %v1130_v22 = vpop.f32.mrb[31].mxu0  ;;  %2599 = vmatprep.subr.bf16.mxu1 %v11851_v63 }
 0x129   : > { %v1633_v25 = vsel %vm1578_vm5, %v1630_v57, %v1632_v15  ;;  %v1635_v26 = vsel %vm1578_vm5, %v1632_v15, %v1634_v13  ;;  %v1131_v27 = vadd.f32 %v12156_v45, %v1130_v22  ;;  %v2466_v28 = vpack.c.bf16 %v2381_v18, %v2380_v17 }
 0x12a   : > { %v1899_v29 = vmax.f32 %v1111_v54, %v1633_v25  ;;  %v1900_v30 = vmax.f32 %v1116_v46, %v1635_v26  ;;  %v1638_v31 = vrot.slane %v1136_v23, 6  ;;  %v2116_v32 = vsel %vm2069_vm6, %v2113_v4, %v2115_v19 }
 0x12b   : > { %v1636_v33 = vrot.slane %v1131_v27, 6  ;;  %v10803_v34 = vpop.f32.mrb[32].mxu0  ;;  %2600 = vmatpush1.bf16.msra.mxu1 %v2466_v28  ;;  %v2118_v35 = vsel %vm2069_vm6, %v2115_v19, %v2117_v20  ;;  %v2382_v36 = vmax.f32 %v12238_v56, %v2116_v32  ;;  %v2120_v37 = vsel %vm2069_vm6, %v2117_v20, %v2119_v21 }
 0x12c   : > { %v2121_v38 = vrot.slane %v1899_v29, 1  ;;  %v2123_v40 = vrot.slane %v1900_v30, 1  ;;  %v1146_v39 = vadd.f32 %v10803_v34, %v12156_v45  ;;  %v1140_v41 = vpop.f32.mrb[33].mxu0  ;;  %2601 = vmatprep.subr.bf16.mxu1 %v11851_v63  ;;  %v2383_v42 = vmax.f32 %v1896_v0, %v2118_v35 }
 0x12d   : > { %v1637_v43 = vsel %vm1578_vm5, %v1634_v13, %v1636_v33  ;;  %v1639_v44 = vsel %vm1578_vm5, %v1636_v33, %v1638_v31  ;;  %v1141_v46 = vadd.f32 %v12156_v45, %v1140_v41  ;;  %v2384_v47 = vmax.f32 %v12254_v11, %v2120_v37 }
 0x12e   : > { %v12278_v48 = vmax.f32 %v1121_v8, %v1637_v43  ;;  %v12280_v49 = vmax.f32 %v1126_v1, %v1639_v44  ;;  %v1642_v50 = vrot.slane %v1146_v39, 6  ;;  %v2467_v52 = vpack.c.bf16 %v2383_v42, %v2382_v36  ;;  %v12337_v43 = vld [vmem:[%s18196_s1 + $0x10] ss:$8 sps:$4 sm:$0xff]  }
 0x12f   : > { %v1640_v51 = vrot.slane %v1141_v46, 6  ;;  %v10806_v53 = vpop.f32.mrb[34].mxu0  ;;  %v2122_v54 = vsel %vm2069_vm6, %v2119_v21, %v2121_v38  ;;  %v2124_v55 = vsel %vm2069_vm6, %v2121_v38, %v2123_v40  ;;  %v12284_v56 = vcombine.low %v400_v10, %v400_v10 }
 0x130   : > { %v2125_v57 = vrot.slane %v12278_v48, 1  ;;  %v2127_v58 = vrot.slane %v12280_v49, 1  ;;  %v1156_v59 = vadd.f32 %v10806_v53, %v12156_v45  ;;  %v1150_v60 = vpop.f32.mrb[35].mxu0  ;;  %v2577_v61 = vand.u32 %v12246_v6, %v2467_v52 }
 0x131   : > { %v1641_v62 = vsel %vm1578_vm5, %v1638_v31, %v1640_v51  ;;  %v1643_v0 = vsel %vm1578_vm5, %v1640_v51, %v1642_v50  ;;  %v1151_v1 = vadd.f32 %v12156_v45, %v1150_v60  ;;  %v2385_v3 = vmax.f32 %v12256_v12, %v2122_v54 }
 0x132   : > { %v12299_v4 = vmax.f32 %v1131_v27, %v1641_v62  ;;  %v12301_v5 = vmax.f32 %v1136_v23, %v1643_v0  ;;  %v1646_v7 = vrot.slane %v1156_v59, 6  ;;  %2602 = vmatpush1.bf16.msra.mxu1 %v2577_v61  ;;  %v2126_v8 = vsel %vm2069_vm6, %v2123_v40, %v2125_v57 }
 0x133   : > { %v1644_v10 = vrot.slane %v1151_v1, 6  ;;  %v10809_v11 = vpop.f32.mrb[36].mxu0  ;;  %2733 = vmatprep.subr.bf16.mxu1 %v11851_v63  ;;  %v2386_v13 = vmax.f32 %v1899_v29, %v2124_v55  ;;  %v2387_v14 = vmax.f32 %v1900_v30, %v2126_v8  ;;  %v2468_v12 = vpack.c.bf16 %v2385_v3, %v2384_v47 }
 0x134   : > { %v2129_v15 = vrot.slane %v12299_v4, 1  ;;  %v2131_v16 = vrot.slane %v12301_v5, 1  ;;  %v1166_v17 = vadd.f32 %v10809_v11, %v12156_v45  ;;  %v1160_v18 = vpop.f32.mrb[37].mxu0  ;;  %v2128_v19 = vsel %vm2069_vm6, %v2125_v57, %v2127_v58 }
 0x135   : > { %v1645_v20 = vsel %vm1578_vm5, %v1642_v50, %v1644_v10  ;;  %v1647_v21 = vsel %vm1578_vm5, %v1644_v10, %v1646_v7  ;;  %v1161_v23 = vadd.f32 %v12156_v45, %v1160_v18  ;;  %2612 = vmatmul.mubr.bf16.vlgmr.msra.gmra.mrb[0].mxu1 %v12296_v2  ;;  %v2469_v22 = vpack.c.bf16 %v2387_v14, %v2386_v13 }
 0x136   : > { %v12318_v25 = vmax.f32 %v1141_v46, %v1645_v20  ;;  %v12320_v26 = vmax.f32 %v1146_v39, %v1647_v21  ;;  %v1650_v27 = vrot.slane %v1166_v17, 6  ;;  %v2696_v28 = vrot.slane %v2468_v12, 4  ;;  %10385 = vmatprep.mubr.msk.bf16.mxu1 %vm2555_vm4, %v12307_v9 }
 0x137   : > { %v1648_v29 = vrot.slane %v1161_v23, 6  ;;  %v10812_v30 = vpop.f32.mrb[38].mxu0  ;;  %v2697_v31 = vrot.slane %v2469_v22, 4  ;;  %v2130_v32 = vsel %vm2069_vm6, %v2127_v58, %v2129_v15  ;;  %v2388_v33 = vmax.f32 %v12278_v48, %v2128_v19  ;;  %v12381_v22 = vld [vmem:[%s18196_s1 + $0x20] ss:$8 sps:$4 sm:$0xff]  }
 0x138   : > { %v2133_v34 = vrot.slane %v12318_v25, 1  ;;  %v2135_v35 = vrot.slane %v12320_v26, 1  ;;  %v1176_v36 = vadd.f32 %v10812_v30, %v12156_v45  ;;  %v1170_v37 = vpop.f32.mrb[39].mxu0  ;;  %v2389_v38 = vmax.f32 %v12280_v49, %v2130_v32  ;;  %v12346_v49 = vld [vmem:[%s18196_s1 + $0x24] ss:$8 sps:$4 sm:$0xff]  }
 0x139   : > { %v1649_v40 = vsel %vm1578_vm5, %v1646_v7, %v1648_v29  ;;  %v1651_v39 = vsel %vm1578_vm5, %v1648_v29, %v1650_v27  ;;  %v1171_v41 = vadd.f32 %v12156_v45, %v1170_v37  ;;  %v2698_v42 = vsel %vm2695_vm7, %v2696_v28, %v2697_v31 }
 0x13a   : > { %v12339_v44 = vmax.f32 %v1151_v1, %v1649_v40  ;;  %v12341_v46 = vmax.f32 %v1156_v59, %v1651_v39  ;;  %v1654_v47 = vrot.slane %v1176_v36, 6  ;;  %2734 = vmatpush1.bf16.msra.mxu1 %v2698_v42  ;;  %v2470_v48 = vpack.c.bf16 %v2389_v38, %v2388_v33 }
 0x13b   : > { %v1652_v50 = vrot.slane %v1171_v41, 6  ;;  %v10815_v52 = vpop.f32.mrb[40].mxu0  ;;  %2735 = vmatprep.subr.bf16.mxu1 %v11851_v63  ;;  %v2132_v51 = vsel %vm2069_vm6, %v2129_v15, %v2131_v16  ;;  %v2134_v53 = vsel %vm2069_vm6, %v2131_v16, %v2133_v34  ;;  %v2136_v54 = vsel %vm2069_vm6, %v2133_v34, %v2135_v35 }
 0x13c   : > { %v2137_v55 = vrot.slane %v12339_v44, 1  ;;  %v2139_v57 = vrot.slane %v12341_v46, 1  ;;  %v1186_v58 = vadd.f32 %v10815_v52, %v12156_v45  ;;  %v1180_v59 = vpop.f32.mrb[41].mxu0  ;;  %v2699_v60 = vrot.slane %v2470_v48, 4 }
 0x13d   : > { %v1653_v61 = vsel %vm1578_vm5, %v1650_v27, %v1652_v50  ;;  %v1655_v62 = vsel %vm1578_vm5, %v1652_v50, %v1654_v47  ;;  %v1181_v0 = vadd.f32 %v12156_v45, %v1180_v59  ;;  %2620 = vmatmul.mubr.bf16.gmra.mrb[4].mxu1 %v12337_v43  ;;  %v2390_v1 = vmax.f32 %v12299_v4, %v2132_v51 }
 0x13e   : > { %v12360_v3 = vmax.f32 %v1161_v23, %v1653_v61  ;;  %v12362_v7 = vmax.f32 %v1166_v17, %v1655_v62  ;;  %v1658_v8 = vrot.slane %v1186_v58, 6  ;;  %v2700_v10 = vsel %vm2695_vm7, %v2697_v31, %v2699_v60  ;;  %10386 = vmatprep.mubr.msk.bf16.mxu1 %vm2555_vm4, %v12346_v49 }
 0x13f   : > { %v1656_v11 = vrot.slane %v1181_v0, 6  ;;  %2736 = vmatpush1.bf16.msra.mxu1 %v2700_v10  ;;  %v10818_v13 = vpop.f32.mrb[42].mxu0  ;;  %v2391_v14 = vmax.f32 %v12301_v5, %v2134_v53  ;;  %v2138_v12 = vsel %vm2069_vm6, %v2135_v35, %v2137_v55  ;;  %v2392_v15 = vmax.f32 %v12318_v25, %v2136_v54 }
 0x140   : > { %v2141_v4 = vrot.slane %v12360_v3, 1  ;;  %v2143_v16 = vrot.slane %v12362_v7, 1  ;;  %v1196_v17 = vadd.f32 %v10818_v13, %v12156_v45  ;;  %v1190_v18 = vpop.f32.mrb[43].mxu0  ;;  %2737 = vmatprep.subr.bf16.mxu1 %v11851_v63  ;;  %v2393_v19 = vmax.f32 %v12320_v26, %v2138_v12  ;;  %v12390_v26 = vld [vmem:[%s18196_s1 + $0x34] ss:$8 sps:$4 sm:$0xff]  }
 0x141   : > { %v1657_v20 = vsel %vm1578_vm5, %v1654_v47, %v1656_v11  ;;  %v1659_v21 = vsel %vm1578_vm5, %v1656_v11, %v1658_v8  ;;  %v1191_v5 = vadd.f32 %v12156_v45, %v1190_v18  ;;  %v2471_v23 = vpack.c.bf16 %v2391_v14, %v2390_v1  ;;  %v12433_v12 = vld [vmem:[%s18196_s1 + $0x44] ss:$8 sps:$4 sm:$0xff]  }
 0x142   : > { %v12383_v25 = vmax.f32 %v1171_v41, %v1657_v20  ;;  %v12385_v27 = vmax.f32 %v1176_v36, %v1659_v21  ;;  %v1662_v28 = vrot.slane %v1196_v17, 6  ;;  %v2472_v29 = vpack.c.bf16 %v2393_v19, %v2392_v15 }
 0x143   : > { %v1660_v30 = vrot.slane %v1191_v5, 6  ;;  %v2701_v31 = vrot.slane %v2471_v23, 4  ;;  %v10821_v32 = vpop.f32.mrb[44].mxu0  ;;  %v2140_v33 = vsel %vm2069_vm6, %v2137_v55, %v2139_v57  ;;  %v2142_v34 = vsel %vm2069_vm6, %v2139_v57, %v2141_v4 }
 0x144   : > { %v2145_v35 = vrot.slane %v12383_v25, 1  ;;  %v2147_v37 = vrot.slane %v12385_v27, 1  ;;  %v1206_v36 = vadd.f32 %v10821_v32, %v12156_v45  ;;  %v1200_v38 = vpop.f32.mrb[45].mxu0  ;;  %v2703_v40 = vrot.slane %v2472_v29, 4 }
 0x145   : > { %v1661_v39 = vsel %vm1578_vm5, %v1658_v8, %v1660_v30  ;;  %v1663_v41 = vsel %vm1578_vm5, %v1660_v30, %v1662_v28  ;;  %v2702_v42 = vsel %vm2695_vm7, %v2699_v60, %v2701_v31  ;;  %v1201_v47 = vadd.f32 %v12156_v45, %v1200_v38  ;;  %2628 = vmatmul.mubr.bf16.gmra.mrb[8].mxu1 %v12381_v22 }
 0x146   : > { %v12402_v48 = vmax.f32 %v1181_v0, %v1661_v39  ;;  %v12404_v50 = vmax.f32 %v1186_v58, %v1663_v41  ;;  %2738 = vmatpush1.bf16.msra.mxu1 %v2702_v42  ;;  %v1666_v52 = vrot.slane %v1206_v36, 6  ;;  %v2704_v51 = vsel %vm2695_vm7, %v2701_v31, %v2703_v40  ;;  %10387 = vmatprep.mubr.msk.bf16.mxu1 %vm2555_vm4, %v12390_v26 }
 0x147   : > { %v1664_v53 = vrot.slane %v1201_v47, 6  ;;  %2739 = vmatprep.subr.bf16.mxu1 %v11851_v63  ;;  %v10824_v54 = vpop.f32.mrb[46].mxu0  ;;  %v2394_v55 = vmax.f32 %v12339_v44, %v2140_v33  ;;  %v2395_v57 = vmax.f32 %v12341_v46, %v2142_v34  ;;  %v2144_v59 = vsel %vm2069_vm6, %v2141_v4, %v2143_v16  ;;  %v12423_v46 = vld [vmem:[%s18196_s1 + $0x30] ss:$8 sps:$4 sm:$0xff]   ;;  %v12435_v4 = vld [vmem:[#allocation3] sm:$0xff] }
 0x148   : > { %v2149_v58 = vrot.slane %v12402_v48, 1  ;;  %v2151_v60 = vrot.slane %v12404_v50, 1  ;;  %v1216_v61 = vadd.f32 %v10824_v54, %v12156_v45  ;;  %v1210_v62 = vpop.f32.mrb[47].mxu0  ;;  %v2146_v0 = vsel %vm2069_vm6, %v2143_v16, %v2145_v35  ;;  %495 = vst.msk [vmem:[#allocation2] sm:$0xff] %vm494_vm8, %v12435_v4  ;;  %496 = vst.msk [vmem:[#allocation2 + $0xb8] sm:$0xff] %vm494_vm8, %v12435_v4 }
 0x149   : > { %v1665_v1 = vsel %vm1578_vm5, %v1662_v28, %v1664_v53  ;;  %v1667_v63 = vsel %vm1578_vm5, %v1664_v53, %v1666_v52  ;;  %v1211_v8 = vadd.f32 %v12156_v45, %v1210_v62  ;;  %v2473_v44 = vpack.c.bf16 %v2395_v57, %v2394_v55 }
 0x14a   : > { %v12425_v10 = vmax.f32 %v1191_v5, %v1665_v1  ;;  %v12427_v11 = vmax.f32 %v1196_v17, %v1667_v63  ;;  %2740 = vmatpush1.bf16.msra.mxu1 %v2704_v51  ;;  %v1670_v13 = vrot.slane %v1216_v61, 6  ;;  %v2396_v14 = vmax.f32 %v12360_v3, %v2144_v59 }
 0x14b   : > { %v1668_v15 = vrot.slane %v1211_v8, 6  ;;  %2741 = vmatprep.subr.bf16.mxu1 %v12435_v4  ;;  %v2705_v16 = vrot.slane %v2473_v44, 4  ;;  %v10827_v18 = vpop.f32.mrb[48].mxu0  ;;  %v2397_v19 = vmax.f32 %v12362_v7, %v2146_v0  ;;  %v2148_v17 = vsel %vm2069_vm6, %v2145_v35, %v2147_v37 }
 0x14c   : > { %v2153_v20 = vrot.slane %v12425_v10, 1  ;;  %v2155_v3 = vrot.slane %v12427_v11, 1  ;;  %v1226_v21 = vadd.f32 %v10827_v18, %v12156_v45  ;;  %v1220_v5 = vpop.f32.mrb[49].mxu0  ;;  %v2150_v23 = vsel %vm2069_vm6, %v2147_v37, %v2149_v58 }
 0x14d   : > { %v1669_v28 = vsel %vm1578_vm5, %v1666_v52, %v1668_v15  ;;  %v1671_v29 = vsel %vm1578_vm5, %v1668_v15, %v1670_v13  ;;  %v2706_v30 = vsel %vm2695_vm7, %v2703_v40, %v2705_v16  ;;  %v1221_v31 = vadd.f32 %v12156_v45, %v1220_v5  ;;  %2636 = vmatmul.mubr.bf16.gmra.mrb[12].mxu1 %v12423_v46 }
 0x14e   : > { %v12449_v7 = vmax.f32 %v1201_v47, %v1669_v28  ;;  %v12451_v32 = vmax.f32 %v1206_v36, %v1671_v29  ;;  %2742 = vmatpush1.bf16.msra.mxu1 %v2706_v30  ;;  %v1674_v33 = vrot.slane %v1226_v21, 6  ;;  %v2474_v34 = vpack.c.bf16 %v2397_v19, %v2396_v14  ;;  %10388 = vmatprep.mubr.msk.bf16.mxu1 %vm2555_vm4, %v12433_v12 }
 0x14f   : > { %v1672_v35 = vrot.slane %v1221_v31, 6  ;;  %2743 = vmatprep.subr.bf16.mxu1 %v12435_v4  ;;  %v10830_v37 = vpop.f32.mrb[50].mxu0  ;;  %v2398_v38 = vmax.f32 %v12383_v25, %v2148_v17  ;;  %v2399_v40 = vmax.f32 %v12385_v27, %v2150_v23  ;;  %v2152_v39 = vsel %vm2069_vm6, %v2149_v58, %v2151_v60  ;;  %v12470_v27 = vld [vmem:[%s18196_s1 + $0x40] ss:$8 sps:$4 sm:$0xff]  }
 0x150   : > { %v2157_v36 = vrot.slane %v12449_v7, 1  ;;  %v2159_v41 = vrot.slane %v12451_v32, 1  ;;  %v2707_v42 = vrot.slane %v2474_v34, 4  ;;  %v1236_v47 = vadd.f32 %v10830_v37, %v12156_v45  ;;  %v1230_v52 = vpop.f32.mrb[51].mxu0 }
 0x151   : > { %v1673_v51 = vsel %vm1578_vm5, %v1670_v13, %v1672_v35  ;;  %v1675_v53 = vsel %vm1578_vm5, %v1672_v35, %v1674_v33  ;;  %v1231_v25 = vadd.f32 %v12156_v45, %v1230_v52  ;;  %v2475_v54 = vpack.c.bf16 %v2399_v40, %v2398_v38 }
 0x152   : > { %v12472_v55 = vmax.f32 %v1211_v8, %v1673_v51  ;;  %v12474_v57 = vmax.f32 %v1216_v61, %v1675_v53  ;;  %v2708_v59 = vsel %vm2695_vm7, %v2705_v16, %v2707_v42  ;;  %v1678_v58 = vrot.slane %v1236_v47, 6 }
 0x153   : > { %2744 = vmatpush1.bf16.msra.mxu1 %v2708_v59  ;;  %v1676_v62 = vrot.slane %v1231_v25, 6  ;;  %v2709_v0 = vrot.slane %v2475_v54, 4  ;;  %v10833_v1 = vpop.f32.mrb[52].mxu0  ;;  %v2154_v63 = vsel %vm2069_vm6, %v2151_v60, %v2153_v20  ;;  %v2400_v44 = vmax.f32 %v12402_v48, %v2152_v39 }
 0x154   : > { %v2161_v13 = vrot.slane %v12472_v55, 1  ;;  %v2163_v8 = vrot.slane %v12474_v57, 1  ;;  %2745 = vmatprep.subr.bf16.mxu1 %v12435_v4  ;;  %v1246_v61 = vadd.f32 %v10833_v1, %v12156_v45  ;;  %v1240_v14 = vpop.f32.mrb[53].mxu0  ;;  %v2401_v15 = vmax.f32 %v12404_v50, %v2154_v63 }
 0x155   : > { %v1677_v16 = vsel %vm1578_vm5, %v1674_v33, %v1676_v62  ;;  %v2710_v18 = vsel %vm2695_vm7, %v2707_v42, %v2709_v0  ;;  %v1241_v19 = vadd.f32 %v12156_v45, %v1240_v14  ;;  %2644 = vmatmul.mubr.bf16.gmra.mrb[16].mxu1 %v12470_v27  ;;  %v2156_v48 = vsel %vm2069_vm6, %v2153_v20, %v2155_v3 }
 0x156   : > { %v1921_v60 = vmax.f32 %v1221_v31, %v1677_v16  ;;  %v1681_v17 = vrot.slane %v1246_v61, 6  ;;  %v2476_v21 = vpack.c.bf16 %v2401_v15, %v2400_v44  ;;  %v2158_v5 = vsel %vm2069_vm6, %v2155_v3, %v2157_v36  ;;  %10389 = vmatprep.mubr.msk.bf16.mxu1 %vm2555_vm4, %v12263_v24 }
 0x157   : > { %2746 = vmatpush1.bf16.msra.mxu1 %v2710_v18  ;;  %v1679_v50 = vrot.slane %v1241_v19, 6  ;;  %v10836_v23 = vpop.f32.mrb[54].mxu0  ;;  %v2402_v28 = vmax.f32 %v12425_v10, %v2156_v48  ;;  %v2403_v29 = vmax.f32 %v12427_v11, %v2158_v5  ;;  %v2160_v30 = vsel %vm2069_vm6, %v2157_v36, %v2159_v41 }
 0x158   : > { %v2165_v33 = vrot.slane %v1921_v60, 1  ;;  %2747 = vmatprep.subr.bf16.mxu1 %v12435_v4  ;;  %v2711_v20 = vrot.slane %v2476_v21, 4  ;;  %v1256_v31 = vadd.f32 %v10836_v23, %v12156_v45  ;;  %v1250_v34 = vpop.f32.mrb[55].mxu0  ;;  %v2162_v3 = vsel %vm2069_vm6, %v2159_v41, %v2161_v13 }
 0x159   : > { %v1680_v35 = vsel %vm1578_vm5, %v1678_v58, %v1679_v50  ;;  %v1682_v37 = vsel %vm1578_vm5, %v1679_v50, %v1681_v17  ;;  %v1251_v38 = vadd.f32 %v12156_v45, %v1250_v34  ;;  %v2477_v10 = vpack.c.bf16 %v2403_v29, %v2402_v28 }
 0x15a   : > { %v12503_v40 = vmax.f32 %v1231_v25, %v1680_v35  ;;  %v12505_v11 = vmax.f32 %v1236_v47, %v1682_v37  ;;  %v2712_v39 = vsel %vm2695_vm7, %v2709_v0, %v2711_v20  ;;  %v1685_v36 = vrot.slane %v1256_v31, 6  ;;  %v12516_v47 = vld [vmem:[%s18199_s4] ss:$0 sm:$0xff] }
 0x15b   : > { %2748 = vmatpush1.bf16.msra.mxu1 %v2712_v39  ;;  %v1683_v42 = vrot.slane %v1251_v38, 6  ;;  %v2713_v52 = vrot.slane %v2477_v10, 4  ;;  %v10839_v51 = vpop.f32.mrb[56].mxu0  ;;  %v2404_v41 = vmax.f32 %v12449_v7, %v2160_v30  ;;  %v2405_v53 = vmax.f32 %v12451_v32, %v2162_v3 }
 0x15c   : > { %v2167_v54 = vrot.slane %v12503_v40, 1  ;;  %v2168_v45 = vrot.slane %v12505_v11, 1  ;;  %2749 = vmatprep.subr.bf16.mxu1 %v12435_v4  ;;  %v1266_v25 = vadd.f32 %v12516_v47, %v10839_v51  ;;  %v1260_v59 = vpop.f32.mrb[57].mxu0  ;;  %v2164_v7 = vsel %vm2069_vm6, %v2161_v13, %v2163_v8  ;;  %v12534_v13 = vld [vmem:[%s18196_s1 + $0x4] ss:$8 sps:$4 sm:$0xff]  }
 0x15d   : > { %v1684_v32 = vsel %vm1578_vm5, %v1681_v17, %v1683_v42  ;;  %v1686_v58 = vsel %vm1578_vm5, %v1683_v42, %v1685_v36  ;;  %v2714_v62 = vsel %vm2695_vm7, %v2711_v20, %v2713_v52  ;;  %v1261_v0 = vadd.f32 %v12516_v47, %v1260_v59  ;;  %2652 = vmatmul.mubr.bf16.gmra.mrb[20].mxu1 %v12284_v56 }
 0x15e   : > { %v12527_v1 = vmax.f32 %v1241_v19, %v1684_v32  ;;  %v12529_v63 = vmax.f32 %v1246_v61, %v1686_v58  ;;  %v1689_v44 = vrot.slane %v1266_v25, 6  ;;  %v2478_v14 = vpack.c.bf16 %v2405_v53, %v2404_v41  ;;  %10390 = vmatprep.mubr.msk.bf16.mxu1 %vm2555_vm4, %v12534_v13 }
 0x15f   : > { %2750 = vmatpush1.bf16.msra.mxu1 %v2714_v62  ;;  %v1687_v15 = vrot.slane %v1261_v0, 6  ;;  %v10842_v16 = vpop.f32.mrb[58].mxu0  ;;  %v2166_v18 = vsel %vm2069_vm6, %v2163_v8, %v2165_v33  ;;  %v2406_v61 = vmax.f32 %v12472_v55, %v2164_v7  ;;  %v2169_v19 = vsel %vm2069_vm6, %v2167_v54, %v2168_v45 }
 0x160   : > { %v2170_v48 = vrot.slane %v12527_v1, 1  ;;  %v2172_v60 = vrot.slane %v12529_v63, 1  ;;  %2751 = vmatprep.subr.bf16.mxu1 %v12435_v4  ;;  %v2715_v17 = vrot.slane %v2478_v14, 4  ;;  %v1276_v21 = vadd.f32 %v12516_v47, %v10842_v16  ;;  %v1270_v5 = vpop.f32.mrb[59].mxu0 }
 0x161   : > { %v1688_v50 = vsel %vm1578_vm5, %v1685_v36, %v1687_v15  ;;  %v1690_v23 = vsel %vm1578_vm5, %v1687_v15, %v1689_v44  ;;  %v1271_v8 = vadd.f32 %v12516_v47, %v1270_v5  ;;  %v2407_v55 = vmax.f32 %v12474_v57, %v2166_v18 }
 0x162   : > { %v12551_v28 = vmax.f32 %v1251_v38, %v1688_v50  ;;  %v12553_v29 = vmax.f32 %v1256_v31, %v1690_v23  ;;  %v2716_v30 = vsel %vm2695_vm7, %v2713_v52, %v2715_v17  ;;  %v1693_v33 = vrot.slane %v1276_v21, 6 }
 0x163   : > { %2752 = vmatpush1.bf16.msra.mxu1 %v2716_v30  ;;  %v1691_v20 = vrot.slane %v1271_v8, 6  ;;  %v2479_v34 = vpack.c.bf16 %v2407_v55, %v2406_v61  ;;  %v10845_v3 = vpop.f32.mrb[60].mxu0  ;;  %v2171_v35 = vsel %vm2069_vm6, %v2168_v45, %v2170_v48  ;;  %v2408_v37 = vmax.f32 %v12503_v40, %v2169_v19 }
 0x164   : > { %v2174_v10 = vrot.slane %v12551_v28, 1  ;;  %v2176_v39 = vrot.slane %v12553_v29, 1  ;;  %2753 = vmatprep.subr.bf16.mxu1 %v12435_v4  ;;  %v1286_v57 = vadd.f32 %v12516_v47, %v10845_v3  ;;  %v1280_v31 = vpop.f32.mrb[61].mxu0  ;;  %v2409_v38 = vmax.f32 %v12505_v11, %v2171_v35 }
 0x165   : > { %v1692_v36 = vsel %vm1578_vm5, %v1689_v44, %v1691_v20  ;;  %v1694_v42 = vsel %vm1578_vm5, %v1691_v20, %v1693_v33  ;;  %v2717_v52 = vrot.slane %v2479_v34, 4  ;;  %v1281_v51 = vadd.f32 %v12516_v47, %v1280_v31 }
 0x166   : > { %v12566_v41 = vmax.f32 %v1261_v0, %v1692_v36  ;;  %v12568_v40 = vmax.f32 %v1266_v25, %v1694_v42  ;;  %v1697_v53 = vrot.slane %v1286_v57, 6  ;;  %v2480_v54 = vpack.c.bf16 %v2409_v38, %v2408_v37 }
 0x167   : > { %v2718_v45 = vsel %vm2695_vm7, %v2715_v17, %v2717_v52  ;;  %v1695_v59 = vrot.slane %v1281_v51, 6  ;;  %v2731_v7 = vand.u32 %v2717_v52, %v12246_v6  ;;  %v10848_v32 = vpop.f32.mrb[62].mxu0  ;;  %v2173_v11 = vsel %vm2069_vm6, %v2170_v48, %v2172_v60 }
 0x168   : > { %v2178_v58 = vrot.slane %v12566_v41, 1  ;;  %v2180_v62 = vrot.slane %v12568_v40, 1  ;;  %2754 = vmatpush1.bf16.msra.mxu1 %v2718_v45  ;;  %v1296_v0 = vadd.f32 %v12516_v47, %v10848_v32  ;;  %v1290_v44 = vpop.f32.mrb[63].mxu0  ;;  %v2175_v25 = vsel %vm2069_vm6, %v2172_v60, %v2174_v10 }
 0x169   : > { %v1696_v14 = vsel %vm1578_vm5, %v1693_v33, %v1695_v59  ;;  %v1698_v15 = vsel %vm1578_vm5, %v1695_v59, %v1697_v53  ;;  %2755 = vmatprep.subr.bf16.mxu1 %v12435_v4  ;;  %v1291_v16 = vadd.f32 %v12516_v47, %v1290_v44  ;;  %v2410_v18 = vmax.f32 %v12527_v1, %v2173_v11 }
 0x16a   : > { %v12582_v61 = vmax.f32 %v1271_v8, %v1696_v14  ;;  %v1931_v19 = vmax.f32 %v1276_v21, %v1698_v15  ;;  %v1701_v48 = vrot.slane %v1296_v0, 6  ;;  %v2411_v17 = vmax.f32 %v12529_v63, %v2175_v25  ;;  %v11468_v14 = vld [vmem:[%s18200_s5] sm:$0xff]  }
 0x16b   : > { %v1699_v5 = vrot.slane %v1291_v16, 6  ;;  %v10851_v50 = vpop.f32.mrb[64].mxu0  ;;  %v2177_v60 = vsel %vm2069_vm6, %v2174_v10, %v2176_v39  ;;  %v2179_v23 = vsel %vm2069_vm6, %v2176_v39, %v2178_v58  ;;  %v2181_v55 = vsel %vm2069_vm6, %v2178_v58, %v2180_v62  ;;  %5000 = vmatpush1.bf16.msra.mxu0 %v11468_v14 }
 0x16c   : > { %v2182_v30 = vrot.slane %v12582_v61, 1  ;;  %v2184_v33 = vrot.slane %v1931_v19, 1  ;;  %2756 = vmatpush1.bf16.msra.mxu1 %v2731_v7  ;;  %v1306_v1 = vadd.f32 %v12516_v47, %v10851_v50  ;;  %v1300_v8 = vpop.f32.mrb[65].mxu0  ;;  %v2481_v20 = vpack.c.bf16 %v2411_v17, %v2410_v18  ;;  %5001 = vmatprep.subr.bf16.mxu0 %v12435_v4 }
 0x16d   : > { %v1700_v21 = vsel %vm1578_vm5, %v1697_v53, %v1699_v5  ;;  %v1702_v63 = vsel %vm1578_vm5, %v1699_v5, %v1701_v48  ;;  %2863 = vmatprep.subr.bf16.mxu1 %v12435_v4  ;;  %v1301_v34 = vadd.f32 %v12516_v47, %v1300_v8  ;;  %v2412_v3 = vmax.f32 %v12551_v28, %v2177_v60 }
 0x16e   : > { %v12595_v35 = vmax.f32 %v1281_v51, %v1700_v21  ;;  %v12597_v37 = vmax.f32 %v1286_v57, %v1702_v63  ;;  %v1705_v10 = vrot.slane %v1306_v1, 6  ;;  %v2413_v39 = vmax.f32 %v12553_v29, %v2179_v23 }
 0x16f   : > { %2766 = vmatmul.mubr.bf16.vlgmr.msra.gmra.mrb[24].mxu1 %v12296_v2  ;;  %v1703_v31 = vrot.slane %v1301_v34, 6  ;;  %v10854_v38 = vpop.f32.mrb[66].mxu0  ;;  %v2183_v36 = vsel %vm2069_vm6, %v2180_v62, %v2182_v30  ;;  %v2414_v42 = vmax.f32 %v12566_v41, %v2181_v55  ;;  %v2185_v52 = vsel %vm2069_vm6, %v2182_v30, %v2184_v33 }
 0x170   : > { %v2186_v53 = vrot.slane %v12595_v35, 1  ;;  %v2188_v28 = vrot.slane %v12597_v37, 1  ;;  %2864 = vmatpush1.bf16.msra.mxu1 %v2480_v54  ;;  %v1316_v57 = vadd.f32 %v12516_v47, %v10854_v38  ;;  %v1310_v51 = vpop.f32.mrb[67].mxu0  ;;  %10391 = vmatprep.mubr.msk.bf16.mxu1 %vm2555_vm4, %v12307_v9  ;;  %v2482_v2 = vpack.c.bf16 %v2413_v39, %v2412_v3 }
 0x171   : > { %v1704_v29 = vsel %vm1578_vm5, %v1701_v48, %v1703_v31  ;;  %v1706_v45 = vsel %vm1578_vm5, %v1703_v31, %v1705_v10  ;;  %2865 = vmatprep.subr.bf16.mxu1 %v12435_v4  ;;  %v1311_v41 = vadd.f32 %v12516_v47, %v1310_v51  ;;  %v2415_v59 = vmax.f32 %v12568_v40, %v2183_v36 }
 0x172   : > { %v12614_v7 = vmax.f32 %v1291_v16, %v1704_v29  ;;  %v12616_v54 = vmax.f32 %v1296_v0, %v1706_v45  ;;  %v1709_v32 = vrot.slane %v1316_v57, 6  ;;  %v2187_v11 = vsel %vm2069_vm6, %v2184_v33, %v2186_v53 }
 0x173   : > { %v1707_v58 = vrot.slane %v1311_v41, 6  ;;  %v10857_v9 = vpop.f32.mrb[68].mxu0  ;;  %v2483_v62 = vpack.c.bf16 %v2415_v59, %v2414_v42  ;;  %v2416_v44 = vmax.f32 %v12582_v61, %v2185_v52  ;;  %v2417_v25 = vmax.f32 %v1931_v19, %v2187_v11 }
 0x174   : > { %v2190_v15 = vrot.slane %v12614_v7, 1  ;;  %v2192_v40 = vrot.slane %v12616_v54, 1  ;;  %2866 = vmatpush1.bf16.msra.mxu1 %v2481_v20  ;;  %v1326_v0 = vadd.f32 %v12516_v47, %v10857_v9  ;;  %v1320_v16 = vpop.f32.mrb[69].mxu0  ;;  %v2189_v18 = vsel %vm2069_vm6, %v2186_v53, %v2188_v28 }
 0x175   : > { %v1708_v48 = vsel %vm1578_vm5, %v1705_v10, %v1707_v58  ;;  %v1710_v17 = vsel %vm1578_vm5, %v1707_v58, %v1709_v32  ;;  %2867 = vmatprep.subr.bf16.mxu1 %v12435_v4  ;;  %v1321_v61 = vadd.f32 %v12516_v47, %v1320_v16  ;;  %v2484_v19 = vpack.c.bf16 %v2417_v25, %v2416_v44 }
 0x176   : > { %v12631_v5 = vmax.f32 %v1301_v34, %v1708_v48  ;;  %v12633_v50 = vmax.f32 %v1306_v1, %v1710_v17  ;;  %v1713_v60 = vrot.slane %v1326_v0, 6  ;;  %v2191_v23 = vsel %vm2069_vm6, %v2188_v28, %v2190_v15  ;;  %v11469_v28 = vld [vmem:[%s18200_s5 + $0x8] sm:$0xff]  }
 0x177   : > { %2774 = vmatmul.mubr.bf16.gmra.mrb[28].mxu1 %v12337_v43  ;;  %v1711_v55 = vrot.slane %v1321_v61, 6  ;;  %v10860_v30 = vpop.f32.mrb[70].mxu0  ;;  %v2418_v33 = vmax.f32 %v12595_v35, %v2189_v18  ;;  %v2419_v8 = vmax.f32 %v12597_v37, %v2191_v23  ;;  %v2193_v20 = vsel %vm2069_vm6, %v2190_v15, %v2192_v40  ;;  %5002 = vmatpush1.bf16.msra.mxu0 %v11469_v28 }
 0x178   : > { %v2194_v21 = vrot.slane %v12631_v5, 1  ;;  %v2196_v1 = vrot.slane %v12633_v50, 1  ;;  %2868 = vmatpush1.bf16.msra.mxu1 %v2482_v2  ;;  %v1336_v63 = vadd.f32 %v12516_v47, %v10860_v30  ;;  %v1330_v34 = vpop.f32.mrb[71].mxu0  ;;  %10392 = vmatprep.mubr.msk.bf16.mxu1 %vm2555_vm4, %v12346_v49  ;;  %v2420_v43 = vmax.f32 %v12614_v7, %v2193_v20 }
 0x179   : > { %v1712_v3 = vsel %vm1578_vm5, %v1709_v32, %v1711_v55  ;;  %v1714_v35 = vsel %vm1578_vm5, %v1711_v55, %v1713_v60  ;;  %2869 = vmatprep.subr.bf16.mxu1 %v12435_v4  ;;  %v1331_v37 = vadd.f32 %v12516_v47, %v1330_v34  ;;  %v2485_v10 = vpack.c.bf16 %v2419_v8, %v2418_v33 }
 0x17a   : > { %v1938_v39 = vmax.f32 %v1311_v41, %v1712_v3  ;;  %v1939_v31 = vmax.f32 %v1316_v57, %v1714_v35  ;;  %v1717_v38 = vrot.slane %v1336_v63, 6  ;;  %v2195_v36 = vsel %vm2069_vm6, %v2192_v40, %v2194_v21  ;;  %5003 = vmatprep.subr.bf16.mxu0 %v12435_v4 }
 0x17b   : > { %v1715_v42 = vrot.slane %v1331_v37, 6  ;;  %v10863_v52 = vpop.f32.mrb[72].mxu0  ;;  %v2421_v49 = vmax.f32 %v12616_v54, %v2195_v36  ;;  %v2197_v53 = vsel %vm2069_vm6, %v2194_v21, %v2196_v1 }
 0x17c   : > { %v2198_v51 = vrot.slane %v1938_v39, 1  ;;  %v2200_v2 = vrot.slane %v1939_v31, 1  ;;  %2870 = vmatpush1.bf16.msra.mxu1 %v2483_v62  ;;  %v1346_v29 = vadd.f32 %v12516_v47, %v10863_v52  ;;  %v1340_v45 = vpop.f32.mrb[73].mxu0  ;;  %v2422_v57 = vmax.f32 %v12631_v5, %v2197_v53 }
 0x17d   : > { %v1716_v41 = vsel %vm1578_vm5, %v1713_v60, %v1715_v42  ;;  %v1718_v59 = vsel %vm1578_vm5, %v1715_v42, %v1717_v38  ;;  %2871 = vmatprep.subr.bf16.mxu1 %v12435_v4  ;;  %v1341_v7 = vadd.f32 %v12516_v47, %v1340_v45  ;;  %v2486_v54 = vpack.c.bf16 %v2421_v49, %v2420_v43 }
 0x17e   : > { %v12663_v32 = vmax.f32 %v1321_v61, %v1716_v41  ;;  %v1941_v11 = vmax.f32 %v1326_v0, %v1718_v59  ;;  %v1721_v58 = vrot.slane %v1346_v29, 6  ;;  %v2199_v9 = vsel %vm2069_vm6, %v2196_v1, %v2198_v51 }
 0x17f   : > { %2782 = vmatmul.mubr.bf16.gmra.mrb[32].mxu1 %v12381_v22  ;;  %v1719_v62 = vrot.slane %v1341_v7, 6  ;;  %v10866_v44 = vpop.f32.mrb[74].mxu0  ;;  %v2423_v25 = vmax.f32 %v12633_v50, %v2199_v9  ;;  %v2201_v14 = vsel %vm2069_vm6, %v2198_v51, %v2200_v2 }
 0x180   : > { %v2202_v15 = vrot.slane %v12663_v32, 1  ;;  %v2204_v40 = vrot.slane %v1941_v11, 1  ;;  %2872 = vmatpush1.bf16.msra.mxu1 %v2484_v19  ;;  %v1356_v0 = vadd.f32 %v12516_v47, %v10866_v44  ;;  %v1350_v16 = vpop.f32.mrb[75].mxu0  ;;  %10393 = vmatprep.mubr.msk.bf16.mxu1 %vm2555_vm4, %v12390_v26  ;;  %v2424_v18 = vmax.f32 %v1938_v39, %v2201_v14 }
 0x181   : > { %v1720_v22 = vsel %vm1578_vm5, %v1717_v38, %v1719_v62  ;;  %v1722_v48 = vsel %vm1578_vm5, %v1719_v62, %v1721_v58  ;;  %2873 = vmatprep.subr.bf16.mxu1 %v12435_v4  ;;  %v1351_v17 = vadd.f32 %v12516_v47, %v1350_v16  ;;  %v2487_v61 = vpack.c.bf16 %v2423_v25, %v2422_v57 }
 0x182   : > { %v1942_v5 = vmax.f32 %v1331_v37, %v1720_v22  ;;  %v1943_v50 = vmax.f32 %v1336_v63, %v1722_v48  ;;  %v1725_v60 = vrot.slane %v1356_v0, 6  ;;  %v2203_v19 = vsel %vm2069_vm6, %v2200_v2, %v2202_v15 }
 0x183   : > { %v1723_v23 = vrot.slane %v1351_v17, 6  ;;  %v10869_v55 = vpop.f32.mrb[76].mxu0  ;;  %v2425_v30 = vmax.f32 %v1939_v31, %v2203_v19  ;;  %v2205_v26 = vsel %vm2069_vm6, %v2202_v15, %v2204_v40 }
 0x184   : > { %v2206_v33 = vrot.slane %v1942_v5, 1  ;;  %v2208_v8 = vrot.slane %v1943_v50, 1  ;;  %2874 = vmatpush1.bf16.msra.mxu1 %v2485_v10  ;;  %v1366_v20 = vadd.f32 %v12516_v47, %v10869_v55  ;;  %v1360_v21 = vpop.f32.mrb[77].mxu0  ;;  %v2426_v1 = vmax.f32 %v12663_v32, %v2205_v26 }
 0x185   : > { %v1724_v34 = vsel %vm1578_vm5, %v1721_v58, %v1723_v23  ;;  %v1726_v63 = vsel %vm1578_vm5, %v1723_v23, %v1725_v60  ;;  %2875 = vmatprep.subr.bf16.mxu1 %v12435_v4  ;;  %v1361_v43 = vadd.f32 %v12516_v47, %v1360_v21  ;;  %v2488_v3 = vpack.c.bf16 %v2425_v30, %v2424_v18 }
 0x186   : > { %v12686_v35 = vmax.f32 %v1341_v7, %v1724_v34  ;;  %v12688_v37 = vmax.f32 %v1346_v29, %v1726_v63  ;;  %v1729_v39 = vrot.slane %v1366_v20, 6  ;;  %v2207_v10 = vsel %vm2069_vm6, %v2204_v40, %v2206_v33 }
 0x187   : > { %2790 = vmatmul.mubr.bf16.gmra.mrb[36].mxu1 %v12423_v46  ;;  %v1727_v31 = vrot.slane %v1361_v43, 6  ;;  %v10872_v38 = vpop.f32.mrb[78].mxu0  ;;  %v2427_v36 = vmax.f32 %v1941_v11, %v2207_v10  ;;  %v2209_v42 = vsel %vm2069_vm6, %v2206_v33, %v2208_v8 }
 0x188   : > { %v2210_v52 = vrot.slane %v12686_v35, 1  ;;  %v2212_v49 = vrot.slane %v12688_v37, 1  ;;  %2876 = vmatpush1.bf16.msra.mxu1 %v2486_v54  ;;  %v1376_v53 = vadd.f32 %v12516_v47, %v10872_v38  ;;  %v1370_v28 = vpop.f32.mrb[79].mxu0  ;;  %10394 = vmatprep.mubr.msk.bf16.mxu1 %vm2555_vm4, %v12433_v12  ;;  %v2428_v51 = vmax.f32 %v1942_v5, %v2209_v42 }
 0x189   : > { %v1728_v2 = vsel %vm1578_vm5, %v1725_v60, %v1727_v31  ;;  %v1730_v46 = vsel %vm1578_vm5, %v1727_v31, %v1729_v39  ;;  %2877 = vmatprep.subr.bf16.mxu1 %v12435_v4  ;;  %v1371_v29 = vadd.f32 %v12516_v47, %v1370_v28  ;;  %v2489_v45 = vpack.c.bf16 %v2427_v36, %v2426_v1  ;;  %v11470_v60 = vld [vmem:[%s18200_s5 + $0x10] sm:$0xff]  }
 0x18a   : > { %v12702_v57 = vmax.f32 %v1351_v17, %v1728_v2  ;;  %v12704_v41 = vmax.f32 %v1356_v0, %v1730_v46  ;;  %v1733_v59 = vrot.slane %v1376_v53, 6  ;;  %v2211_v7 = vsel %vm2069_vm6, %v2208_v8, %v2210_v52  ;;  %5004 = vmatpush1.bf16.msra.mxu0 %v11470_v60 }
 0x18b   : > { %v1731_v54 = vrot.slane %v1371_v29, 6  ;;  %v10875_v32 = vpop.f32.mrb[80].mxu0  ;;  %v2429_v12 = vmax.f32 %v1943_v50, %v2211_v7  ;;  %v2213_v11 = vsel %vm2069_vm6, %v2210_v52, %v2212_v49  ;;  %5005 = vmatprep.subr.bf16.mxu0 %v12435_v4 }
 0x18c   : > { %v2214_v58 = vrot.slane %v12702_v57, 1  ;;  %v2216_v9 = vrot.slane %v12704_v41, 1  ;;  %2878 = vmatpush1.bf16.msra.mxu1 %v2487_v61  ;;  %v1386_v62 = vadd.f32 %v12516_v47, %v10875_v32  ;;  %v1380_v44 = vpop.f32.mrb[81].mxu0  ;;  %v2430_v25 = vmax.f32 %v12686_v35, %v2213_v11 }
 0x18d   : > { %v1732_v14 = vsel %vm1578_vm5, %v1729_v39, %v1731_v54  ;;  %v1734_v15 = vsel %vm1578_vm5, %v1731_v54, %v1733_v59  ;;  %2879 = vmatprep.subr.bf16.mxu1 %v12435_v4  ;;  %v1381_v40 = vadd.f32 %v12516_v47, %v1380_v44  ;;  %v2490_v0 = vpack.c.bf16 %v2429_v12, %v2428_v51 }
 0x18e   : > { %v12720_v16 = vmax.f32 %v1361_v43, %v1732_v14  ;;  %v12722_v18 = vmax.f32 %v1366_v20, %v1734_v15  ;;  %v1737_v22 = vrot.slane %v1386_v62, 6  ;;  %v2215_v48 = vsel %vm2069_vm6, %v2212_v49, %v2214_v58  ;;  %v11471_v14 = vld [vmem:[%s18200_s5 + $0x18] sm:$0xff]  }
 0x18f   : > { %2798 = vmatmul.mubr.bf16.gmra.mrb[40].mxu1 %v12470_v27  ;;  %v1735_v17 = vrot.slane %v1381_v40, 6  ;;  %v10878_v61 = vpop.f32.mrb[82].mxu0  ;;  %v2431_v5 = vmax.f32 %v12688_v37, %v2215_v48  ;;  %v2217_v50 = vsel %vm2069_vm6, %v2214_v58, %v2216_v9  ;;  %5006 = vmatpush1.bf16.msra.mxu0 %v11471_v14 }
 0x190   : > { %v2218_v19 = vrot.slane %v12720_v16, 1  ;;  %v2220_v23 = vrot.slane %v12722_v18, 1  ;;  %2880 = vmatpush1.bf16.msra.mxu1 %v2488_v3  ;;  %v1396_v55 = vadd.f32 %v12516_v47, %v10878_v61  ;;  %v1390_v30 = vpop.f32.mrb[83].mxu0  ;;  %10395 = vmatprep.mubr.msk.bf16.mxu1 %vm2555_vm4, %v12263_v24  ;;  %v2432_v27 = vmax.f32 %v12702_v57, %v2217_v50 }
 0x191   : > { %v1736_v26 = vsel %vm1578_vm5, %v1733_v59, %v1735_v17  ;;  %v1738_v33 = vsel %vm1578_vm5, %v1735_v17, %v1737_v22  ;;  %2881 = vmatprep.subr.bf16.mxu1 %v12435_v4  ;;  %v1391_v8 = vadd.f32 %v12516_v47, %v1390_v30  ;;  %v2491_v20 = vpack.c.bf16 %v2431_v5, %v2430_v25 }
 0x192   : > { %v12741_v21 = vmax.f32 %v1371_v29, %v1736_v26  ;;  %v12743_v1 = vmax.f32 %v1376_v53, %v1738_v33  ;;  %v1741_v34 = vrot.slane %v1396_v55, 6  ;;  %v2219_v63 = vsel %vm2069_vm6, %v2216_v9, %v2218_v19  ;;  %5007 = vmatprep.subr.bf16.mxu0 %v12435_v4 }
 0x193   : > { %v1739_v43 = vrot.slane %v1391_v8, 6  ;;  %v10881_v3 = vpop.f32.mrb[84].mxu0  ;;  %v2861_v35 = vand.u32 %v12246_v6, %v2491_v20  ;;  %v2221_v37 = vsel %vm2069_vm6, %v2218_v19, %v2220_v23  ;;  %v2433_v39 = vmax.f32 %v12704_v41, %v2219_v63 }
 0x194   : > { %v2222_v10 = vrot.slane %v12741_v21, 1  ;;  %v2224_v31 = vrot.slane %v12743_v1, 1  ;;  %2882 = vmatpush1.bf16.msra.mxu1 %v2489_v45  ;;  %v1406_v38 = vadd.f32 %v12516_v47, %v10881_v3  ;;  %v1400_v36 = vpop.f32.mrb[85].mxu0  ;;  %v2434_v42 = vmax.f32 %v12720_v16, %v2221_v37 }
 0x195   : > { %v1740_v52 = vsel %vm1578_vm5, %v1737_v22, %v1739_v43  ;;  %v1742_v49 = vsel %vm1578_vm5, %v1739_v43, %v1741_v34  ;;  %2883 = vmatprep.subr.bf16.mxu1 %v12435_v4  ;;  %v1401_v53 = vadd.f32 %v12516_v47, %v1400_v36  ;;  %v2492_v28 = vpack.c.bf16 %v2433_v39, %v2432_v27 }
 0x196   : > { %v12758_v51 = vmax.f32 %v1381_v40, %v1740_v52  ;;  %v12760_v2 = vmax.f32 %v1386_v62, %v1742_v49  ;;  %v1745_v46 = vrot.slane %v1406_v38, 6  ;;  %v2223_v29 = vsel %vm2069_vm6, %v2220_v23, %v2222_v10 }
 0x197   : > { %2806 = vmatmul.mubr.bf16.gmra.mrb[44].mxu1 %v12284_v56  ;;  %v1743_v45 = vrot.slane %v1401_v53, 6  ;;  %v10884_v57 = vpop.f32.mrb[86].mxu0  ;;  %v2435_v41 = vmax.f32 %v12722_v18, %v2223_v29  ;;  %v2978_v59 = vrot.slane %v2492_v28, 4  ;;  %v2225_v7 = vsel %vm2069_vm6, %v2222_v10, %v2224_v31  ;;  %v12814_v10 = vld [vmem:[%s18196_s1 + $0x14] ss:$8 sps:$4 sm:$0xff]  }
 0x198   : > { %v2226_v54 = vrot.slane %v12758_v51, 1  ;;  %v2228_v32 = vrot.slane %v12760_v2, 1  ;;  %2884 = vmatpush1.bf16.msra.mxu1 %v2490_v0  ;;  %v1416_v12 = vadd.f32 %v12516_v47, %v10884_v57  ;;  %v1410_v11 = vpop.f32.mrb[87].mxu0  ;;  %10396 = vmatprep.mubr.msk.bf16.mxu1 %vm2555_vm4, %v12534_v13  ;;  %v2436_v58 = vmax.f32 %v12741_v21, %v2225_v7  ;;  %v12803_v21 = vld [vmem:[%s18196_s1] ss:$8 sps:$4 sm:$0xff]  }
 0x199   : > { %v1744_v9 = vsel %vm1578_vm5, %v1741_v34, %v1743_v45  ;;  %v1746_v62 = vsel %vm1578_vm5, %v1743_v45, %v1745_v46  ;;  %2885 = vmatprep.subr.bf16.mxu1 %v12435_v4  ;;  %v1411_v44 = vadd.f32 %v12516_v47, %v1410_v11  ;;  %v2493_v25 = vpack.c.bf16 %v2435_v41, %v2434_v42 }
 0x19a   : > { %v12779_v15 = vmax.f32 %v1391_v8, %v1744_v9  ;;  %v12781_v40 = vmax.f32 %v1396_v55, %v1746_v62  ;;  %v1749_v13 = vrot.slane %v1416_v12, 6  ;;  %v2227_v0 = vsel %vm2069_vm6, %v2224_v31, %v2226_v54 }
 0x19b   : > { %v1747_v16 = vrot.slane %v1411_v44, 6  ;;  %v10887_v18 = vpop.f32.mrb[88].mxu0  ;;  %v2979_v22 = vrot.slane %v2493_v25, 4  ;;  %v2437_v48 = vmax.f32 %v12743_v1, %v2227_v0  ;;  %v2229_v17 = vsel %vm2069_vm6, %v2226_v54, %v2228_v32 }
 0x19c   : > { %v2230_v61 = vrot.slane %v12779_v15, 1  ;;  %v2232_v5 = vrot.slane %v12781_v40, 1  ;;  %2886 = vmatpush1.bf16.msra.mxu1 %v2861_v35  ;;  %v1426_v50 = vadd.f32 %v12516_v47, %v10887_v18  ;;  %v1420_v60 = vpop.f32.mrb[89].mxu0  ;;  %v2438_v19 = vmax.f32 %v12758_v51, %v2229_v17 }
 0x19d   : > { %v1748_v23 = vsel %vm1578_vm5, %v1745_v46, %v1747_v16  ;;  %v1750_v55 = vsel %vm1578_vm5, %v1747_v16, %v1749_v13  ;;  %v1421_v30 = vadd.f32 %v12516_v47, %v1420_v60  ;;  %3015 = vmatprep.subr.bf16.mxu1 %v12435_v4  ;;  %v2980_v27 = vsel %vm2695_vm7, %v2978_v59, %v2979_v22 }
 0x19e   : > { %v12796_v26 = vmax.f32 %v1401_v53, %v1748_v23  ;;  %v12798_v33 = vmax.f32 %v1406_v38, %v1750_v55  ;;  %v1753_v8 = vrot.slane %v1426_v50, 6  ;;  %v2494_v20 = vpack.c.bf16 %v2437_v48, %v2436_v58 }
 0x19f   : > { %2896 = vmatmul.mubr.bf16.vlgmr.msra.gmra.mrb[48].mxu1 %v12803_v21  ;;  %v1751_v1 = vrot.slane %v1421_v30, 6  ;;  %v10890_v34 = vpop.f32.mrb[90].mxu0  ;;  %v2231_v63 = vsel %vm2069_vm6, %v2228_v32, %v2230_v61  ;;  %v2233_v43 = vsel %vm2069_vm6, %v2230_v61, %v2232_v5 }
 0x1a0   : > { %v2234_v3 = vrot.slane %v12796_v26, 1  ;;  %v2236_v35 = vrot.slane %v12798_v33, 1  ;;  %3016 = vmatpush1.bf16.msra.mxu1 %v2980_v27  ;;  %v1436_v37 = vadd.f32 %v12516_v47, %v10890_v34  ;;  %v1430_v39 = vpop.f32.mrb[91].mxu0  ;;  %10397 = vmatprep.mubr.msk.bf16.mxu1 %vm2555_vm4, %v12814_v10  ;;  %v2981_v31 = vrot.slane %v2494_v20, 4 }
 0x1a1   : > { %v1752_v38 = vsel %vm1578_vm5, %v1749_v13, %v1751_v1  ;;  %v1754_v36 = vsel %vm1578_vm5, %v1751_v1, %v1753_v8  ;;  %v1431_v42 = vadd.f32 %v12516_v47, %v1430_v39  ;;  %3017 = vmatprep.subr.bf16.mxu1 %v12435_v4  ;;  %v2439_v52 = vmax.f32 %v12760_v2, %v2231_v63  ;;  %v12880_v39 = vld [vmem:[#allocation3] sm:$0xff] }
 0x1a2   : > { %v12823_v49 = vmax.f32 %v1411_v44, %v1752_v38  ;;  %v12825_v53 = vmax.f32 %v1416_v12, %v1754_v36  ;;  %v1757_v28 = vrot.slane %v1436_v37, 6  ;;  %v2982_v51 = vsel %vm2695_vm7, %v2979_v22, %v2981_v31  ;;  %v11472_v22 = vld [vmem:[%s18200_s5 + $0x20] sm:$0xff]  }
 0x1a3   : > { %v1755_v46 = vrot.slane %v1431_v42, 6  ;;  %v10893_v29 = vpop.f32.mrb[92].mxu0  ;;  %v2495_v45 = vpack.c.bf16 %v2439_v52, %v2438_v19  ;;  %v2235_v57 = vsel %vm2069_vm6, %v2232_v5, %v2234_v3  ;;  %v2440_v41 = vmax.f32 %v12779_v15, %v2233_v43  ;;  %v12847_v15 = vld [vmem:[%s18196_s1 + $0x10] ss:$8 sps:$4 sm:$0xff]   ;;  %5008 = vmatpush1.bf16.msra.mxu0 %v11472_v22 }
 0x1a4   : > { %v2238_v59 = vrot.slane %v12823_v49, 1  ;;  %v2240_v7 = vrot.slane %v12825_v53, 1  ;;  %3018 = vmatpush1.bf16.msra.mxu1 %v2982_v51  ;;  %v1446_v2 = vadd.f32 %v12516_v47, %v10893_v29  ;;  %v1440_v54 = vpop.f32.mrb[93].mxu0  ;;  %v2441_v32 = vmax.f32 %v12781_v40, %v2235_v57  ;;  %5009 = vmatprep.subr.bf16.mxu0 %v12880_v39 }
 0x1a5   : > { %v1756_v12 = vsel %vm1578_vm5, %v1753_v8, %v1755_v46  ;;  %v1758_v11 = vsel %vm1578_vm5, %v1755_v46, %v1757_v28  ;;  %v1441_v58 = vadd.f32 %v12516_v47, %v1440_v54  ;;  %3019 = vmatprep.subr.bf16.mxu1 %v12435_v4  ;;  %v2983_v9 = vrot.slane %v2495_v45, 4  ;;  %v12905_v45 = vld [vmem:[%s18196_s1 + $0x20] ss:$8 sps:$4 sm:$0xff]  }
 0x1a6   : > { %v12838_v62 = vmax.f32 %v1421_v30, %v1756_v12  ;;  %v12840_v44 = vmax.f32 %v1426_v50, %v1758_v11  ;;  %v1761_v25 = vrot.slane %v1446_v2, 6  ;;  %v12842_v14 = vpack.c.bf16 %v2441_v32, %v2440_v41  ;;  %v12862_v50 = vld [vmem:[%s18196_s1 + $0x24] ss:$8 sps:$4 sm:$0xff]  }
 0x1a7   : > { %2904 = vmatmul.mubr.bf16.gmra.mrb[52].mxu1 %v12847_v15  ;;  %v1759_v40 = vrot.slane %v1441_v58, 6  ;;  %v2984_v13 = vsel %vm2695_vm7, %v2981_v31, %v2983_v9  ;;  %v10896_v0 = vpop.f32.mrb[94].mxu0  ;;  %v2237_v16 = vsel %vm2069_vm6, %v2234_v3, %v2236_v35  ;;  %v2239_v18 = vsel %vm2069_vm6, %v2236_v35, %v2238_v59 }
 0x1a8   : > { %v2242_v48 = vrot.slane %v12838_v62, 1  ;;  %v2244_v17 = vrot.slane %v12840_v44, 1  ;;  %3020 = vmatpush1.bf16.msra.mxu1 %v2984_v13  ;;  %v1456_v61 = vadd.f32 %v12516_v47, %v10896_v0  ;;  %v1450_v5 = vpop.f32.mrb[95].mxu0  ;;  %10398 = vmatprep.mubr.msk.bf16.mxu1 %vm2555_vm4, %v12862_v50  ;;  %v2985_v60 = vrot.slane %v12842_v14, 4 }
 0x1a9   : > { %v1760_v19 = vsel %vm1578_vm5, %v1757_v28, %v1759_v40  ;;  %v1762_v23 = vsel %vm1578_vm5, %v1759_v40, %v1761_v25  ;;  %v1451_v55 = vadd.f32 %v12516_v47, %v1450_v5  ;;  %3021 = vmatprep.subr.bf16.mxu1 %v12435_v4  ;;  %v2442_v30 = vmax.f32 %v12796_v26, %v2237_v16 }
 0x1aa   : > { %v12872_v27 = vmax.f32 %v1431_v42, %v1760_v19  ;;  %v12874_v8 = vmax.f32 %v1436_v37, %v1762_v23  ;;  %v1765_v20 = vrot.slane %v1456_v61, 6  ;;  %v2986_v1 = vsel %vm2695_vm7, %v2983_v9, %v2985_v60 }
 0x1ab   : > { %v1763_v34 = vrot.slane %v1451_v55, 6  ;;  %v10899_v63 = vpop.f32.mrb[96].mxu0  ;;  %v2443_v43 = vmax.f32 %v12798_v33, %v2239_v18  ;;  %v2241_v3 = vsel %vm2069_vm6, %v2238_v59, %v2240_v7  ;;  %v2243_v35 = vsel %vm2069_vm6, %v2240_v7, %v2242_v48 }
 0x1ac   : > { %v2246_v4 = vrot.slane %v12872_v27, 1  ;;  %v2248_v26 = vrot.slane %v12874_v8, 1  ;;  %3022 = vmatpush1.bf16.msra.mxu1 %v2986_v1  ;;  %v1466_v37 = vadd.f32 %v12516_v47, %v10899_v63  ;;  %v1460_v31 = vpop.f32.mrb[97].mxu0  ;;  %v2444_v38 = vmax.f32 %v12823_v49, %v2241_v3 }
 0x1ad   : > { %v1764_v33 = vsel %vm1578_vm5, %v1761_v25, %v1763_v34  ;;  %v1766_v36 = vsel %vm1578_vm5, %v1763_v34, %v1765_v20  ;;  %v1461_v42 = vadd.f32 %v12516_v47, %v1460_v31  ;;  %3023 = vmatprep.subr.bf16.mxu1 %v12880_v39  ;;  %v2497_v52 = vpack.c.bf16 %v2443_v43, %v2442_v30 }
 0x1ae   : > { %v12894_v28 = vsel %vm2069_vm6, %v2246_v4, %v2248_v26  ;;  %v12896_v51 = vmax.f32 %v1441_v58, %v1764_v33  ;;  %v12898_v46 = vmax.f32 %v1446_v2, %v1766_v36  ;;  %v1769_v29 = vrot.slane %v1466_v37, 6  ;;  %v11477_v2 = vld [vmem:[%s18200_s5 + $0x28] sm:$0xff]   ;;  %v12918_v58 = vld [vmem:[%s18196_s1 + $0x34] ss:$8 sps:$4 sm:$0xff]  }
 0x1af   : > { %v2448_v49 = vmax.f32 %v12872_v27, %v12894_v28  ;;  %2912 = vmatmul.mubr.bf16.gmra.mrb[56].mxu1 %v12905_v45  ;;  %v1767_v57 = vrot.slane %v1461_v42, 6  ;;  %v2987_v41 = vrot.slane %v2497_v52, 4  ;;  %v10902_v59 = vpop.f32.mrb[98].mxu0  ;;  %v2445_v7 = vmax.f32 %v12825_v53, %v2243_v35  ;;  %5010 = vmatpush1.bf16.msra.mxu0 %v11477_v2 }
 0x1b0   : > { %v2250_v54 = vrot.slane %v12896_v51, 1  ;;  %v2252_v32 = vrot.slane %v12898_v46, 1  ;;  %v1476_v12 = vadd.f32 %v12516_v47, %v10902_v59  ;;  %v1470_v11 = vpop.f32.mrb[99].mxu0  ;;  %10399 = vmatprep.mubr.msk.bf16.mxu1 %vm2555_vm4, %v12918_v58  ;;  %v2245_v53 = vsel %vm2069_vm6, %v2242_v48, %v2244_v17  ;;  %5011 = vmatprep.subr.bf16.mxu0 %v12880_v39 }
 0x1b1   : > { %v1768_v9 = vsel %vm1578_vm5, %v1765_v20, %v1767_v57  ;;  %v1770_v25 = vsel %vm1578_vm5, %v1767_v57, %v1769_v29  ;;  %v2988_v14 = vsel %vm2695_vm7, %v2985_v60, %v2987_v41  ;;  %v1471_v40 = vadd.f32 %v12516_v47, %v1470_v11 }
 0x1b2   : > { %v2253_v13 = vsel %vm2069_vm6, %v2250_v54, %v2252_v32  ;;  %v1966_v0 = vmax.f32 %v1451_v55, %v1768_v9  ;;  %v1967_v16 = vmax.f32 %v1456_v61, %v1770_v25  ;;  %3024 = vmatpush1.bf16.msra.mxu1 %v2988_v14  ;;  %v1773_v18 = vrot.slane %v1476_v12, 6  ;;  %v11478_v14 = vld [vmem:[%s18200_s5 + $0x30] sm:$0xff]  }
 0x1b3   : > { %v2450_v22 = vmax.f32 %v12896_v51, %v2253_v13  ;;  %v1771_v48 = vrot.slane %v1471_v40, 6  ;;  %3025 = vmatprep.subr.bf16.mxu1 %v12880_v39  ;;  %v2498_v5 = vpack.c.bf16 %v2445_v7, %v2444_v38  ;;  %v2247_v60 = vsel %vm2069_vm6, %v2244_v17, %v2246_v4  ;;  %v12944_v17 = vld [vmem:[%s18196_s1 + $0x30] ss:$8 sps:$4 sm:$0xff]   ;;  %5012 = vmatpush1.bf16.msra.mxu0 %v11478_v14  ;;  %v11473_v13 = vld [vmem:[%s18200_s5 + $0x100] sm:$0xff]  }
 0x1b4   : > { %v2254_v47 = vrot.slane %v1966_v0, 1  ;;  %v2256_v19 = vrot.slane %v1967_v16, 1  ;;  %v1970_v23 = vmax.f32 %v1471_v40, %v1773_v18  ;;  %v2446_v55 = vmax.f32 %v12838_v62, %v2245_v53  ;;  %5013 = vmatprep.subr.bf16.mxu0 %v12880_v39  ;;  %v11733_v40 = vld [vmem:[%s18196_s1 + $0x4] ss:$8 sps:$4 sm:$0xff]  }
 0x1b5   : > { %v1772_v61 = vsel %vm1578_vm5, %v1769_v29, %v1771_v48  ;;  %v1774_v30 = vsel %vm1578_vm5, %v1771_v48, %v1773_v18  ;;  %v2989_v27 = vrot.slane %v2498_v5, 4  ;;  %v2447_v20 = vmax.f32 %v12840_v44, %v2247_v60  ;;  %v11479_v18 = vld [vmem:[%s18200_s5 + $0x38] sm:$0xff]  }
 0x1b6   : > { %v2257_v1 = vsel %vm2069_vm6, %v2254_v47, %v2256_v19  ;;  %v1968_v34 = vmax.f32 %v1461_v42, %v1772_v61  ;;  %v1969_v63 = vmax.f32 %v1466_v37, %v1774_v30  ;;  %v2262_v43 = vrot.slane %v1970_v23, 1  ;;  %v12954_v37 = vld [vmem:[%s18196_s1 + $0x44] ss:$8 sps:$4 sm:$0xff]  }
 0x1b7   : > { %v2452_v3 = vmax.f32 %v1966_v0, %v2257_v1  ;;  %2920 = vmatmul.mubr.bf16.gmra.mrb[60].mxu1 %v12944_v17  ;;  %v2990_v62 = vsel %vm2695_vm7, %v2987_v41, %v2989_v27  ;;  %v2499_v35 = vpack.c.bf16 %v2447_v20, %v2446_v55  ;;  %v2251_v44 = vsel %vm2069_vm6, %v2248_v26, %v2250_v54  ;;  %v3166_v30 = vld [vmem:[#allocation2] sm:$0x80] }
 0x1b8   : > { %v2258_v4 = vrot.slane %v1968_v34, 1  ;;  %v2260_v31 = vrot.slane %v1969_v63, 1  ;;  %3026 = vmatpush1.bf16.msra.mxu1 %v2990_v62  ;;  %10400 = vmatprep.mubr.msk.bf16.mxu1 %vm2555_vm4, %v12954_v37  ;;  %v2449_v38 = vmax.f32 %v12874_v8, %v2251_v44  ;;  %v2255_v33 = vsel %vm2069_vm6, %v2252_v32, %v2254_v47  ;;  %v13037_v47 = vld [vmem:[#allocation2] sm:$0xf8] }
 0x1b9   : > { %3027 = vmatprep.subr.bf16.mxu1 %v12880_v39  ;;  %v2991_v36 = vrot.slane %v2499_v35, 4  ;;  %v2451_v26 = vmax.f32 %v12898_v46, %v2255_v33  ;;  %5014 = vmatpush1.bf16.msra.mxu0 %v11479_v18 }
 0x1ba   : > { %v2261_v42 = vsel %vm2069_vm6, %v2258_v4, %v2260_v31  ;;  %v2263_v52 = vsel %vm2069_vm6, %v2260_v31, %v2262_v43  ;;  %v2500_v28 = vpack.c.bf16 %v2449_v38, %v2448_v49  ;;  %v2259_v51 = vsel %vm2069_vm6, %v2256_v19, %v2258_v4  ;;  %v11732_v49 = vld [vmem:[%s18196_s1 + $0x40] ss:$8 sps:$4 sm:$0xff]   ;;  %5015 = vmatprep.subr.bf16.mxu0 %v12880_v39 }
 0x1bb   : > { %v2454_v29 = vmax.f32 %v1968_v34, %v2261_v42  ;;  %v2455_v57 = vmax.f32 %v1969_v63, %v2263_v52  ;;  %v2992_v41 = vsel %vm2695_vm7, %v2989_v27, %v2991_v36  ;;  %v2501_v59 = vpack.c.bf16 %v2451_v26, %v2450_v22  ;;  %v11484_v27 = vld [vmem:[%s18200_s5 + $0x60] sm:$0xff]   ;;  %v11485_v52 = vld [vmem:[%s18200_s5 + $0x68] sm:$0xff]  }
 0x1bc   : > { %3028 = vmatpush1.bf16.msra.mxu1 %v2992_v41  ;;  %v2993_v8 = vrot.slane %v2500_v28, 4  ;;  %v2453_v7 = vmax.f32 %v1967_v16, %v2259_v51  ;;  %v11474_v16 = vld [vmem:[%s18200_s5 + $0x108] sm:$0xff]   ;;  %v3175_v63 = vshrl.u32 %v13037_v47, 16 }
 0x1bd   : > { %3029 = vmatprep.subr.bf16.mxu1 %v12880_v39  ;;  %v2995_v2 = vrot.slane %v2501_v59, 4  ;;  %v2503_v54 = vpack.c.bf16 %v2455_v57, %v2454_v29 }
 0x1be   : > { %v2994_v46 = vsel %vm2695_vm7, %v2991_v36, %v2993_v8  ;;  %v2502_v32 = vpack.c.bf16 %v2453_v7, %v2452_v3  ;;  %v3474_v3 = vshrl.u32 %v3166_v30, 16 }
 0x1bf   : > { %2928 = vmatmul.mubr.bf16.gmra.mrb[64].mxu1 %v11732_v49  ;;  %v2996_v12 = vsel %vm2695_vm7, %v2993_v8, %v2995_v2  ;;  %v2999_v11 = vrot.slane %v2503_v54, 4  ;;  %v11486_v54 = vld [vmem:[%s18200_s5 + $0x70] sm:$0xff]  }
 0x1c0   : > { %3030 = vmatpush1.bf16.msra.mxu1 %v2994_v46  ;;  %10401 = vmatprep.mubr.msk.bf16.mxu1 %vm2555_vm4, %v12263_v24  ;;  %v2997_v53 = vrot.slane %v2502_v32, 4 }
 0x1c1   : > { %3031 = vmatprep.subr.bf16.mxu1 %v12880_v39  ;;  %v3013_v0 = vand.u32 %v2999_v11, %v12246_v6  ;;  %v11475_v6 = vld [vmem:[%s18200_s5 + $0x110] sm:$0xff]  }
 0x1c2   : > { %v2998_v9 = vsel %vm2695_vm7, %v2995_v2, %v2997_v53  ;;  %v3000_v25 = vsel %vm2695_vm7, %v2997_v53, %v2999_v11 }
 0x1c4   : > { %3032 = vmatpush1.bf16.msra.mxu1 %v2996_v12 }
 0x1c5   : > { %3033 = vmatprep.subr.bf16.mxu1 %v12880_v39 }
 0x1c7   : > { %2936 = vmatmul.mubr.bf16.gmra.mrb[68].mxu1 %v12284_v56 }
 0x1c8   : > { %3034 = vmatpush1.bf16.msra.mxu1 %v2998_v9  ;;  %10402 = vmatprep.mubr.msk.bf16.mxu1 %vm2555_vm4, %v11733_v40 }
 0x1c9   : > { %3035 = vmatprep.subr.bf16.mxu1 %v12880_v39 }
 0x1cc   : > { %3036 = vmatpush1.bf16.msra.mxu1 %v3000_v25  ;;  %v11487_v25 = vld [vmem:[%s18200_s5 + $0x78] sm:$0xff]  }
 0x1cd   : > { %3037 = vmatprep.subr.bf16.mxu1 %v12880_v39 }
 0x1d0   : > { %3038 = vmatpush1.bf16.msra.mxu1 %v3013_v0 }
 0x1d1   : > { %10903 = vmatprep.subr.bf16.mxu1 %v11473_v13 }
 0x1d3   : > { %3048 = vmatmul.mubr.bf16.vlgmr.msra.gmra.mrb[72].mxu1 %v12803_v21  ;;  %v11476_v21 = vld [vmem:[%s18200_s5 + $0x118] sm:$0xff]  }
 0x1d4   : > { %10403 = vmatprep.mubr.msk.bf16.mxu1 %vm2555_vm4, %v12814_v10  ;;  %10904 = vmatpush3.bf16.msra.mxu1 %v11473_v13  ;;  %v11480_v10 = vld [vmem:[%s18200_s5 + $0x40] sm:$0xff]  }
 0x1d5   : > { %10905 = vmatprep.subr.bf16.mxu1 %v11474_v16  ;;  %5016 = vmatpush1.bf16.msra.mxu0 %v11480_v10 }
 0x1d6   : > { %5017 = vmatprep.subr.bf16.mxu0 %v12880_v39 }
 0x1d8   : > { %10906 = vmatpush3.bf16.msra.mxu1 %v11474_v16 }
 0x1d9   : > { %10907 = vmatprep.subr.bf16.mxu1 %v11475_v6 }
 0x1db   : > { %3056 = vmatmul.mubr.bf16.gmra.mrb[76].mxu1 %v12847_v15  ;;  %v11481_v15 = vld [vmem:[%s18200_s5 + $0x48] sm:$0xff]  }
 0x1dc   : > { %10404 = vmatprep.mubr.msk.bf16.mxu1 %vm2555_vm4, %v12862_v50  ;;  %10908 = vmatpush3.bf16.msra.mxu1 %v11475_v6  ;;  %v11482_v50 = vld [vmem:[%s18200_s5 + $0x50] sm:$0xff]  }
 0x1dd   : > { %10909 = vmatprep.subr.bf16.mxu1 %v11476_v21  ;;  %5018 = vmatpush1.bf16.msra.mxu0 %v11481_v15 }
 0x1de   : > { %5019 = vmatprep.subr.bf16.mxu0 %v12880_v39 }
 0x1e0   : > { %10910 = vmatpush3.bf16.msra.mxu1 %v11476_v21 }
 0x1e1   : > { %5020 = vmatpush1.bf16.msra.mxu0 %v11482_v50 }
 0x1e2   : > { %5021 = vmatprep.subr.bf16.mxu0 %v12880_v39 }
 0x1e3   : > { %3064 = vmatmul.mubr.bf16.gmra.mrb[80].mxu1 %v12905_v45  ;;  %v11483_v45 = vld [vmem:[%s18200_s5 + $0x58] sm:$0xff]  }
 0x1e4   : > { %10405 = vmatprep.mubr.msk.bf16.mxu1 %vm2555_vm4, %v12918_v58 }
 0x1e5   : > { %5022 = vmatpush1.bf16.msra.mxu0 %v11483_v45 }
 0x1e6   : > { %5023 = vmatprep.subr.bf16.mxu0 %v12880_v39 }
 0x1e9   : > { %5024 = vmatpush1.bf16.msra.mxu0 %v11484_v27 }
 0x1ea   : > { %5025 = vmatprep.subr.bf16.mxu0 %v12880_v39 }
 0x1eb   : > { %3072 = vmatmul.mubr.bf16.gmra.mrb[84].mxu1 %v12944_v17 }
 0x1ec   : > { %10406 = vmatprep.mubr.msk.bf16.mxu1 %vm2555_vm4, %v12954_v37  ;;  %v3476_v37 = vrot.slane %v3474_v3, 4 }
 0x1ed   : > { %5026 = vmatpush1.bf16.msra.mxu0 %v11485_v52 }
 0x1ee   : > { %5027 = vmatprep.subr.bf16.mxu0 %v12880_v39 }
 0x1f1   : > { %5028 = vmatpush1.bf16.msra.mxu0 %v11486_v54 }
 0x1f2   : > { %5029 = vmatprep.subr.bf16.mxu0 %v12880_v39 }
 0x1f3   : > { %3080 = vmatmul.mubr.bf16.gmra.mrb[88].mxu1 %v11732_v49 }
 0x1f4   : > { %10407 = vmatprep.mubr.msk.bf16.mxu1 %vm2555_vm4, %v12263_v24 }
 0x1f5   : > { %5030 = vmatpush1.bf16.msra.mxu0 %v11487_v25 }
 0x1f6   : > { %5208 = vmatprep.subr.bf16.mxu0 %v12880_v39 }
 0x1fb   : > { %3088 = vmatmul.mubr.bf16.gmra.mrb[92].mxu1 %v12284_v56  ;;  %v3177_v56 = vshll.u32 %v13037_v47, 16 }
 0x1fd   : > { %v3179_v43 = vrot.slane %v3177_v56, 1 }
 0x1ff   : > { %v3180_v4 = vor.u32 %v3179_v43, %v3175_v63 }
 0x208   : > { %v2613_v58 = vpop.f32.mrb[0].mxu1 }
 0x209   : > { %v2659_v22 = vmax.f32 %v2613_v58, 0.0  ;;  %v2615_v48 = vpop.f32.mrb[1].mxu1 }
 0x20a   : > { %v2616_v24 = vpop.f32.mrb[2].mxu1 }
 0x20b   : > { %v2660_v5 = vmax.f32 %v2616_v24, 0.0  ;;  %v2618_v60 = vpop.f32.mrb[3].mxu1 }
 0x20d   : > { %v2670_v19 = vpack.c.bf16 %v2660_v5, %v2659_v22 }
 0x20f   : > { %2676 = vst.msk [vmem:[#allocation2 + $0x8] sm:$0xff] %vm494_vm8, %v2670_v19 }
 0x210   : > { %v2621_v23 = vpop.f32.mrb[4].mxu1 }
 0x211   : > { %v2661_v55 = vmax.f32 %v2621_v23, 0.0  ;;  %v2623_v61 = vpop.f32.mrb[5].mxu1 }
 0x212   : > { %v2624_v20 = vpop.f32.mrb[6].mxu1 }
 0x213   : > { %v2662_v1 = vmax.f32 %v2624_v20, 0.0  ;;  %v2626_v34 = vpop.f32.mrb[7].mxu1 }
 0x215   : > { %v2671_v17 = vpack.c.bf16 %v2662_v1, %v2661_v55 }
 0x216   : > { %v13046_v62 = vld [vmem:[#allocation2 + $0x8] sm:$0xff] }
 0x217   : > { %2677 = vst.msk [vmem:[#allocation2 + $0x10] sm:$0xff] %vm494_vm8, %v2671_v17  ;;  %v3182_v35 = vshll.u32 %v13046_v62, 16  ;;  %v3186_v44 = vshrl.u32 %v13046_v62, 16  ;;  %v3169_v46 = vld [vmem:[#allocation2 + $0x8] sm:$0xf0] }
 0x218   : > { %v2629_v31 = vpop.f32.mrb[8].mxu1  ;;  %v3172_v9 = vld [vmem:[#allocation2 + $0x8] sm:$0xe0]  ;;  %v3802_v13 = vrot.slane %v3169_v46, 1 }
 0x219   : > { %v2663_v38 = vmax.f32 %v2629_v31, 0.0  ;;  %v2631_v33 = vpop.f32.mrb[9].mxu1  ;;  %v3477_v36 = vrot.slane %v3186_v44, 4  ;;  %v3478_v26 = vrot.slane %v3182_v35, 5  ;;  %v3184_v42 = vrot.slane %v3182_v35, 1 }
 0x21a   : > { %v2632_v28 = vpop.f32.mrb[10].mxu1  ;;  %v3662_v51 = vrot.slane %v3186_v44, 5  ;;  %v3663_v8 = vrot.slane %v3182_v35, 6  ;;  %v3959_v15 = vrot.slane %v3172_v9, 2 }
 0x21b   : > { %v2664_v29 = vmax.f32 %v2632_v28, 0.0  ;;  %v3479_v57 = vor.u32 %v3478_v26, %v3477_v36  ;;  %v2634_v41 = vpop.f32.mrb[11].mxu1  ;;  %v3185_v59 = vsel %vm3173_vm9, %v3180_v4, %v3184_v42  ;;  %v3188_v12 = vor.u32 %v3186_v44, %v3184_v42 }
 0x21c   : > { %3357 = vrot.lane.b32.xlu1 %v3185_v59, %s11853_s12  ;;  %v13064_v49 = vor.u32 %v3663_v8, %v3662_v51 }
 0x21d   : > { %v2672_v7 = vpack.c.bf16 %v2664_v29, %v2663_v38  ;;  %v3480_v2 = vsel %vm3472_vm10, %v3476_v37, %v3479_v57 }
 0x21e   : > { %3570 = vrot.lane.b32.xlu0 %v3480_v2, %s11853_s12  ;;  %v13062_v32 = vld [vmem:[#allocation2 + $0x10] sm:$0xff] }
 0x21f   : > { %2678 = vst.msk [vmem:[#allocation2 + $0x18] sm:$0xff] %vm494_vm8, %v2672_v7  ;;  %v3190_v11 = vshll.u32 %v13062_v32, 16  ;;  %v3194_v53 = vshrl.u32 %v13062_v32, 16  ;;  %v13073_v40 = vrot.slane %v13062_v32, 1  ;;  %v3960_v50 = vrot.slane %v13062_v32, 2 }
 0x220   : > { %v2637_v14 = vpop.f32.mrb[12].mxu1 }
 0x221   : > { %v2665_v0 = vmax.f32 %v2637_v14, 0.0  ;;  %v2639_v16 = vpop.f32.mrb[13].mxu1  ;;  %v3192_v18 = vrot.slane %v3190_v11, 1  ;;  %v3481_v6 = vrot.slane %v3194_v53, 4  ;;  %v3482_v21 = vrot.slane %v3190_v11, 5 }
 0x222   : > { %v2640_v10 = vpop.f32.mrb[14].mxu1  ;;  %v3817_v45 = vrot.slane %v3194_v53, 1  ;;  %v3818_v58 = vrot.slane %v3190_v11, 2  ;;  %v3665_v19 = vrot.slane %v3194_v53, 5  ;;  %v3666_v56 = vrot.slane %v3190_v11, 6 }
 0x223   : > { %v2666_v22 = vmax.f32 %v2640_v10, 0.0  ;;  %v3193_v48 = vsel %vm3173_vm9, %v3188_v12, %v3192_v18  ;;  %v3483_v24 = vor.u32 %v3482_v21, %v3481_v6  ;;  %v2642_v5 = vpop.f32.mrb[15].mxu1  ;;  %v13085_v61 = vsel %vm2069_vm6, %v3802_v13, %v13073_v40 }
 0x224   : > { %3359 = vrot.lane.b32.xlu1 %v3193_v48, %s11853_s12  ;;  %v13080_v60 = vor.u32 %v3818_v58, %v3817_v45  ;;  %18404 = vst [vmem:[#allocation4_spill] sm:$0xff] %v13085_v61  ;;  %v3961_v27 = vsel %vm3958_vm11, %v3959_v15, %v3960_v50  ;;  %v3667_v20 = vor.u32 %v3666_v56, %v3665_v19 }
 0x225   : > { %v2673_v23 = vpack.c.bf16 %v2666_v22, %v2665_v0  ;;  %v3484_v55 = vsel %vm3472_vm10, %v3479_v57, %v3483_v24  ;;  %v3196_v39 = vor.u32 %v3194_v53, %v3192_v18  ;;  %v4416_v38 = vrot.slane %v3961_v27, 3 }
 0x226   : > { %3572 = vrot.lane.b32.xlu0 %v3484_v55, %s11853_s12  ;;  %v13088_v30 = vld [vmem:[#allocation2 + $0x18] sm:$0xff]  ;;  %v13097_v3 = vsel %vm3661_vm12, %v13064_v49, %v3667_v20 }
 0x227   : > { %2679 = vst.msk [vmem:[#allocation2 + $0x20] sm:$0xff] %vm494_vm8, %v2673_v23  ;;  %v3198_v1 = vshll.u32 %v13088_v30, 16  ;;  %v3962_v34 = vrot.slane %v13088_v30, 2  ;;  %v3202_v63 = vshrl.u32 %v13088_v30, 16 }
 0x228   : > { %v2645_v43 = vpop.f32.mrb[16].mxu1 }
 0x229   : > { %v2667_v17 = vmax.f32 %v2645_v43, 0.0  ;;  %v2647_v35 = vpop.f32.mrb[17].mxu1  ;;  %v3200_v44 = vrot.slane %v3198_v1, 1  ;;  %v3963_v4 = vsel %vm3958_vm11, %v3960_v50, %v3962_v34  ;;  %v3485_v31 = vrot.slane %v3202_v63, 4 }
 0x22a   : > { %v2648_v37 = vpop.f32.mrb[18].mxu1  ;;  %v4417_v33 = vrot.slane %v3963_v4, 3  ;;  %v3486_v36 = vrot.slane %v3198_v1, 5  ;;  %v3821_v26 = vrot.slane %v3202_v63, 1  ;;  %v3822_v51 = vrot.slane %v3198_v1, 2 }
 0x22b   : > { %v2668_v42 = vmax.f32 %v2648_v37, 0.0  ;;  %v3201_v52 = vsel %vm3173_vm9, %v3196_v39, %v3200_v44  ;;  %v2650_v28 = vpop.f32.mrb[19].mxu1  ;;  %v3669_v41 = vrot.slane %v3202_v63, 5  ;;  %v3670_v59 = vrot.slane %v3198_v1, 6 }
 0x22c   : > { %3361 = vrot.lane.b32.xlu1 %v3201_v52, %s11853_s12  ;;  %v4418_v29 = vsel %vm4403_vm13, %v4416_v38, %v4417_v33  ;;  %v3487_v57 = vor.u32 %v3486_v36, %v3485_v31  ;;  %v3823_v7 = vor.u32 %v3822_v51, %v3821_v26  ;;  %v3204_v12 = vor.u32 %v3202_v63, %v3200_v44 }
 0x22d   : > { %v2674_v8 = vpack.c.bf16 %v2668_v42, %v2667_v17  ;;  %10911 = vmatprep.mubr.msk.bf16.mxu1 %vm494_vm8, %v4418_v29  ;;  %v3671_v46 = vor.u32 %v3670_v59, %v3669_v41 }
 0x22e   : > { %v3488_v2 = vsel %vm3472_vm10, %v3483_v24, %v3487_v57  ;;  %v13105_v54 = vld [vmem:[#allocation2 + $0x20] sm:$0xff]  ;;  %v13114_v14 = vsel %vm3808_vm14, %v13080_v60, %v3823_v7 }
 0x22f   : > { %2680 = vst.msk [vmem:[#allocation2 + $0x28] sm:$0xff] %vm494_vm8, %v2674_v8  ;;  %3574 = vrot.lane.b32.xlu0 %v3488_v2, %s11853_s12  ;;  %v3206_v11 = vshll.u32 %v13105_v54, 16  ;;  %v3964_v53 = vrot.slane %v13105_v54, 2  ;;  %v3210_v9 = vshrl.u32 %v13105_v54, 16  ;;  %v13117_v13 = vsel %vm3661_vm12, %v3667_v20, %v3671_v46 }
 0x230   : > { %v2653_v25 = vpop.f32.mrb[20].mxu1 }
 0x231   : > { %v3208_v0 = vrot.slane %v3206_v11, 1  ;;  %v3965_v16 = vsel %vm3958_vm11, %v3962_v34, %v3964_v53  ;;  %v3489_v18 = vrot.slane %v3210_v9, 4  ;;  %v3490_v6 = vrot.slane %v3206_v11, 5  ;;  %v2655_v21 = vpop.f32.mrb[21].mxu1 }
 0x232   : > { %v4427_v10 = vrot.slane %v3965_v16, 3  ;;  %v2669_v15 = vmax.f32 %v2653_v25, 0.0  ;;  %v2656_v50 = vpop.f32.mrb[22].mxu1  ;;  %v3825_v45 = vrot.slane %v3210_v9, 1  ;;  %v3826_v24 = vrot.slane %v3206_v11, 2 }
 0x233   : > { %v3209_v58 = vsel %vm3173_vm9, %v3204_v12, %v3208_v0  ;;  %v3491_v22 = vor.u32 %v3490_v6, %v3489_v18  ;;  %v2657_v48 = vpop.f32.mrb[23].mxu1  ;;  %v3673_v56 = vrot.slane %v3210_v9, 5  ;;  %v3674_v23 = vrot.slane %v3206_v11, 6 }
 0x234   : > { %3363 = vrot.lane.b32.xlu1 %v3209_v58, %s11853_s12  ;;  %v4428_v5 = vsel %vm4403_vm13, %v4417_v33, %v4427_v10  ;;  %v2675_v19 = vpack.c.bf16 %v2669_v15, %v2669_v15  ;;  %v3827_v27 = vor.u32 %v3826_v24, %v3825_v45  ;;  %v3212_v1 = vor.u32 %v3210_v9, %v3208_v0 }
 0x235   : > { %10912 = vmatmul.mubr.msk.bf16.vlgmr.msra.gmra.mrb[96].mxu1 %vm494_vm8, %v4428_v5  ;;  %v3492_v55 = vsel %vm3472_vm10, %v3487_v57, %v3491_v22  ;;  %v3675_v39 = vor.u32 %v3674_v23, %v3673_v56 }
 0x236   : > { %3576 = vrot.lane.b32.xlu0 %v3492_v55, %s11853_s12  ;;  %2682 = vst.msk [vmem:[#allocation2 + $0x30] sm:$0xf] %vm2681_vm15, %v2675_v19  ;;  %v13127_v20 = vld [vmem:[#allocation2 + $0x28] sm:$0xff]  ;;  %v13133_v17 = vsel %vm3808_vm14, %v3823_v7, %v3827_v27 }
 0x237   : > { %v3214_v34 = vshll.u32 %v13127_v20, 16  ;;  %v3966_v63 = vrot.slane %v13127_v20, 2  ;;  %v3218_v43 = vshrl.u32 %v13127_v20, 16  ;;  %v13136_v35 = vsel %vm3661_vm12, %v3671_v46, %v3675_v39 }
 0x239   : > { %v3216_v44 = vrot.slane %v3214_v34, 1  ;;  %v3967_v4 = vsel %vm3958_vm11, %v3964_v53, %v3966_v63  ;;  %v3493_v31 = vrot.slane %v3218_v43, 4  ;;  %v3494_v37 = vrot.slane %v3214_v34, 5 }
 0x23a   : > { %v4437_v38 = vrot.slane %v3967_v4, 3  ;;  %v3829_v33 = vrot.slane %v3218_v43, 1  ;;  %v3830_v36 = vrot.slane %v3214_v34, 2  ;;  %v3677_v52 = vrot.slane %v3218_v43, 5 }
 0x23b   : > { %v3217_v26 = vsel %vm3173_vm9, %v3212_v1, %v3216_v44  ;;  %v3495_v42 = vor.u32 %v3494_v37, %v3493_v31  ;;  %v3678_v29 = vrot.slane %v3214_v34, 6  ;;  %v3220_v23 = vor.u32 %v3218_v43, %v3216_v44 }
 0x23c   : > { %3365 = vrot.lane.b32.xlu1 %v3217_v26, %s11853_s12  ;;  %v4438_v28 = vsel %vm4403_vm13, %v4427_v10, %v4437_v38  ;;  %v13142_v51 = vor.u32 %v3830_v36, %v3829_v33 }
 0x23d   : > { %10915 = vmatprep.mubr.msk.bf16.mxu1 %vm494_vm8, %v4438_v28  ;;  %v3496_v57 = vsel %vm3472_vm10, %v3491_v22, %v3495_v42  ;;  %v13151_v59 = vor.u32 %v3678_v29, %v3677_v52 }
 0x23e   : > { %3578 = vrot.lane.b32.xlu0 %v3496_v57, %s11853_s12  ;;  %v13149_v41 = vsel %vm3808_vm14, %v3827_v27, %v13142_v51 }
 0x23f   : > { %v13155_v8 = vsel %vm3661_vm12, %v3675_v39, %v13151_v59 }
 0x242   : > { %v2767_v7 = vpop.f32.mrb[24].mxu1 }
 0x243   : > { %v2813_v2 = vmax.f32 %v2767_v7, 0.0  ;;  %v2769_v46 = vpop.f32.mrb[25].mxu1 }
 0x244   : > { %v2770_v12 = vpop.f32.mrb[26].mxu1 }
 0x245   : > { %v2814_v11 = vmax.f32 %v2770_v12, 0.0  ;;  %v2772_v53 = vpop.f32.mrb[27].mxu1 }
 0x247   : > { %v2824_v9 = vpack.c.bf16 %v2814_v11, %v2813_v2 }
 0x249   : > { %v2836_v25 = vrot.slane %v2824_v9, 4 }
 0x24a   : > { %v2775_v0 = vpop.f32.mrb[28].mxu1 }
 0x24b   : > { %2854 = vst.msk [vmem:[#allocation2 + $0x30] sm:$0xf0] %vm2853_vm1, %v2836_v25  ;;  %v2815_v16 = vmax.f32 %v2775_v0, 0.0  ;;  %v2777_v18 = vpop.f32.mrb[29].mxu1 }
 0x24c   : > { %v2778_v6 = vpop.f32.mrb[30].mxu1 }
 0x24d   : > { %v2816_v21 = vmax.f32 %v2778_v6, 0.0  ;;  %v2780_v10 = vpop.f32.mrb[31].mxu1 }
 0x24f   : > { %v2825_v15 = vpack.c.bf16 %v2816_v21, %v2815_v16 }
 0x251   : > { %v2837_v50 = vrot.slane %v2825_v15, 4 }
 0x252   : > { %v2783_v45 = vpop.f32.mrb[32].mxu1  ;;  %v13158_v58 = vld [vmem:[#allocation2 + $0x30] sm:$0xff] }
 0x253   : > { %v2838_v22 = vsel %vm2695_vm7, %v2836_v25, %v2837_v50  ;;  %v2817_v48 = vmax.f32 %v2783_v45, 0.0  ;;  %v2785_v24 = vpop.f32.mrb[33].mxu1  ;;  %v3222_v5 = vshll.u32 %v13158_v58, 16  ;;  %v3968_v19 = vrot.slane %v13158_v58, 2 }
 0x254   : > { %2855 = vst.msk [vmem:[#allocation2 + $0x38] sm:$0xff] %vm494_vm8, %v2838_v22  ;;  %v2786_v56 = vpop.f32.mrb[34].mxu1  ;;  %v3226_v55 = vshrl.u32 %v13158_v58, 16 }
 0x255   : > { %v2818_v27 = vmax.f32 %v2786_v56, 0.0  ;;  %v2788_v39 = vpop.f32.mrb[35].mxu1  ;;  %v3224_v1 = vrot.slane %v3222_v5, 1  ;;  %v3969_v34 = vsel %vm3958_vm11, %v3966_v63, %v3968_v19  ;;  %v3498_v4 = vrot.slane %v3222_v5, 5 }
 0x256   : > { %v4447_v31 = vrot.slane %v3969_v34, 3  ;;  %v3497_v37 = vrot.slane %v3226_v55, 4  ;;  %v3833_v33 = vrot.slane %v3226_v55, 1  ;;  %v3834_v52 = vrot.slane %v3222_v5, 2 }
 0x257   : > { %v2826_v36 = vpack.c.bf16 %v2818_v27, %v2817_v48  ;;  %v3225_v26 = vsel %vm3173_vm9, %v3220_v23, %v3224_v1  ;;  %v3681_v44 = vrot.slane %v3226_v55, 5  ;;  %v3682_v29 = vrot.slane %v3222_v5, 6 }
 0x258   : > { %3367 = vrot.lane.b32.xlu1 %v3225_v26, %s11853_s12  ;;  %v4448_v28 = vsel %vm4403_vm13, %v4437_v38, %v4447_v31  ;;  %v3499_v43 = vor.u32 %v3498_v4, %v3497_v37  ;;  %v3835_v7 = vor.u32 %v3834_v52, %v3833_v33  ;;  %v3228_v21 = vor.u32 %v3226_v55, %v3224_v1 }
 0x259   : > { %v2839_v57 = vrot.slane %v2826_v36, 4  ;;  %10916 = vmatmul.mubr.msk.bf16.gmra.mrb[100].mxu1 %vm494_vm8, %v4448_v28  ;;  %v3683_v46 = vor.u32 %v3682_v29, %v3681_v44 }
 0x25a   : > { %v3500_v63 = vsel %vm3472_vm10, %v3495_v42, %v3499_v43  ;;  %v2791_v2 = vpop.f32.mrb[36].mxu1  ;;  %v13177_v38 = vsel %vm3808_vm14, %v13142_v51, %v3835_v7 }
 0x25b   : > { %v2840_v12 = vsel %vm2695_vm7, %v2837_v50, %v2839_v57  ;;  %3580 = vrot.lane.b32.xlu0 %v3500_v63, %s11853_s12  ;;  %v2819_v11 = vmax.f32 %v2791_v2, 0.0  ;;  %v2793_v53 = vpop.f32.mrb[37].mxu1  ;;  %v13173_v9 = vld [vmem:[#allocation2 + $0x38] sm:$0xff]  ;;  %v13185_v10 = vsel %vm3661_vm12, %v13151_v59, %v3683_v46 }
 0x25c   : > { %2856 = vst.msk [vmem:[#allocation2 + $0x40] sm:$0xff] %vm494_vm8, %v2840_v12  ;;  %v2794_v25 = vpop.f32.mrb[38].mxu1  ;;  %v3230_v0 = vshll.u32 %v13173_v9, 16  ;;  %v3970_v42 = vrot.slane %v13173_v9, 2  ;;  %v3234_v16 = vshrl.u32 %v13173_v9, 16 }
 0x25d   : > { %v2820_v18 = vmax.f32 %v2794_v25, 0.0  ;;  %v2796_v6 = vpop.f32.mrb[39].mxu1 }
 0x25e   : > { %v3232_v15 = vrot.slane %v3230_v0, 1  ;;  %v3971_v51 = vsel %vm3958_vm11, %v3968_v19, %v3970_v42  ;;  %v3501_v50 = vrot.slane %v3234_v16, 4  ;;  %v3502_v45 = vrot.slane %v3230_v0, 5 }
 0x25f   : > { %v2827_v22 = vpack.c.bf16 %v2820_v18, %v2819_v11  ;;  %v4457_v48 = vrot.slane %v3971_v51, 3  ;;  %v3837_v24 = vrot.slane %v3234_v16, 1  ;;  %v3838_v23 = vrot.slane %v3230_v0, 2 }
 0x260   : > { %v3233_v5 = vsel %vm3173_vm9, %v3228_v21, %v3232_v15  ;;  %v3503_v56 = vor.u32 %v3502_v45, %v3501_v50  ;;  %v3685_v39 = vrot.slane %v3234_v16, 5  ;;  %v3686_v34 = vrot.slane %v3230_v0, 6 }
 0x261   : > { %v2841_v27 = vrot.slane %v2827_v22, 4  ;;  %3369 = vrot.lane.b32.xlu1 %v3233_v5, %s11853_s12  ;;  %v4458_v55 = vsel %vm4403_vm13, %v4447_v31, %v4457_v48  ;;  %v3839_v1 = vor.u32 %v3838_v23, %v3837_v24  ;;  %v3236_v29 = vor.u32 %v3234_v16, %v3232_v15 }
 0x262   : > { %v2799_v59 = vpop.f32.mrb[40].mxu1  ;;  %10919 = vmatprep.mubr.msk.bf16.mxu1 %vm494_vm8, %v4458_v55  ;;  %v3504_v19 = vsel %vm3472_vm10, %v3499_v43, %v3503_v56  ;;  %v3687_v63 = vor.u32 %v3686_v34, %v3685_v39 }
 0x263   : > { %v2842_v4 = vsel %vm2695_vm7, %v2839_v57, %v2841_v27  ;;  %v2821_v37 = vmax.f32 %v2799_v59, 0.0  ;;  %3582 = vrot.lane.b32.xlu0 %v3504_v19, %s11853_s12  ;;  %v2801_v33 = vpop.f32.mrb[41].mxu1  ;;  %v13195_v36 = vld [vmem:[#allocation2 + $0x40] sm:$0xff]  ;;  %v13202_v57 = vsel %vm3808_vm14, %v3835_v7, %v3839_v1 }
 0x264   : > { %2857 = vst.msk [vmem:[#allocation2 + $0x48] sm:$0xff] %vm494_vm8, %v2842_v4  ;;  %v2802_v26 = vpop.f32.mrb[42].mxu1  ;;  %v3238_v31 = vshll.u32 %v13195_v36, 16  ;;  %v3972_v52 = vrot.slane %v13195_v36, 2  ;;  %v3242_v28 = vshrl.u32 %v13195_v36, 16  ;;  %v13206_v18 = vsel %vm3661_vm12, %v3683_v46, %v3687_v63 }
 0x265   : > { %v2822_v43 = vmax.f32 %v2802_v26, 0.0  ;;  %v2804_v44 = vpop.f32.mrb[43].mxu1 }
 0x266   : > { %v3240_v2 = vrot.slane %v3238_v31, 1  ;;  %v3973_v12 = vsel %vm3958_vm11, %v3970_v42, %v3972_v52  ;;  %v3505_v11 = vrot.slane %v3242_v28, 4  ;;  %v3506_v53 = vrot.slane %v3238_v31, 5 }
 0x267   : > { %v2828_v25 = vpack.c.bf16 %v2822_v43, %v2821_v37  ;;  %v4467_v0 = vrot.slane %v3973_v12, 3  ;;  %v3841_v51 = vrot.slane %v3242_v28, 1  ;;  %v3842_v16 = vrot.slane %v3238_v31, 2 }
 0x268   : > { %v3241_v6 = vsel %vm3173_vm9, %v3236_v29, %v3240_v2  ;;  %v3507_v21 = vor.u32 %v3506_v53, %v3505_v11  ;;  %v3689_v15 = vrot.slane %v3242_v28, 5  ;;  %v3690_v22 = vrot.slane %v3238_v31, 6 }
 0x269   : > { %v2843_v50 = vrot.slane %v2828_v25, 4  ;;  %3371 = vrot.lane.b32.xlu1 %v3241_v6, %s11853_s12  ;;  %v4468_v7 = vsel %vm4403_vm13, %v4457_v48, %v4467_v0  ;;  %v3843_v55 = vor.u32 %v3842_v16, %v3841_v51  ;;  %v3244_v37 = vor.u32 %v3242_v28, %v3240_v2 }
 0x26a   : > { %v2807_v45 = vpop.f32.mrb[44].mxu1  ;;  %10920 = vmatmul.mubr.msk.bf16.gmra.mrb[104].mxu1 %vm494_vm8, %v4468_v7  ;;  %v3508_v42 = vsel %vm3472_vm10, %v3503_v56, %v3507_v21  ;;  %v3691_v33 = vor.u32 %v3690_v22, %v3689_v15 }
 0x26b   : > { %v2844_v46 = vsel %vm2695_vm7, %v2841_v27, %v2843_v50  ;;  %v2823_v24 = vmax.f32 %v2807_v45, 0.0  ;;  %3584 = vrot.lane.b32.xlu0 %v3508_v42, %s11853_s12  ;;  %v2809_v5 = vpop.f32.mrb[45].mxu1  ;;  %v3150_v23 = vld [vmem:[#allocation2 + $0x48] sm:$0xff]  ;;  %v13217_v56 = vsel %vm3808_vm14, %v3839_v1, %v3843_v55 }
 0x26c   : > { %2858 = vst.msk [vmem:[#allocation2 + $0x50] sm:$0xff] %vm494_vm8, %v2844_v46  ;;  %v2810_v39 = vpop.f32.mrb[46].mxu1  ;;  %v3246_v48 = vshll.u32 %v3150_v23, 16  ;;  %v3974_v59 = vrot.slane %v3150_v23, 2  ;;  %v3250_v19 = vshrl.u32 %v3150_v23, 16  ;;  %v13221_v12 = vsel %vm3661_vm12, %v3687_v63, %v3691_v33 }
 0x26d   : > { %v2829_v34 = vpack.c.bf16 %v2823_v24, %v2823_v24  ;;  %v2811_v4 = vpop.f32.mrb[47].mxu1 }
 0x26e   : > { %v3248_v27 = vrot.slane %v3246_v48, 1  ;;  %v3975_v26 = vsel %vm3958_vm11, %v3972_v52, %v3974_v59  ;;  %v3509_v31 = vrot.slane %v3250_v19, 4  ;;  %v3510_v43 = vrot.slane %v3246_v48, 5 }
 0x26f   : > { %v2845_v44 = vrot.slane %v2829_v34, 4  ;;  %v4477_v29 = vrot.slane %v3975_v26, 3  ;;  %v3845_v25 = vrot.slane %v3250_v19, 1  ;;  %v3846_v2 = vrot.slane %v3246_v48, 2 }
 0x270   : > { %v3249_v11 = vsel %vm3173_vm9, %v3244_v37, %v3248_v27  ;;  %v3511_v53 = vor.u32 %v3510_v43, %v3509_v31  ;;  %v3693_v6 = vrot.slane %v3250_v19, 5  ;;  %v3694_v51 = vrot.slane %v3246_v48, 6 }
 0x271   : > { %v2846_v28 = vsel %vm2695_vm7, %v2843_v50, %v2845_v44  ;;  %3373 = vrot.lane.b32.xlu1 %v3249_v11, %s11853_s12  ;;  %v4478_v1 = vsel %vm4403_vm13, %v4467_v0, %v4477_v29  ;;  %v3847_v50 = vor.u32 %v3846_v2, %v3845_v25  ;;  %v3252_v5 = vor.u32 %v3250_v19, %v3248_v27 }
 0x272   : > { %2859 = vst.msk [vmem:[#allocation2 + $0x58] sm:$0xff] %vm494_vm8, %v2846_v28  ;;  %v2897_v52 = vpop.f32.mrb[48].mxu1  ;;  %10923 = vmatprep.mubr.msk.bf16.mxu1 %vm494_vm8, %v4478_v1  ;;  %v3512_v63 = vsel %vm3472_vm10, %v3507_v21, %v3511_v53  ;;  %v3695_v39 = vor.u32 %v3694_v51, %v3693_v6 }
 0x273   : > { %v2943_v7 = vmax.f32 %v2897_v52, 0.0  ;;  %3586 = vrot.lane.b32.xlu0 %v3512_v63, %s11853_s12  ;;  %v2899_v16 = vpop.f32.mrb[49].mxu1  ;;  %v3151_v15 = vld [vmem:[#allocation2 + $0x50] sm:$0xff]  ;;  %v13232_v23 = vsel %vm3808_vm14, %v3843_v55, %v3847_v50 }
 0x274   : > { %v2900_v45 = vpop.f32.mrb[50].mxu1  ;;  %v3254_v42 = vshll.u32 %v3151_v15, 16  ;;  %v3976_v22 = vrot.slane %v3151_v15, 2  ;;  %v3258_v0 = vshrl.u32 %v3151_v15, 16  ;;  %v13236_v31 = vsel %vm3661_vm12, %v3691_v33, %v3695_v39 }
 0x275   : > { %v2944_v46 = vmax.f32 %v2900_v45, 0.0  ;;  %v2902_v24 = vpop.f32.mrb[51].mxu1 }
 0x276   : > { %v3256_v34 = vrot.slane %v3254_v42, 1  ;;  %v3977_v21 = vsel %vm3958_vm11, %v3974_v59, %v3976_v22  ;;  %v3513_v48 = vrot.slane %v3258_v0, 4  ;;  %v3514_v4 = vrot.slane %v3254_v42, 5 }
 0x277   : > { %v2954_v37 = vpack.c.bf16 %v2944_v46, %v2943_v7  ;;  %v4487_v26 = vrot.slane %v3977_v21, 3  ;;  %v3849_v11 = vrot.slane %v3258_v0, 1  ;;  %v3850_v27 = vrot.slane %v3254_v42, 2 }
 0x278   : > { %v3257_v43 = vsel %vm3173_vm9, %v3252_v5, %v3256_v34  ;;  %v3515_v44 = vor.u32 %v3514_v4, %v3513_v48  ;;  %v3697_v59 = vrot.slane %v3258_v0, 5  ;;  %v3698_v25 = vrot.slane %v3254_v42, 6 }
 0x279   : > { %2960 = vst.msk [vmem:[#allocation2 + $0x60] sm:$0xff] %vm494_vm8, %v2954_v37  ;;  %3375 = vrot.lane.b32.xlu1 %v3257_v43, %s11853_s12  ;;  %v4488_v55 = vsel %vm4403_vm13, %v4477_v29, %v4487_v26  ;;  %v3152_v19 = vld [vmem:[#allocation2 + $0x58] sm:$0xff]  ;;  %v3260_v51 = vor.u32 %v3258_v0, %v3256_v34  ;;  %v3851_v7 = vor.u32 %v3850_v27, %v3849_v11 }
 0x27a   : > { %v2905_v28 = vpop.f32.mrb[52].mxu1  ;;  %10924 = vmatmul.mubr.msk.bf16.gmra.mrb[108].mxu1 %vm494_vm8, %v4488_v55  ;;  %v3516_v33 = vsel %vm3472_vm10, %v3511_v53, %v3515_v44  ;;  %v3262_v1 = vshll.u32 %v3152_v19, 16  ;;  %v3978_v2 = vrot.slane %v3152_v19, 2  ;;  %v3266_v6 = vshrl.u32 %v3152_v19, 16 }
 0x27b   : > { %v2945_v52 = vmax.f32 %v2905_v28, 0.0  ;;  %3588 = vrot.lane.b32.xlu0 %v3516_v33, %s11853_s12  ;;  %v2907_v63 = vpop.f32.mrb[53].mxu1  ;;  %v3699_v16 = vor.u32 %v3698_v25, %v3697_v59  ;;  %v13247_v53 = vsel %vm3808_vm14, %v3847_v50, %v3851_v7 }
 0x27c   : > { %v2908_v29 = vpop.f32.mrb[54].mxu1  ;;  %v3264_v15 = vrot.slane %v3262_v1, 1  ;;  %v3979_v45 = vsel %vm3958_vm11, %v3976_v22, %v3978_v2  ;;  %v3517_v42 = vrot.slane %v3266_v6, 4  ;;  %v3518_v46 = vrot.slane %v3262_v1, 5 }
 0x27d   : > { %v2946_v24 = vmax.f32 %v2908_v29, 0.0  ;;  %v2910_v5 = vpop.f32.mrb[55].mxu1  ;;  %v4497_v21 = vrot.slane %v3979_v45, 3  ;;  %v13251_v37 = vsel %vm3661_vm12, %v3695_v39, %v3699_v16  ;;  %v3853_v22 = vrot.slane %v3266_v6, 1 }
 0x27e   : > { %v3265_v48 = vsel %vm3173_vm9, %v3260_v51, %v3264_v15  ;;  %v3519_v4 = vor.u32 %v3518_v46, %v3517_v42  ;;  %v3854_v43 = vrot.slane %v3262_v1, 2  ;;  %v3701_v50 = vrot.slane %v3266_v6, 5 }
 0x27f   : > { %v2955_v0 = vpack.c.bf16 %v2946_v24, %v2945_v52  ;;  %3377 = vrot.lane.b32.xlu1 %v3265_v48, %s11853_s12  ;;  %v4498_v34 = vsel %vm4403_vm13, %v4487_v26, %v4497_v21  ;;  %v3702_v19 = vrot.slane %v3262_v1, 6  ;;  %v3268_v28 = vor.u32 %v3266_v6, %v3264_v15 }
 0x280   : > { %10927 = vmatprep.mubr.msk.bf16.mxu1 %vm494_vm8, %v4498_v34  ;;  %v3520_v11 = vsel %vm3472_vm10, %v3515_v44, %v3519_v4  ;;  %v3153_v55 = vld [vmem:[#allocation2 + $0x60] sm:$0xff]  ;;  %v3855_v33 = vor.u32 %v3854_v43, %v3853_v22 }
 0x281   : > { %2961 = vst.msk [vmem:[#allocation2 + $0x68] sm:$0xff] %vm494_vm8, %v2955_v0  ;;  %3590 = vrot.lane.b32.xlu0 %v3520_v11, %s11853_s12  ;;  %v3270_v39 = vshll.u32 %v3153_v55, 16  ;;  %v3980_v27 = vrot.slane %v3153_v55, 2  ;;  %v3274_v59 = vshrl.u32 %v3153_v55, 16  ;;  %v3703_v26 = vor.u32 %v3702_v19, %v3701_v50 }
 0x282   : > { %v2913_v25 = vpop.f32.mrb[56].mxu1  ;;  %v13261_v46 = vsel %vm3808_vm14, %v3851_v7, %v3855_v33 }
 0x283   : > { %v2947_v52 = vmax.f32 %v2913_v25, 0.0  ;;  %v2915_v63 = vpop.f32.mrb[57].mxu1  ;;  %v3272_v51 = vrot.slane %v3270_v39, 1  ;;  %v3981_v29 = vsel %vm3958_vm11, %v3978_v2, %v3980_v27  ;;  %v3521_v44 = vrot.slane %v3274_v59, 4 }
 0x284   : > { %v2916_v45 = vpop.f32.mrb[58].mxu1  ;;  %v4507_v42 = vrot.slane %v3981_v29, 3  ;;  %v3522_v1 = vrot.slane %v3270_v39, 5  ;;  %v13265_v6 = vsel %vm3661_vm12, %v3699_v16, %v3703_v26  ;;  %v3857_v2 = vrot.slane %v3274_v59, 1 }
 0x285   : > { %v2948_v24 = vmax.f32 %v2916_v45, 0.0  ;;  %v3273_v5 = vsel %vm3173_vm9, %v3268_v28, %v3272_v51  ;;  %v2918_v48 = vpop.f32.mrb[59].mxu1  ;;  %v3858_v34 = vrot.slane %v3270_v39, 2  ;;  %v3705_v43 = vrot.slane %v3274_v59, 5 }
 0x286   : > { %3379 = vrot.lane.b32.xlu1 %v3273_v5, %s11853_s12  ;;  %v4508_v15 = vsel %vm4403_vm13, %v4497_v21, %v4507_v42  ;;  %v3523_v0 = vor.u32 %v3522_v1, %v3521_v44  ;;  %v3706_v7 = vrot.slane %v3270_v39, 6  ;;  %v3276_v28 = vor.u32 %v3274_v59, %v3272_v51  ;;  %v3165_v51 = vld [vmem:[#allocation2] sm:$0xf0] }
 0x287   : > { %v2956_v22 = vpack.c.bf16 %v2948_v24, %v2947_v52  ;;  %10928 = vmatmul.mubr.msk.bf16.gmra.mrb[112].mxu1 %vm494_vm8, %v4508_v15  ;;  %v3859_v50 = vor.u32 %v3858_v34, %v3857_v2 }
 0x288   : > { %v3524_v11 = vsel %vm3472_vm10, %v3519_v4, %v3523_v0  ;;  %v3154_v55 = vld [vmem:[#allocation2 + $0x68] sm:$0xff]  ;;  %v3707_v52 = vor.u32 %v3706_v7, %v3705_v43 }
 0x289   : > { %2962 = vst.msk [vmem:[#allocation2 + $0x70] sm:$0xff] %vm494_vm8, %v2956_v22  ;;  %3592 = vrot.lane.b32.xlu0 %v3524_v11, %s11853_s12  ;;  %v3278_v16 = vshll.u32 %v3154_v55, 16  ;;  %v3982_v19 = vrot.slane %v3154_v55, 2  ;;  %v3282_v25 = vshrl.u32 %v3154_v55, 16  ;;  %v13274_v63 = vsel %vm3808_vm14, %v3855_v33, %v3859_v50 }
 0x28a   : > { %v2921_v21 = vpop.f32.mrb[60].mxu1  ;;  %v13278_v48 = vsel %vm3661_vm12, %v3703_v26, %v3707_v52  ;;  %v3427_v55 = vrot.slane %v3165_v51, 1 }
 0x28b   : > { %v2949_v29 = vmax.f32 %v2921_v21, 0.0  ;;  %v2923_v44 = vpop.f32.mrb[61].mxu1  ;;  %v3280_v39 = vrot.slane %v3278_v16, 1  ;;  %v3983_v4 = vsel %vm3958_vm11, %v3980_v27, %v3982_v19  ;;  %v3525_v45 = vrot.slane %v3282_v25, 4 }
 0x28c   : > { %v2924_v1 = vpop.f32.mrb[62].mxu1  ;;  %v4517_v24 = vrot.slane %v3983_v4, 3  ;;  %v3526_v5 = vrot.slane %v3278_v16, 5  ;;  %v3861_v33 = vrot.slane %v3282_v25, 1  ;;  %v3862_v43 = vrot.slane %v3278_v16, 2 }
 0x28d   : > { %v2950_v15 = vmax.f32 %v2924_v1, 0.0  ;;  %v3281_v2 = vsel %vm3173_vm9, %v3276_v28, %v3280_v39  ;;  %v2926_v59 = vpop.f32.mrb[63].mxu1  ;;  %v3709_v27 = vrot.slane %v3282_v25, 5  ;;  %v3710_v11 = vrot.slane %v3278_v16, 6 }
 0x28e   : > { %3381 = vrot.lane.b32.xlu1 %v3281_v2, %s11853_s12  ;;  %v4518_v34 = vsel %vm4403_vm13, %v4507_v42, %v4517_v24  ;;  %v3527_v22 = vor.u32 %v3526_v5, %v3525_v45  ;;  %v3428_v21 = vrot.slane %v13046_v62, 1  ;;  %v3358_v44 = vpop.permute.xlu1 %3357  ;;  %v3863_v4 = vor.u32 %v3862_v43, %v3861_v33 }
 0x28f   : > { %v2957_v7 = vpack.c.bf16 %v2950_v15, %v2949_v29  ;;  %10931 = vmatprep.mubr.msk.bf16.mxu1 %vm494_vm8, %v4518_v34  ;;  %v3284_v5 = vor.u32 %v3282_v25, %v3280_v39  ;;  %v13299_v15 = vor.u32 %v3710_v11, %v3709_v27 }
 0x290   : > { %v3528_v26 = vsel %vm3472_vm10, %v3523_v0, %v3527_v22  ;;  %v3155_v28 = vld [vmem:[#allocation2 + $0x70] sm:$0xff]  ;;  %v13294_v0 = vsel %vm494_vm8, %v13037_v47, %v3358_v44  ;;  %v13297_v16 = vsel %vm3808_vm14, %v3859_v50, %v3863_v4  ;;  %v3429_v25 = vsel %vm2069_vm6, %v3427_v55, %v3428_v21  ;;  %v3571_v39 = vpop.permute.xlu0 %3570 }
 0x291   : > { %2963 = vst.msk [vmem:[#allocation2 + $0x78] sm:$0xff] %vm494_vm8, %v2957_v7  ;;  %3594 = vrot.lane.b32.xlu0 %v3528_v26, %s11853_s12  ;;  %v13288_v42 = vshll.u32 %v3155_v28, 16  ;;  %v3984_v45 = vrot.slane %v3155_v28, 2  ;;  %v13290_v1 = vshrl.u32 %v3155_v28, 16  ;;  %v13308_v50 = vsel %vm3661_vm12, %v3707_v52, %v13299_v15 }
 0x292   : > { %v2929_v29 = vpop.f32.mrb[64].mxu1  ;;  %18405 = vst [vmem:[#allocation5_spill] sm:$0xff] %v13308_v50  ;;  %v4404_v55 = vrot.slane %v13294_v0, 3 }
 0x293   : > { %v2951_v2 = vmax.f32 %v2929_v29, 0.0  ;;  %v2931_v59 = vpop.f32.mrb[65].mxu1  ;;  %v3288_v51 = vrot.slane %v13288_v42, 1  ;;  %v3985_v33 = vsel %vm3958_vm11, %v3982_v19, %v3984_v45  ;;  %v3529_v34 = vrot.slane %v13290_v1, 4 }
 0x294   : > { %v2932_v43 = vpop.f32.mrb[66].mxu1  ;;  %v4527_v7 = vrot.slane %v3985_v33, 3  ;;  %v3530_v47 = vrot.slane %v13288_v42, 5  ;;  %v3431_v19 = vsel %vm2069_vm6, %v3428_v21, %v13073_v40  ;;  %v3865_v28 = vrot.slane %v13290_v1, 1 }
 0x295   : > { %v2952_v27 = vmax.f32 %v2932_v43, 0.0  ;;  %v3289_v11 = vsel %vm3173_vm9, %v3284_v5, %v3288_v51  ;;  %v2934_v26 = vpop.f32.mrb[67].mxu1  ;;  %v3866_v52 = vrot.slane %v13288_v42, 2  ;;  %v4053_v43 = vsel %vm494_vm8, %v3429_v25, %v3571_v39 }
 0x296   : > { %3383 = vrot.lane.b32.xlu1 %v3289_v11, %s11853_s12  ;;  %v4528_v44 = vsel %vm4403_vm13, %v4517_v24, %v4527_v7  ;;  %v3531_v29 = vor.u32 %v3530_v47, %v3529_v34  ;;  %v3360_v59 = vpop.permute.xlu1 %3359  ;;  %v3713_v5 = vrot.slane %v13290_v1, 5 }
 0x297   : > { %v2958_v33 = vpack.c.bf16 %v2952_v27, %v2951_v2  ;;  %10932 = vmatmul.mubr.msk.bf16.gmra.mrb[116].mxu1 %vm494_vm8, %v4528_v44  ;;  %v13322_v21 = vsel %vm494_vm8, %v13046_v62, %v3360_v59  ;;  %v3867_v47 = vor.u32 %v3866_v52, %v3865_v28  ;;  %v3714_v2 = vrot.slane %v13288_v42, 6 }
 0x298   : > { %v3532_v11 = vsel %vm3472_vm10, %v3527_v22, %v3531_v29  ;;  %v3573_v24 = vpop.permute.xlu0 %3572  ;;  %v13327_v34 = vld [vmem:[#allocation2 + $0x78] sm:$0xff]  ;;  %v4407_v27 = vrot.slane %v4053_v43, 3  ;;  %v3292_v28 = vor.u32 %v13290_v1, %v3288_v51  ;;  %v3432_v1 = vrot.slane %v13088_v30, 1 }
 0x299   : > { %2964 = vst.msk [vmem:[#allocation2 + $0x80] sm:$0xff] %vm494_vm8, %v2958_v33  ;;  %3596 = vrot.lane.b32.xlu0 %v3532_v11, %s11853_s12  ;;  %v13333_v25 = vsel %vm494_vm8, %v3431_v19, %v3573_v24  ;;  %v3294_v62 = vshll.u32 %v13327_v34, 16  ;;  %v3986_v39 = vrot.slane %v13327_v34, 2  ;;  %v3298_v22 = vshrl.u32 %v13327_v34, 16  ;;  %v11488_v24 = vld [vmem:[%s18200_s5 + $0x80] sm:$0xff]  }
 0x29a   : > { %v2937_v26 = vpop.f32.mrb[68].mxu1  ;;  %v18207_v44 = vrot.slane %v13333_v25, 3  ;;  %v13341_v42 = vsel %vm3808_vm14, %v3863_v4, %v3867_v47 }
 0x29b   : > { %18406 = vst [vmem:[#allocation6_spill] sm:$0xff] %v13341_v42  ;;  %v2953_v59 = vmax.f32 %v2937_v26, 0.0  ;;  %v2939_v52 = vpop.f32.mrb[69].mxu1  ;;  %v3296_v33 = vrot.slane %v3294_v62, 1  ;;  %v13344_v19 = vsel %vm3958_vm11, %v3984_v45, %v3986_v39  ;;  %v3533_v11 = vrot.slane %v3298_v22, 4 }
 0x29c   : > { %v2940_v43 = vpop.f32.mrb[70].mxu1  ;;  %v4537_v34 = vrot.slane %v13344_v19, 3  ;;  %v3534_v0 = vrot.slane %v3294_v62, 5  ;;  %v4409_v4 = vsel %vm4403_vm13, %v4407_v27, %v18207_v44  ;;  %v18407_v52 = vrot.slane %v13322_v21, 3 }
 0x29d   : > { %v2959_v51 = vpack.c.bf16 %v2953_v59, %v2953_v59  ;;  %v3297_v26 = vsel %vm3173_vm9, %v3292_v28, %v3296_v33  ;;  %v2941_v45 = vpop.f32.mrb[71].mxu1  ;;  %5031 = vmatprep.mubr.bf16.mxu0 %v4409_v4  ;;  %v3715_v42 = vor.u32 %v3714_v2, %v3713_v5  ;;  %v3869_v27 = vrot.slane %v3298_v22, 1 }
 0x29e   : > { %v4406_v61 = vsel %vm4403_vm13, %v4404_v55, %v18407_v52  ;;  %3385 = vrot.lane.b32.xlu1 %v3297_v26, %s11853_s12  ;;  %v4538_v19 = vsel %vm4403_vm13, %v4527_v7, %v4537_v34  ;;  %v3535_v43 = vor.u32 %v3534_v0, %v3533_v11  ;;  %v3362_v50 = vpop.permute.xlu1 %3361  ;;  %v3870_v44 = vrot.slane %v3294_v62, 2  ;;  %v11489_v55 = vld [vmem:[%s18200_s5 + $0x88] sm:$0xff]  }
 0x29f   : > { %5032 = vmatmul.mubr.bf16.vlgmr.msra.gmra.mrb[100].mxu0 %v4406_v61  ;;  %2965 = vst.msk [vmem:[#allocation2 + $0x88] sm:$0xf] %vm2681_vm15, %v2959_v51  ;;  %10935 = vmatprep.mubr.msk.bf16.mxu1 %vm494_vm8, %v4538_v19  ;;  %v13364_v28 = vsel %vm494_vm8, %v13062_v32, %v3362_v50  ;;  %v13371_v7 = vsel %vm3661_vm12, %v13299_v15, %v3715_v42  ;;  %v3717_v61 = vrot.slane %v3298_v22, 5  ;;  %v3718_v5 = vrot.slane %v3294_v62, 6  ;;  %v13382_v50 = vld [vmem:[#allocation3] sm:$0xff] }
 0x2a0   : > { %5209 = vmatpush1.bf16.msra.mxu0 %v11488_v24  ;;  %18408 = vst [vmem:[#allocation7_spill] sm:$0xff] %v13371_v7  ;;  %v3536_v0 = vsel %vm3472_vm10, %v3531_v29, %v3535_v43  ;;  %v13378_v2 = vsel %vm2069_vm6, %v13073_v40, %v3432_v1  ;;  %v13380_v32 = vld [vmem:[#allocation2 + $0x80] sm:$0xff]  ;;  %v3871_v59 = vor.u32 %v3870_v44, %v3869_v27  ;;  %v4419_v15 = vrot.slane %v13364_v28, 3  ;;  %v11493_v28 = vld [vmem:[%s18200_s5 + $0xa8] sm:$0xff]  }
 0x2a1   : > { %18409 = vst [vmem:[#allocation8_spill] sm:$0xff] %v13378_v2  ;;  %5210 = vmatprep.subr.bf16.mxu0 %v13382_v50  ;;  %3598 = vrot.lane.b32.xlu0 %v3536_v0, %s11853_s12  ;;  %v3575_v62 = vpop.permute.xlu0 %3574  ;;  %v13388_v29 = vshll.u32 %v13380_v32, 16  ;;  %v18208_v11 = vrot.slane %v13380_v32, 2  ;;  %v13392_v40 = vshrl.u32 %v13380_v32, 16  ;;  %v3300_v4 = vor.u32 %v3298_v22, %v3296_v33 }
 0x2a2   : > { %v4059_v24 = vsel %vm494_vm8, %v13378_v2, %v3575_v62  ;;  %v13397_v51 = vsel %vm3808_vm14, %v3867_v47, %v3871_v59  ;;  %v3719_v44 = vor.u32 %v3718_v5, %v3717_v61  ;;  %v3434_v22 = vrot.slane %v13105_v54, 1  ;;  %v11490_v47 = vld [vmem:[%s18200_s5 + $0x90] sm:$0xff]  }
 0x2a3   : > { %18410 = vst [vmem:[#allocation9_spill] sm:$0xff] %v13397_v51  ;;  %v4421_v26 = vrot.slane %v4059_v24, 3  ;;  %v18209_v45 = vrot.slane %v13388_v29, 1  ;;  %v13403_v52 = vsel %vm3958_vm11, %v3986_v39, %v18208_v11  ;;  %v3537_v19 = vrot.slane %v13392_v40, 4 }
 0x2a4   : > { %5211 = vmatpush1.bf16.msra.mxu0 %v11489_v55  ;;  %v18210_v27 = vrot.slane %v13403_v52, 3  ;;  %v3538_v0 = vrot.slane %v13388_v29, 5  ;;  %v13414_v33 = vsel %vm3661_vm12, %v3715_v42, %v3719_v44  ;;  %v18412_v55 = vrot.slane %v13333_v25, 3 }
 0x2a5   : > { %5212 = vmatprep.subr.bf16.mxu0 %v13382_v50  ;;  %18411 = vst [vmem:[#allocation10_spill] sm:$0xff] %v13414_v33  ;;  %v3305_v39 = vsel %vm3173_vm9, %v3300_v4, %v18209_v45  ;;  %v18413_v54 = vrot.slane %v13322_v21, 3  ;;  %v3873_v62 = vrot.slane %v13392_v40, 1  ;;  %v3721_v11 = vrot.slane %v13392_v40, 5 }
 0x2a6   : > { %v4422_v61 = vsel %vm4403_vm13, %v18412_v55, %v4421_v26  ;;  %3387 = vrot.lane.b32.xlu1 %v3305_v39, %s11853_s12  ;;  %v3049_v42 = vpop.f32.mrb[72].mxu1  ;;  %v4548_v24 = vsel %vm4403_vm13, %v4537_v34, %v18210_v27  ;;  %v13432_v4 = vor.u32 %v3538_v0, %v3537_v19  ;;  %v3364_v25 = vpop.permute.xlu1 %3363  ;;  %v3874_v55 = vrot.slane %v13388_v29, 2 }
 0x2a7   : > { %v4420_v5 = vsel %vm4403_vm13, %v18413_v54, %v4419_v15  ;;  %5039 = vmatprep.mubr.bf16.mxu0 %v4422_v61  ;;  %v3051_v21 = vpop.f32.mrb[73].mxu1  ;;  %10936 = vmatmul.mubr.msk.bf16.gmra.mrb[120].mxu1 %vm494_vm8, %v4548_v24  ;;  %v11735_v54 = vld [vmem:[#allocation2 + $0x18] sm:$0xff]  ;;  %v3722_v45 = vrot.slane %v13388_v29, 6  ;;  %v13444_v0 = vsel %vm2069_vm6, %v3432_v1, %v3434_v22 }
 0x2a8   : > { %5040 = vmatmul.mubr.bf16.gmra.mrb[104].mxu0 %v4420_v5  ;;  %v4011_v39 = vsel %vm494_vm8, %v11735_v54, %v3364_v25  ;;  %v3540_v34 = vsel %vm3472_vm10, %v3535_v43, %v13432_v4  ;;  %v3052_v19 = vpop.f32.mrb[74].mxu1  ;;  %18414 = vst [vmem:[#allocation11_spill] sm:$0xff] %v13444_v0  ;;  %v3577_v61 = vpop.permute.xlu0 %3576  ;;  %v11491_v5 = vld [vmem:[%s18200_s5 + $0x98] sm:$0xff]   ;;  %v13449_v24 = vor.u32 %v3874_v55, %v3873_v62  ;;  %v3095_v25 = vmax.f32 %v3049_v42, 0.0 }
 0x2a9   : > { %5213 = vmatpush1.bf16.msra.mxu0 %v11490_v47  ;;  %3600 = vrot.lane.b32.xlu0 %v3540_v34, %s11853_s12  ;;  %v3096_v21 = vmax.f32 %v3052_v19, 0.0  ;;  %v3054_v54 = vpop.f32.mrb[75].mxu1  ;;  %v4062_v43 = vsel %vm494_vm8, %v13444_v0, %v3577_v61  ;;  %v13455_v30 = vor.u32 %v3722_v45, %v3721_v11  ;;  %v4429_v1 = vrot.slane %v4011_v39, 3  ;;  %v11492_v11 = vld [vmem:[%s18200_s5 + $0xa0] sm:$0xff]  }
 0x2aa   : > { %5214 = vmatprep.subr.bf16.mxu0 %v13382_v50  ;;  %v4431_v47 = vrot.slane %v4062_v43, 3  ;;  %v13459_v27 = vsel %vm3808_vm14, %v3871_v59, %v13449_v24  ;;  %v18213_v34 = vrot.slane %v13127_v20, 1  ;;  %v11736_v19 = vld [vmem:[#allocation2 + $0x20] sm:$0xff] }
 0x2ab   : > { %18415 = vst [vmem:[#allocation12_spill] sm:$0xff] %v13459_v27  ;;  %v3106_v62 = vpack.c.bf16 %v3096_v21, %v3095_v25  ;;  %v13463_v42 = vsel %vm3661_vm12, %v3719_v44, %v13455_v30  ;;  %v4430_v39 = vsel %vm4403_vm13, %v4419_v15, %v4429_v1 }
 0x2ac   : > { %18416 = vst [vmem:[#allocation13_spill] sm:$0xff] %v13463_v42  ;;  %v4432_v55 = vsel %vm4403_vm13, %v4421_v26, %v4431_v47  ;;  %v13481_v25 = vsel %vm2069_vm6, %v3434_v22, %v18213_v34 }
 0x2ad   : > { %5215 = vmatpush1.bf16.msra.mxu0 %v11491_v5  ;;  %v3118_v45 = vrot.slane %v3106_v62, 4  ;;  %5047 = vmatprep.mubr.bf16.mxu0 %v4432_v55  ;;  %18417 = vst [vmem:[#allocation14_spill] sm:$0xff] %v13481_v25 }
 0x2ae   : > { %5216 = vmatprep.subr.bf16.mxu0 %v13382_v50  ;;  %v3057_v59 = vpop.f32.mrb[76].mxu1  ;;  %v3366_v44 = vpop.permute.xlu1 %3365 }
 0x2af   : > { %3135 = vst.msk [vmem:[#allocation2 + $0x88] sm:$0xf0] %vm2853_vm1, %v3118_v45  ;;  %v3059_v26 = vpop.f32.mrb[77].mxu1  ;;  %v13476_v61 = vsel %vm494_vm8, %v11736_v19, %v3366_v44  ;;  %v3097_v15 = vmax.f32 %v3057_v59, 0.0  ;;  %v11494_v59 = vld [vmem:[%s18200_s5 + $0xb0] sm:$0xff]  }
 0x2b0   : > { %5048 = vmatmul.mubr.bf16.gmra.mrb[108].mxu0 %v4430_v39  ;;  %v3060_v5 = vpop.f32.mrb[78].mxu1  ;;  %v3579_v21 = vpop.permute.xlu0 %3578  ;;  %v18211_v55 = vrot.slane %v13476_v61, 3 }
 0x2b1   : > { %5217 = vmatpush1.bf16.msra.mxu0 %v11492_v11  ;;  %v3098_v54 = vmax.f32 %v3060_v5, 0.0  ;;  %v3062_v43 = vpop.f32.mrb[79].mxu1  ;;  %v13488_v62 = vsel %vm494_vm8, %v13481_v25, %v3579_v21 }
 0x2b2   : > { %5218 = vmatprep.subr.bf16.mxu0 %v13382_v50  ;;  %v18212_v22 = vrot.slane %v13488_v62, 3  ;;  %v4440_v19 = vsel %vm4403_vm13, %v4429_v1, %v18211_v55 }
 0x2b3   : > { %v3107_v39 = vpack.c.bf16 %v3098_v54, %v3097_v15 }
 0x2b4   : > { %v4442_v11 = vsel %vm4403_vm13, %v4431_v47, %v18212_v22  ;;  %v18420_v22 = vrot.slane %v13380_v32, 2 }
 0x2b5   : > { %5219 = vmatpush1.bf16.msra.mxu0 %v11493_v28  ;;  %v3119_v44 = vrot.slane %v3107_v39, 4  ;;  %5055 = vmatprep.mubr.bf16.mxu0 %v4442_v11  ;;  %v18419_v39 = vrot.slane %v13388_v29, 1 }
 0x2b6   : > { %5220 = vmatprep.subr.bf16.mxu0 %v13382_v50  ;;  %v3065_v26 = vpop.f32.mrb[80].mxu1  ;;  %v13503_v5 = vld [vmem:[#allocation2 + $0x88] sm:$0xff] }
 0x2b7   : > { %18418 = vst [vmem:[#allocation15_spill] sm:$0xff] %v13503_v5  ;;  %v3120_v21 = vsel %vm2695_vm7, %v3118_v45, %v3119_v44  ;;  %v3067_v15 = vpop.f32.mrb[81].mxu1  ;;  %v3310_v47 = vshll.u32 %v13503_v5, 16  ;;  %v3990_v28 = vrot.slane %v13503_v5, 2  ;;  %v3099_v54 = vmax.f32 %v3065_v26, 0.0  ;;  %v11495_v45 = vld [vmem:[%s18200_s5 + $0xb8] sm:$0xff]  }
 0x2b8   : > { %5056 = vmatmul.mubr.bf16.gmra.mrb[112].mxu0 %v4440_v19  ;;  %3136 = vst.msk [vmem:[#allocation2 + $0x90] sm:$0xff] %vm494_vm8, %v3120_v21  ;;  %v3068_v43 = vpop.f32.mrb[82].mxu1  ;;  %v3308_v11 = vor.u32 %v13392_v40, %v18419_v39  ;;  %v3314_v1 = vshrl.u32 %v13503_v5, 16 }
 0x2b9   : > { %5221 = vmatpush1.bf16.msra.mxu0 %v11494_v59  ;;  %v3100_v19 = vmax.f32 %v3068_v43, 0.0  ;;  %v3070_v15 = vpop.f32.mrb[83].mxu1  ;;  %v3312_v55 = vrot.slane %v3310_v47, 1  ;;  %v13519_v21 = vsel %vm3958_vm11, %v18420_v22, %v3990_v28  ;;  %v3542_v26 = vrot.slane %v3310_v47, 5  ;;  %v11737_v43 = vld [vmem:[#allocation2 + $0x8] sm:$0xf0] }
 0x2ba   : > { %5222 = vmatprep.subr.bf16.mxu0 %v13382_v50  ;;  %v18219_v29 = vrot.slane %v13519_v21, 3  ;;  %v3541_v40 = vrot.slane %v3314_v1, 4  ;;  %v3877_v39 = vrot.slane %v3314_v1, 1  ;;  %v3878_v59 = vrot.slane %v3310_v47, 2 }
 0x2bb   : > { %v13523_v34 = vpack.c.bf16 %v3100_v19, %v3099_v54  ;;  %v3313_v25 = vsel %vm3173_vm9, %v3308_v11, %v3312_v55  ;;  %v3810_v15 = vshrl.u32 %v11737_v43, 16  ;;  %v3725_v0 = vrot.slane %v3314_v1, 5  ;;  %v11496_v54 = vld [vmem:[%s18200_s5 + $0xc0] sm:$0xff]  }
 0x2bc   : > { %3389 = vrot.lane.b32.xlu1 %v3313_v25, %s11853_s12  ;;  %v18421_v22 = vrot.slane %v13403_v52, 3  ;;  %v3543_v5 = vor.u32 %v3542_v26, %v3541_v40  ;;  %v13535_v19 = vor.u32 %v3878_v59, %v3877_v39  ;;  %v3726_v11 = vrot.slane %v3310_v47, 6 }
 0x2bd   : > { %5223 = vmatpush1.bf16.msra.mxu0 %v11495_v45  ;;  %v3121_v42 = vrot.slane %v13523_v34, 4  ;;  %v3438_v40 = vrot.slane %v13158_v58, 1  ;;  %v13555_v39 = vrot.slane %v3810_v15, 1 }
 0x2be   : > { %v4558_v2 = vsel %vm4403_vm13, %v18421_v22, %v18219_v29  ;;  %5224 = vmatprep.subr.bf16.mxu0 %v13382_v50  ;;  %v3544_v52 = vsel %vm3472_vm10, %v13432_v4, %v3543_v5  ;;  %v3073_v25 = vpop.f32.mrb[84].mxu1  ;;  %v3813_v22 = vshll.u32 %v11737_v43, 16  ;;  %v13545_v45 = vsel %vm3808_vm14, %v13449_v24, %v13535_v19  ;;  %v11497_v43 = vld [vmem:[%s18200_s5 + $0xc8] sm:$0xff]  }
 0x2bf   : > { %10939 = vmatprep.mubr.msk.bf16.mxu1 %vm494_vm8, %v4558_v2  ;;  %18422 = vst [vmem:[#allocation16_spill] sm:$0xff] %v13545_v45  ;;  %v13547_v26 = vor.u32 %v3726_v11, %v3725_v0  ;;  %v3122_v47 = vsel %vm2695_vm7, %v3119_v44, %v3121_v42  ;;  %3602 = vrot.lane.b32.xlu0 %v3544_v52, %s11853_s12  ;;  %v3075_v34 = vpop.f32.mrb[85].mxu1  ;;  %v13551_v2 = vld [vmem:[#allocation2 + $0x90] sm:$0xff]  ;;  %v3440_v4 = vrot.slane %v13173_v9, 1  ;;  %v3101_v9 = vmax.f32 %v3073_v25, 0.0 }
 0x2c0   : > { %18423 = vst [vmem:[#allocation17_spill] sm:$0xff] %v13551_v2  ;;  %3137 = vst.msk [vmem:[#allocation2 + $0x98] sm:$0xff] %vm494_vm8, %v3122_v47  ;;  %v3076_v59 = vpop.f32.mrb[86].mxu1  ;;  %v3318_v24 = vshll.u32 %v13551_v2, 16  ;;  %v3992_v0 = vrot.slane %v13551_v2, 2  ;;  %v3322_v44 = vshrl.u32 %v13551_v2, 16  ;;  %v3316_v52 = vor.u32 %v3314_v1, %v3312_v55 }
 0x2c1   : > { %5225 = vmatpush1.bf16.msra.mxu0 %v11496_v54  ;;  %v13567_v58 = vsel %vm3661_vm12, %v13455_v30, %v13547_v26  ;;  %v3102_v15 = vmax.f32 %v3076_v59, 0.0  ;;  %v3078_v11 = vpop.f32.mrb[87].mxu1  ;;  %v13577_v30 = vld [vmem:[#allocation2 + $0xb8] sm:$0x1f] }
 0x2c2   : > { %18424 = vst [vmem:[#allocation18_spill] sm:$0xff] %v13567_v58  ;;  %5226 = vmatprep.subr.bf16.mxu0 %v13382_v50  ;;  %v3320_v34 = vrot.slane %v3318_v24, 1  ;;  %v13572_v54 = vsel %vm3958_vm11, %v3990_v28, %v3992_v0  ;;  %v3545_v29 = vrot.slane %v3322_v44, 4  ;;  %v3546_v2 = vrot.slane %v3318_v24, 5  ;;  %v11498_v28 = vld [vmem:[%s18200_s5 + $0xd0] sm:$0xff]  }
 0x2c3   : > { %v13574_v45 = vpack.c.bf16 %v3102_v15, %v3101_v9  ;;  %v18222_v27 = vrot.slane %v13572_v54, 3  ;;  %v3881_v25 = vrot.slane %v3322_v44, 1  ;;  %v3882_v59 = vrot.slane %v3318_v24, 2 }
 0x2c4   : > { %v3321_v55 = vsel %vm3173_vm9, %v3316_v52, %v3320_v34  ;;  %v13580_v1 = vor.u32 %v3546_v2, %v3545_v29  ;;  %v13582_v11 = vrot.slane %v3813_v22, 2  ;;  %v3729_v47 = vrot.slane %v3322_v44, 5 }
 0x2c5   : > { %5227 = vmatpush1.bf16.msra.mxu0 %v11497_v43  ;;  %3391 = vrot.lane.b32.xlu1 %v3321_v55, %s11853_s12  ;;  %v18425_v15 = vrot.slane %v13519_v21, 3  ;;  %v13595_v29 = vor.u32 %v3882_v59, %v3881_v25  ;;  %v3730_v22 = vrot.slane %v3318_v24, 6  ;;  %v18426_v9 = vrot.slane %v13127_v20, 1 }
 0x2c6   : > { %5228 = vmatprep.subr.bf16.mxu0 %v13382_v50  ;;  %v3081_v2 = vpop.f32.mrb[88].mxu1  ;;  %v3548_v43 = vsel %vm3472_vm10, %v3543_v5, %v13580_v1  ;;  %v13606_v21 = vsel %vm2069_vm6, %v3438_v40, %v3440_v4  ;;  %v18429_v25 = vrot.slane %v13574_v45, 4  ;;  %v18431_v5 = vrot.slane %v13195_v36, 1 }
 0x2c7   : > { %v4568_v52 = vsel %vm4403_vm13, %v18425_v15, %v18222_v27  ;;  %v13603_v55 = vsel %vm2069_vm6, %v18426_v9, %v3438_v40  ;;  %18428 = vst [vmem:[#allocation20_spill] sm:$0xff] %v13606_v21  ;;  %3604 = vrot.lane.b32.xlu0 %v3548_v43, %s11853_s12  ;;  %v3083_v59 = vpop.f32.mrb[89].mxu1  ;;  %v13623_v40 = vsel %vm3808_vm14, %v13535_v19, %v13595_v29  ;;  %v3103_v19 = vmax.f32 %v3081_v2, 0.0 }
 0x2c8   : > { %10940 = vmatmul.mubr.msk.bf16.gmra.mrb[124].mxu1 %vm494_vm8, %v4568_v52  ;;  %18427 = vst [vmem:[#allocation19_spill] sm:$0xff] %v13603_v55  ;;  %v3124_v24 = vsel %vm2695_vm7, %v3121_v42, %v18429_v25  ;;  %v13613_v52 = vld [vmem:[#allocation2 + $0x98] sm:$0xff]  ;;  %v13618_v20 = vsel %vm2069_vm6, %v3440_v4, %v18431_v5  ;;  %18433 = vst [vmem:[#allocation23_spill] sm:$0xff] %v13623_v40  ;;  %v13625_v9 = vor.u32 %v3730_v22, %v3729_v47  ;;  %v3084_v42 = vpop.f32.mrb[90].mxu1 }
 0x2c9   : > { %18430 = vst [vmem:[#allocation21_spill] sm:$0xff] %v13613_v52  ;;  %18432 = vst [vmem:[#allocation22_spill] sm:$0xff] %v13618_v20  ;;  %v3326_v43 = vshll.u32 %v13613_v52, 16  ;;  %v3330_v59 = vshrl.u32 %v13613_v52, 16  ;;  %5229 = vmatpush1.bf16.msra.mxu0 %v11498_v28  ;;  %v11499_v4 = vld [vmem:[%s18200_s5 + $0xd8] sm:$0xff]   ;;  %v3104_v15 = vmax.f32 %v3084_v42, 0.0  ;;  %v3324_v22 = vor.u32 %v3322_v44, %v3320_v34 }
 0x2ca   : > { %3138 = vst.msk [vmem:[#allocation2 + $0xa0] sm:$0xff] %vm494_vm8, %v3124_v24  ;;  %v3086_v47 = vpop.f32.mrb[91].mxu1  ;;  %v13638_v24 = vsel %vm3661_vm12, %v13547_v26, %v13625_v9  ;;  %5230 = vmatprep.subr.bf16.mxu0 %v13382_v50  ;;  %v3368_v27 = vpop.permute.xlu1 %3367  ;;  %v18435_v28 = vrot.slane %v13613_v52, 2  ;;  %v11738_v42 = vld [vmem:[#allocation2 + $0x28] sm:$0xff] }
 0x2cb   : > { %18434 = vst [vmem:[#allocation24_spill] sm:$0xff] %v13638_v24  ;;  %v3328_v25 = vrot.slane %v3326_v43, 1  ;;  %v3549_v58 = vrot.slane %v3330_v59, 4  ;;  %v3550_v5 = vrot.slane %v3326_v43, 5  ;;  %v13646_v2 = vpack.c.bf16 %v3104_v15, %v3103_v19  ;;  %v11500_v15 = vld [vmem:[%s18200_s5 + $0xe0] sm:$0xff]  }
 0x2cc   : > { %v13644_v40 = vsel %vm3958_vm11, %v3992_v0, %v18435_v28  ;;  %v13649_v44 = vsel %vm494_vm8, %v11738_v42, %v3368_v27  ;;  %v3885_v34 = vrot.slane %v3330_v59, 1  ;;  %v18436_v28 = vrot.slane %v13572_v54, 3 }
 0x2cd   : > { %v18223_v26 = vrot.slane %v13644_v40, 3  ;;  %v3329_v24 = vsel %vm3173_vm9, %v3324_v22, %v3328_v25  ;;  %v13654_v33 = vor.u32 %v3550_v5, %v3549_v58  ;;  %5231 = vmatpush1.bf16.msra.mxu0 %v11499_v4  ;;  %v3125_v19 = vrot.slane %v13646_v2, 4  ;;  %v3581_v27 = vpop.permute.xlu0 %3580 }
 0x2ce   : > { %3393 = vrot.lane.b32.xlu1 %v3329_v24, %s11853_s12  ;;  %v3886_v58 = vrot.slane %v3326_v43, 2  ;;  %v3733_v5 = vrot.slane %v3330_v59, 5  ;;  %5232 = vmatprep.subr.bf16.mxu0 %v13382_v50  ;;  %v13670_v4 = vsel %vm494_vm8, %v13603_v55, %v3581_v27  ;;  %v3089_v42 = vpop.f32.mrb[92].mxu1  ;;  %v3332_v2 = vor.u32 %v3330_v59, %v3328_v25  ;;  %v11501_v59 = vld [vmem:[%s18200_s5 + $0xe8] sm:$0xff]  }
 0x2cf   : > { %v4578_v22 = vsel %vm4403_vm13, %v18436_v28, %v18223_v26  ;;  %v3552_v24 = vsel %vm3472_vm10, %v13580_v1, %v13654_v33  ;;  %v3734_v0 = vrot.slane %v3326_v43, 6  ;;  %v18437_v54 = vrot.slane %v13574_v45, 4  ;;  %v3091_v27 = vpop.f32.mrb[93].mxu1 }
 0x2d0   : > { %10943 = vmatprep.mubr.msk.bf16.mxu1 %vm494_vm8, %v4578_v22  ;;  %v4451_v26 = vrot.slane %v13670_v4, 3  ;;  %v3105_v47 = vmax.f32 %v3089_v42, 0.0  ;;  %3606 = vrot.lane.b32.xlu0 %v3552_v24, %s11853_s12  ;;  %v3887_v51 = vor.u32 %v3886_v58, %v3885_v34  ;;  %v3092_v22 = vpop.f32.mrb[94].mxu1  ;;  %v18439_v34 = vrot.slane %v13488_v62, 3 }
 0x2d1   : > { %v3126_v28 = vsel %vm2695_vm7, %v18437_v54, %v3125_v19  ;;  %v13681_v55 = vld [vmem:[#allocation2 + $0xa0] sm:$0xff]  ;;  %v13687_v25 = vor.u32 %v3734_v0, %v3733_v5  ;;  %5233 = vmatpush1.bf16.msra.mxu0 %v11500_v15  ;;  %v3093_v42 = vpop.f32.mrb[95].mxu1  ;;  %v18440_v24 = vrot.slane %v13649_v44, 3  ;;  %v18441_v54 = vrot.slane %v13476_v61, 3 }
 0x2d2   : > { %18438 = vst [vmem:[#allocation25_spill] sm:$0xff] %v13681_v55  ;;  %3139 = vst.msk [vmem:[#allocation2 + $0xa8] sm:$0xff] %vm494_vm8, %v3126_v28  ;;  %v3334_v1 = vshll.u32 %v13681_v55, 16  ;;  %v3996_v43 = vrot.slane %v13681_v55, 2  ;;  %v3338_v45 = vshrl.u32 %v13681_v55, 16  ;;  %v3111_v4 = vpack.c.bf16 %v3105_v47, %v3105_v47  ;;  %5234 = vmatprep.subr.bf16.mxu0 %v13382_v50  ;;  %v13720_v55 = vld [vmem:[#allocation2 + $0x48] sm:$0xff] }
 0x2d3   : > { %v4452_v58 = vsel %vm4403_vm13, %v18439_v34, %v4451_v26  ;;  %v4450_v28 = vsel %vm4403_vm13, %v18441_v54, %v18440_v24  ;;  %v13702_v0 = vsel %vm3808_vm14, %v13595_v29, %v3887_v51  ;;  %v18443_v47 = vrot.slane %v13613_v52, 2  ;;  %v3370_v61 = vpop.permute.xlu1 %3369 }
 0x2d4   : > { %18442 = vst [vmem:[#allocation26_spill] sm:$0xff] %v13702_v0  ;;  %5063 = vmatprep.mubr.bf16.mxu0 %v4452_v58  ;;  %v3336_v15 = vrot.slane %v3334_v1, 1  ;;  %v3553_v5 = vrot.slane %v3338_v45, 4  ;;  %v3554_v27 = vrot.slane %v3334_v1, 5  ;;  %v3127_v22 = vrot.slane %v3111_v4, 4  ;;  %v11739_v58 = vld [vmem:[#allocation2 + $0x30] sm:$0xff] }
 0x2d5   : > { %v13708_v62 = vsel %vm3958_vm11, %v18443_v47, %v3996_v43  ;;  %5064 = vmatmul.mubr.bf16.gmra.mrb[116].mxu0 %v4450_v28  ;;  %v13714_v29 = vsel %vm3661_vm12, %v13625_v9, %v13687_v25  ;;  %v3889_v34 = vrot.slane %v3338_v45, 1  ;;  %v13717_v24 = vsel %vm494_vm8, %v11739_v58, %v3370_v61  ;;  %v3583_v52 = vpop.permute.xlu0 %3582 }
 0x2d6   : > { %v4587_v42 = vrot.slane %v13708_v62, 3  ;;  %18444 = vst [vmem:[#allocation27_spill] sm:$0xff] %v13714_v29  ;;  %v3337_v54 = vsel %vm3173_vm9, %v3332_v2, %v3336_v15  ;;  %v3555_v47 = vor.u32 %v3554_v27, %v3553_v5  ;;  %5235 = vmatpush1.bf16.msra.mxu0 %v11501_v59  ;;  %v3128_v28 = vsel %vm2695_vm7, %v3125_v19, %v3127_v22 }
 0x2d7   : > { %v18230_v62 = vrot.slane %v13717_v24, 3  ;;  %3395 = vrot.lane.b32.xlu1 %v3337_v54, %s11853_s12  ;;  %v18445_v9 = vrot.slane %v13644_v40, 3  ;;  %v3890_v58 = vrot.slane %v3334_v1, 2  ;;  %5236 = vmatprep.subr.bf16.mxu0 %v13382_v50  ;;  %3140 = vst.msk [vmem:[#allocation2 + $0xb0] sm:$0xff] %vm494_vm8, %v3128_v28  ;;  %v4071_v2 = vsel %vm494_vm8, %v13606_v21, %v3583_v52 }
 0x2d8   : > { %v3556_v19 = vsel %vm3472_vm10, %v13654_v33, %v3555_v47  ;;  %v3737_v59 = vrot.slane %v3338_v45, 5  ;;  %v3738_v5 = vrot.slane %v3334_v1, 6  ;;  %v4461_v27 = vrot.slane %v4071_v2, 3 }
 0x2d9   : > { %v4588_v61 = vsel %vm4403_vm13, %v18445_v9, %v4587_v42  ;;  %3608 = vrot.lane.b32.xlu0 %v3556_v19, %s11853_s12  ;;  %v13737_v40 = vld [vmem:[#allocation2 + $0xa8] sm:$0xff]  ;;  %v3891_v22 = vor.u32 %v3890_v58, %v3889_v34  ;;  %v18446_v54 = vshrl.u32 %v13577_v30, 16  ;;  %v18447_v28 = vshll.u32 %v13577_v30, 16 }
 0x2da   : > { %10944 = vmatmul.mubr.msk.bf16.gmra.mrb[128].mxu1 %vm494_vm8, %v4588_v61  ;;  %v13744_v52 = vshll.u32 %v13737_v40, 16  ;;  %v3998_v61 = vrot.slane %v13737_v40, 2  ;;  %v13748_v33 = vshrl.u32 %v13737_v40, 16  ;;  %v13750_v1 = vor.u32 %v3738_v5, %v3737_v59 }
 0x2db   : > { %v3904_v9 = vrot.slane %v18446_v54, 1  ;;  %v3907_v4 = vrot.slane %v18447_v28, 2  ;;  %v4462_v2 = vsel %vm4403_vm13, %v4451_v26, %v4461_v27  ;;  %v18448_v34 = vrot.slane %v13649_v44, 3  ;;  %v3372_v26 = vpop.permute.xlu1 %3371 }
 0x2dc   : > { %v3340_v19 = vor.u32 %v3338_v45, %v3336_v15  ;;  %v13759_v54 = vsel %vm3808_vm14, %v3887_v51, %v3891_v22  ;;  %5071 = vmatprep.mubr.bf16.mxu0 %v4462_v2  ;;  %v3344_v28 = vrot.slane %v13744_v52, 1  ;;  %v3999_v21 = vsel %vm3958_vm11, %v3996_v43, %v3998_v61  ;;  %v11502_v43 = vld [vmem:[%s18200_s5 + $0xf0] sm:$0xff]   ;;  %v11741_v15 = vld [vmem:[#allocation2 + $0x38] sm:$0xff] }
 0x2dd   : > { %v4460_v58 = vsel %vm4403_vm13, %v18448_v34, %v18230_v62  ;;  %18449 = vst [vmem:[#allocation28_spill] sm:$0xff] %v13759_v54  ;;  %v3557_v59 = vrot.slane %v13748_v33, 4  ;;  %v3558_v5 = vrot.slane %v13744_v52, 5  ;;  %v4597_v29 = vrot.slane %v3999_v21, 3  ;;  %v3585_v54 = vpop.permute.xlu0 %3584  ;;  %5237 = vmatpush1.bf16.msra.mxu0 %v11502_v43 }
 0x2de   : > { %5072 = vmatmul.mubr.bf16.gmra.mrb[120].mxu0 %v4460_v58  ;;  %v13768_v44 = vsel %vm3661_vm12, %v13687_v25, %v13750_v1  ;;  %v3893_v51 = vrot.slane %v13748_v33, 1  ;;  %v3894_v45 = vrot.slane %v13744_v52, 2  ;;  %v13776_v2 = vsel %vm494_vm8, %v11741_v15, %v3372_v26  ;;  %v13789_v7 = vld [vmem:[#allocation2 + $0xb0] sm:$0xf]  ;;  %5238 = vmatprep.subr.bf16.mxu0 %v13382_v50 }
 0x2df   : > { %18450 = vst [vmem:[#allocation29_spill] sm:$0xff] %v13768_v44  ;;  %v3345_v34 = vsel %vm3173_vm9, %v3340_v19, %v3344_v28  ;;  %v3559_v21 = vor.u32 %v3558_v5, %v3557_v59  ;;  %v18451_v58 = vrot.slane %v13720_v55, 1  ;;  %v18452_v25 = vrot.slane %v13195_v36, 1  ;;  %18453 = vst [vmem:[#allocation30_spill] sm:$0xff] %v13789_v7  ;;  %v13791_v26 = vld [vmem:[#allocation2 + $0xb0] sm:$0xff] }
 0x2e0   : > { %v18232_v44 = vrot.slane %v13776_v2, 3  ;;  %3397 = vrot.lane.b32.xlu1 %v3345_v34, %s11853_s12  ;;  %v4598_v0 = vsel %vm4403_vm13, %v4587_v42, %v4597_v29  ;;  %v3895_v19 = vor.u32 %v3894_v45, %v3893_v51  ;;  %v13793_v59 = vor.u32 %v3907_v4, %v3904_v9 }
 0x2e1   : > { %v13784_v62 = vsel %vm2069_vm6, %v18452_v25, %v18451_v58  ;;  %v4074_v36 = vsel %vm494_vm8, %v13618_v20, %v3585_v54  ;;  %10947 = vmatprep.mubr.msk.bf16.mxu1 %vm494_vm8, %v4598_v0  ;;  %v3560_v5 = vsel %vm3472_vm10, %v3555_v47, %v3559_v21  ;;  %v3350_v15 = vshll.u32 %v13789_v7, 16 }
 0x2e2   : > { %v4000_v34 = vrot.slane %v13791_v26, 2  ;;  %v4471_v42 = vrot.slane %v4074_v36, 3  ;;  %3610 = vrot.lane.b32.xlu0 %v3560_v5, %s11853_s12  ;;  %v3348_v4 = vor.u32 %v13748_v33, %v3344_v28  ;;  %v3562_v9 = vshrl.u32 %v13791_v26, 16 }
 0x2e3   : > { %v3565_v51 = vshll.u32 %v13791_v26, 16  ;;  %v3352_v54 = vrot.slane %v3350_v15, 1  ;;  %v18454_v47 = vrot.slane %v13577_v30, 2  ;;  %v3741_v43 = vrot.slane %v13748_v33, 5  ;;  %v3374_v33 = vpop.permute.xlu1 %3373 }
 0x2e4   : > { %v4001_v0 = vsel %vm3958_vm11, %v3998_v61, %v4000_v34  ;;  %v4472_v50 = vsel %vm4403_vm13, %v4461_v27, %v4471_v42  ;;  %v3564_v36 = vrot.slane %v3562_v9, 4  ;;  %v18455_v28 = vrot.slane %v13717_v24, 3 }
 0x2e5   : > { %v4003_v45 = vsel %vm3958_vm11, %v4000_v34, %v18454_v47  ;;  %v4607_v58 = vrot.slane %v4001_v0, 3  ;;  %5079 = vmatprep.mubr.bf16.mxu0 %v4472_v50  ;;  %v3353_v61 = vsel %vm3173_vm9, %v3348_v4, %v3352_v54  ;;  %v3567_v15 = vrot.slane %v3565_v51, 5  ;;  %v11742_v47 = vld [vmem:[#allocation2 + $0x40] sm:$0xff] }
 0x2e6   : > { %v4617_v25 = vrot.slane %v4003_v45, 3  ;;  %v4470_v5 = vsel %vm4403_vm13, %v18455_v28, %v18232_v44  ;;  %v13819_v20 = vsel %vm3808_vm14, %v3891_v22, %v3895_v19  ;;  %3399 = vrot.lane.b32.xlu1 %v3353_v61, %s11853_s12  ;;  %v3354_v0 = vshrl.u32 %v13789_v7, 16  ;;  %v3587_v28 = vpop.permute.xlu0 %3586 }
 0x2e7   : > { %18456 = vst [vmem:[#allocation31_spill] sm:$0xff] %v13819_v20  ;;  %5080 = vmatmul.mubr.bf16.gmra.mrb[124].mxu0 %v4470_v5  ;;  %v4608_v27 = vsel %vm4403_vm13, %v4597_v29, %v4607_v58  ;;  %v3742_v24 = vrot.slane %v13744_v52, 6  ;;  %v4021_v45 = vsel %vm494_vm8, %v11742_v47, %v3374_v33  ;;  %v3568_v4 = vor.u32 %v3567_v15, %v3564_v36 }
 0x2e8   : > { %v4618_v34 = vsel %vm4403_vm13, %v4607_v58, %v4617_v25  ;;  %10948 = vmatmul.mubr.msk.bf16.gmra.mrb[132].mxu1 %vm494_vm8, %v4608_v27  ;;  %v3897_v22 = vrot.slane %v3562_v9, 1  ;;  %v3898_v50 = vrot.slane %v3565_v51, 2  ;;  %v3356_v5 = vor.u32 %v3354_v0, %v3352_v54 }
 0x2e9   : > { %10951 = vmatprep.mubr.msk.bf16.mxu1 %vm494_vm8, %v4618_v34  ;;  %v3743_v61 = vor.u32 %v3742_v24, %v3741_v43  ;;  %v3745_v29 = vrot.slane %v3562_v9, 5  ;;  %v3746_v44 = vrot.slane %v3565_v51, 6  ;;  %v4479_v58 = vrot.slane %v4021_v45, 3  ;;  %v11503_v51 = vld [vmem:[%s18200_s5 + $0xf8] sm:$0xff]   ;;  %v11743_v43 = vld [vmem:[#allocation2 + $0x50] sm:$0xff] }
 0x2ea   : > { %v4077_v7 = vsel %vm494_vm8, %v13784_v62, %v3587_v28  ;;  %v3569_v52 = vsel %vm3472_vm10, %v3559_v21, %v3568_v4  ;;  %v3899_v20 = vor.u32 %v3898_v50, %v3897_v22  ;;  %3401 = vrot.lane.b32.xlu1 %v3356_v5, %s11853_s12  ;;  %v18457_v36 = vrot.slane %v13577_v30, 2  ;;  %5239 = vmatpush1.bf16.msra.mxu0 %v11503_v51  ;;  %v11744_v50 = vld [vmem:[#allocation2 + $0x58] sm:$0xff] }
 0x2eb   : > { %v4481_v33 = vrot.slane %v4077_v7, 3  ;;  %3612 = vrot.lane.b32.xlu0 %v3569_v52, %s11853_s12  ;;  %v13838_v54 = vsel %vm3661_vm12, %v13750_v1, %v3743_v61  ;;  %v13840_v9 = vor.u32 %v3746_v44, %v3745_v29  ;;  %v3446_v27 = vrot.slane %v11743_v43, 1  ;;  %v3376_v0 = vpop.permute.xlu1 %3375 }
 0x2ec   : > { %v4627_v15 = vrot.slane %v18457_v36, 3  ;;  %v13846_v21 = vsel %vm3808_vm14, %v3895_v19, %v3899_v20  ;;  %v13850_v7 = vsel %vm3808_vm14, %v3899_v20, %v13793_v59  ;;  %v18458_v44 = vrot.slane %v13776_v2, 3 }
 0x2ed   : > { %v4482_v30 = vsel %vm4403_vm13, %v4471_v42, %v4481_v33  ;;  %v13855_v1 = vsel %vm3661_vm12, %v3743_v61, %v13840_v9  ;;  %v3816_v19 = vor.u32 %v13582_v11, %v13555_v39  ;;  %v13863_v20 = vrot.slane %v13737_v40, 1 }
 0x2ee   : > { %5087 = vmatprep.mubr.bf16.mxu0 %v4482_v30  ;;  %v4480_v34 = vsel %vm4403_vm13, %v18458_v44, %v4479_v58  ;;  %v18234_v42 = vrot.slane %v13791_v26, 1  ;;  %v4628_v24 = vsel %vm4403_vm13, %v4617_v25, %v4627_v15  ;;  %v4023_v47 = vsel %vm494_vm8, %v13720_v55, %v3376_v0  ;;  %3912 = vrot.lane.b32.xlu1 %v13114_v14, %s11853_s12  ;;  %v3589_v25 = vpop.permute.xlu0 %3588  ;;  %v11745_v15 = vld [vmem:[#allocation2 + $0x60] sm:$0xff] }
 0x2ef   : > { %3614 = vrot.lane.b32.xlu0 %v3568_v4, %s11853_s12  ;;  %5088 = vmatmul.mubr.bf16.gmra.mrb[128].mxu0 %v4480_v34  ;;  %v18459_v11 = vrot.slane %v13720_v55, 1  ;;  %v4489_v45 = vrot.slane %v4023_v47, 3  ;;  %v3820_v14 = vsel %vm3808_vm14, %v3816_v19, %v13080_v60  ;;  %v3448_v28 = vrot.slane %v11744_v50, 1  ;;  %v11746_v19 = vld [vmem:[#allocation2 + $0x68] sm:$0xff] }
 0x2f0   : > { %10952 = vmatmul.mubr.msk.bf16.gmra.mrb[136].mxu1 %vm494_vm8, %v4628_v24  ;;  %v13877_v39 = vsel %vm2069_vm6, %v13863_v20, %v18234_v42  ;;  %v18489_v42 = vld [vmem:[#allocation20_spill] sm:$0xff] }
 0x2f1   : > { %v13882_v2 = vsel %vm2069_vm6, %v18459_v11, %v3446_v27  ;;  %v3378_v55 = vpop.permute.xlu1 %3377  ;;  %v4490_v61 = vsel %vm4403_vm13, %v4479_v58, %v4489_v45  ;;  %v13897_v60 = vsel %vm2069_vm6, %v3446_v27, %v3448_v28 }
 0x2f2   : > { %v4080_v4 = vsel %vm494_vm8, %v13882_v2, %v3589_v25  ;;  %3756 = vrot.lane.b32.xlu1 %v13097_v3, %s11853_s12  ;;  %v4025_v29 = vsel %vm494_vm8, %v11743_v43, %v3378_v55 }
 0x2f3   : > { %v4491_v22 = vrot.slane %v4080_v4, 3  ;;  %3910 = vrot.lane.b32.xlu0 %v3820_v14, %s11853_s12  ;;  %v3591_v52 = vpop.permute.xlu0 %3590  ;;  %v11747_v4 = vld [vmem:[#allocation2 + $0x70] sm:$0xff] }
 0x2f4   : > { %v4083_v36 = vsel %vm494_vm8, %v13897_v60, %v3591_v52 }
 0x2f5   : > { %v4492_v5 = vsel %vm4403_vm13, %v4481_v33, %v4491_v22  ;;  %v4501_v3 = vrot.slane %v4083_v36, 3  ;;  %v4499_v33 = vrot.slane %v4025_v29, 3  ;;  %v11748_v36 = vld [vmem:[#allocation2 + $0x78] sm:$0xff] }
 0x2f6   : > { %5095 = vmatprep.mubr.bf16.mxu0 %v4492_v5  ;;  %3758 = vrot.lane.b32.xlu1 %v13117_v13, %s11853_s12 }
 0x2f7   : > { %3754 = vrot.lane.b32.xlu0 %v13064_v49, %s11853_s12  ;;  %5096 = vmatmul.mubr.bf16.gmra.mrb[132].mxu0 %v4490_v61  ;;  %v4502_v58 = vsel %vm4403_vm13, %v4491_v22, %v4501_v3  ;;  %v3450_v49 = vrot.slane %v11745_v15, 1  ;;  %v4500_v30 = vsel %vm4403_vm13, %v4489_v45, %v4499_v33 }
 0x2f8   : > { %5103 = vmatprep.mubr.bf16.mxu0 %v4502_v58  ;;  %v3380_v51 = vpop.permute.xlu1 %3379 }
 0x2f9   : > { %v4027_v43 = vsel %vm494_vm8, %v11744_v50, %v3380_v51  ;;  %v13913_v13 = vsel %vm2069_vm6, %v3448_v28, %v3450_v49 }
 0x2fa   : > { %3760 = vrot.lane.b32.xlu1 %v13136_v35, %s11853_s12  ;;  %v4509_v44 = vrot.slane %v4027_v43, 3 }
 0x2fb   : > { %3914 = vrot.lane.b32.xlu0 %v13133_v17, %s11853_s12  ;;  %v3593_v17 = vpop.permute.xlu0 %3592 }
 0x2fc   : > { %v4086_v27 = vsel %vm494_vm8, %v13913_v13, %v3593_v17  ;;  %v4510_v24 = vsel %vm4403_vm13, %v4499_v33, %v4509_v44 }
 0x2fd   : > { %v4511_v35 = vrot.slane %v4086_v27, 3 }
 0x2fe   : > { %3762 = vrot.lane.b32.xlu1 %v13155_v8, %s11853_s12 }
 0x2ff   : > { %3916 = vrot.lane.b32.xlu0 %v13149_v41, %s11853_s12  ;;  %5104 = vmatmul.mubr.bf16.gmra.mrb[136].mxu0 %v4500_v30  ;;  %v4512_v34 = vsel %vm4403_vm13, %v4501_v3, %v4511_v35  ;;  %v3452_v41 = vrot.slane %v11746_v19, 1  ;;  %v3456_v3 = vrot.slane %v11748_v36, 1 }
 0x300   : > { %5111 = vmatprep.mubr.bf16.mxu0 %v4512_v34  ;;  %v3382_v0 = vpop.permute.xlu1 %3381  ;;  %v18461_v34 = vld [vmem:[#allocation6_spill] sm:$0xff] }
 0x301   : > { %v4029_v47 = vsel %vm494_vm8, %v11745_v15, %v3382_v0  ;;  %v13929_v8 = vsel %vm2069_vm6, %v3450_v49, %v3452_v41  ;;  %v18463_v0 = vld [vmem:[#allocation9_spill] sm:$0xff] }
 0x302   : > { %3764 = vrot.lane.b32.xlu1 %v13185_v10, %s11853_s12  ;;  %v4519_v25 = vrot.slane %v4029_v47, 3  ;;  %v18465_v47 = vld [vmem:[#allocation12_spill] sm:$0xff] }
 0x303   : > { %3918 = vrot.lane.b32.xlu0 %v13177_v38, %s11853_s12  ;;  %v3595_v38 = vpop.permute.xlu0 %3594 }
 0x304   : > { %v4089_v11 = vsel %vm494_vm8, %v13929_v8, %v3595_v38  ;;  %v18466_v38 = vld [vmem:[#allocation13_spill] sm:$0xff] }
 0x305   : > { %v4521_v10 = vrot.slane %v4089_v11, 3  ;;  %v18467_v11 = vld [vmem:[#allocation16_spill] sm:$0xff] }
 0x306   : > { %3766 = vrot.lane.b32.xlu1 %v13206_v18, %s11853_s12  ;;  %v4520_v18 = vsel %vm4403_vm13, %v4509_v44, %v4519_v25 }
 0x307   : > { %3920 = vrot.lane.b32.xlu0 %v13202_v57, %s11853_s12  ;;  %5112 = vmatmul.mubr.bf16.gmra.mrb[140].mxu0 %v4510_v24  ;;  %v4522_v45 = vsel %vm4403_vm13, %v4511_v35, %v4521_v10  ;;  %v3454_v57 = vrot.slane %v11747_v4, 1  ;;  %v18460_v35 = vld [vmem:[#allocation5_spill] sm:$0xff]  ;;  %v18464_v24 = vld [vmem:[#allocation10_spill] sm:$0xff] }
 0x308   : > { %5119 = vmatprep.mubr.bf16.mxu0 %v4522_v45  ;;  %v3384_v14 = vpop.permute.xlu1 %3383  ;;  %v13940_v22 = vpop.f32.mrb[96].mxu1 }
 0x309   : > { %v13942_v50 = vpop.f32.mrb[97].mxu1  ;;  %v4031_v55 = vsel %vm494_vm8, %v11746_v19, %v3384_v14 }
 0x30a   : > { %3768 = vrot.lane.b32.xlu1 %v13221_v12, %s11853_s12  ;;  %v13945_v28 = vpop.f32.mrb[98].mxu1  ;;  %v4529_v52 = vrot.slane %v4031_v55, 3  ;;  %v18470_v55 = vld [vmem:[#allocation23_spill] sm:$0xff] }
 0x30b   : > { %3922 = vrot.lane.b32.xlu0 %v13217_v56, %s11853_s12  ;;  %v13951_v56 = vsel %vm2069_vm6, %v3452_v41, %v3454_v57  ;;  %v3597_v5 = vpop.permute.xlu0 %3596  ;;  %v13953_v12 = vpop.f32.mrb[99].mxu1 }
 0x30c   : > { %v4092_v61 = vsel %vm494_vm8, %v13951_v56, %v3597_v5  ;;  %v4530_v58 = vsel %vm4403_vm13, %v4519_v25, %v4529_v52  ;;  %v11749_v5 = vld [vmem:[#allocation2 + $0x80] sm:$0xff] }
 0x30d   : > { %v4531_v29 = vrot.slane %v4092_v61, 3 }
 0x30e   : > { %3770 = vrot.lane.b32.xlu1 %v13236_v31, %s11853_s12  ;;  %v13969_v31 = vsel %vm2069_vm6, %v3454_v57, %v3456_v3 }
 0x30f   : > { %3924 = vrot.lane.b32.xlu0 %v13232_v23, %s11853_s12  ;;  %5120 = vmatmul.mubr.bf16.gmra.mrb[144].mxu0 %v4520_v18  ;;  %v4532_v23 = vsel %vm4403_vm13, %v4521_v10, %v4531_v29  ;;  %v18468_v10 = vld [vmem:[#allocation18_spill] sm:$0xff] }
 0x310   : > { %5127 = vmatprep.mubr.bf16.mxu0 %v4532_v23  ;;  %v3386_v33 = vpop.permute.xlu1 %3385 }
 0x311   : > { %v4033_v15 = vsel %vm494_vm8, %v11747_v4, %v3386_v33  ;;  %v18469_v4 = vld [vmem:[#allocation15_spill] sm:$0xff] }
 0x312   : > { %3772 = vrot.lane.b32.xlu1 %v13251_v37, %s11853_s12  ;;  %v4539_v51 = vrot.slane %v4033_v15, 3  ;;  %v3460_v57 = vrot.slane %v18469_v4, 1  ;;  %v18472_v15 = vld [vmem:[#allocation26_spill] sm:$0xff] }
 0x313   : > { %3926 = vrot.lane.b32.xlu0 %v13247_v53, %s11853_s12  ;;  %v3599_v53 = vpop.permute.xlu0 %3598 }
 0x314   : > { %v4095_v49 = vsel %vm494_vm8, %v13969_v31, %v3599_v53  ;;  %v4540_v17 = vsel %vm4403_vm13, %v4529_v52, %v4539_v51  ;;  %v18471_v52 = vld [vmem:[#allocation24_spill] sm:$0xff]  ;;  %v18473_v53 = vld [vmem:[#allocation27_spill] sm:$0xff] }
 0x315   : > { %v4541_v37 = vrot.slane %v4095_v49, 3 }
 0x316   : > { %3774 = vrot.lane.b32.xlu1 %v13265_v6, %s11853_s12 }
 0x317   : > { %3928 = vrot.lane.b32.xlu0 %v13261_v46, %s11853_s12  ;;  %5128 = vmatmul.mubr.bf16.gmra.mrb[148].mxu0 %v4530_v58  ;;  %v4542_v30 = vsel %vm4403_vm13, %v4531_v29, %v4541_v37  ;;  %v3458_v46 = vrot.slane %v13380_v32, 1 }
 0x318   : > { %5135 = vmatprep.mubr.bf16.mxu0 %v4542_v30  ;;  %v3388_v43 = vpop.permute.xlu1 %3387 }
 0x319   : > { %v4035_v27 = vsel %vm494_vm8, %v11748_v36, %v3388_v43  ;;  %v13986_v6 = vsel %vm2069_vm6, %v3456_v3, %v3458_v46  ;;  %v14025_v23 = vsel %vm2069_vm6, %v3458_v46, %v3460_v57  ;;  %v18475_v46 = vld [vmem:[#allocation28_spill] sm:$0xff] }
 0x31a   : > { %3776 = vrot.lane.b32.xlu1 %v13278_v48, %s11853_s12  ;;  %v4549_v44 = vrot.slane %v4035_v27, 3  ;;  %v18476_v27 = vld [vmem:[#allocation29_spill] sm:$0xff] }
 0x31b   : > { %3930 = vrot.lane.b32.xlu0 %v13274_v63, %s11853_s12  ;;  %v3601_v63 = vpop.permute.xlu0 %3600 }
 0x31c   : > { %v4098_v32 = vsel %vm494_vm8, %v13986_v6, %v3601_v63  ;;  %v4550_v41 = vsel %vm4403_vm13, %v4539_v51, %v4549_v44  ;;  %v3168_v63 = vld [vmem:[#allocation2 + $0xb8] sm:$0x1] }
 0x31d   : > { %v4551_v48 = vrot.slane %v4098_v32, 3 }
 0x31e   : > { %3778 = vrot.lane.b32.xlu1 %v18460_v35, %s11853_s12 }
 0x31f   : > { %3932 = vrot.lane.b32.xlu0 %v13297_v16, %s11853_s12  ;;  %5136 = vmatmul.mubr.bf16.gmra.mrb[152].mxu0 %v4540_v17  ;;  %v4552_v19 = vsel %vm4403_vm13, %v4541_v37, %v4551_v48  ;;  %v18462_v16 = vld [vmem:[#allocation7_spill] sm:$0xff]  ;;  %v18474_v37 = vld [vmem:[#allocation17_spill] sm:$0xff] }
 0x320   : > { %5143 = vmatprep.mubr.bf16.mxu0 %v4552_v19  ;;  %v3462_v51 = vrot.slane %v18474_v37, 1  ;;  %v18477_v19 = vld [vmem:[#allocation31_spill] sm:$0xff] }
 0x322   : > { %3780 = vrot.lane.b32.xlu1 %v18462_v16, %s11853_s12  ;;  %v14043_v32 = vsel %vm2069_vm6, %v3460_v57, %v3462_v51  ;;  %v3750_v16 = vshll.u32 %v3168_v63, 16 }
 0x323   : > { %3934 = vrot.lane.b32.xlu0 %v18461_v34, %s11853_s12 }
 0x324   : > { %v3752_v57 = vrot.slane %v3750_v16, 6 }
 0x326   : > { %3782 = vrot.lane.b32.xlu1 %v18464_v24, %s11853_s12  ;;  %v18478_v24 = vld [vmem:[#allocation21_spill] sm:$0xff] }
 0x327   : > { %3936 = vrot.lane.b32.xlu0 %v18463_v0, %s11853_s12  ;;  %5144 = vmatmul.mubr.bf16.gmra.mrb[156].mxu0 %v4550_v41 }
 0x32a   : > { %3784 = vrot.lane.b32.xlu1 %v18466_v38, %s11853_s12 }
 0x32b   : > { %3938 = vrot.lane.b32.xlu0 %v18465_v47, %s11853_s12  ;;  %v3464_v47 = vrot.slane %v18478_v24, 1 }
 0x32c   : > { %v14010_v25 = vpop.f32.mrb[100].mxu1 }
 0x32d   : > { %v14012_v45 = vpop.f32.mrb[101].mxu1 }
 0x32e   : > { %3786 = vrot.lane.b32.xlu1 %v18468_v10, %s11853_s12  ;;  %v3390_v14 = vpop.permute.xlu1 %3389  ;;  %v14015_v18 = vpop.f32.mrb[102].mxu1 }
 0x32f   : > { %3940 = vrot.lane.b32.xlu0 %v18467_v11, %s11853_s12  ;;  %v4037_v61 = vsel %vm494_vm8, %v11749_v5, %v3390_v14  ;;  %v14020_v29 = vpop.f32.mrb[103].mxu1  ;;  %v14072_v5 = vsel %vm2069_vm6, %v3462_v51, %v3464_v47 }
 0x330   : > { %v4559_v3 = vrot.slane %v4037_v61, 3 }
 0x331   : > { %v3603_v36 = vpop.permute.xlu0 %3602 }
 0x332   : > { %3788 = vrot.lane.b32.xlu1 %v18471_v52, %s11853_s12  ;;  %v4101_v33 = vsel %vm494_vm8, %v14025_v23, %v3603_v36  ;;  %v4560_v30 = vsel %vm4403_vm13, %v4549_v44, %v4559_v3  ;;  %v401_v36 = vld [vmem:[%s18197_s2] sm:$0xff] }
 0x333   : > { %3942 = vrot.lane.b32.xlu0 %v18470_v55, %s11853_s12  ;;  %v4561_v58 = vrot.slane %v4101_v33, 3  ;;  %v403_v33 = vld [vmem:[%s18197_s2 + $0x10] sm:$0xff]  ;;  %vm445_vm3 = vcmp.gt.f32.partialorder %v401_v36, 0.5 }
 0x334   : > { %vm447_vm4 = vcmp.gt.f32.partialorder %v403_v33, 0.5 }
 0x335   : > { %v4562_v49 = vsel %vm4403_vm13, %v4551_v48, %v4561_v58 }
 0x336   : > { %3790 = vrot.lane.b32.xlu1 %v18473_v53, %s11853_s12  ;;  %5151 = vmatprep.mubr.bf16.mxu0 %v4562_v49  ;;  %v14089_v49 = vld [vmem:[#allocation3] sm:$0xff] }
 0x337   : > { %3944 = vrot.lane.b32.xlu0 %v18472_v15, %s11853_s12  ;;  %5152 = vmatmul.mubr.bf16.gmra.mrb[160].mxu0 %v4560_v30  ;;  %v3392_v43 = vpop.permute.xlu1 %3391  ;;  %v18479_v15 = vld [vmem:[#allocation25_spill] sm:$0xff]  ;;  %v405_v30 = vld [vmem:[%s18197_s2 + $0x20] sm:$0xff]  ;;  %v5772_v63 = vsel %vm447_vm4, 1, %v14089_v49 }
 0x338   : > { %v4039_v17 = vsel %vm494_vm8, %v18469_v4, %v3392_v43  ;;  %v3466_v53 = vrot.slane %v18479_v15, 1  ;;  %v5770_v43 = vsel %vm445_vm3, 1, %v14089_v49  ;;  %vm449_vm7 = vcmp.gt.f32.partialorder %v405_v30, 0.5  ;;  %v18480_v30 = vld [vmem:[#allocation30_spill] sm:$0xff] }
 0x339   : > { %v3605_v35 = vpop.permute.xlu0 %3604  ;;  %v4569_v48 = vrot.slane %v4039_v17, 3 }
 0x33a   : > { %3792 = vrot.lane.b32.xlu1 %v18476_v27, %s11853_s12  ;;  %v4104_v44 = vsel %vm494_vm8, %v14043_v32, %v3605_v35  ;;  %v14105_v17 = vsel %vm2069_vm6, %v3464_v47, %v3466_v53  ;;  %v14139_v36 = vsel %vm2069_vm6, %v3466_v53, %v13863_v20  ;;  %v411_v53 = vld [vmem:[%s18197_s2 + $0x50] sm:$0xff] }
 0x33b   : > { %3946 = vrot.lane.b32.xlu0 %v18475_v46, %s11853_s12  ;;  %v4571_v34 = vrot.slane %v4104_v44, 3  ;;  %v4570_v11 = vsel %vm4403_vm13, %v4559_v3, %v4569_v48 }
 0x33d   : > { %v14051_v41 = vpop.f32.mrb[104].mxu1  ;;  %v4572_v0 = vsel %vm4403_vm13, %v4561_v58, %v4571_v34 }
 0x33e   : > { %3794 = vrot.lane.b32.xlu1 %v13838_v54, %s11853_s12  ;;  %5159 = vmatprep.mubr.bf16.mxu0 %v4572_v0  ;;  %v14055_v38 = vpop.f32.mrb[105].mxu1  ;;  %v402_v54 = vld [vmem:[%s18197_s2 + $0x8] sm:$0xff] }
 0x33f   : > { %3948 = vrot.lane.b32.xlu0 %v18477_v19, %s11853_s12  ;;  %5160 = vmatmul.mubr.bf16.gmra.mrb[164].mxu0 %v4570_v11  ;;  %v14060_v4 = vpop.f32.mrb[106].mxu1  ;;  %vm446_vm2 = vcmp.gt.f32.partialorder %v402_v54, 0.5 }
 0x340   : > { %v3394_v10 = vpop.permute.xlu1 %3393  ;;  %v14069_v55 = vpop.f32.mrb[107].mxu1 }
 0x341   : > { %v4041_v14 = vsel %vm494_vm8, %v18474_v37, %v3394_v10  ;;  %v5771_v37 = vsel %vm446_vm2, 1, %v14089_v49  ;;  %v408_v10 = vld [vmem:[%s18197_s2 + $0x38] sm:$0xff] }
 0x342   : > { %3796 = vrot.lane.b32.xlu1 %v13855_v1, %s11853_s12  ;;  %v4579_v61 = vrot.slane %v4041_v14, 3  ;;  %v3753_v1 = vsel %vm3661_vm12, %v13840_v9, %v3752_v57  ;;  %v404_v9 = vld [vmem:[%s18197_s2 + $0x18] sm:$0xff]  ;;  %v409_v14 = vld [vmem:[%s18197_s2 + $0x40] sm:$0xff]  ;;  %vm452_vm2 = vcmp.gt.f32.partialorder %v408_v10, 0.5  ;;  %v414_v10 = vld [vmem:[%s18197_s2 + $0x68] sm:$0xff] }
 0x343   : > { %3950 = vrot.lane.b32.xlu0 %v13846_v21, %s11853_s12  ;;  %v3607_v21 = vpop.permute.xlu0 %3606  ;;  %vm448_vm5 = vcmp.gt.f32.partialorder %v404_v9, 0.5  ;;  %vm453_vm3 = vcmp.gt.f32.partialorder %v409_v14, 0.5 }
 0x344   : > { %v4107_v52 = vsel %vm494_vm8, %v14072_v5, %v3607_v21  ;;  %v5773_v19 = vsel %vm448_vm5, 1, %v14089_v49  ;;  %vm455_vm5 = vcmp.gt.f32.partialorder %v411_v53, 0.5  ;;  %v3163_v53 = vld [vmem:[#allocation2 + $0xb0] sm:$0x7] }
 0x345   : > { %v4581_v3 = vrot.slane %v4107_v52, 3 }
 0x346   : > { %3798 = vrot.lane.b32.xlu1 %v3753_v1, %s11853_s12 }
 0x347   : > { %3952 = vrot.lane.b32.xlu0 %v13850_v7, %s11853_s12  ;;  %v4582_v58 = vsel %vm4403_vm13, %v4571_v34, %v4581_v3  ;;  %v4580_v7 = vsel %vm4403_vm13, %v4569_v48, %v4579_v61  ;;  %v406_v48 = vld [vmem:[%s18197_s2 + $0x28] sm:$0xff]  ;;  %v407_v34 = vld [vmem:[%s18197_s2 + $0x30] sm:$0xff] }
 0x348   : > { %5167 = vmatprep.mubr.bf16.mxu0 %v4582_v58  ;;  %vm450_vm15 = vcmp.gt.f32.partialorder %v406_v48, 0.5  ;;  %vm451_vm1 = vcmp.gt.f32.partialorder %v407_v34, 0.5  ;;  %v413_v48 = vld [vmem:[%s18197_s2 + $0x60] sm:$0xff] }
 0x349   : > { %5168 = vmatmul.mubr.bf16.gmra.mrb[168].mxu0 %v4580_v7  ;;  %v3396_v51 = vpop.permute.xlu1 %3395  ;;  %v5776_v1 = vsel %vm451_vm1, 1, %v14089_v49  ;;  %v5777_v7 = vsel %vm452_vm2, 1, %v14089_v49  ;;  %vm458_vm1 = vcmp.gt.f32.partialorder %v414_v10, 0.5  ;;  %v419_v10 = vld [vmem:[%s18197_s2 + $0x90] sm:$0xff] }
 0x34a   : > { %v4043_v46 = vsel %vm494_vm8, %v18478_v24, %v3396_v51  ;;  %5818 = vperm.xlu1 %11450, %v5771_v37   ;;  %v5774_v24 = vsel %vm449_vm7, 1, %v14089_v49 }
 0x34b   : > { %3954 = vrot.lane.b32.xlu0 %v13793_v59, %s11853_s12  ;;  %v3609_v27 = vpop.permute.xlu0 %3608  ;;  %v4589_v59 = vrot.slane %v4043_v46, 3  ;;  %v3470_v46 = vrot.slane %v18480_v30, 1 }
 0x34c   : > { %v4110_v35 = vsel %vm494_vm8, %v14105_v17, %v3609_v27 }
 0x34d   : > { %v4591_v44 = vrot.slane %v4110_v35, 3  ;;  %v14117_v16 = vpop.f32.mrb[108].mxu1  ;;  %v4590_v11 = vsel %vm4403_vm13, %v4579_v61, %v4589_v59  ;;  %v5775_v61 = vsel %vm450_vm15, 1, %v14089_v49  ;;  %vm457_vm15 = vcmp.gt.f32.partialorder %v413_v48, 0.5 }
 0x34e   : > { %5821 = vperm.xlu1 %11450, %v5772_v63   ;;  %v14121_v47 = vpop.f32.mrb[109].mxu1  ;;  %v412_v63 = vld [vmem:[%s18197_s2 + $0x58] sm:$0xff] }
 0x34f   : > { %5815 = vperm.xlu0 %11449, %v5770_v43   ;;  %v4592_v0 = vsel %vm4403_vm13, %v4581_v3, %v4591_v44  ;;  %v14127_v54 = vpop.f32.mrb[110].mxu1  ;;  %v5778_v43 = vsel %vm453_vm3, 1, %v14089_v49  ;;  %vm456_vm7 = vcmp.gt.f32.partialorder %v412_v63, 0.5 }
 0x350   : > { %5175 = vmatprep.mubr.bf16.mxu0 %v4592_v0  ;;  %v14134_v52 = vpop.f32.mrb[111].mxu1  ;;  %v5780_v0 = vsel %vm455_vm5, 1, %v14089_v49 }
 0x351   : > { %5176 = vmatmul.mubr.bf16.gmra.mrb[172].mxu0 %v4590_v11 }
 0x352   : > { %v3398_v57 = vpop.permute.xlu1 %3397  ;;  %5827 = vperm.xlu1 %11450, %v5774_v24  }
 0x353   : > { %5824 = vperm.xlu0 %11449, %v5773_v19   ;;  %v4045_v21 = vsel %vm494_vm8, %v18479_v15, %v3398_v57  ;;  %v410_v15 = vld [vmem:[%s18197_s2 + $0x48] sm:$0xff] }
 0x354   : > { %v3611_v3 = vpop.permute.xlu0 %3610  ;;  %v4599_v33 = vrot.slane %v4045_v21, 3  ;;  %vm454_vm4 = vcmp.gt.f32.partialorder %v410_v15, 0.5  ;;  %v5782_v15 = vsel %vm457_vm15, 1, %v14089_v49 }
 0x355   : > { %v4113_v58 = vsel %vm494_vm8, %v14139_v36, %v3611_v3 }
 0x356   : > { %v4601_v37 = vrot.slane %v4113_v58, 3  ;;  %5833 = vperm.xlu1 %11450, %v5776_v1   ;;  %v4600_v27 = vsel %vm4403_vm13, %v4589_v59, %v4599_v33  ;;  %v3471_v59 = vsel %vm2069_vm6, %v13863_v20, %v3470_v46  ;;  %v415_v20 = vld [vmem:[%s18197_s2 + $0x70] sm:$0xff] }
 0x357   : > { %5830 = vperm.xlu0 %11449, %v5775_v61   ;;  %v5781_v61 = vsel %vm456_vm7, 1, %v14089_v49  ;;  %vm459_vm2 = vcmp.gt.f32.partialorder %v415_v20, 0.5  ;;  %vm463_vm7 = vcmp.gt.f32.partialorder %v419_v10, 0.5 }
 0x358   : > { %v3400_v9 = vpop.permute.xlu1 %3399  ;;  %v4602_v51 = vsel %vm4403_vm13, %v4591_v44, %v4601_v37  ;;  %v5779_v44 = vsel %vm454_vm4, 1, %v14089_v49 }
 0x359   : > { %5183 = vmatprep.mubr.bf16.mxu0 %v4602_v51  ;;  %v14160_v35 = vsel %vm494_vm8, %v13737_v40, %v3400_v9  ;;  %v416_v51 = vld [vmem:[%s18197_s2 + $0x78] sm:$0xff] }
 0x35a   : > { %5184 = vmatmul.mubr.bf16.gmra.mrb[176].mxu0 %v4600_v27  ;;  %5839 = vperm.xlu1 %11450, %v5778_v43   ;;  %v4609_v40 = vrot.slane %v14160_v35, 3  ;;  %v14171_v11 = vpop.f32.mrb[112].mxu1  ;;  %v417_v27 = vld [vmem:[%s18197_s2 + $0x80] sm:$0xff]  ;;  %vm460_vm3 = vcmp.gt.f32.partialorder %v416_v51, 0.5  ;;  %v5784_v35 = vsel %vm459_vm2, 1, %v14089_v49 }
 0x35b   : > { %5836 = vperm.xlu0 %11449, %v5777_v7   ;;  %v14176_v14 = vpop.f32.mrb[113].mxu1  ;;  %vm461_vm4 = vcmp.gt.f32.partialorder %v417_v27, 0.5  ;;  %v421_v27 = vld [vmem:[%s18197_s2 + $0xa0] sm:$0xff] }
 0x35c   : > { %v3402_v19 = vpop.permute.xlu1 %3401  ;;  %v14181_v21 = vpop.f32.mrb[114].mxu1  ;;  %v4610_v9 = vsel %vm4403_vm13, %v4599_v33, %v4609_v40 }
 0x35d   : > { %v3613_v34 = vpop.permute.xlu0 %3612  ;;  %v14185_v58 = vpop.f32.mrb[115].mxu1  ;;  %v4050_v30 = vsel %vm494_vm8, %v3163_v53, %v3402_v19 }
 0x35e   : > { %v4116_v24 = vsel %vm494_vm8, %v3471_v59, %v3613_v34  ;;  %5845 = vperm.xlu1 %11450, %v5780_v0   ;;  %v4619_v48 = vrot.slane %v4050_v30, 3  ;;  %v18482_v59 = vld [vmem:[#allocation4_spill] sm:$0xff]  ;;  %v418_v0 = vld [vmem:[%s18197_s2 + $0x88] sm:$0xff]  ;;  %v420_v30 = vld [vmem:[%s18197_s2 + $0x98] sm:$0xff] }
 0x35f   : > { %v4611_v57 = vrot.slane %v4116_v24, 3  ;;  %5842 = vperm.xlu0 %11449, %v5779_v44   ;;  %v18481_v44 = vld [vmem:[#allocation8_spill] sm:$0xff]  ;;  %vm462_vm5 = vcmp.gt.f32.partialorder %v418_v0, 0.5  ;;  %vm464_vm15 = vcmp.gt.f32.partialorder %v420_v30, 0.5 }
 0x360   : > { %v4620_v51 = vsel %vm4403_vm13, %v4609_v40, %v4619_v48  ;;  %v5787_v40 = vsel %vm462_vm5, 1, %v14089_v49 }
 0x361   : > { %v3615_v3 = vpop.permute.xlu0 %3614  ;;  %v4612_v1 = vsel %vm4403_vm13, %v4601_v37, %v4611_v57  ;;  %v3913_v37 = vpop.permute.xlu1 %3912 }
 0x362   : > { %v4119_v7 = vsel %vm494_vm8, %v3470_v46, %v3615_v3  ;;  %5191 = vmatprep.mubr.bf16.mxu0 %v4612_v1  ;;  %v5783_v46 = vsel %vm458_vm1, 1, %v14089_v49  ;;  %5851 = vperm.xlu1 %11450, %v5782_v15   ;;  %v14202_v34 = vsel %vm494_vm8, %v18481_v44, %v3913_v37  ;;  %v5785_v1 = vsel %vm460_vm3, 1, %v14089_v49  ;;  %v11753_v44 = vld [vmem:[#allocation2 + $0x18] sm:$0xff] }
 0x363   : > { %v4621_v43 = vrot.slane %v4119_v7, 3  ;;  %5192 = vmatmul.mubr.bf16.gmra.mrb[180].mxu0 %v4610_v9  ;;  %5848 = vperm.xlu0 %11449, %v5781_v61   ;;  %v11752_v61 = vld [vmem:[#allocation2 + $0x10] sm:$0xff]  ;;  %v4414_v15 = vrot.slane %v14202_v34, 3  ;;  %v5786_v7 = vsel %vm461_vm4, 1, %v14089_v49  ;;  %v3621_v34 = vrot.slane %v11753_v44, 5 }
 0x364   : > { %v3619_v3 = vrot.slane %v11752_v61, 5  ;;  %vm465_vm1 = vcmp.gt.f32.partialorder %v421_v27, 0.5 }
 0x365   : > { %v3911_v63 = vpop.permute.xlu0 %3910  ;;  %v4622_v33 = vsel %vm4403_vm13, %v4611_v57, %v4621_v43  ;;  %v11751_v57 = vld [vmem:[#allocation2 + $0x8] sm:$0xff]  ;;  %v3757_v9 = vpop.permute.xlu1 %3756 }
 0x366   : > { %v4191_v19 = vsel %vm494_vm8, %v18482_v59, %v3911_v63  ;;  %5199 = vmatprep.mubr.bf16.mxu0 %v4622_v33  ;;  %v3618_v20 = vrot.slane %v11751_v57, 5  ;;  %5857 = vperm.xlu1 %11450, %v5784_v35   ;;  %v5788_v35 = vsel %vm463_vm7, 1, %v14089_v49  ;;  %v18483_v59 = vld [vmem:[#allocation11_spill] sm:$0xff] }
 0x367   : > { %v4413_v24 = vrot.slane %v4191_v19, 3  ;;  %5854 = vperm.xlu0 %11449, %v5783_v46  }
 0x368   : > { %v3620_v46 = vsel %vm910_vm0, %v3618_v20, %v3619_v3 }
 0x369   : > { %v3755_v53 = vpop.permute.xlu0 %3754  ;;  %v4415_v37 = vsel %vm4403_vm13, %v4413_v24, %v4414_v15  ;;  %v4125_v63 = vsel %vm494_vm8, %v3620_v46, %v3757_v9  ;;  %v422_v24 = vld [vmem:[%s18197_s2 + $0xa8] sm:$0xff]  ;;  %v424_v46 = vld [vmem:[%s18197_s2 + $0xb8] sm:$0xff] }
 0x36a   : > { %v4122_v43 = vsel %vm494_vm8, %v3618_v20, %v3755_v53  ;;  %5863 = vperm.xlu1 %11450, %v5786_v7   ;;  %v14230_v0 = vpop.f32.mrb[116].mxu1  ;;  %v423_v20 = vld [vmem:[%s18197_s2 + $0xb0] sm:$0xff]  ;;  %v4411_v61 = vrot.slane %v4125_v63, 3  ;;  %v5789_v7 = vsel %vm464_vm15, 1, %v14089_v49  ;;  %vm466_vm2 = vcmp.gt.f32.partialorder %v422_v24, 0.5  ;;  %v425_v63 = vld [vmem:[%s18197_s2 + $0xc0] sm:$0xff] }
 0x36b   : > { %5200 = vmatmul.mubr.bf16.gmra.mrb[184].mxu0 %v4620_v51  ;;  %5860 = vperm.xlu0 %11449, %v5785_v1   ;;  %v4410_v48 = vrot.slane %v4122_v43, 3  ;;  %v14235_v57 = vpop.f32.mrb[117].mxu1  ;;  %v3759_v1 = vpop.permute.xlu1 %3758  ;;  %v5790_v43 = vsel %vm465_vm1, 1, %v14089_v49  ;;  %vm467_vm3 = vcmp.gt.f32.partialorder %v423_v20, 0.5  ;;  %vm468_vm4 = vcmp.gt.f32.partialorder %v424_v46, 0.5  ;;  %v426_v24 = vld [vmem:[%s18197_s2 + $0xc8] sm:$0xff] }
 0x36c   : > { %5240 = vmatprep.mubr.bf16.mxu0 %v4415_v37  ;;  %v14240_v53 = vpop.f32.mrb[118].mxu1  ;;  %v3622_v37 = vsel %vm910_vm0, %v3619_v3, %v3621_v34  ;;  %v5792_v44 = vsel %vm467_vm3, 1, %v14089_v49  ;;  %vm469_vm5 = vcmp.gt.f32.partialorder %v425_v63, 0.5  ;;  %vm470_vm7 = vcmp.gt.f32.partialorder %v426_v24, 0.5 }
 0x36d   : > { %v3915_v33 = vpop.permute.xlu0 %3914  ;;  %v14244_v51 = vpop.f32.mrb[119].mxu1  ;;  %v4412_v27 = vsel %vm4403_vm13, %v4410_v48, %v4411_v61 }
 0x36e   : > { %v4195_v19 = vsel %vm494_vm8, %v18483_v59, %v3915_v33  ;;  %5869 = vperm.xlu1 %11450, %v5788_v35   ;;  %v18484_v33 = vld [vmem:[#allocation14_spill] sm:$0xff]  ;;  %v5791_v35 = vsel %vm466_vm2, 1, %v14089_v49 }
 0x36f   : > { %v4425_v10 = vrot.slane %v4195_v19, 3  ;;  %5866 = vperm.xlu0 %11449, %v5787_v40   ;;  %v14253_v40 = vsel %vm494_vm8, %v3622_v37, %v3759_v1  ;;  %v427_v1 = vld [vmem:[%s18197_s2 + $0xd0] sm:$0xff]  ;;  %v5794_v37 = vsel %vm469_vm5, 1, %v14089_v49 }
 0x370   : > { %v4423_v59 = vrot.slane %v14253_v40, 3  ;;  %v428_v40 = vld [vmem:[%s18197_s2 + $0xd8] sm:$0xff]  ;;  %vm471_vm15 = vcmp.gt.f32.partialorder %v427_v1, 0.5 }
 0x371   : > { %v3917_v9 = vpop.permute.xlu0 %3916  ;;  %v4426_v30 = vsel %vm4403_vm13, %v4414_v15, %v4425_v10  ;;  %v11754_v15 = vld [vmem:[#allocation2 + $0x20] sm:$0xff]  ;;  %vm472_vm1 = vcmp.gt.f32.partialorder %v428_v40, 0.5 }
 0x372   : > { %v14261_v3 = vsel %vm494_vm8, %v18484_v33, %v3917_v9  ;;  %5875 = vperm.xlu1 %11450, %v5790_v43   ;;  %v3623_v19 = vrot.slane %v11754_v15, 5  ;;  %v5793_v9 = vsel %vm468_vm4, 1, %v14089_v49  ;;  %v4424_v46 = vsel %vm4403_vm13, %v4411_v61, %v4423_v59  ;;  %v429_v33 = vld [vmem:[%s18197_s2 + $0xe0] sm:$0xff] }
 0x373   : > { %5241 = vmatmul.mubr.bf16.vlgmr.msra.gmra.mrb[100].mxu0 %v4412_v27  ;;  %5872 = vperm.xlu0 %11449, %v5789_v7   ;;  %v4435_v20 = vrot.slane %v14261_v3, 3  ;;  %v3761_v7 = vpop.permute.xlu1 %3760  ;;  %v18485_v3 = vld [vmem:[#allocation19_spill] sm:$0xff]  ;;  %v5795_v61 = vsel %vm470_vm7, 1, %v14089_v49  ;;  %vm473_vm2 = vcmp.gt.f32.partialorder %v429_v33, 0.5  ;;  %v5797_v40 = vsel %vm472_vm1, 1, %v14089_v49 }
 0x374   : > { %5248 = vmatprep.mubr.bf16.mxu0 %v4426_v30  ;;  %v3624_v27 = vsel %vm910_vm0, %v3621_v34, %v3623_v19  ;;  %v5798_v33 = vsel %vm473_vm2, 1, %v14089_v49 }
 0x375   : > { %v3919_v48 = vpop.permute.xlu0 %3918  ;;  %v14281_v30 = vsel %vm494_vm8, %v3624_v27, %v3761_v7  ;;  %v4436_v63 = vsel %vm4403_vm13, %v4425_v10, %v4435_v20  ;;  %v11755_v10 = vld [vmem:[#allocation2 + $0x28] sm:$0xff] }
 0x376   : > { %5881 = vperm.xlu1 %11450, %v5792_v44   ;;  %v14289_v34 = vsel %vm494_vm8, %v18485_v3, %v3919_v48  ;;  %v5796_v44 = vsel %vm471_vm15, 1, %v14089_v49  ;;  %v4433_v15 = vrot.slane %v14281_v30, 3  ;;  %v3625_v24 = vrot.slane %v11755_v10, 5  ;;  %v430_v7 = vld [vmem:[%s18197_s2 + $0xe8] sm:$0xff] }
 0x377   : > { %5878 = vperm.xlu0 %11449, %v5791_v35   ;;  %v4445_v48 = vrot.slane %v14289_v34, 3  ;;  %v3763_v27 = vpop.permute.xlu1 %3762  ;;  %vm474_vm3 = vcmp.gt.f32.partialorder %v430_v7, 0.5  ;;  %v433_v7 = vld [vmem:[%s18197_s2 + $0x100] sm:$0xff] }
 0x378   : > { %v3626_v3 = vsel %vm910_vm0, %v3623_v19, %v3625_v24  ;;  %v4434_v34 = vsel %vm4403_vm13, %v4423_v59, %v4433_v15  ;;  %v5799_v59 = vsel %vm474_vm3, 1, %v14089_v49  ;;  %vm477_vm7 = vcmp.gt.f32.partialorder %v433_v7, 0.5  ;;  %v436_v7 = vld [vmem:[%s18197_s2 + $0x118] sm:$0xff] }
 0x379   : > { %v3921_v43 = vpop.permute.xlu0 %3920  ;;  %v4134_v10 = vsel %vm494_vm8, %v3626_v3, %v3763_v27  ;;  %v11756_v3 = vld [vmem:[#allocation2 + $0x30] sm:$0xff]  ;;  %vm480_vm2 = vcmp.gt.f32.partialorder %v436_v7, 0.5 }
 0x37a   : > { %5887 = vperm.xlu1 %11450, %v5794_v37   ;;  %v14294_v1 = vpop.f32.mrb[120].mxu1  ;;  %v431_v37 = vld [vmem:[%s18197_s2 + $0xf0] sm:$0xff]  ;;  %v4201_v19 = vsel %vm494_vm8, %v18489_v42, %v3921_v43  ;;  %v4443_v27 = vrot.slane %v4134_v10, 3  ;;  %v5802_v10 = vsel %vm477_vm7, 1, %v14089_v49  ;;  %v5805_v7 = vsel %vm480_vm2, 1, %v14089_v49 }
 0x37b   : > { %5249 = vmatmul.mubr.bf16.gmra.mrb[104].mxu0 %v4424_v46  ;;  %5884 = vperm.xlu0 %11449, %v5793_v9   ;;  %18486 = vst [vmem:[#allocation5_spill] sm:$0xff] %v14294_v1  ;;  %v14300_v9 = vpop.f32.mrb[121].mxu1  ;;  %vm475_vm4 = vcmp.gt.f32.partialorder %v431_v37, 0.5  ;;  %v435_v42 = vld [vmem:[%s18197_s2 + $0x110] sm:$0xff]  ;;  %v3765_v43 = vpop.permute.xlu1 %3764 }
 0x37c   : > { %5256 = vmatprep.mubr.bf16.mxu0 %v4436_v63  ;;  %v14305_v46 = vpop.f32.mrb[122].mxu1  ;;  %v5800_v37 = vsel %vm475_vm4, 1, %v14089_v49  ;;  %vm479_vm1 = vcmp.gt.f32.partialorder %v435_v42, 0.5 }
 0x37d   : > { %v3923_v35 = vpop.permute.xlu0 %3922  ;;  %18487 = vst [vmem:[#allocation6_spill] sm:$0xff] %v14305_v46  ;;  %v14310_v63 = vpop.f32.mrb[123].mxu1 }
 0x37e   : > { %5893 = vperm.xlu1 %11450, %v5796_v44   ;;  %18488 = vst [vmem:[#allocation7_spill] sm:$0xff] %v14310_v63  ;;  %v4446_v44 = vsel %vm4403_vm13, %v4435_v20, %v4445_v48  ;;  %v3627_v20 = vrot.slane %v11756_v3, 5  ;;  %v4444_v3 = vsel %vm4403_vm13, %v4433_v15, %v4443_v27 }
 0x37f   : > { %5890 = vperm.xlu0 %11449, %v5795_v61   ;;  %v432_v61 = vld [vmem:[%s18197_s2 + $0xf8] sm:$0xff] }
 0x380   : > { %vm476_vm5 = vcmp.gt.f32.partialorder %v432_v61, 0.5 }
 0x381   : > { %v14308_v30 = vpop.permute.xlu0 %3924 }
 0x382   : > { %5899 = vperm.xlu1 %11450, %v5798_v33   ;;  %v5801_v33 = vsel %vm476_vm5, 1, %v14089_v49 }
 0x383   : > { %5257 = vmatmul.mubr.bf16.gmra.mrb[108].mxu0 %v4434_v34  ;;  %5896 = vperm.xlu0 %11449, %v5797_v40   ;;  %v434_v40 = vld [vmem:[%s18197_s2 + $0x108] sm:$0xff]  ;;  %v4455_v34 = vrot.slane %v4201_v19, 3 }
 0x384   : > { %5264 = vmatprep.mubr.bf16.mxu0 %v4446_v44  ;;  %vm478_vm15 = vcmp.gt.f32.partialorder %v434_v40, 0.5  ;;  %v3628_v44 = vsel %vm910_vm0, %v3625_v24, %v3627_v20  ;;  %v18490_v40 = vld [vmem:[#allocation22_spill] sm:$0xff] }
 0x385   : > { %v14326_v46 = vpop.permute.xlu0 %3926  ;;  %v14345_v19 = vsel %vm494_vm8, %v3628_v44, %v3765_v43  ;;  %v14353_v24 = vsel %vm494_vm8, %v18490_v40, %v3923_v35  ;;  %v5803_v15 = vsel %vm478_vm15, 1, %v14089_v49  ;;  %v5804_v43 = vsel %vm479_vm1, 1, %v14089_v49 }
 0x386   : > { %5905 = vperm.xlu1 %11450, %v5800_v37   ;;  %v437_v37 = vld [vmem:[%s18197_s2 + $0x120] sm:$0xff]  ;;  %v4465_v35 = vrot.slane %v14353_v24, 3  ;;  %v440_v24 = vld [vmem:[%s18197_s2 + $0x138] sm:$0xff] }
 0x387   : > { %5902 = vperm.xlu0 %11449, %v5799_v59   ;;  %v4456_v59 = vsel %vm4403_vm13, %v4445_v48, %v4455_v34  ;;  %v4453_v48 = vrot.slane %v14345_v19, 3  ;;  %vm481_vm3 = vcmp.gt.f32.partialorder %v437_v37, 0.5  ;;  %vm484_vm7 = vcmp.gt.f32.partialorder %v440_v24, 0.5 }
 0x388   : > { %v5806_v19 = vsel %vm481_vm3, 1, %v14089_v49  ;;  %v5809_v1 = vsel %vm484_vm7, 1, %v14089_v49 }
 0x389   : > { %v14336_v61 = vpop.permute.xlu0 %3928  ;;  %v4454_v37 = vsel %vm4403_vm13, %v4443_v27, %v4453_v48  ;;  %v14386_v27 = vsel %vm494_vm8, %v13784_v62, %v14308_v30  ;;  %v11758_v30 = vld [vmem:[#allocation2 + $0x40] sm:$0xff] }
 0x38a   : > { %5911 = vperm.xlu1 %11450, %v5802_v10   ;;  %v439_v10 = vld [vmem:[%s18197_s2 + $0x130] sm:$0xff] }
 0x38b   : > { %5265 = vmatmul.mubr.bf16.gmra.mrb[112].mxu0 %v4444_v3  ;;  %5908 = vperm.xlu0 %11449, %v5801_v33   ;;  %v11757_v33 = vld [vmem:[#allocation2 + $0x38] sm:$0xff]  ;;  %v438_v3 = vld [vmem:[%s18197_s2 + $0x128] sm:$0xff]  ;;  %vm483_vm5 = vcmp.gt.f32.partialorder %v439_v10, 0.5 }
 0x38c   : > { %5272 = vmatprep.mubr.bf16.mxu0 %v4456_v59  ;;  %v3629_v44 = vrot.slane %v11757_v33, 5  ;;  %v3767_v59 = vpop.permute.xlu1 %3766  ;;  %vm482_vm4 = vcmp.gt.f32.partialorder %v438_v3, 0.5  ;;  %v441_v3 = vld [vmem:[%s18197_s2 + $0x140] sm:$0xff] }
 0x38d   : > { %v14356_v42 = vpop.permute.xlu0 %3930  ;;  %v11504_v10 = vld [vmem:[%s18203_s8 + $0x100] ss:$8 sps:$4 sm:$0xff]   ;;  %vm485_vm15 = vcmp.gt.f32.partialorder %v441_v3, 0.5 }
 0x38e   : > { %5917 = vperm.xlu1 %11450, %v5804_v43   ;;  %v3630_v33 = vsel %vm910_vm0, %v3627_v20, %v3629_v44  ;;  %v4466_v43 = vsel %vm4403_vm13, %v4455_v34, %v4465_v35  ;;  %v5807_v20 = vsel %vm482_vm4, 1, %v14089_v49  ;;  %v11506_v34 = vld [vmem:[%s18203_s8 + $0x104] ss:$8 sps:$4 sm:$0xff]  }
 0x38f   : > { %5914 = vperm.xlu0 %11449, %v5803_v15   ;;  %v14377_v15 = vsel %vm494_vm8, %v3630_v33, %v3767_v59  ;;  %v3631_v33 = vrot.slane %v11758_v30, 5  ;;  %8664 = vmatprep.subr.bf16.mxu1 %v11506_v34  ;;  %v5810_v30 = vsel %vm485_vm15, 1, %v14089_v49 }
 0x390   : > { %v4463_v62 = vrot.slane %v14377_v15, 3  ;;  %8665 = vmatpush1.bf16.msra.mxu1 %v11504_v10  ;;  %v3769_v24 = vpop.permute.xlu1 %3768 }
 0x391   : > { %v14368_v40 = vpop.permute.xlu0 %3932  ;;  %v3632_v3 = vsel %vm910_vm0, %v3629_v44, %v3631_v33  ;;  %v14428_v44 = vsel %vm494_vm8, %v13882_v2, %v14326_v46  ;;  %v11510_v2 = vld [vmem:[%s18203_s8 + $0x120] ss:$8 sps:$4 sm:$0xff]  }
 0x392   : > { %5923 = vperm.xlu1 %11450, %v5806_v19   ;;  %v442_v19 = vld [vmem:[%s18197_s2 + $0x148] sm:$0xff]  ;;  %v4464_v34 = vsel %vm4403_vm13, %v4453_v48, %v4463_v62  ;;  %v11509_v48 = vld [vmem:[%s18203_s8 + $0x114] ss:$8 sps:$4 sm:$0xff]  }
 0x393   : > { %5273 = vmatmul.mubr.bf16.gmra.mrb[116].mxu0 %v4454_v37  ;;  %5920 = vperm.xlu0 %11449, %v5805_v7   ;;  %v5808_v7 = vsel %vm483_vm5, 1, %v14089_v49  ;;  %v4475_v37 = vrot.slane %v14386_v27, 3  ;;  %vm486_vm1 = vcmp.gt.f32.partialorder %v442_v19, 0.5  ;;  %v444_v27 = vld [vmem:[%s18197_s2 + $0x158] sm:$0xff] }
 0x394   : > { %5280 = vmatprep.mubr.bf16.mxu0 %v4466_v43  ;;  %v443_v43 = vld [vmem:[%s18197_s2 + $0x150] sm:$0xff]  ;;  %v5811_v19 = vsel %vm486_vm1, 1, %v14089_v49  ;;  %vm488_vm3 = vcmp.gt.f32.partialorder %v444_v27, 0.5  ;;  %8666 = vmatprep.subr.bf16.mxu1 %v11509_v48  ;;  %v11518_v27 = vld [vmem:[%s18203_s8 + $0x4] ss:$8 sps:$4 sm:$0xff]  }
 0x395   : > { %v14395_v59 = vpop.permute.xlu0 %3934  ;;  %vm487_vm2 = vcmp.gt.f32.partialorder %v443_v43, 0.5  ;;  %v4476_v10 = vsel %vm4403_vm13, %v4465_v35, %v4475_v37  ;;  %v11759_v35 = vld [vmem:[#allocation2 + $0x48] sm:$0xff]  ;;  %v4485_v43 = vrot.slane %v14428_v44, 3  ;;  %8411 = vmatprep.subr.bf16.mxu0 %v11518_v27 }
 0x396   : > { %5929 = vperm.xlu1 %11450, %v5808_v7   ;;  %v11507_v7 = vld [vmem:[%s18203_s8 + $0x110] ss:$8 sps:$4 sm:$0xff]   ;;  %v5812_v63 = vsel %vm487_vm2, 1, %v14089_v49  ;;  %v11530_v27 = vld [vmem:[%s18203_s8 + $0x24] ss:$8 sps:$4 sm:$0xff]  }
 0x397   : > { %5926 = vperm.xlu0 %11449, %v5807_v20   ;;  %v14416_v20 = vsel %vm494_vm8, %v3632_v3, %v3769_v24  ;;  %v3633_v24 = vrot.slane %v11759_v35, 5  ;;  %8667 = vmatpush1.bf16.msra.mxu1 %v11507_v7  ;;  %v3771_v35 = vpop.permute.xlu1 %3770  ;;  %v11515_v7 = vld [vmem:[%s18203_s8 + $0x134] ss:$8 sps:$4 sm:$0xff]  }
 0x398   : > { %v4473_v46 = vrot.slane %v14416_v20, 3  ;;  %v5813_v20 = vsel %vm488_vm3, 1, %v14089_v49 }
 0x399   : > { %v14407_v15 = vpop.permute.xlu0 %3936 }
 0x39a   : > { %5935 = vperm.xlu1 %11450, %v5810_v30   ;;  %v4474_v49 = vsel %vm4403_vm13, %v4463_v62, %v4473_v46  ;;  %v11521_v62 = vld [vmem:[%s18203_s8 + $0x144] ss:$8 sps:$4 sm:$0xff]  }
 0x39b   : > { %5281 = vmatmul.mubr.bf16.gmra.mrb[120].mxu0 %v4464_v34  ;;  %5932 = vperm.xlu0 %11449, %v5809_v1   ;;  %v11512_v1 = vld [vmem:[%s18203_s8 + $0x124] ss:$8 sps:$4 sm:$0xff]   ;;  %v14436_v34 = vpop.f32.mrb[124].mxu1 }
 0x39c   : > { %5288 = vmatprep.mubr.bf16.mxu0 %v4476_v10  ;;  %18491 = vst [vmem:[#allocation9_spill] sm:$0xff] %v14436_v34  ;;  %v14444_v30 = vpop.f32.mrb[125].mxu1  ;;  %v11516_v10 = vld [vmem:[%s18203_s8] ss:$8 sps:$4 sm:$0xff]   ;;  %8668 = vmatprep.subr.bf16.mxu1 %v11512_v1  ;;  %v3634_v1 = vsel %vm910_vm0, %v3631_v33, %v3633_v24  ;;  %v14485_v33 = vsel %vm494_vm8, %v13897_v60, %v14336_v61  ;;  %v11536_v60 = vld [vmem:[%s18203_s8 + $0x34] ss:$8 sps:$4 sm:$0xff]  }
 0x39d   : > { %v14434_v3 = vpop.permute.xlu0 %3938  ;;  %18492 = vst [vmem:[#allocation10_spill] sm:$0xff] %v14444_v30  ;;  %v14453_v48 = vpop.f32.mrb[126].mxu1  ;;  %v11524_v30 = vld [vmem:[%s18203_s8 + $0x14] ss:$8 sps:$4 sm:$0xff]   ;;  %8412 = vmatpush1.bf16.msra.mxu0 %v11516_v10  ;;  %8669 = vmatpush1.bf16.msra.mxu1 %v11510_v2  ;;  %v4146_v10 = vsel %vm494_vm8, %v3634_v1, %v3771_v35  ;;  %v11519_v1 = vld [vmem:[%s18203_s8 + $0x140] ss:$8 sps:$4 sm:$0xff]  }
 0x39e   : > { %18493 = vst [vmem:[#allocation12_spill] sm:$0xff] %v14453_v48  ;;  %v14455_v34 = vpop.f32.mrb[127].mxu1  ;;  %5941 = vperm.xlu1 %11450, %v5812_v63   ;;  %v11513_v63 = vld [vmem:[%s18203_s8 + $0x130] ss:$8 sps:$4 sm:$0xff]   ;;  %8413 = vmatprep.subr.bf16.mxu0 %v11524_v30  ;;  %v4486_v48 = vsel %vm4403_vm13, %v4475_v37, %v4485_v43  ;;  %v11528_v30 = vld [vmem:[%s18203_s8 + $0x20] ss:$8 sps:$4 sm:$0xff]  }
 0x39f   : > { %5938 = vperm.xlu0 %11449, %v5811_v19   ;;  %18494 = vst [vmem:[#allocation13_spill] sm:$0xff] %v14455_v34  ;;  %v11522_v19 = vld [vmem:[%s18203_s8 + $0x10] ss:$8 sps:$4 sm:$0xff]   ;;  %8670 = vmatprep.subr.bf16.mxu1 %v11515_v7  ;;  %v4483_v37 = vrot.slane %v4146_v10, 3  ;;  %v4495_v61 = vrot.slane %v14485_v33, 3  ;;  %v3773_v7 = vpop.permute.xlu1 %3772 }
 0x3a0   : > { %v11760_v35 = vld [vmem:[#allocation2 + $0x50] sm:$0xff] }
 0x3a1   : > { %v14464_v44 = vpop.permute.xlu0 %3940  ;;  %8414 = vmatpush1.bf16.msra.mxu0 %v11522_v19  ;;  %8671 = vmatpush1.bf16.msra.mxu1 %v11513_v63  ;;  %v11525_v10 = vld [vmem:[%s18203_s8 + $0x150] ss:$8 sps:$4 sm:$0xff]  }
 0x3a2   : > { %8415 = vmatprep.subr.bf16.mxu0 %v11530_v27  ;;  %8672 = vmatprep.subr.bf16.mxu1 %v11521_v62  ;;  %v4484_v27 = vsel %vm4403_vm13, %v4473_v46, %v4483_v37  ;;  %v11539_v62 = vld [vmem:[%s18203_s8 + $0x44] ss:$8 sps:$4 sm:$0xff]   ;;  %v14525_v46 = vsel %vm494_vm8, %v13913_v13, %v14356_v42  ;;  %v11531_v13 = vld [vmem:[%s18203_s8 + $0x160] ss:$8 sps:$4 sm:$0xff]   ;;  %v11545_v42 = vld [vmem:[%s18203_s8 + $0x54] ss:$8 sps:$4 sm:$0xff]  }
 0x3a3   : > { %5289 = vmatmul.mubr.bf16.gmra.mrb[124].mxu0 %v4474_v49  ;;  %5944 = vperm.xlu0 %11449, %v5813_v20   ;;  %v3635_v20 = vrot.slane %v11760_v35, 5  ;;  %v11534_v49 = vld [vmem:[%s18203_s8 + $0x30] ss:$8 sps:$4 sm:$0xff]  }
 0x3a4   : > { %5296 = vmatprep.mubr.bf16.mxu0 %v4486_v48  ;;  %v11527_v48 = vld [vmem:[%s18203_s8 + $0x154] ss:$8 sps:$4 sm:$0xff]  }
 0x3a5   : > { %v14487_v2 = vpop.permute.xlu0 %3942  ;;  %8416 = vmatpush1.bf16.msra.mxu0 %v11528_v30  ;;  %v3636_v63 = vsel %vm910_vm0, %v3633_v24, %v3635_v20  ;;  %8673 = vmatpush1.bf16.msra.mxu1 %v11519_v1  ;;  %v4496_v30 = vsel %vm4403_vm13, %v4485_v43, %v4495_v61  ;;  %v11533_v24 = vld [vmem:[%s18203_s8 + $0x164] ss:$8 sps:$4 sm:$0xff]   ;;  %v11761_v35 = vld [vmem:[#allocation2 + $0x58] sm:$0xff]  ;;  %v11537_v43 = vld [vmem:[%s18203_s8 + $0x40] ss:$8 sps:$4 sm:$0xff]  }
 0x3a6   : > { %8417 = vmatprep.subr.bf16.mxu0 %v11536_v60  ;;  %v14516_v33 = vsel %vm494_vm8, %v3636_v63, %v3773_v7  ;;  %8674 = vmatprep.subr.bf16.mxu1 %v11527_v48  ;;  %v3637_v1 = vrot.slane %v11761_v35, 5 }
 0x3a7   : > { %v4493_v48 = vrot.slane %v14516_v33, 3  ;;  %v11542_v33 = vld [vmem:[%s18203_s8 + $0x174] ss:$8 sps:$4 sm:$0xff]  }
 0x3a9   : > { %v14502_v19 = vpop.permute.xlu0 %3944  ;;  %8418 = vmatpush1.bf16.msra.mxu0 %v11534_v49  ;;  %8675 = vmatpush1.bf16.msra.mxu1 %v11525_v10  ;;  %v4505_v49 = vrot.slane %v14525_v46, 3  ;;  %v4494_v46 = vsel %vm4403_vm13, %v4483_v37, %v4493_v48  ;;  %v11548_v37 = vld [vmem:[%s18203_s8 + $0x184] ss:$8 sps:$4 sm:$0xff]  }
 0x3aa   : > { %8419 = vmatprep.subr.bf16.mxu0 %v11539_v62  ;;  %8676 = vmatprep.subr.bf16.mxu1 %v11533_v24  ;;  %v11543_v62 = vld [vmem:[%s18203_s8 + $0x50] ss:$8 sps:$4 sm:$0xff]  }
 0x3ab   : > { %5297 = vmatmul.mubr.bf16.gmra.mrb[128].mxu0 %v4484_v27  ;;  %v11540_v24 = vld [vmem:[%s18203_s8 + $0x170] ss:$8 sps:$4 sm:$0xff]  }
 0x3ac   : > { %5304 = vmatprep.mubr.bf16.mxu0 %v4496_v30  ;;  %v3775_v30 = vpop.permute.xlu1 %3774 }
 0x3ad   : > { %v14527_v60 = vpop.permute.xlu0 %3946  ;;  %v14529_v7 = vpop.f32.mrb[128].mxu1  ;;  %8420 = vmatpush1.bf16.msra.mxu0 %v11537_v43  ;;  %8677 = vmatpush1.bf16.msra.mxu1 %v11531_v13  ;;  %v11551_v43 = vld [vmem:[%s18203_s8 + $0x64] ss:$8 sps:$4 sm:$0xff]  }
 0x3ae   : > { %18495 = vst [vmem:[#allocation16_spill] sm:$0xff] %v14529_v7  ;;  %v14535_v63 = vpop.f32.mrb[129].mxu1  ;;  %v3638_v7 = vsel %vm910_vm0, %v3635_v20, %v3637_v1  ;;  %8421 = vmatprep.subr.bf16.mxu0 %v11545_v42  ;;  %8678 = vmatprep.subr.bf16.mxu1 %v11542_v33  ;;  %v4213_v20 = vsel %vm494_vm8, %v13929_v8, %v14368_v40 }
 0x3af   : > { %18496 = vst [vmem:[#allocation18_spill] sm:$0xff] %v14535_v63  ;;  %v14544_v27 = vpop.f32.mrb[130].mxu1  ;;  %v4506_v63 = vsel %vm4403_vm13, %v4495_v61, %v4505_v49  ;;  %v11762_v61 = vld [vmem:[#allocation2 + $0x60] sm:$0xff]  ;;  %v4515_v34 = vrot.slane %v4213_v20, 3 }
 0x3b0   : > { %18497 = vst [vmem:[#allocation15_spill] sm:$0xff] %v14544_v27  ;;  %v14549_v10 = vpop.f32.mrb[131].mxu1  ;;  %v14558_v27 = vld [vmem:[#allocation2 + $0xb8] sm:$0xf]  ;;  %v3639_v33 = vrot.slane %v11762_v61, 5  ;;  %v3777_v8 = vpop.permute.xlu1 %3776 }
 0x3b1   : > { %18498 = vst [vmem:[#allocation23_spill] sm:$0xff] %v14549_v10  ;;  %v14551_v35 = vpop.permute.xlu0 %3948  ;;  %v4152_v10 = vsel %vm494_vm8, %v3638_v7, %v3775_v30  ;;  %v18235_v42 = vrot.slane %v14558_v27, 1  ;;  %8422 = vmatpush1.bf16.msra.mxu0 %v11543_v62  ;;  %v11549_v7 = vld [vmem:[%s18203_s8 + $0x60] ss:$8 sps:$4 sm:$0xff]   ;;  %8679 = vmatpush1.bf16.msra.mxu1 %v11540_v24 }
 0x3b2   : > { %v4503_v30 = vrot.slane %v4152_v10, 3  ;;  %8423 = vmatprep.subr.bf16.mxu0 %v11551_v43  ;;  %8680 = vmatprep.subr.bf16.mxu1 %v11548_v37  ;;  %v3640_v24 = vsel %vm910_vm0, %v3637_v1, %v3639_v33  ;;  %v4215_v1 = vsel %vm494_vm8, %v13951_v56, %v14395_v59 }
 0x3b3   : > { %5305 = vmatmul.mubr.bf16.gmra.mrb[132].mxu0 %v4494_v46  ;;  %v11546_v46 = vld [vmem:[%s18203_s8 + $0x180] ss:$8 sps:$4 sm:$0xff]   ;;  %v4155_v37 = vsel %vm494_vm8, %v3640_v24, %v3777_v8 }
 0x3b4   : > { %5312 = vmatprep.mubr.bf16.mxu0 %v4506_v63  ;;  %v18499_v63 = vrot.slane %v13791_v26, 1  ;;  %v4504_v43 = vsel %vm4403_vm13, %v4493_v48, %v4503_v30  ;;  %v4513_v8 = vrot.slane %v4155_v37, 3  ;;  %v3779_v24 = vpop.permute.xlu1 %3778  ;;  %v4217_v37 = vsel %vm494_vm8, %v13969_v31, %v14407_v15 }
 0x3b5   : > { %v3951_v13 = vpop.permute.xlu0 %3950  ;;  %8424 = vmatpush1.bf16.msra.mxu0 %v11549_v7  ;;  %8681 = vmatpush1.bf16.msra.mxu1 %v11546_v46  ;;  %v4219_v15 = vsel %vm494_vm8, %v13986_v6, %v14434_v3  ;;  %v11552_v6 = vld [vmem:[%s18203_s8 + $0x70] ss:$8 sps:$4 sm:$0xff]   ;;  %v11554_v3 = vld [vmem:[%s18203_s8 + $0x74] ss:$8 sps:$4 sm:$0xff]  }
 0x3b6   : > { %v14583_v40 = vsel %vm494_vm8, %v13877_v39, %v3951_v13  ;;  %v3807_v10 = vsel %vm2069_vm6, %v18499_v63, %v18235_v42  ;;  %v4516_v13 = vsel %vm4403_vm13, %v4505_v49, %v4515_v34  ;;  %v11763_v63 = vld [vmem:[#allocation2 + $0x68] sm:$0xff]  ;;  %v4514_v59 = vsel %vm4403_vm13, %v4503_v30, %v4513_v8  ;;  %8425 = vmatprep.subr.bf16.mxu0 %v11554_v3 }
 0x3b7   : > { %v18237_v39 = vrot.slane %v14583_v40, 3  ;;  %v11572_v3 = vld [vmem:[%s18203_s8 + $0xa4] ss:$8 sps:$4 sm:$0xff]  }
 0x3b9   : > { %v3953_v62 = vpop.permute.xlu0 %3952  ;;  %8426 = vmatpush1.bf16.msra.mxu0 %v11552_v6 }
 0x3ba   : > { %v14592_v61 = vsel %vm494_vm8, %v3807_v10, %v3953_v62  ;;  %v3641_v10 = vrot.slane %v11763_v63, 5  ;;  %v4525_v62 = vrot.slane %v4215_v1, 3 }
 0x3bb   : > { %v18236_v20 = vrot.slane %v14592_v61, 3  ;;  %5313 = vmatmul.mubr.bf16.gmra.mrb[136].mxu0 %v4504_v43  ;;  %v14598_v26 = vpop.f32.mrb[132].mxu1 }
 0x3bc   : > { %5320 = vmatprep.mubr.bf16.mxu0 %v4516_v13  ;;  %v14604_v7 = vpop.f32.mrb[133].mxu1  ;;  %v3642_v56 = vsel %vm910_vm0, %v3639_v33, %v3641_v10  ;;  %v4526_v42 = vsel %vm4403_vm13, %v4515_v34, %v4525_v62  ;;  %v11764_v33 = vld [vmem:[#allocation2 + $0x70] sm:$0xff] }
 0x3bd   : > { %v14606_v48 = vpop.f32.mrb[134].mxu1  ;;  %v14613_v46 = vsel %vm4403_vm13, %v18237_v39, %v18236_v20  ;;  %v4158_v43 = vsel %vm494_vm8, %v3642_v56, %v3779_v24  ;;  %v3643_v39 = vrot.slane %v11764_v33, 5  ;;  %v4535_v24 = vrot.slane %v4217_v37, 3  ;;  %v3781_v56 = vpop.permute.xlu1 %3780 }
 0x3be   : > { %v14615_v49 = vpop.f32.mrb[135].mxu1  ;;  %v4523_v20 = vrot.slane %v4158_v43, 3  ;;  %v11765_v43 = vld [vmem:[#allocation2 + $0x78] sm:$0xff] }
 0x3bf   : > { %v4536_v31 = vsel %vm4403_vm13, %v4525_v62, %v4535_v24  ;;  %v3645_v33 = vrot.slane %v11765_v43, 5  ;;  %v4221_v62 = vsel %vm494_vm8, %v14025_v23, %v14464_v44  ;;  %v11560_v44 = vld [vmem:[%s18203_s8 + $0x84] ss:$8 sps:$4 sm:$0xff]  }
 0x3c0   : > { %v4524_v34 = vsel %vm4403_vm13, %v4513_v8, %v4523_v20  ;;  %8427 = vmatprep.subr.bf16.mxu0 %v11560_v44 }
 0x3c1   : > { %v3783_v37 = vpop.permute.xlu1 %3782 }
 0x3c3   : > { %5321 = vmatmul.mubr.bf16.gmra.mrb[140].mxu0 %v4514_v59  ;;  %v14620_v13 = vpop.f32.mrb[136].mxu1  ;;  %v3644_v59 = vsel %vm910_vm0, %v3641_v10, %v3643_v39 }
 0x3c4   : > { %18500 = vst [vmem:[#allocation24_spill] sm:$0xff] %v14620_v13  ;;  %5328 = vmatprep.mubr.bf16.mxu0 %v4526_v42  ;;  %v14626_v63 = vpop.f32.mrb[137].mxu1  ;;  %v4161_v13 = vsel %vm494_vm8, %v3644_v59, %v3781_v56  ;;  %v11563_v59 = vld [vmem:[%s18203_s8 + $0x1a4] ss:$8 sps:$4 sm:$0xff]  }
 0x3c5   : > { %v14628_v1 = vpop.f32.mrb[138].mxu1  ;;  %v4533_v42 = vrot.slane %v4161_v13, 3 }
 0x3c6   : > { %18501 = vst [vmem:[#allocation26_spill] sm:$0xff] %v14628_v1  ;;  %v14630_v30 = vpop.f32.mrb[139].mxu1  ;;  %v4545_v1 = vrot.slane %v4219_v15, 3  ;;  %v11561_v15 = vld [vmem:[%s18203_s8 + $0x1a0] ss:$8 sps:$4 sm:$0xff]  }
 0x3c7   : > { %18502 = vst [vmem:[#allocation27_spill] sm:$0xff] %v14630_v30  ;;  %v3646_v30 = vsel %vm910_vm0, %v3643_v39, %v3645_v33  ;;  %v4534_v10 = vsel %vm4403_vm13, %v4523_v20, %v4533_v42  ;;  %v11555_v39 = vld [vmem:[%s18203_s8 + $0x190] ss:$8 sps:$4 sm:$0xff]   ;;  %v11557_v20 = vld [vmem:[%s18203_s8 + $0x194] ss:$8 sps:$4 sm:$0xff]  }
 0x3c8   : > { %v4164_v8 = vsel %vm494_vm8, %v3646_v30, %v3783_v37  ;;  %v4546_v56 = vsel %vm4403_vm13, %v4535_v24, %v4545_v1  ;;  %v11766_v30 = vld [vmem:[#allocation2 + $0x80] sm:$0xff]  ;;  %v4555_v24 = vrot.slane %v4221_v62, 3  ;;  %8682 = vmatprep.subr.bf16.mxu1 %v11557_v20  ;;  %v11564_v62 = vld [vmem:[%s18203_s8 + $0x90] ss:$8 sps:$4 sm:$0xff]  }
 0x3c9   : > { %v4543_v13 = vrot.slane %v4164_v8, 3  ;;  %v3647_v23 = vrot.slane %v11766_v30, 5  ;;  %8683 = vmatpush1.bf16.msra.mxu1 %v11555_v39  ;;  %v11570_v30 = vld [vmem:[%s18203_s8 + $0xa0] ss:$8 sps:$4 sm:$0xff]  }
 0x3ca   : > { %8684 = vmatprep.subr.bf16.mxu1 %v11563_v59  ;;  %v4556_v8 = vsel %vm4403_vm13, %v4545_v1, %v4555_v24  ;;  %v11569_v1 = vld [vmem:[%s18203_s8 + $0x1b4] ss:$8 sps:$4 sm:$0xff]  }
 0x3cb   : > { %5329 = vmatmul.mubr.bf16.gmra.mrb[144].mxu0 %v4524_v34  ;;  %v3785_v34 = vpop.permute.xlu1 %3784  ;;  %v3648_v43 = vsel %vm910_vm0, %v3645_v33, %v3647_v23  ;;  %v4544_v37 = vsel %vm4403_vm13, %v4533_v42, %v4543_v13  ;;  %v11566_v33 = vld [vmem:[%s18203_s8 + $0x94] ss:$8 sps:$4 sm:$0xff]   ;;  %v11567_v42 = vld [vmem:[%s18203_s8 + $0x1b0] ss:$8 sps:$4 sm:$0xff]  }
 0x3cc   : > { %5336 = vmatprep.mubr.bf16.mxu0 %v4536_v31  ;;  %v11558_v31 = vld [vmem:[%s18203_s8 + $0x80] ss:$8 sps:$4 sm:$0xff]  }
 0x3cd   : > { %8428 = vmatpush1.bf16.msra.mxu0 %v11558_v31  ;;  %8685 = vmatpush1.bf16.msra.mxu1 %v11561_v15  ;;  %v4225_v15 = vsel %vm494_vm8, %v14072_v5, %v14502_v19  ;;  %v11768_v5 = vld [vmem:[#allocation2 + $0x90] sm:$0xff] }
 0x3ce   : > { %8429 = vmatprep.subr.bf16.mxu0 %v11566_v33  ;;  %8686 = vmatprep.subr.bf16.mxu1 %v11569_v1  ;;  %v3651_v19 = vrot.slane %v11768_v5, 5  ;;  %v11579_v33 = vld [vmem:[%s18203_s8 + $0xc0] ss:$8 sps:$4 sm:$0xff]  }
 0x3cf   : > { %v3787_v20 = vpop.permute.xlu1 %3786 }
 0x3d1   : > { %8430 = vmatpush1.bf16.msra.mxu0 %v11564_v62  ;;  %8687 = vmatpush1.bf16.msra.mxu1 %v11567_v42  ;;  %v11582_v42 = vld [vmem:[%s18203_s8 + $0x1d0] ss:$8 sps:$4 sm:$0xff]  }
 0x3d2   : > { %8431 = vmatprep.subr.bf16.mxu0 %v11572_v3 }
 0x3d3   : > { %5337 = vmatmul.mubr.bf16.gmra.mrb[148].mxu0 %v4534_v10  ;;  %v4167_v10 = vsel %vm494_vm8, %v3648_v43, %v3785_v34  ;;  %v11573_v43 = vld [vmem:[%s18203_s8 + $0xb0] ss:$8 sps:$4 sm:$0xff]   ;;  %v3789_v62 = vpop.permute.xlu1 %3788 }
 0x3d4   : > { %5344 = vmatprep.mubr.bf16.mxu0 %v4546_v56  ;;  %v4223_v56 = vsel %vm494_vm8, %v14043_v32, %v14487_v2  ;;  %v4553_v32 = vrot.slane %v4167_v10, 3  ;;  %v11767_v2 = vld [vmem:[#allocation2 + $0x88] sm:$0xff] }
 0x3d5   : > { %v3649_v6 = vrot.slane %v11767_v2, 5  ;;  %v4565_v39 = vrot.slane %v4223_v56, 3  ;;  %8432 = vmatpush1.bf16.msra.mxu0 %v11570_v30  ;;  %v11581_v10 = vld [vmem:[%s18203_s8 + $0xc4] ss:$8 sps:$4 sm:$0xff]   ;;  %v11584_v56 = vld [vmem:[%s18203_s8 + $0x1d4] ss:$8 sps:$4 sm:$0xff]   ;;  %v4227_v30 = vsel %vm494_vm8, %v14105_v17, %v14527_v60 }
 0x3d6   : > { %v4554_v59 = vsel %vm4403_vm13, %v4543_v13, %v4553_v32  ;;  %v11576_v13 = vld [vmem:[%s18203_s8 + $0x1c0] ss:$8 sps:$4 sm:$0xff]   ;;  %v11769_v60 = vld [vmem:[#allocation2 + $0x98] sm:$0xff] }
 0x3d7   : > { %v3650_v44 = vsel %vm910_vm0, %v3647_v23, %v3649_v6  ;;  %v4566_v31 = vsel %vm4403_vm13, %v4555_v24, %v4565_v39  ;;  %v11575_v23 = vld [vmem:[%s18203_s8 + $0xb4] ss:$8 sps:$4 sm:$0xff]   ;;  %v11578_v24 = vld [vmem:[%s18203_s8 + $0x1c4] ss:$8 sps:$4 sm:$0xff]   ;;  %v3652_v1 = vsel %vm910_vm0, %v3649_v6, %v3651_v19 }
 0x3d8   : > { %v4170_v34 = vsel %vm494_vm8, %v3650_v44, %v3787_v20  ;;  %8433 = vmatprep.subr.bf16.mxu0 %v11575_v23  ;;  %8688 = vmatprep.subr.bf16.mxu1 %v11578_v24  ;;  %v4173_v3 = vsel %vm494_vm8, %v3652_v1, %v3789_v62  ;;  %v11585_v44 = vld [vmem:[%s18203_s8 + $0xd0] ss:$8 sps:$4 sm:$0xff]   ;;  %v11587_v6 = vld [vmem:[%s18203_s8 + $0xd4] ss:$8 sps:$4 sm:$0xff]  }
 0x3d9   : > { %8434 = vmatpush1.bf16.msra.mxu0 %v11573_v43  ;;  %8689 = vmatpush1.bf16.msra.mxu1 %v11576_v13  ;;  %v4573_v17 = vrot.slane %v4173_v3, 3  ;;  %v11591_v43 = vld [vmem:[%s18203_s8 + $0xe0] ss:$8 sps:$4 sm:$0xff]  }
 0x3da   : > { %8435 = vmatprep.subr.bf16.mxu0 %v11581_v10  ;;  %8690 = vmatprep.subr.bf16.mxu1 %v11584_v56  ;;  %v4229_v10 = vsel %vm494_vm8, %v14139_v36, %v14551_v35  ;;  %v11594_v56 = vld [vmem:[%s18203_s8 + $0xf0] ss:$8 sps:$4 sm:$0xff]   ;;  %v11770_v36 = vld [vmem:[#allocation2 + $0xa0] sm:$0xff] }
 0x3db   : > { %5345 = vmatmul.mubr.bf16.gmra.mrb[152].mxu0 %v4544_v37  ;;  %v4563_v37 = vrot.slane %v4170_v34, 3  ;;  %v11593_v34 = vld [vmem:[%s18203_s8 + $0xe4] ss:$8 sps:$4 sm:$0xff]   ;;  %v3655_v35 = vrot.slane %v11770_v36, 5 }
 0x3dc   : > { %5352 = vmatprep.mubr.bf16.mxu0 %v4556_v8  ;;  %v4575_v8 = vrot.slane %v4225_v15, 3  ;;  %v3791_v15 = vpop.permute.xlu1 %3790 }
 0x3dd   : > { %v4564_v2 = vsel %vm4403_vm13, %v4553_v32, %v4563_v37  ;;  %8436 = vmatpush1.bf16.msra.mxu0 %v11579_v33  ;;  %8691 = vmatpush1.bf16.msra.mxu1 %v11582_v42  ;;  %v11588_v32 = vld [vmem:[%s18203_s8 + $0x1e0] ss:$8 sps:$4 sm:$0xff]   ;;  %v4574_v13 = vsel %vm4403_vm13, %v4563_v37, %v4573_v17  ;;  %v11597_v37 = vld [vmem:[%s18203_s8 + $0x1f0] ss:$8 sps:$4 sm:$0xff]   ;;  %v4595_v33 = vrot.slane %v4229_v10, 3 }
 0x3de   : > { %v4576_v20 = vsel %vm4403_vm13, %v4565_v39, %v4575_v8  ;;  %v11590_v39 = vld [vmem:[%s18203_s8 + $0x1e4] ss:$8 sps:$4 sm:$0xff]   ;;  %8437 = vmatprep.subr.bf16.mxu0 %v11587_v6 }
 0x3df   : > { %8692 = vmatprep.subr.bf16.mxu1 %v11590_v39  ;;  %v11602_v42 = vld [vmem:[%s18203_s8 + $0x204] ss:$8 sps:$4 sm:$0xff]  }
 0x3e0   : > { %v3793_v1 = vpop.permute.xlu1 %3792  ;;  %v11771_v6 = vld [vmem:[#allocation2 + $0xa8] sm:$0xff] }
 0x3e1   : > { %8438 = vmatpush1.bf16.msra.mxu0 %v11585_v44  ;;  %8693 = vmatpush1.bf16.msra.mxu1 %v11588_v32  ;;  %v3657_v32 = vrot.slane %v11771_v6, 5 }
 0x3e2   : > { %8439 = vmatprep.subr.bf16.mxu0 %v11593_v34 }
 0x3e3   : > { %5353 = vmatmul.mubr.bf16.gmra.mrb[156].mxu0 %v4554_v59  ;;  %v3653_v59 = vrot.slane %v11769_v60, 5  ;;  %v3658_v60 = vsel %vm910_vm0, %v3655_v35, %v3657_v32 }
 0x3e4   : > { %5360 = vmatprep.mubr.bf16.mxu0 %v4566_v31  ;;  %v4585_v31 = vrot.slane %v4227_v30, 3  ;;  %v3795_v39 = vpop.permute.xlu1 %3794 }
 0x3e5   : > { %v3654_v23 = vsel %vm910_vm0, %v3651_v19, %v3653_v59  ;;  %8440 = vmatpush1.bf16.msra.mxu0 %v11591_v43  ;;  %v11596_v19 = vld [vmem:[%s18203_s8 + $0xf4] ss:$8 sps:$4 sm:$0xff]  }
 0x3e6   : > { %v4176_v24 = vsel %vm494_vm8, %v3654_v23, %v3791_v15  ;;  %v4586_v5 = vsel %vm4403_vm13, %v4575_v8, %v4585_v31  ;;  %v11599_v8 = vld [vmem:[%s18203_s8 + $0x1f4] ss:$8 sps:$4 sm:$0xff]   ;;  %8441 = vmatprep.subr.bf16.mxu0 %v11596_v19  ;;  %v4596_v30 = vsel %vm4403_vm13, %v4585_v31, %v4595_v33  ;;  %v4182_v15 = vsel %vm494_vm8, %v3658_v60, %v3795_v39 }
 0x3e7   : > { %v4583_v62 = vrot.slane %v4176_v24, 3  ;;  %8694 = vmatprep.subr.bf16.mxu1 %v11599_v8  ;;  %v4603_v43 = vrot.slane %v4182_v15, 3  ;;  %v11772_v23 = vld [vmem:[#allocation2 + $0xb0] sm:$0xff]  ;;  %v3955_v24 = vpop.permute.xlu0 %3954  ;;  %v18504_v19 = vrot.slane %v14558_v27, 1 }
 0x3e8   : > { %8695 = vmatpush1.bf16.msra.mxu1 %v11597_v37  ;;  %v3659_v31 = vrot.slane %v11772_v23, 5 }
 0x3e9   : > { %8442 = vmatpush1.bf16.msra.mxu0 %v11594_v56  ;;  %8917 = vmatprep.subr.bf16.mxu1 %v11602_v42  ;;  %v4584_v3 = vsel %vm4403_vm13, %v4573_v17, %v4583_v62  ;;  %v4238_v37 = vsel %vm494_vm8, %v18504_v19, %v3955_v24 }
 0x3ea   : > { %v4625_v8 = vrot.slane %v4238_v37, 3 }
 0x3eb   : > { %5361 = vmatmul.mubr.bf16.gmra.mrb[160].mxu0 %v4564_v2  ;;  %v3656_v2 = vsel %vm910_vm0, %v3653_v59, %v3655_v35  ;;  %v18503_v59 = vrot.slane %v14583_v40, 3  ;;  %v14813_v15 = vpop.permute.xlu0 %5815 }
 0x3ec   : > { %5368 = vmatprep.mubr.bf16.mxu0 %v4576_v20  ;;  %v4179_v20 = vsel %vm494_vm8, %v3656_v2, %v3793_v1  ;;  %18507 = vst [vmem:[#allocation28_spill] sm:$0xff] %v14813_v15 }
 0x3ed   : > { %v4593_v44 = vrot.slane %v4179_v20, 3  ;;  %v4606_v17 = vsel %vm4403_vm13, %v4595_v33, %v18503_v59  ;;  %v18505_v33 = vrot.slane %v14592_v61, 3  ;;  %v14805_v61 = vld [vmem:[%s18202_s7] ss:$0 sm:$0xff] }
 0x3ef   : > { %v4594_v34 = vsel %vm4403_vm13, %v4583_v62, %v4593_v44  ;;  %v4604_v10 = vsel %vm4403_vm13, %v4593_v44, %v4603_v43  ;;  %v4626_v42 = vsel %vm4403_vm13, %v18505_v33, %v4625_v8  ;;  %v6102_v33 = vld [vmem:[#allocation3] sm:$0xf0] }
 0x3f3   : > { %5369 = vmatmul.mubr.bf16.gmra.mrb[164].mxu0 %v4574_v13  ;;  %v3797_v13 = vpop.permute.xlu1 %3796 }
 0x3f4   : > { %5376 = vmatprep.mubr.bf16.mxu0 %v4586_v5  ;;  %v3660_v5 = vsel %vm910_vm0, %v3657_v32, %v3659_v31 }
 0x3f5   : > { %v4185_v56 = vsel %vm494_vm8, %v3660_v5, %v3797_v13 }
 0x3f6   : > { %v4613_v40 = vrot.slane %v4185_v56, 3 }
 0x3f7   : > { %v3799_v62 = vpop.permute.xlu1 %3798 }
 0x3f8   : > { %v4614_v36 = vsel %vm4403_vm13, %v4603_v43, %v4613_v40  ;;  %v4188_v35 = vsel %vm494_vm8, %v3659_v31, %v3799_v62  ;;  %vm5946_vm8 = vcmp.eq.s32.totalorder %v14813_v15, 1  ;;  %v14829_v62 = vpop.permute.xlu0 %5824 }
 0x3f9   : > { %v4623_v1 = vrot.slane %v4188_v35, 3  ;;  %18509 = vst [vmem:[#allocation31_spill] sm:$0xff] %v14829_v62  ;;  %v6103_v35 = vld [vmem:[#allocation3] sm:$0x80]  ;;  %vm5949_vm7 = vcmp.eq.s32.totalorder %v14829_v62, 1 }
 0x3fb   : > { %5377 = vmatmul.mubr.bf16.gmra.mrb[168].mxu0 %v4584_v3  ;;  %v4624_v27 = vsel %vm4403_vm13, %v4613_v40, %v4623_v1 }
 0x3fc   : > { %5384 = vmatprep.mubr.bf16.mxu0 %v4596_v30 }
 0x403   : > { %5385 = vmatmul.mubr.bf16.gmra.mrb[172].mxu0 %v4594_v34  ;;  %v14811_v34 = vpop.permute.xlu1 %5818 }
 0x404   : > { %5392 = vmatprep.mubr.bf16.mxu0 %v4606_v17  ;;  %18506 = vst [vmem:[#allocation17_spill] sm:$0xff] %v14811_v34  ;;  %v6078_v17 = vld [vmem:[#allocation3] sm:$0xf8]  ;;  %vm5947_vm4 = vcmp.eq.s32.totalorder %v14811_v34, 1 }
 0x405   : > { %v6135_v24 = vshll.u32 %v6078_v17, 16 }
 0x407   : > { %v14825_v40 = vpop.permute.xlu1 %5821  ;;  %v6137_v1 = vrot.slane %v6135_v24, 1 }
 0x408   : > { %18508 = vst [vmem:[#allocation29_spill] sm:$0xff] %v14825_v40  ;;  %vm5948_vm5 = vcmp.eq.s32.totalorder %v14825_v40, 1 }
 0x40b   : > { %5393 = vmatmul.mubr.bf16.gmra.mrb[176].mxu0 %v4604_v10 }
 0x40c   : > { %5400 = vmatprep.mubr.bf16.mxu0 %v14613_v46  ;;  %v14799_v46 = vld [vmem:[%s18201_s6] ss:$0 sm:$0xff] }
 0x413   : > { %5401 = vmatmul.mubr.bf16.gmra.mrb[180].mxu0 %v4614_v36 }
 0x414   : > { %5408 = vmatprep.mubr.bf16.mxu0 %v4626_v42  ;;  %v6133_v42 = vshrl.u32 %v6078_v17, 16 }
 0x41b   : > { %5409 = vmatmul.mubr.bf16.gmra.mrb[184].mxu0 %v4624_v27 }
 0x446   : > { %v5242_v2 = vpop.f32.mrb[100].mxu0 }
 0x447   : > { %v5452_v3 = vadd.f32 %v13942_v50, %v5242_v2  ;;  %v5244_v20 = vpop.f32.mrb[101].mxu0 }
 0x448   : > { %v5245_v30 = vpop.f32.mrb[102].mxu0 }
 0x449   : > { %v5632_v44 = vmul.f32 %v14799_v46, %v5452_v3  ;;  %v5455_v6 = vadd.f32 %v13953_v12, %v5245_v30  ;;  %v5247_v32 = vpop.f32.mrb[103].mxu0  ;;  %v7088_v30 = vrot.slane %v6078_v17, 3 }
 0x44b   : > { %v5682_v39 = vadd.f32 %v14805_v61, %v5632_v44  ;;  %v5633_v60 = vmul.f32 %v14799_v46, %v5455_v6  ;;  %v6384_v44 = vshrl.u32 %v6103_v35, 16  ;;  %v6338_v6 = vrot.slane %v6102_v33, 1 }
 0x44d   : > { %v5726_v50 = vmax.f32 %v5682_v39, 0.0  ;;  %v5683_v59 = vadd.f32 %v14805_v61, %v5633_v60  ;;  %v6386_v35 = vrot.slane %v6384_v44, 4 }
 0x44e   : > { %v5250_v43 = vpop.f32.mrb[104].mxu0 }
 0x44f   : > { %v5727_v23 = vmax.f32 %v5683_v59, 0.0  ;;  %v5460_v12 = vadd.f32 %v13940_v22, %v5250_v43  ;;  %v5252_v31 = vpop.f32.mrb[105].mxu0  ;;  %v5990_v5 = vsel %vm5946_vm8, %v5726_v50, 0.0  ;;  %v14840_v43 = vpop.permute.xlu1 %5827 }
 0x450   : > { %v5253_v13 = vpop.f32.mrb[106].mxu0  ;;  %18510 = vst [vmem:[#allocation21_spill] sm:$0xff] %v14840_v43  ;;  %vm5950_vm1 = vcmp.eq.s32.totalorder %v14840_v43, 1 }
 0x451   : > { %v5991_v10 = vsel %vm5947_vm4, %v5727_v23, 0.0  ;;  %v5634_v56 = vmul.f32 %v14799_v46, %v5460_v12  ;;  %v5463_v19 = vadd.f32 %v13945_v28, %v5253_v13  ;;  %v5255_v37 = vpop.f32.mrb[107].mxu0  ;;  %v6138_v12 = vor.u32 %v6137_v1, %v6133_v42 }
 0x452   : > { %v14827_v8 = vpack.c.bf16 %v5991_v10, %v5990_v5  ;;  %v14844_v5 = vpop.permute.xlu0 %5830 }
 0x453   : > { %v5684_v22 = vadd.f32 %v14805_v61, %v5634_v56  ;;  %v5635_v36 = vmul.f32 %v14799_v46, %v5463_v19  ;;  %18511 = vst [vmem:[#allocation25_spill] sm:$0xff] %v14844_v5  ;;  %vm18276_vm15 = vcmp.eq.s32.totalorder %v14844_v5, 1 }
 0x454   : > { %6056 = vst [vmem:[#allocation3 + $0x8] sm:$0xff] %v14827_v8  ;;  %v6140_v27 = vshll.u32 %v14827_v8, 16  ;;  %v6144_v28 = vshrl.u32 %v14827_v8, 16  ;;  %v7089_v13 = vrot.slane %v14827_v8, 3  ;;  %v6339_v24 = vrot.slane %v14827_v8, 1 }
 0x455   : > { %v5728_v2 = vmax.f32 %v5684_v22, 0.0  ;;  %v5685_v3 = vadd.f32 %v14805_v61, %v5635_v36 }
 0x456   : > { %v5258_v20 = vpop.f32.mrb[108].mxu0  ;;  %v6387_v50 = vrot.slane %v6144_v28, 4  ;;  %v6388_v59 = vrot.slane %v6140_v27, 5  ;;  %v6142_v31 = vrot.slane %v6140_v27, 1  ;;  %v6340_v44 = vsel %vm2069_vm6, %v6338_v6, %v6339_v24 }
 0x457   : > { %v5729_v32 = vmax.f32 %v5685_v3, 0.0  ;;  %v5468_v39 = vadd.f32 %v14012_v45, %v5258_v20  ;;  %v5260_v60 = vpop.f32.mrb[109].mxu0  ;;  %v5992_v17 = vsel %vm5948_vm5, %v5728_v2, 0.0 }
 0x458   : > { %v5261_v23 = vpop.f32.mrb[110].mxu0  ;;  %v6389_v33 = vor.u32 %v6388_v59, %v6387_v50  ;;  %v6143_v20 = vsel %vm3173_vm9, %v6138_v12, %v6142_v31  ;;  %v6146_v60 = vor.u32 %v6144_v28, %v6142_v31 }
 0x459   : > { %v5993_v45 = vsel %vm5949_vm7, %v5729_v32, 0.0  ;;  %v5636_v10 = vmul.f32 %v14799_v46, %v5468_v39  ;;  %v5471_v56 = vadd.f32 %v14020_v29, %v5261_v23  ;;  %v5263_v19 = vpop.f32.mrb[111].mxu0  ;;  %v7090_v29 = vsel %vm4403_vm13, %v7088_v30, %v7089_v13  ;;  %v14868_v32 = vpop.permute.xlu1 %5833 }
 0x45a   : > { %v14854_v37 = vpack.c.bf16 %v5993_v45, %v5992_v17  ;;  %18512 = vst [vmem:[#allocation30_spill] sm:$0xff] %v14868_v32  ;;  %vm18238_vm2 = vcmp.eq.s32.totalorder %v14868_v32, 1 }
 0x45b   : > { %v5686_v22 = vadd.f32 %v14805_v61, %v5636_v10  ;;  %v5637_v36 = vmul.f32 %v14799_v46, %v5471_v56  ;;  %v6390_v10 = vsel %vm3472_vm10, %v6386_v35, %v6389_v33  ;;  %v7091_v56 = vrot.slane %v6143_v20, 3 }
 0x45c   : > { %6057 = vst [vmem:[#allocation3 + $0x10] sm:$0xff] %v14854_v37  ;;  %v6148_v42 = vshll.u32 %v14854_v37, 16  ;;  %v6152_v1 = vshrl.u32 %v14854_v37, 16  ;;  %v6341_v27 = vrot.slane %v14854_v37, 1 }
 0x45d   : > { %v5730_v2 = vmax.f32 %v5686_v22, 0.0  ;;  %v5687_v3 = vadd.f32 %v14805_v61, %v5637_v36 }
 0x45e   : > { %v5266_v39 = vpop.f32.mrb[112].mxu0  ;;  %v6150_v50 = vrot.slane %v6148_v42, 1  ;;  %v6391_v59 = vrot.slane %v6152_v1, 4  ;;  %v6392_v23 = vrot.slane %v6148_v42, 5  ;;  %v14876_v12 = vsel %vm2069_vm6, %v6339_v24, %v6341_v27 }
 0x45f   : > { %v5731_v30 = vmax.f32 %v5687_v3, 0.0  ;;  %v5476_v17 = vadd.f32 %v14010_v25, %v5266_v39  ;;  %v5268_v45 = vpop.f32.mrb[113].mxu0  ;;  %v5994_v6 = vsel %vm5950_vm1, %v5730_v2, 0.0  ;;  %v7097_v3 = vrot.slane %v6390_v10, 3 }
 0x460   : > { %v5269_v28 = vpop.f32.mrb[114].mxu0  ;;  %v14881_v31 = vsel %vm3173_vm9, %v6146_v60, %v6150_v50  ;;  %v6393_v19 = vor.u32 %v6392_v23, %v6391_v59  ;;  %v7095_v39 = vrot.slane %v14876_v12, 3 }
 0x461   : > { %v5995_v25 = vsel %vm18276_vm15, %v5731_v30, 0.0  ;;  %v5638_v22 = vmul.f32 %v14799_v46, %v5476_v17  ;;  %v5479_v36 = vadd.f32 %v14015_v18, %v5269_v28  ;;  %v5271_v35 = vpop.f32.mrb[115].mxu0  ;;  %v7092_v24 = vrot.slane %v14881_v31, 3 }
 0x462   : > { %v14888_v42 = vpack.c.bf16 %v5995_v25, %v5994_v6  ;;  %v14891_v2 = vsel %vm3472_vm10, %v6389_v33, %v6393_v19  ;;  %v7094_v18 = vrot.slane %v6340_v44, 3  ;;  %v11600_v33 = vld [vmem:[%s18203_s8 + $0x200] ss:$8 sps:$4 sm:$0xff]   ;;  %v6154_v31 = vor.u32 %v6152_v1, %v6150_v50  ;;  %v11605_v44 = vld [vmem:[%s18203_s8 + $0x214] ss:$8 sps:$4 sm:$0xff]   ;;  %v14915_v25 = vpop.permute.xlu0 %5836 }
 0x463   : > { %v5688_v20 = vadd.f32 %v14805_v61, %v5638_v22  ;;  %v5639_v60 = vmul.f32 %v14799_v46, %v5479_v36  ;;  %v7093_v59 = vsel %vm4403_vm13, %v7091_v56, %v7092_v24  ;;  %v7098_v23 = vrot.slane %v14891_v2, 3  ;;  %v11633_v56 = vld [vmem:[%s18203_s8 + $0x300] ss:$8 sps:$4 sm:$0xff]   ;;  %18513 = vst [vmem:[#allocation8_spill] sm:$0xff] %v14915_v25  ;;  %v14923_v1 = vld [vmem:[%s18203_s8 + $0x304] ss:$8 sps:$4 sm:$0xff]  }
 0x464   : > { %6058 = vst [vmem:[#allocation3 + $0x18] sm:$0xff] %v14888_v42  ;;  %8443 = vmatprep.mubr.bf16.mxu0 %v7093_v59  ;;  %v6156_v30 = vshll.u32 %v14888_v42, 16  ;;  %v6160_v17 = vshrl.u32 %v14888_v42, 16  ;;  %v6343_v45 = vrot.slane %v14888_v42, 1  ;;  %vm18240_vm3 = vcmp.eq.s32.totalorder %v14915_v25, 1  ;;  %9170 = vmatprep.subr.bf16.mxu0 %v14923_v1 }
 0x465   : > { %v5732_v10 = vmax.f32 %v5688_v20, 0.0  ;;  %v5689_v6 = vadd.f32 %v14805_v61, %v5639_v60  ;;  %8444 = vmatmul.mubr.bf16.vlgmr.msra.gmra.mrb[188].mxu0 %v7090_v29  ;;  %v7099_v28 = vsel %vm4403_vm13, %v7097_v3, %v7098_v23  ;;  %v7096_v29 = vsel %vm4403_vm13, %v7094_v18, %v7095_v39 }
 0x466   : > { %v5274_v22 = vpop.f32.mrb[116].mxu0  ;;  %8696 = vmatprep.mubr.bf16.mxu1 %v7099_v28  ;;  %v6158_v36 = vrot.slane %v6156_v30, 1  ;;  %v6395_v35 = vrot.slane %v6160_v17, 4  ;;  %v6396_v3 = vrot.slane %v6156_v30, 5  ;;  %v14932_v59 = vsel %vm2069_vm6, %v6341_v27, %v6343_v45  ;;  %9171 = vmatpush1.bf16.msra.mxu0 %v11633_v56 }
 0x467   : > { %v5733_v50 = vmax.f32 %v5689_v6, 0.0  ;;  %v5484_v20 = vadd.f32 %v14055_v38, %v5274_v22  ;;  %v5276_v60 = vpop.f32.mrb[117].mxu0  ;;  %8697 = vmatmul.mubr.bf16.vlgmr.msra.gmra.mrb[140].mxu1 %v7096_v29  ;;  %v5996_v18 = vsel %vm18238_vm2, %v5732_v10, 0.0  ;;  %v18239_v6 = vrot.slane %v14854_v37, 3  ;;  %v11603_v22 = vld [vmem:[%s18203_s8 + $0x210] ss:$8 sps:$4 sm:$0xff]   ;;  %v14945_v29 = vpop.permute.xlu1 %5839 }
 0x468   : > { %v5277_v30 = vpop.f32.mrb[118].mxu0  ;;  %8918 = vmatpush1.bf16.msra.mxu1 %v11600_v33  ;;  %v14937_v28 = vsel %vm3173_vm9, %v6154_v31, %v6158_v36  ;;  %v14940_v38 = vor.u32 %v6396_v3, %v6395_v35  ;;  %18514 = vst [vmem:[#allocation4_spill] sm:$0xff] %v14945_v29  ;;  %v11608_v35 = vld [vmem:[%s18203_s8 + $0x224] ss:$8 sps:$4 sm:$0xff]   ;;  %vm18243_vm2 = vcmp.eq.s32.totalorder %v14945_v29, 1 }
 0x469   : > { %v5997_v27 = vsel %vm18240_vm3, %v5733_v50, 0.0  ;;  %v5640_v10 = vmul.f32 %v14799_v46, %v5484_v20  ;;  %v5487_v33 = vadd.f32 %v14069_v55, %v5277_v30  ;;  %v5279_v60 = vpop.f32.mrb[119].mxu0  ;;  %v7117_v31 = vrot.slane %v14937_v28, 3  ;;  %8919 = vmatprep.subr.bf16.mxu1 %v11605_v44  ;;  %v11612_v28 = vld [vmem:[%s18203_s8 + $0x240] ss:$8 sps:$4 sm:$0xff]  }
 0x46a   : > { %v14957_v3 = vpack.c.bf16 %v5997_v27, %v5996_v18  ;;  %v14961_v50 = vsel %vm3472_vm10, %v6393_v19, %v14940_v38  ;;  %v18242_v55 = vrot.slane %v14932_v59, 3  ;;  %v11606_v18 = vld [vmem:[%s18203_s8 + $0x220] ss:$8 sps:$4 sm:$0xff]   ;;  %v7116_v19 = vsel %vm4403_vm13, %v7089_v13, %v18239_v6  ;;  %v11638_v6 = vld [vmem:[%s18203_s8 + $0x314] ss:$8 sps:$4 sm:$0xff]  }
 0x46b   : > { %v5690_v20 = vadd.f32 %v14805_v61, %v5640_v10  ;;  %v5641_v44 = vmul.f32 %v14799_v46, %v5487_v33  ;;  %v7118_v30 = vsel %vm4403_vm13, %v7092_v24, %v7117_v31  ;;  %v18241_v60 = vrot.slane %v14961_v50, 3  ;;  %v11611_v10 = vld [vmem:[%s18203_s8 + $0x234] ss:$8 sps:$4 sm:$0xff]   ;;  %9172 = vmatprep.subr.bf16.mxu0 %v11638_v6 }
 0x46c   : > { %6059 = vst [vmem:[#allocation3 + $0x20] sm:$0xff] %v14957_v3  ;;  %8453 = vmatprep.mubr.bf16.mxu0 %v7118_v30  ;;  %8920 = vmatpush1.bf16.msra.mxu1 %v11603_v22  ;;  %v6164_v56 = vshll.u32 %v14957_v3, 16  ;;  %v6168_v24 = vshrl.u32 %v14957_v3, 16  ;;  %v6345_v27 = vrot.slane %v14957_v3, 1  ;;  %v6162_v13 = vor.u32 %v6160_v17, %v6158_v36  ;;  %v11636_v22 = vld [vmem:[%s18203_s8 + $0x310] ss:$8 sps:$4 sm:$0xff]  }
 0x46d   : > { %v5734_v33 = vmax.f32 %v5690_v20, 0.0  ;;  %v5691_v30 = vadd.f32 %v14805_v61, %v5641_v44  ;;  %8454 = vmatmul.mubr.bf16.gmra.mrb[192].mxu0 %v7116_v19  ;;  %v7122_v8 = vsel %vm4403_vm13, %v7098_v23, %v18241_v60  ;;  %8921 = vmatprep.subr.bf16.mxu1 %v11608_v35  ;;  %v14997_v20 = vpop.permute.xlu0 %5842  ;;  %v7120_v2 = vsel %vm4403_vm13, %v7095_v39, %v18242_v55  ;;  %v11641_v35 = vld [vmem:[%s18203_s8 + $0x324] ss:$8 sps:$4 sm:$0xff]  }
 0x46e   : > { %18515 = vst [vmem:[#allocation11_spill] sm:$0xff] %v14997_v20  ;;  %v5282_v44 = vpop.f32.mrb[120].mxu0  ;;  %8706 = vmatprep.mubr.bf16.mxu1 %v7122_v8  ;;  %v6166_v23 = vrot.slane %v6164_v56, 1  ;;  %v6399_v17 = vrot.slane %v6168_v24, 4  ;;  %v6400_v36 = vrot.slane %v6164_v56, 5  ;;  %vm18244_vm3 = vcmp.eq.s32.totalorder %v14997_v20, 1  ;;  %9173 = vmatpush1.bf16.msra.mxu0 %v11636_v22 }
 0x46f   : > { %v5735_v19 = vmax.f32 %v5691_v30, 0.0  ;;  %v5492_v8 = vadd.f32 %v14051_v41, %v5282_v44  ;;  %v5284_v60 = vpop.f32.mrb[121].mxu0  ;;  %8707 = vmatmul.mubr.bf16.gmra.mrb[144].mxu1 %v7120_v2  ;;  %v15016_v12 = vsel %vm2069_vm6, %v6343_v45, %v6345_v27  ;;  %v5998_v39 = vsel %vm18243_vm2, %v5734_v33, 0.0  ;;  %v15029_v44 = vpop.permute.xlu1 %5845  ;;  %9174 = vmatprep.subr.bf16.mxu0 %v11641_v35 }
 0x470   : > { %v5285_v56 = vpop.f32.mrb[122].mxu0  ;;  %v15021_v55 = vsel %vm3173_vm9, %v6162_v13, %v6166_v23  ;;  %v18246_v30 = vrot.slane %v14888_v42, 3  ;;  %v15024_v41 = vor.u32 %v6400_v36, %v6399_v17  ;;  %8922 = vmatpush1.bf16.msra.mxu1 %v11606_v18  ;;  %v11609_v60 = vld [vmem:[%s18203_s8 + $0x230] ss:$8 sps:$4 sm:$0xff]   ;;  %18516 = vst [vmem:[#allocation14_spill] sm:$0xff] %v15029_v44  ;;  %vm18249_vm2 = vcmp.eq.s32.totalorder %v15029_v44, 1 }
 0x471   : > { %v5999_v45 = vsel %vm18244_vm3, %v5735_v19, 0.0  ;;  %v5642_v6 = vmul.f32 %v14799_v46, %v5492_v8  ;;  %v5495_v33 = vadd.f32 %v14060_v4, %v5285_v56  ;;  %v5287_v13 = vpop.f32.mrb[123].mxu0  ;;  %v7135_v2 = vrot.slane %v15021_v55, 3  ;;  %8923 = vmatprep.subr.bf16.mxu1 %v11611_v10  ;;  %v11614_v18 = vld [vmem:[%s18203_s8 + $0x244] ss:$8 sps:$4 sm:$0xff]  }
 0x472   : > { %v15040_v17 = vpack.c.bf16 %v5999_v45, %v5998_v39  ;;  %v15045_v36 = vsel %vm3472_vm10, %v14940_v38, %v15024_v41  ;;  %v18248_v4 = vrot.slane %v15016_v12, 3  ;;  %v11639_v10 = vld [vmem:[%s18203_s8 + $0x320] ss:$8 sps:$4 sm:$0xff]   ;;  %v18517_v39 = vrot.slane %v14854_v37, 3 }
 0x473   : > { %v5692_v19 = vadd.f32 %v14805_v61, %v5642_v6  ;;  %v5643_v22 = vmul.f32 %v14799_v46, %v5495_v33  ;;  %v7136_v8 = vsel %vm4403_vm13, %v7117_v31, %v7135_v2  ;;  %v18245_v38 = vrot.slane %v15045_v36, 3  ;;  %9175 = vmatpush1.bf16.msra.mxu0 %v11639_v10  ;;  %v11615_v10 = vld [vmem:[%s18203_s8 + $0x250] ss:$8 sps:$4 sm:$0xff]  }
 0x474   : > { %6060 = vst [vmem:[#allocation3 + $0x28] sm:$0xff] %v15040_v17  ;;  %8463 = vmatprep.mubr.bf16.mxu0 %v7136_v8  ;;  %v7134_v35 = vsel %vm4403_vm13, %v18517_v39, %v18246_v30  ;;  %v6172_v56 = vshll.u32 %v15040_v17, 16  ;;  %v6176_v45 = vshrl.u32 %v15040_v17, 16  ;;  %v18247_v6 = vrot.slane %v15040_v17, 1  ;;  %8924 = vmatpush1.bf16.msra.mxu1 %v11609_v60  ;;  %v11617_v60 = vld [vmem:[%s18203_s8 + $0x254] ss:$8 sps:$4 sm:$0xff]  }
 0x475   : > { %v5736_v31 = vmax.f32 %v5692_v19, 0.0  ;;  %v5693_v33 = vadd.f32 %v14805_v61, %v5643_v22  ;;  %8464 = vmatmul.mubr.bf16.gmra.mrb[196].mxu0 %v7134_v35  ;;  %v18518_v37 = vrot.slane %v14961_v50, 3  ;;  %v6170_v8 = vor.u32 %v6168_v24, %v6166_v23  ;;  %8925 = vmatprep.subr.bf16.mxu1 %v11614_v18  ;;  %v11645_v19 = vld [vmem:[%s18203_s8 + $0x330] ss:$8 sps:$4 sm:$0xff]   ;;  %v15085_v22 = vpop.permute.xlu0 %5848 }
 0x476   : > { %18519 = vst [vmem:[#allocation19_spill] sm:$0xff] %v15085_v22  ;;  %v5290_v39 = vpop.f32.mrb[124].mxu0  ;;  %v18520_v50 = vrot.slane %v14932_v59, 3  ;;  %v6174_v24 = vrot.slane %v6172_v56, 1  ;;  %v6403_v23 = vrot.slane %v6176_v45, 4  ;;  %v6404_v18 = vrot.slane %v6172_v56, 5 }
 0x477   : > { %v7140_v13 = vsel %vm4403_vm13, %v18518_v37, %v18245_v38  ;;  %v11647_v37 = vld [vmem:[%s18203_s8 + $0x334] ss:$8 sps:$4 sm:$0xff]   ;;  %vm18250_vm3 = vcmp.eq.s32.totalorder %v15085_v22, 1  ;;  %v5737_v38 = vmax.f32 %v5693_v33, 0.0  ;;  %v5292_v30 = vpop.f32.mrb[125].mxu0  ;;  %v15104_v59 = vsel %vm2069_vm6, %v6345_v27, %v18247_v6 }
 0x478   : > { %8716 = vmatprep.mubr.bf16.mxu1 %v7140_v13  ;;  %v7138_v35 = vsel %vm4403_vm13, %v18520_v50, %v18248_v4  ;;  %v5500_v13 = vadd.f32 %v14121_v47, %v5290_v39  ;;  %v6000_v56 = vsel %vm18249_vm2, %v5736_v31, 0.0  ;;  %v5293_v50 = vpop.f32.mrb[126].mxu0  ;;  %v15112_v33 = vsel %vm3173_vm9, %v6170_v8, %v6174_v24  ;;  %8926 = vmatpush1.bf16.msra.mxu1 %v11612_v28  ;;  %v11650_v27 = vld [vmem:[%s18203_s8 + $0x344] ss:$8 sps:$4 sm:$0xff]   ;;  %v15120_v39 = vpop.permute.xlu1 %5851 }
 0x479   : > { %8717 = vmatmul.mubr.bf16.gmra.mrb[148].mxu1 %v7138_v35  ;;  %v7151_v47 = vrot.slane %v14957_v3, 3  ;;  %v15115_v30 = vor.u32 %v6404_v18, %v6403_v23  ;;  %18521 = vst [vmem:[#allocation20_spill] sm:$0xff] %v15120_v39  ;;  %v6001_v35 = vsel %vm18250_vm3, %v5737_v38, 0.0  ;;  %v5503_v6 = vadd.f32 %v14134_v52, %v5293_v50  ;;  %v5295_v8 = vpop.f32.mrb[127].mxu0  ;;  %8927 = vmatprep.subr.bf16.mxu1 %v11617_v60  ;;  %v11620_v28 = vld [vmem:[%s18203_s8 + $0x264] ss:$8 sps:$4 sm:$0xff]  }
 0x47a   : > { %v5644_v31 = vmul.f32 %v14799_v46, %v5500_v13  ;;  %v7153_v4 = vrot.slane %v15112_v33, 3  ;;  %9176 = vmatprep.subr.bf16.mxu0 %v11647_v37  ;;  %vm18254_vm2 = vcmp.eq.s32.totalorder %v15120_v39, 1  ;;  %v15131_v23 = vpack.c.bf16 %v6001_v35, %v6000_v56  ;;  %v11648_v60 = vld [vmem:[%s18203_s8 + $0x340] ss:$8 sps:$4 sm:$0xff]  }
 0x47b   : > { %v15136_v38 = vsel %vm3472_vm10, %v15024_v41, %v15115_v30  ;;  %v18253_v52 = vrot.slane %v15104_v59, 3  ;;  %9177 = vmatpush1.bf16.msra.mxu0 %v11645_v19  ;;  %v5645_v37 = vmul.f32 %v14799_v46, %v5503_v6  ;;  %v18522_v19 = vrot.slane %v14888_v42, 3 }
 0x47c   : > { %v5694_v18 = vadd.f32 %v14805_v61, %v5644_v31  ;;  %v7154_v13 = vsel %vm4403_vm13, %v7135_v2, %v7153_v4  ;;  %v18251_v41 = vrot.slane %v15136_v38, 3  ;;  %9178 = vmatprep.subr.bf16.mxu0 %v11650_v27  ;;  %6061 = vst [vmem:[#allocation3 + $0x30] sm:$0xff] %v15131_v23  ;;  %v6180_v6 = vshll.u32 %v15131_v23, 16  ;;  %8928 = vmatpush1.bf16.msra.mxu1 %v11615_v10  ;;  %v11618_v2 = vld [vmem:[%s18203_s8 + $0x260] ss:$8 sps:$4 sm:$0xff]  }
 0x47d   : > { %8473 = vmatprep.mubr.bf16.mxu0 %v7154_v13  ;;  %v7152_v56 = vsel %vm4403_vm13, %v18522_v19, %v7151_v47  ;;  %v6184_v50 = vshrl.u32 %v15131_v23, 16  ;;  %v18252_v55 = vrot.slane %v15131_v23, 1  ;;  %v5695_v35 = vadd.f32 %v14805_v61, %v5645_v37  ;;  %8929 = vmatprep.subr.bf16.mxu1 %v11620_v28  ;;  %v11623_v10 = vld [vmem:[%s18203_s8 + $0x274] ss:$8 sps:$4 sm:$0xff]   ;;  %v15176_v37 = vpop.permute.xlu0 %5854 }
 0x47e   : > { %v5738_v27 = vmax.f32 %v5694_v18, 0.0  ;;  %8474 = vmatmul.mubr.bf16.gmra.mrb[200].mxu0 %v7152_v56  ;;  %v18523_v42 = vrot.slane %v15045_v36, 3  ;;  %v6178_v8 = vor.u32 %v6176_v45, %v6174_v24  ;;  %v11653_v18 = vld [vmem:[%s18203_s8 + $0x354] ss:$8 sps:$4 sm:$0xff]   ;;  %18524 = vst [vmem:[#allocation22_spill] sm:$0xff] %v15176_v37  ;;  %v5298_v13 = vpop.f32.mrb[128].mxu0 }
 0x47f   : > { %v18525_v36 = vrot.slane %v15016_v12, 3  ;;  %v6182_v45 = vrot.slane %v6180_v6, 1  ;;  %v6407_v24 = vrot.slane %v6184_v50, 4  ;;  %v6408_v28 = vrot.slane %v6180_v6, 5  ;;  %9179 = vmatpush1.bf16.msra.mxu0 %v11648_v60  ;;  %v11651_v56 = vld [vmem:[%s18203_s8 + $0x350] ss:$8 sps:$4 sm:$0xff]  }
 0x480   : > { %v7158_v31 = vsel %vm4403_vm13, %v18523_v42, %v18251_v41  ;;  %vm18255_vm3 = vcmp.eq.s32.totalorder %v15176_v37, 1  ;;  %v5739_v42 = vmax.f32 %v5695_v35, 0.0  ;;  %v5300_v41 = vpop.f32.mrb[129].mxu0  ;;  %v18526_v12 = vrot.slane %v15040_v17, 1  ;;  %v11621_v60 = vld [vmem:[%s18203_s8 + $0x270] ss:$8 sps:$4 sm:$0xff]   ;;  %9180 = vmatprep.subr.bf16.mxu0 %v11653_v18  ;;  %8930 = vmatpush1.bf16.msra.mxu1 %v11618_v2 }
 0x481   : > { %8726 = vmatprep.mubr.bf16.mxu1 %v7158_v31  ;;  %v7156_v19 = vsel %vm4403_vm13, %v18525_v36, %v18253_v52  ;;  %v5508_v31 = vadd.f32 %v14117_v16, %v5298_v13  ;;  %v6002_v6 = vsel %vm18254_vm2, %v5738_v27, 0.0  ;;  %v5301_v35 = vpop.f32.mrb[130].mxu0  ;;  %v15203_v16 = vsel %vm3173_vm9, %v6178_v8, %v6182_v45  ;;  %8931 = vmatprep.subr.bf16.mxu1 %v11623_v10  ;;  %v11626_v2 = vld [vmem:[%s18203_s8 + $0x284] ss:$8 sps:$4 sm:$0xff]  }
 0x482   : > { %8727 = vmatmul.mubr.bf16.gmra.mrb[152].mxu1 %v7156_v19  ;;  %v15195_v36 = vsel %vm2069_vm6, %v18526_v12, %v18252_v55  ;;  %v7169_v41 = vrot.slane %v15040_v17, 3  ;;  %v15206_v13 = vor.u32 %v6408_v28, %v6407_v24  ;;  %v11659_v19 = vld [vmem:[%s18203_s8 + $0x364] ss:$8 sps:$4 sm:$0xff]   ;;  %v15211_v12 = vpop.permute.xlu1 %5857  ;;  %v6003_v18 = vsel %vm18255_vm3, %v5739_v42, 0.0  ;;  %v5303_v8 = vpop.f32.mrb[131].mxu0 }
 0x483   : > { %18527 = vst [vmem:[#allocation32_spill] sm:$0xff] %v15211_v12  ;;  %v5646_v27 = vmul.f32 %v14799_v46, %v5508_v31  ;;  %v5511_v55 = vadd.f32 %v14127_v54, %v5301_v35  ;;  %v7171_v52 = vrot.slane %v15203_v16, 3  ;;  %vm18259_vm2 = vcmp.eq.s32.totalorder %v15211_v12, 1  ;;  %9181 = vmatpush1.bf16.msra.mxu0 %v11651_v56  ;;  %v11657_v54 = vld [vmem:[%s18203_s8 + $0x360] ss:$8 sps:$4 sm:$0xff]  }
 0x484   : > { %v15222_v24 = vpack.c.bf16 %v6003_v18, %v6002_v6  ;;  %v15227_v28 = vsel %vm3472_vm10, %v15115_v30, %v15206_v13  ;;  %v18258_v42 = vrot.slane %v15195_v36, 3  ;;  %9182 = vmatprep.subr.bf16.mxu0 %v11659_v19  ;;  %v11662_v56 = vld [vmem:[%s18203_s8 + $0x374] ss:$8 sps:$4 sm:$0xff]   ;;  %8932 = vmatpush1.bf16.msra.mxu1 %v11621_v60  ;;  %v11624_v19 = vld [vmem:[%s18203_s8 + $0x280] ss:$8 sps:$4 sm:$0xff]   ;;  %v18528_v3 = vrot.slane %v15136_v38, 3 }
 0x485   : > { %v5696_v10 = vadd.f32 %v14805_v61, %v5646_v27  ;;  %v5647_v31 = vmul.f32 %v14799_v46, %v5511_v55  ;;  %v7172_v6 = vsel %vm4403_vm13, %v7153_v4, %v7171_v52  ;;  %v18256_v30 = vrot.slane %v15227_v28, 3  ;;  %8933 = vmatprep.subr.bf16.mxu1 %v11626_v2  ;;  %v11629_v60 = vld [vmem:[%s18203_s8 + $0x294] ss:$8 sps:$4 sm:$0xff]  }
 0x486   : > { %6062 = vst [vmem:[#allocation3 + $0x38] sm:$0xff] %v15222_v24  ;;  %8483 = vmatprep.mubr.bf16.mxu0 %v7172_v6  ;;  %v7170_v55 = vsel %vm4403_vm13, %v7151_v47, %v7169_v41  ;;  %v6188_v33 = vshll.u32 %v15222_v24, 16  ;;  %v6192_v4 = vshrl.u32 %v15222_v24, 16  ;;  %v18257_v35 = vrot.slane %v15222_v24, 1  ;;  %v15267_v6 = vpop.permute.xlu0 %5860 }
 0x487   : > { %v5740_v18 = vmax.f32 %v5696_v10, 0.0  ;;  %v5697_v27 = vadd.f32 %v14805_v61, %v5647_v31  ;;  %8484 = vmatmul.mubr.bf16.gmra.mrb[204].mxu0 %v7170_v55  ;;  %v7176_v47 = vsel %vm4403_vm13, %v18528_v3, %v18256_v30  ;;  %v6186_v8 = vor.u32 %v6184_v50, %v6182_v45  ;;  %18529 = vst [vmem:[#allocation33_spill] sm:$0xff] %v15267_v6  ;;  %v5306_v10 = vpop.f32.mrb[132].mxu0  ;;  %v11660_v45 = vld [vmem:[%s18203_s8 + $0x370] ss:$8 sps:$4 sm:$0xff]  }
 0x488   : > { %8736 = vmatprep.mubr.bf16.mxu1 %v7176_v47  ;;  %v18530_v31 = vrot.slane %v15104_v59, 3  ;;  %v6190_v55 = vrot.slane %v6188_v33, 1  ;;  %v6411_v3 = vrot.slane %v6192_v4, 4  ;;  %v6412_v50 = vrot.slane %v6188_v33, 5  ;;  %9183 = vmatpush1.bf16.msra.mxu0 %v11657_v54  ;;  %v5308_v30 = vpop.f32.mrb[133].mxu0 }
 0x489   : > { %vm18260_vm3 = vcmp.eq.s32.totalorder %v15267_v6, 1  ;;  %v5741_v2 = vmax.f32 %v5697_v27, 0.0  ;;  %v5516_v47 = vadd.f32 %v14176_v14, %v5306_v10  ;;  %v18531_v59 = vrot.slane %v15131_v23, 1  ;;  %9184 = vmatprep.subr.bf16.mxu0 %v11662_v56  ;;  %v11665_v54 = vld [vmem:[%s18203_s8 + $0x384] ss:$8 sps:$4 sm:$0xff]   ;;  %v5309_v27 = vpop.f32.mrb[134].mxu0  ;;  %8934 = vmatpush1.bf16.msra.mxu1 %v11624_v19 }
 0x48a   : > { %v7174_v38 = vsel %vm4403_vm13, %v18530_v31, %v18258_v42  ;;  %v6004_v33 = vsel %vm18259_vm2, %v5740_v18, 0.0  ;;  %v15294_v14 = vsel %vm3173_vm9, %v6186_v8, %v6190_v55  ;;  %v7187_v30 = vrot.slane %v15131_v23, 3  ;;  %v11627_v56 = vld [vmem:[%s18203_s8 + $0x290] ss:$8 sps:$4 sm:$0xff]   ;;  %v5311_v8 = vpop.f32.mrb[135].mxu0  ;;  %8935 = vmatprep.subr.bf16.mxu1 %v11629_v60 }
 0x48b   : > { %8737 = vmatmul.mubr.bf16.gmra.mrb[156].mxu1 %v7174_v38  ;;  %v15286_v31 = vsel %vm2069_vm6, %v18531_v59, %v18257_v35  ;;  %v15297_v10 = vor.u32 %v6412_v50, %v6411_v3  ;;  %v15302_v38 = vpop.permute.xlu1 %5863  ;;  %v6005_v59 = vsel %vm18260_vm3, %v5741_v2, 0.0  ;;  %v5648_v18 = vmul.f32 %v14799_v46, %v5516_v47  ;;  %v11632_v19 = vld [vmem:[%s18203_s8 + $0x2a4] ss:$8 sps:$4 sm:$0xff]  }
 0x48c   : > { %18532 = vst [vmem:[#allocation34_spill] sm:$0xff] %v15302_v38  ;;  %v5519_v35 = vadd.f32 %v14185_v58, %v5309_v27  ;;  %v7189_v42 = vrot.slane %v15294_v14, 3  ;;  %vm18264_vm2 = vcmp.eq.s32.totalorder %v15302_v38, 1  ;;  %v15313_v3 = vpack.c.bf16 %v6005_v59, %v6004_v33  ;;  %9185 = vmatpush1.bf16.msra.mxu0 %v11660_v45  ;;  %v11663_v58 = vld [vmem:[%s18203_s8 + $0x380] ss:$8 sps:$4 sm:$0xff]  }
 0x48d   : > { %v15318_v50 = vsel %vm3472_vm10, %v15206_v13, %v15297_v10  ;;  %v18263_v2 = vrot.slane %v15286_v31, 3  ;;  %v5698_v60 = vadd.f32 %v14805_v61, %v5648_v18  ;;  %9186 = vmatprep.subr.bf16.mxu0 %v11665_v54  ;;  %v11671_v45 = vld [vmem:[%s18203_s8 + $0x394] ss:$8 sps:$4 sm:$0xff]   ;;  %8936 = vmatpush1.bf16.msra.mxu1 %v11627_v56  ;;  %v11630_v54 = vld [vmem:[%s18203_s8 + $0x2a0] ss:$8 sps:$4 sm:$0xff]   ;;  %v18533_v17 = vrot.slane %v15227_v28, 3 }
 0x48e   : > { %v5649_v47 = vmul.f32 %v14799_v46, %v5519_v35  ;;  %v7190_v33 = vsel %vm4403_vm13, %v7171_v52, %v7189_v42  ;;  %v18261_v13 = vrot.slane %v15318_v50, 3  ;;  %6063 = vst [vmem:[#allocation3 + $0x40] sm:$0xff] %v15313_v3  ;;  %v7188_v35 = vsel %vm4403_vm13, %v7169_v41, %v7187_v30  ;;  %8937 = vmatprep.subr.bf16.mxu1 %v11632_v19  ;;  %v11644_v56 = vld [vmem:[%s18203_s8 + $0x2b4] ss:$8 sps:$4 sm:$0xff]  }
 0x48f   : > { %8493 = vmatprep.mubr.bf16.mxu0 %v7190_v33  ;;  %v6196_v16 = vshll.u32 %v15313_v3, 16  ;;  %v6200_v52 = vshrl.u32 %v15313_v3, 16  ;;  %v18262_v27 = vrot.slane %v15313_v3, 1  ;;  %v5742_v59 = vmax.f32 %v5698_v60, 0.0  ;;  %v15358_v33 = vpop.permute.xlu0 %5866  ;;  %v5314_v60 = vpop.f32.mrb[136].mxu0 }
 0x490   : > { %v5699_v18 = vadd.f32 %v14805_v61, %v5649_v47  ;;  %8494 = vmatmul.mubr.bf16.gmra.mrb[208].mxu0 %v7188_v35  ;;  %v7194_v41 = vsel %vm4403_vm13, %v18533_v17, %v18261_v13  ;;  %v6194_v8 = vor.u32 %v6192_v4, %v6190_v55  ;;  %18534 = vst [vmem:[#allocation35_spill] sm:$0xff] %v15358_v33  ;;  %v18535_v47 = vrot.slane %v15195_v36, 3  ;;  %v11669_v55 = vld [vmem:[%s18203_s8 + $0x390] ss:$8 sps:$4 sm:$0xff]   ;;  %v5316_v13 = vpop.f32.mrb[137].mxu0 }
 0x491   : > { %8746 = vmatprep.mubr.bf16.mxu1 %v7194_v41  ;;  %v6198_v35 = vrot.slane %v6196_v16, 1  ;;  %v6415_v17 = vrot.slane %v6200_v52, 4  ;;  %v6416_v4 = vrot.slane %v6196_v16, 5  ;;  %9187 = vmatpush1.bf16.msra.mxu0 %v11663_v58  ;;  %vm18265_vm3 = vcmp.eq.s32.totalorder %v15358_v33, 1  ;;  %v11674_v58 = vld [vmem:[%s18203_s8 + $0x3a4] ss:$8 sps:$4 sm:$0xff]  }
 0x492   : > { %v7192_v28 = vsel %vm4403_vm13, %v18535_v47, %v18263_v2  ;;  %v5743_v19 = vmax.f32 %v5699_v18, 0.0  ;;  %v5524_v41 = vadd.f32 %v14171_v11, %v5314_v60  ;;  %v18536_v36 = vrot.slane %v15222_v24, 1  ;;  %9188 = vmatprep.subr.bf16.mxu0 %v11671_v45  ;;  %v5317_v18 = vpop.f32.mrb[138].mxu0  ;;  %8938 = vmatpush1.bf16.msra.mxu1 %v11630_v54  ;;  %v11642_v45 = vld [vmem:[%s18203_s8 + $0x2b0] ss:$8 sps:$4 sm:$0xff]  }
 0x493   : > { %8747 = vmatmul.mubr.bf16.gmra.mrb[160].mxu1 %v7192_v28  ;;  %v6006_v16 = vsel %vm18264_vm2, %v5742_v59, 0.0  ;;  %v15385_v11 = vsel %vm3173_vm9, %v6194_v8, %v6198_v35  ;;  %v7205_v13 = vrot.slane %v15222_v24, 3  ;;  %v15388_v60 = vor.u32 %v6416_v4, %v6415_v17  ;;  %v15393_v28 = vpop.permute.xlu1 %5869  ;;  %v5319_v8 = vpop.f32.mrb[139].mxu0  ;;  %8939 = vmatprep.subr.bf16.mxu1 %v11644_v56  ;;  %v11656_v54 = vld [vmem:[%s18203_s8 + $0x2c4] ss:$8 sps:$4 sm:$0xff]  }
 0x494   : > { %v15377_v47 = vsel %vm2069_vm6, %v18536_v36, %v18262_v27  ;;  %18537 = vst [vmem:[#allocation36_spill] sm:$0xff] %v15393_v28  ;;  %v6007_v36 = vsel %vm18265_vm3, %v5743_v19, 0.0  ;;  %v5650_v59 = vmul.f32 %v14799_v46, %v5524_v41  ;;  %v5527_v27 = vadd.f32 %v14181_v21, %v5317_v18  ;;  %v11672_v21 = vld [vmem:[%s18203_s8 + $0x3a0] ss:$8 sps:$4 sm:$0xff]   ;;  %v11816_v33 = vld [vmem:[%s18203_s8 + $0x3f0] ss:$8 sps:$4 sm:$0xff]  }
 0x495   : > { %v7207_v2 = vrot.slane %v15385_v11, 3  ;;  %vm18269_vm2 = vcmp.eq.s32.totalorder %v15393_v28, 1  ;;  %v15404_v17 = vpack.c.bf16 %v6007_v36, %v6006_v16  ;;  %v15409_v4 = vsel %vm3472_vm10, %v15297_v10, %v15388_v60  ;;  %9189 = vmatpush1.bf16.msra.mxu0 %v11669_v55  ;;  %v11680_v55 = vld [vmem:[%s18203_s8 + $0x3b4] ss:$8 sps:$4 sm:$0xff]  }
 0x496   : > { %v18268_v19 = vrot.slane %v15377_v47, 3  ;;  %v5700_v56 = vadd.f32 %v14805_v61, %v5650_v59  ;;  %v5651_v41 = vmul.f32 %v14799_v46, %v5527_v27  ;;  %v18266_v10 = vrot.slane %v15409_v4, 3  ;;  %9190 = vmatprep.subr.bf16.mxu0 %v11674_v58  ;;  %8940 = vmatpush1.bf16.msra.mxu1 %v11642_v45  ;;  %v11654_v58 = vld [vmem:[%s18203_s8 + $0x2c0] ss:$8 sps:$4 sm:$0xff]   ;;  %v11668_v45 = vld [vmem:[%s18203_s8 + $0x2d4] ss:$8 sps:$4 sm:$0xff]  }
 0x497   : > { %v7208_v16 = vsel %vm4403_vm13, %v7189_v42, %v7207_v2  ;;  %6064 = vst [vmem:[#allocation3 + $0x48] sm:$0xff] %v15404_v17  ;;  %v7206_v27 = vsel %vm4403_vm13, %v7187_v30, %v7205_v13  ;;  %v6204_v14 = vshll.u32 %v15404_v17, 16  ;;  %v6208_v42 = vshrl.u32 %v15404_v17, 16  ;;  %8941 = vmatprep.subr.bf16.mxu1 %v11656_v54 }
 0x498   : > { %8503 = vmatprep.mubr.bf16.mxu0 %v7208_v16  ;;  %v18267_v18 = vrot.slane %v15404_v17, 1  ;;  %v5744_v36 = vmax.f32 %v5700_v56, 0.0  ;;  %v5701_v59 = vadd.f32 %v14805_v61, %v5651_v41  ;;  %v18538_v23 = vrot.slane %v15318_v50, 3  ;;  %v15449_v16 = vpop.permute.xlu0 %5872  ;;  %v5322_v56 = vpop.f32.mrb[140].mxu0 }
 0x499   : > { %8504 = vmatmul.mubr.bf16.gmra.mrb[212].mxu0 %v7206_v27  ;;  %v6202_v8 = vor.u32 %v6200_v52, %v6198_v35  ;;  %18539 = vst [vmem:[#allocation37_spill] sm:$0xff] %v15449_v16  ;;  %v18540_v41 = vrot.slane %v15286_v31, 3  ;;  %v6206_v27 = vrot.slane %v6204_v14, 1  ;;  %v6420_v52 = vrot.slane %v6204_v14, 5  ;;  %v11678_v35 = vld [vmem:[%s18203_s8 + $0x3b0] ss:$8 sps:$4 sm:$0xff]  }
 0x49a   : > { %v7212_v30 = vsel %vm4403_vm13, %v18538_v23, %v18266_v10  ;;  %v6419_v23 = vrot.slane %v6208_v42, 4  ;;  %9191 = vmatpush1.bf16.msra.mxu0 %v11672_v21  ;;  %vm18270_vm3 = vcmp.eq.s32.totalorder %v15449_v16, 1  ;;  %v5745_v54 = vmax.f32 %v5701_v59, 0.0  ;;  %v5324_v10 = vpop.f32.mrb[141].mxu0  ;;  %v11683_v21 = vld [vmem:[%s18203_s8 + $0x3c4] ss:$8 sps:$4 sm:$0xff]   ;;  %8942 = vmatpush1.bf16.msra.mxu1 %v11654_v58 }
 0x49b   : > { %8756 = vmatprep.mubr.bf16.mxu1 %v7212_v30  ;;  %v7210_v50 = vsel %vm4403_vm13, %v18540_v41, %v18268_v19  ;;  %v5532_v30 = vadd.f32 %v14235_v57, %v5322_v56  ;;  %v18541_v31 = vrot.slane %v15313_v3, 1  ;;  %9192 = vmatprep.subr.bf16.mxu0 %v11680_v55  ;;  %v6008_v14 = vsel %vm18269_vm2, %v5744_v36, 0.0  ;;  %v5325_v59 = vpop.f32.mrb[142].mxu0  ;;  %v11666_v55 = vld [vmem:[%s18203_s8 + $0x2d0] ss:$8 sps:$4 sm:$0xff]  }
 0x49c   : > { %8757 = vmatmul.mubr.bf16.gmra.mrb[164].mxu1 %v7210_v50  ;;  %v15476_v57 = vsel %vm3173_vm9, %v6202_v8, %v6206_v27  ;;  %v7223_v10 = vrot.slane %v15313_v3, 3  ;;  %v15479_v56 = vor.u32 %v6420_v52, %v6419_v23  ;;  %v15484_v50 = vpop.permute.xlu1 %5875  ;;  %v5327_v8 = vpop.f32.mrb[143].mxu0  ;;  %8943 = vmatprep.subr.bf16.mxu1 %v11668_v45  ;;  %v11677_v58 = vld [vmem:[%s18203_s8 + $0x2e4] ss:$8 sps:$4 sm:$0xff]  }
 0x49d   : > { %v15468_v41 = vsel %vm2069_vm6, %v18541_v31, %v18267_v18  ;;  %18542 = vst [vmem:[#allocation38_spill] sm:$0xff] %v15484_v50  ;;  %v6009_v31 = vsel %vm18270_vm3, %v5745_v54, 0.0  ;;  %v5652_v36 = vmul.f32 %v14799_v46, %v5532_v30  ;;  %v5535_v18 = vadd.f32 %v14244_v51, %v5325_v59  ;;  %v11681_v51 = vld [vmem:[%s18203_s8 + $0x3c0] ss:$8 sps:$4 sm:$0xff]   ;;  %v11689_v8 = vld [vmem:[%s18203_s8 + $0x2f4] ss:$8 sps:$4 sm:$0xff]  }
 0x49e   : > { %v7225_v19 = vrot.slane %v15476_v57, 3  ;;  %vm18274_vm2 = vcmp.eq.s32.totalorder %v15484_v50, 1  ;;  %v15495_v23 = vpack.c.bf16 %v6009_v31, %v6008_v14  ;;  %v15500_v52 = vsel %vm3472_vm10, %v15388_v60, %v15479_v56  ;;  %9193 = vmatpush1.bf16.msra.mxu0 %v11678_v35  ;;  %v15510_v54 = vld [vmem:[%s18201_s6] ss:$0 sm:$0xff]  ;;  %8944 = vmatpush1.bf16.msra.mxu1 %v11666_v55 }
 0x49f   : > { %v18273_v46 = vrot.slane %v15468_v41, 3  ;;  %v5702_v45 = vadd.f32 %v14805_v61, %v5652_v36  ;;  %v5653_v30 = vmul.f32 %v15510_v54, %v5535_v18  ;;  %v18271_v35 = vrot.slane %v15500_v52, 3  ;;  %9194 = vmatprep.subr.bf16.mxu0 %v11683_v21  ;;  %v11686_v61 = vld [vmem:[%s18203_s8 + $0x3d4] ss:$8 sps:$4 sm:$0xff]   ;;  %v11675_v21 = vld [vmem:[%s18203_s8 + $0x2e0] ss:$8 sps:$4 sm:$0xff]   ;;  %8945 = vmatprep.subr.bf16.mxu1 %v11677_v58 }
 0x4a0   : > { %v7226_v60 = vsel %vm4403_vm13, %v7207_v2, %v7225_v19  ;;  %6065 = vst [vmem:[#allocation3 + $0x50] sm:$0xff] %v15495_v23  ;;  %v7224_v18 = vsel %vm4403_vm13, %v7205_v13, %v7223_v10  ;;  %v6212_v11 = vshll.u32 %v15495_v23, 16  ;;  %v6216_v2 = vshrl.u32 %v15495_v23, 16  ;;  %v15537_v31 = vld [vmem:[%s18202_s7] ss:$0 sm:$0xff] }
 0x4a1   : > { %8513 = vmatprep.mubr.bf16.mxu0 %v7226_v60  ;;  %v18272_v14 = vrot.slane %v15495_v23, 1  ;;  %v5746_v59 = vmax.f32 %v5702_v45, 0.0  ;;  %v5703_v24 = vadd.f32 %v15537_v31, %v5653_v30  ;;  %v18543_v13 = vrot.slane %v15409_v4, 3  ;;  %v15550_v45 = vpop.permute.xlu0 %5878  ;;  %v5330_v60 = vpop.f32.mrb[144].mxu0 }
 0x4a2   : > { %8514 = vmatmul.mubr.bf16.gmra.mrb[216].mxu0 %v7224_v18  ;;  %v6210_v55 = vor.u32 %v6208_v42, %v6206_v27  ;;  %18544 = vst [vmem:[#allocation39_spill] sm:$0xff] %v15550_v45  ;;  %v18545_v30 = vrot.slane %v15377_v47, 3  ;;  %v6214_v18 = vrot.slane %v6212_v11, 1  ;;  %v6424_v42 = vrot.slane %v6212_v11, 5  ;;  %v11684_v27 = vld [vmem:[%s18203_s8 + $0x3d0] ss:$8 sps:$4 sm:$0xff]   ;;  %8946 = vmatpush1.bf16.msra.mxu1 %v11675_v21 }
 0x4a3   : > { %v7230_v36 = vsel %vm4403_vm13, %v18543_v13, %v18271_v35  ;;  %v6423_v13 = vrot.slane %v6216_v2, 4  ;;  %9195 = vmatpush1.bf16.msra.mxu0 %v11681_v51  ;;  %vm18275_vm3 = vcmp.eq.s32.totalorder %v15550_v45, 1  ;;  %v5747_v58 = vmax.f32 %v5703_v24, 0.0  ;;  %v5332_v35 = vpop.f32.mrb[145].mxu0  ;;  %v11692_v51 = vld [vmem:[%s18203_s8 + $0x3e4] ss:$8 sps:$4 sm:$0xff]   ;;  %8947 = vmatprep.subr.bf16.mxu1 %v11689_v8 }
 0x4a4   : > { %8766 = vmatprep.mubr.bf16.mxu1 %v7230_v36  ;;  %v7228_v4 = vsel %vm4403_vm13, %v18545_v30, %v18273_v46  ;;  %v5540_v36 = vadd.f32 %v14230_v0, %v5330_v60  ;;  %v18546_v47 = vrot.slane %v15404_v17, 1  ;;  %9196 = vmatprep.subr.bf16.mxu0 %v11686_v61  ;;  %v6010_v11 = vsel %vm18274_vm2, %v5746_v59, 0.0  ;;  %v5333_v24 = vpop.f32.mrb[146].mxu0  ;;  %v11687_v61 = vld [vmem:[%s18203_s8 + $0x2f0] ss:$8 sps:$4 sm:$0xff]  }
 0x4a5   : > { %8767 = vmatmul.mubr.bf16.gmra.mrb[168].mxu1 %v7228_v4  ;;  %v15577_v0 = vsel %vm3173_vm9, %v6210_v55, %v6214_v18  ;;  %v7241_v35 = vrot.slane %v15404_v17, 3  ;;  %v15580_v60 = vor.u32 %v6424_v42, %v6423_v13  ;;  %v15585_v4 = vpop.permute.xlu1 %5881  ;;  %v5335_v55 = vpop.f32.mrb[147].mxu0  ;;  %v6218_v3 = vor.u32 %v6216_v2, %v6214_v18  ;;  %v11693_v2 = vld [vmem:[%s18203_s8 + $0x3f0] ss:$8 sps:$4 sm:$0xff]  }
 0x4a6   : > { %v15569_v30 = vsel %vm2069_vm6, %v18546_v47, %v18272_v14  ;;  %18547 = vst [vmem:[#allocation40_spill] sm:$0xff] %v15585_v4  ;;  %v6011_v47 = vsel %vm18275_vm3, %v5747_v58, 0.0  ;;  %v5654_v59 = vmul.f32 %v15510_v54, %v5540_v36  ;;  %v5543_v14 = vadd.f32 %v14240_v53, %v5333_v24  ;;  %v11690_v53 = vld [vmem:[%s18203_s8 + $0x3e0] ss:$8 sps:$4 sm:$0xff]   ;;  %8948 = vmatpush1.bf16.msra.mxu1 %v11687_v61 }
 0x4a7   : > { %v7243_v46 = vrot.slane %v15577_v0, 3  ;;  %vm18278_vm2 = vcmp.eq.s32.totalorder %v15585_v4, 1  ;;  %v15593_v21 = vpack.c.bf16 %v6011_v47, %v6010_v11  ;;  %v15598_v13 = vsel %vm3472_vm10, %v15479_v56, %v15580_v60  ;;  %9197 = vmatpush1.bf16.msra.mxu0 %v11684_v27  ;;  %v11695_v56 = vld [vmem:[%s18203_s8 + $0x3f4] ss:$8 sps:$4 sm:$0xff]   ;;  %10965 = vmatprep.subr.bf16.mxu1 %v14923_v1 }
 0x4a8   : > { %v7245_v42 = vrot.slane %v15569_v30, 3  ;;  %v5704_v58 = vadd.f32 %v15537_v31, %v5654_v59  ;;  %v5655_v8 = vmul.f32 %v15510_v54, %v5543_v14  ;;  %v7247_v11 = vrot.slane %v15598_v13, 3  ;;  %9198 = vmatprep.subr.bf16.mxu0 %v11692_v51  ;;  %v5338_v59 = vpop.f32.mrb[148].mxu0 }
 0x4a9   : > { %v7244_v36 = vsel %vm4403_vm13, %v7225_v19, %v7243_v46  ;;  %6066 = vst [vmem:[#allocation3 + $0x58] sm:$0xff] %v15593_v21  ;;  %v7242_v14 = vsel %vm4403_vm13, %v7223_v10, %v7241_v35  ;;  %v6220_v57 = vshll.u32 %v15593_v21, 16  ;;  %v6224_v19 = vshrl.u32 %v15593_v21, 16  ;;  %v15629_v10 = vpop.permute.xlu0 %5884 }
 0x4aa   : > { %8523 = vmatprep.mubr.bf16.mxu0 %v7244_v36  ;;  %v6359_v27 = vrot.slane %v15593_v21, 1  ;;  %v5748_v51 = vmax.f32 %v5704_v58, 0.0  ;;  %v5705_v24 = vadd.f32 %v15537_v31, %v5655_v8  ;;  %v18548_v0 = vrot.slane %v15500_v52, 3  ;;  %18549 = vst [vmem:[#allocation41_spill] sm:$0xff] %v15629_v10  ;;  %v5340_v8 = vpop.f32.mrb[149].mxu0 }
 0x4ab   : > { %8524 = vmatmul.mubr.bf16.gmra.mrb[220].mxu0 %v7242_v14  ;;  %v18550_v61 = vrot.slane %v15468_v41, 3  ;;  %v6222_v13 = vrot.slane %v6220_v57, 1  ;;  %v6427_v58 = vrot.slane %v6224_v19, 4  ;;  %v6428_v52 = vrot.slane %v6220_v57, 5  ;;  %v5341_v14 = vpop.f32.mrb[150].mxu0 }
 0x4ac   : > { %v7248_v47 = vsel %vm4403_vm13, %v18548_v0, %v7247_v11  ;;  %9199 = vmatpush1.bf16.msra.mxu0 %v11690_v53  ;;  %vm18277_vm3 = vcmp.eq.s32.totalorder %v15629_v10, 1  ;;  %v5749_v1 = vmax.f32 %v5705_v24, 0.0  ;;  %v5548_v18 = vadd.f32 %v14300_v9, %v5338_v59  ;;  %v15652_v9 = vpop.permute.xlu1 %5887  ;;  %v5343_v8 = vpop.f32.mrb[151].mxu0 }
 0x4ad   : > { %8776 = vmatprep.mubr.bf16.mxu1 %v7248_v47  ;;  %v7246_v55 = vsel %vm4403_vm13, %v18550_v61, %v7245_v42  ;;  %v18551_v41 = vrot.slane %v15495_v23, 1  ;;  %9200 = vmatprep.subr.bf16.mxu0 %v11695_v56  ;;  %v6012_v53 = vsel %vm18278_vm2, %v5748_v51, 0.0  ;;  %v6223_v57 = vsel %vm3173_vm9, %v6218_v3, %v6222_v13  ;;  %18552 = vst [vmem:[#allocation42_spill] sm:$0xff] %v15652_v9  ;;  %v18553_v61 = vld [vmem:[#allocation7_spill] sm:$0xff] }
 0x4ae   : > { %8777 = vmatmul.mubr.bf16.gmra.mrb[172].mxu1 %v7246_v55  ;;  %v7259_v24 = vrot.slane %v15495_v23, 3  ;;  %v6429_v0 = vor.u32 %v6428_v52, %v6427_v58  ;;  %v6013_v47 = vsel %vm18277_vm3, %v5749_v1, 0.0  ;;  %v5656_v59 = vmul.f32 %v15510_v54, %v5548_v18 }
 0x4af   : > { %v15646_v36 = vsel %vm2069_vm6, %v18551_v41, %v6359_v27  ;;  %v5551_v55 = vadd.f32 %v18553_v61, %v5341_v14  ;;  %v7261_v56 = vrot.slane %v6223_v57, 3  ;;  %vm18282_vm15 = vcmp.eq.s32.totalorder %v15652_v9, 1  ;;  %v15678_v61 = vpop.permute.xlu0 %5890 }
 0x4b0   : > { %v15659_v51 = vpack.c.bf16 %v6013_v47, %v6012_v53  ;;  %v6430_v3 = vsel %vm3472_vm10, %v15580_v60, %v6429_v0  ;;  %v18279_v58 = vrot.slane %v15646_v36, 3  ;;  %9201 = vmatpush1.bf16.msra.mxu0 %v11693_v2  ;;  %v5706_v52 = vadd.f32 %v15537_v31, %v5656_v59  ;;  %18554 = vst [vmem:[#allocation7_spill] sm:$0xff] %v15678_v61 }
 0x4b1   : > { %v5657_v1 = vmul.f32 %v15510_v54, %v5551_v55  ;;  %v7262_v18 = vsel %vm4403_vm13, %v7243_v46, %v7261_v56  ;;  %v7265_v41 = vrot.slane %v6430_v3, 3  ;;  %v7260_v53 = vsel %vm4403_vm13, %v7241_v35, %v7259_v24  ;;  %v5346_v55 = vpop.f32.mrb[152].mxu0 }
 0x4b2   : > { %6067 = vst [vmem:[#allocation3 + $0x60] sm:$0xff] %v15659_v51  ;;  %8533 = vmatprep.mubr.bf16.mxu0 %v7262_v18  ;;  %v6228_v60 = vshll.u32 %v15659_v51, 16  ;;  %v6232_v2 = vshrl.u32 %v15659_v51, 16  ;;  %v6361_v14 = vrot.slane %v15659_v51, 1  ;;  %v5750_v57 = vmax.f32 %v5706_v52, 0.0 }
 0x4b3   : > { %v5707_v47 = vadd.f32 %v15537_v31, %v5657_v1  ;;  %8534 = vmatmul.mubr.bf16.gmra.mrb[224].mxu0 %v7260_v53  ;;  %v7266_v46 = vsel %vm4403_vm13, %v7247_v11, %v7265_v41  ;;  %v6226_v59 = vor.u32 %v6224_v19, %v6222_v13  ;;  %v7264_v17 = vsel %vm4403_vm13, %v7245_v42, %v18279_v58  ;;  %v18555_v1 = vld [vmem:[#allocation5_spill] sm:$0xff]  ;;  %v5348_v11 = vpop.f32.mrb[153].mxu0 }
 0x4b4   : > { %8786 = vmatprep.mubr.bf16.mxu1 %v7266_v46  ;;  %v6230_v35 = vrot.slane %v6228_v60, 1  ;;  %v6431_v8 = vrot.slane %v6232_v2, 4  ;;  %v6432_v3 = vrot.slane %v6228_v60, 5  ;;  %vm18280_vm3 = vcmp.eq.s32.totalorder %v15678_v61, 1  ;;  %v5349_v13 = vpop.f32.mrb[154].mxu0  ;;  %v15696_v46 = vpop.permute.xlu1 %5893  ;;  %v16064_v61 = vld [vmem:[#allocation3 + $0x20] sm:$0xff] }
 0x4b5   : > { %v5751_v52 = vmax.f32 %v5707_v47, 0.0  ;;  %v5556_v18 = vadd.f32 %v18555_v1, %v5346_v55  ;;  %v15690_v19 = vsel %vm2069_vm6, %v6359_v27, %v6361_v14  ;;  %v6014_v30 = vsel %vm18282_vm15, %v5750_v57, 0.0  ;;  %18556 = vst [vmem:[#allocation5_spill] sm:$0xff] %v15696_v46  ;;  %v5351_v27 = vpop.f32.mrb[155].mxu0 }
 0x4b6   : > { %8787 = vmatmul.mubr.bf16.gmra.mrb[176].mxu1 %v7264_v17  ;;  %v6231_v42 = vsel %vm3173_vm9, %v6226_v59, %v6230_v35  ;;  %v7277_v53 = vrot.slane %v15593_v21, 3  ;;  %v6433_v60 = vor.u32 %v6432_v3, %v6431_v8  ;;  %v18557_v17 = vld [vmem:[#allocation6_spill] sm:$0xff]  ;;  %vm18289_vm2 = vcmp.eq.s32.totalorder %v15696_v46, 1 }
 0x4b7   : > { %v6015_v47 = vsel %vm18280_vm3, %v5751_v52, 0.0  ;;  %v5658_v55 = vmul.f32 %v15510_v54, %v5556_v18  ;;  %v5559_v1 = vadd.f32 %v18557_v17, %v5349_v13  ;;  %v7279_v11 = vrot.slane %v6231_v42, 3  ;;  %v15719_v17 = vpop.permute.xlu0 %5896 }
 0x4b8   : > { %v15703_v57 = vpack.c.bf16 %v6015_v47, %v6014_v30  ;;  %v6434_v59 = vsel %vm3472_vm10, %v6429_v0, %v6433_v60  ;;  %v18281_v21 = vrot.slane %v15690_v19, 3  ;;  %v7278_v18 = vsel %vm4403_vm13, %v7259_v24, %v7277_v53  ;;  %18558 = vst [vmem:[#allocation6_spill] sm:$0xff] %v15719_v17 }
 0x4b9   : > { %v5708_v8 = vadd.f32 %v15537_v31, %v5658_v55  ;;  %v5659_v3 = vmul.f32 %v15510_v54, %v5559_v1  ;;  %v7280_v52 = vsel %vm4403_vm13, %v7261_v56, %v7279_v11  ;;  %v7283_v58 = vrot.slane %v6434_v59, 3  ;;  %v5354_v1 = vpop.f32.mrb[156].mxu0  ;;  %v11817_v39 = vld [vmem:[#allocation3 + $0x60] sm:$0xff] }
 0x4ba   : > { %6068 = vst [vmem:[#allocation3 + $0x68] sm:$0xff] %v15703_v57  ;;  %8543 = vmatprep.mubr.bf16.mxu0 %v7280_v52  ;;  %v6236_v30 = vshll.u32 %v15703_v57, 16  ;;  %v6240_v0 = vshrl.u32 %v15703_v57, 16  ;;  %v6363_v13 = vrot.slane %v15703_v57, 1  ;;  %v6234_v55 = vor.u32 %v6232_v2, %v6230_v35 }
 0x4bb   : > { %v5752_v42 = vmax.f32 %v5708_v8, 0.0  ;;  %v5709_v47 = vadd.f32 %v15537_v31, %v5659_v3  ;;  %8544 = vmatmul.mubr.bf16.gmra.mrb[228].mxu0 %v7278_v18  ;;  %v7284_v56 = vsel %vm4403_vm13, %v7265_v41, %v7283_v58  ;;  %v18559_v23 = vrot.slane %v15646_v36, 3  ;;  %v18560_v3 = vld [vmem:[#allocation10_spill] sm:$0xff]  ;;  %v5356_v41 = vpop.f32.mrb[157].mxu0 }
 0x4bc   : > { %8796 = vmatprep.mubr.bf16.mxu1 %v7284_v56  ;;  %v6238_v27 = vrot.slane %v6236_v30, 1  ;;  %v6435_v59 = vrot.slane %v6240_v0, 4  ;;  %v6436_v52 = vrot.slane %v6236_v30, 5  ;;  %vm18287_vm3 = vcmp.eq.s32.totalorder %v15719_v17, 1  ;;  %v5357_v56 = vpop.f32.mrb[158].mxu0  ;;  %v15735_v30 = vpop.permute.xlu1 %5899 }
 0x4bd   : > { %v7282_v24 = vsel %vm4403_vm13, %v18559_v23, %v18281_v21  ;;  %v5753_v8 = vmax.f32 %v5709_v47, 0.0  ;;  %v5564_v18 = vadd.f32 %v18560_v3, %v5354_v1  ;;  %v15729_v2 = vsel %vm2069_vm6, %v6361_v14, %v6363_v13  ;;  %18561 = vst [vmem:[#allocation10_spill] sm:$0xff] %v15735_v30  ;;  %v5359_v14 = vpop.f32.mrb[159].mxu0 }
 0x4be   : > { %8797 = vmatmul.mubr.bf16.gmra.mrb[180].mxu1 %v7282_v24  ;;  %v6016_v35 = vsel %vm18289_vm2, %v5752_v42, 0.0  ;;  %v6239_v36 = vsel %vm3173_vm9, %v6234_v55, %v6238_v27  ;;  %v7295_v23 = vrot.slane %v15659_v51, 3  ;;  %v6437_v21 = vor.u32 %v6436_v52, %v6435_v59  ;;  %v18562_v24 = vld [vmem:[#allocation13_spill] sm:$0xff] }
 0x4bf   : > { %v6017_v47 = vsel %vm18287_vm3, %v5753_v8, 0.0  ;;  %v5660_v1 = vmul.f32 %v15510_v54, %v5564_v18  ;;  %v5567_v3 = vadd.f32 %v18562_v24, %v5357_v56  ;;  %v7297_v41 = vrot.slane %v6239_v36, 3 }
 0x4c0   : > { %vm18296_vm15 = vcmp.eq.s32.totalorder %v15735_v30, 1  ;;  %v15742_v42 = vpack.c.bf16 %v6017_v47, %v6016_v35  ;;  %v6438_v55 = vsel %vm3472_vm10, %v6433_v60, %v6437_v21  ;;  %v18288_v51 = vrot.slane %v15729_v2, 3 }
 0x4c1   : > { %v5710_v59 = vadd.f32 %v15537_v31, %v5660_v1  ;;  %v5661_v52 = vmul.f32 %v15510_v54, %v5567_v3  ;;  %v7298_v8 = vsel %vm4403_vm13, %v7279_v11, %v7297_v41  ;;  %v7301_v17 = vrot.slane %v6438_v55, 3  ;;  %v15756_v11 = vpop.permute.xlu0 %5902  ;;  %v5362_v3 = vpop.f32.mrb[160].mxu0  ;;  %v11818_v29 = vld [vmem:[#allocation3 + $0x68] sm:$0xff] }
 0x4c2   : > { %6069 = vst [vmem:[#allocation3 + $0x70] sm:$0xff] %v15742_v42  ;;  %8553 = vmatprep.mubr.bf16.mxu0 %v7298_v8  ;;  %v7296_v18 = vsel %vm4403_vm13, %v7277_v53, %v7295_v23  ;;  %v6244_v56 = vshll.u32 %v15742_v42, 16  ;;  %v6248_v35 = vshrl.u32 %v15742_v42, 16  ;;  %v6365_v60 = vrot.slane %v15742_v42, 1  ;;  %18563 = vst [vmem:[#allocation13_spill] sm:$0xff] %v15756_v11 }
 0x4c3   : > { %v5754_v36 = vmax.f32 %v5710_v59, 0.0  ;;  %v5711_v47 = vadd.f32 %v15537_v31, %v5661_v52  ;;  %8554 = vmatmul.mubr.bf16.gmra.mrb[232].mxu0 %v7296_v18  ;;  %v7302_v1 = vsel %vm4403_vm13, %v7283_v58, %v7301_v17  ;;  %v6242_v24 = vor.u32 %v6240_v0, %v6238_v27  ;;  %v18565_v52 = vld [vmem:[#allocation9_spill] sm:$0xff]  ;;  %v5364_v58 = vpop.f32.mrb[161].mxu0 }
 0x4c4   : > { %8806 = vmatprep.mubr.bf16.mxu1 %v7302_v1  ;;  %v18564_v53 = vrot.slane %v15690_v19, 3  ;;  %v6246_v55 = vrot.slane %v6244_v56, 1  ;;  %v6439_v8 = vrot.slane %v6248_v35, 4  ;;  %v6440_v46 = vrot.slane %v6244_v56, 5  ;;  %v5365_v1 = vpop.f32.mrb[162].mxu0  ;;  %v15772_v56 = vpop.permute.xlu1 %5905 }
 0x4c5   : > { %vm18294_vm3 = vcmp.eq.s32.totalorder %v15756_v11, 1  ;;  %v5755_v59 = vmax.f32 %v5711_v47, 0.0  ;;  %v5572_v18 = vadd.f32 %v18565_v52, %v5362_v3  ;;  %v15766_v0 = vsel %vm2069_vm6, %v6363_v13, %v6365_v60  ;;  %18566 = vst [vmem:[#allocation9_spill] sm:$0xff] %v15772_v56  ;;  %v5367_v13 = vpop.f32.mrb[163].mxu0 }
 0x4c6   : > { %v7300_v14 = vsel %vm4403_vm13, %v18564_v53, %v18288_v51  ;;  %v6018_v27 = vsel %vm18296_vm15, %v5754_v36, 0.0  ;;  %v6247_v19 = vsel %vm3173_vm9, %v6242_v24, %v6246_v55  ;;  %v7313_v53 = vrot.slane %v15703_v57, 3 }
 0x4c7   : > { %8807 = vmatmul.mubr.bf16.gmra.mrb[184].mxu1 %v7300_v14  ;;  %v6441_v51 = vor.u32 %v6440_v46, %v6439_v8  ;;  %v6019_v47 = vsel %vm18294_vm3, %v5755_v59, 0.0  ;;  %v5662_v3 = vmul.f32 %v15510_v54, %v5572_v18  ;;  %v18567_v14 = vld [vmem:[#allocation12_spill] sm:$0xff]  ;;  %v7315_v58 = vrot.slane %v6247_v19, 3 }
 0x4c8   : > { %v5575_v52 = vadd.f32 %v18567_v14, %v5365_v1  ;;  %vm18303_vm2 = vcmp.eq.s32.totalorder %v15772_v56, 1  ;;  %v15779_v36 = vpack.c.bf16 %v6019_v47, %v6018_v27  ;;  %v18295_v57 = vrot.slane %v15766_v0, 3 }
 0x4c9   : > { %v6442_v24 = vsel %vm3472_vm10, %v6437_v21, %v6441_v51  ;;  %v5712_v46 = vadd.f32 %v15537_v31, %v5662_v3  ;;  %v7316_v59 = vsel %vm4403_vm13, %v7297_v41, %v7315_v58  ;;  %v7314_v18 = vsel %vm4403_vm13, %v7295_v23, %v7313_v53  ;;  %v15793_v41 = vpop.permute.xlu0 %5908  ;;  %v16464_v28 = vld [vmem:[#allocation3 + $0x70] sm:$0xff] }
 0x4ca   : > { %v5663_v8 = vmul.f32 %v15510_v54, %v5575_v52  ;;  %v7319_v11 = vrot.slane %v6442_v24, 3  ;;  %6070 = vst [vmem:[#allocation3 + $0x78] sm:$0xff] %v15779_v36  ;;  %8563 = vmatprep.mubr.bf16.mxu0 %v7316_v59  ;;  %v6252_v1 = vshll.u32 %v15779_v36, 16  ;;  %v6256_v27 = vshrl.u32 %v15779_v36, 16  ;;  %18568 = vst [vmem:[#allocation12_spill] sm:$0xff] %v15793_v41  ;;  %v5370_v52 = vpop.f32.mrb[164].mxu0 }
 0x4cb   : > { %v6367_v21 = vrot.slane %v15779_v36, 1  ;;  %v5756_v19 = vmax.f32 %v5712_v46, 0.0  ;;  %8564 = vmatmul.mubr.bf16.gmra.mrb[236].mxu0 %v7314_v18  ;;  %v6250_v14 = vor.u32 %v6248_v35, %v6246_v55  ;;  %v18569_v23 = vrot.slane %v15729_v2, 3  ;;  %v11819_v5 = vld [vmem:[#allocation3 + $0x70] sm:$0xff] }
 0x4cc   : > { %v5713_v47 = vadd.f32 %v15537_v31, %v5663_v8  ;;  %v7320_v3 = vsel %vm4403_vm13, %v7301_v17, %v7319_v11  ;;  %v6254_v24 = vrot.slane %v6252_v1, 1  ;;  %v6443_v59 = vrot.slane %v6256_v27, 4  ;;  %v18570_v8 = vld [vmem:[#allocation18_spill] sm:$0xff]  ;;  %v5372_v17 = vpop.f32.mrb[165].mxu0 }
 0x4cd   : > { %8816 = vmatprep.mubr.bf16.mxu1 %v7320_v3  ;;  %v7318_v13 = vsel %vm4403_vm13, %v18569_v23, %v18295_v57  ;;  %v6444_v30 = vrot.slane %v6252_v1, 5  ;;  %vm18301_vm3 = vcmp.eq.s32.totalorder %v15793_v41, 1  ;;  %v5580_v18 = vadd.f32 %v18570_v8, %v5370_v52  ;;  %v5373_v3 = vpop.f32.mrb[166].mxu0  ;;  %v15809_v1 = vpop.permute.xlu1 %5911 }
 0x4ce   : > { %v5757_v46 = vmax.f32 %v5713_v47, 0.0  ;;  %v15803_v35 = vsel %vm2069_vm6, %v6365_v60, %v6367_v21  ;;  %v6020_v55 = vsel %vm18303_vm2, %v5756_v19, 0.0  ;;  %v6255_v2 = vsel %vm3173_vm9, %v6250_v14, %v6254_v24  ;;  %18571 = vst [vmem:[#allocation18_spill] sm:$0xff] %v15809_v1  ;;  %v5375_v60 = vpop.f32.mrb[167].mxu0 }
 0x4cf   : > { %8817 = vmatmul.mubr.bf16.gmra.mrb[188].mxu1 %v7318_v13  ;;  %v7331_v23 = vrot.slane %v15742_v42, 3  ;;  %v6445_v57 = vor.u32 %v6444_v30, %v6443_v59  ;;  %v5664_v52 = vmul.f32 %v15510_v54, %v5580_v18  ;;  %v18572_v13 = vld [vmem:[#allocation23_spill] sm:$0xff]  ;;  %v7333_v17 = vrot.slane %v6255_v2, 3 }
 0x4d0   : > { %v6021_v47 = vsel %vm18301_vm3, %v5757_v46, 0.0  ;;  %v5583_v8 = vadd.f32 %v18572_v13, %v5373_v3  ;;  %vm18309_vm15 = vcmp.eq.s32.totalorder %v15809_v1, 1  ;;  %v18302_v42 = vrot.slane %v15803_v35, 3 }
 0x4d1   : > { %v15816_v19 = vpack.c.bf16 %v6021_v47, %v6020_v55  ;;  %v6446_v14 = vsel %vm3472_vm10, %v6441_v51, %v6445_v57  ;;  %v5714_v30 = vadd.f32 %v15537_v31, %v5664_v52  ;;  %v7334_v46 = vsel %vm4403_vm13, %v7315_v58, %v7333_v17  ;;  %v15830_v58 = vpop.permute.xlu0 %5914 }
 0x4d2   : > { %v5665_v59 = vmul.f32 %v15510_v54, %v5583_v8  ;;  %v7337_v41 = vrot.slane %v6446_v14, 3  ;;  %8573 = vmatprep.mubr.bf16.mxu0 %v7334_v46  ;;  %v7332_v18 = vsel %vm4403_vm13, %v7313_v53, %v7331_v23  ;;  %v6258_v13 = vor.u32 %v6256_v27, %v6254_v24  ;;  %18573 = vst [vmem:[#allocation23_spill] sm:$0xff] %v15830_v58  ;;  %v5378_v8 = vpop.f32.mrb[168].mxu0 }
 0x4d3   : > { %6071 = vst [vmem:[#allocation3 + $0x80] sm:$0xff] %v15816_v19  ;;  %v6260_v3 = vshll.u32 %v15816_v19, 16  ;;  %v6264_v55 = vshrl.u32 %v15816_v19, 16  ;;  %v6369_v51 = vrot.slane %v15816_v19, 1  ;;  %v5758_v2 = vmax.f32 %v5714_v30, 0.0  ;;  %8574 = vmatmul.mubr.bf16.gmra.mrb[240].mxu0 %v7332_v18 }
 0x4d4   : > { %v5715_v47 = vadd.f32 %v15537_v31, %v5665_v59  ;;  %v7338_v52 = vsel %vm4403_vm13, %v7319_v11, %v7337_v41  ;;  %v18574_v53 = vrot.slane %v15766_v0, 3  ;;  %vm18308_vm3 = vcmp.eq.s32.totalorder %v15830_v58, 1  ;;  %v18575_v59 = vld [vmem:[#allocation16_spill] sm:$0xff]  ;;  %v5380_v11 = vpop.f32.mrb[169].mxu0 }
 0x4d5   : > { %8826 = vmatprep.mubr.bf16.mxu1 %v7338_v52  ;;  %v6262_v14 = vrot.slane %v6260_v3, 1  ;;  %v6447_v46 = vrot.slane %v6264_v55, 4  ;;  %v6448_v56 = vrot.slane %v6260_v3, 5  ;;  %v5588_v18 = vadd.f32 %v18575_v59, %v5378_v8  ;;  %v5381_v52 = vpop.f32.mrb[170].mxu0  ;;  %v15846_v3 = vpop.permute.xlu1 %5917 }
 0x4d6   : > { %v7336_v60 = vsel %vm4403_vm13, %v18574_v53, %v18302_v42  ;;  %v5759_v30 = vmax.f32 %v5715_v47, 0.0  ;;  %v15840_v27 = vsel %vm2069_vm6, %v6367_v21, %v6369_v51  ;;  %v6022_v24 = vsel %vm18309_vm15, %v5758_v2, 0.0  ;;  %18576 = vst [vmem:[#allocation16_spill] sm:$0xff] %v15846_v3  ;;  %v5383_v21 = vpop.f32.mrb[171].mxu0 }
 0x4d7   : > { %8827 = vmatmul.mubr.bf16.gmra.mrb[192].mxu1 %v7336_v60  ;;  %v6263_v0 = vsel %vm3173_vm9, %v6258_v13, %v6262_v14  ;;  %v7349_v53 = vrot.slane %v15779_v36, 3  ;;  %v6449_v42 = vor.u32 %v6448_v56, %v6447_v46  ;;  %v5666_v8 = vmul.f32 %v15510_v54, %v5588_v18  ;;  %v18577_v60 = vld [vmem:[#allocation15_spill] sm:$0xff] }
 0x4d8   : > { %v6023_v47 = vsel %vm18308_vm3, %v5759_v30, 0.0  ;;  %v5591_v59 = vadd.f32 %v18577_v60, %v5381_v52  ;;  %v7351_v11 = vrot.slane %v6263_v0, 3  ;;  %vm18311_vm2 = vcmp.eq.s32.totalorder %v15846_v3, 1 }
 0x4d9   : > { %v15853_v2 = vpack.c.bf16 %v6023_v47, %v6022_v24  ;;  %v6450_v13 = vsel %vm3472_vm10, %v6445_v57, %v6449_v42  ;;  %v7353_v36 = vrot.slane %v15840_v27, 3  ;;  %v5716_v56 = vadd.f32 %v15537_v31, %v5666_v8 }
 0x4da   : > { %v5667_v46 = vmul.f32 %v15510_v54, %v5591_v59  ;;  %v7352_v30 = vsel %vm4403_vm13, %v7333_v17, %v7351_v11  ;;  %v7355_v58 = vrot.slane %v6450_v13, 3  ;;  %v7350_v18 = vsel %vm4403_vm13, %v7331_v23, %v7349_v53  ;;  %v15867_v17 = vpop.permute.xlu0 %5920  ;;  %v5386_v59 = vpop.f32.mrb[172].mxu0 }
 0x4db   : > { %6072 = vst [vmem:[#allocation3 + $0x88] sm:$0xff] %v15853_v2  ;;  %8583 = vmatprep.mubr.bf16.mxu0 %v7352_v30  ;;  %v6268_v52 = vshll.u32 %v15853_v2, 16  ;;  %v6272_v24 = vshrl.u32 %v15853_v2, 16  ;;  %v6371_v57 = vrot.slane %v15853_v2, 1  ;;  %v5760_v0 = vmax.f32 %v5716_v56, 0.0  ;;  %18578 = vst [vmem:[#allocation15_spill] sm:$0xff] %v15867_v17 }
 0x4dc   : > { %v5717_v47 = vadd.f32 %v15537_v31, %v5667_v46  ;;  %8584 = vmatmul.mubr.bf16.gmra.mrb[244].mxu0 %v7350_v18  ;;  %v7356_v8 = vsel %vm4403_vm13, %v7337_v41, %v7355_v58  ;;  %v6266_v60 = vor.u32 %v6264_v55, %v6262_v14  ;;  %v18579_v23 = vrot.slane %v15803_v35, 3  ;;  %v5388_v41 = vpop.f32.mrb[173].mxu0 }
 0x4dd   : > { %8836 = vmatprep.mubr.bf16.mxu1 %v7356_v8  ;;  %v6270_v13 = vrot.slane %v6268_v52, 1  ;;  %v6451_v30 = vrot.slane %v6272_v24, 4  ;;  %v6452_v1 = vrot.slane %v6268_v52, 5  ;;  %vm18310_vm3 = vcmp.eq.s32.totalorder %v15867_v17, 1  ;;  %v5389_v18 = vpop.f32.mrb[174].mxu0  ;;  %v15883_v52 = vpop.permute.xlu1 %5923 }
 0x4de   : > { %v7354_v21 = vsel %vm4403_vm13, %v18579_v23, %v7353_v36  ;;  %v5761_v56 = vmax.f32 %v5717_v47, 0.0  ;;  %v5596_v46 = vadd.f32 %v14604_v7, %v5386_v59  ;;  %v15877_v55 = vsel %vm2069_vm6, %v6369_v51, %v6371_v57  ;;  %18580 = vst [vmem:[#allocation43_spill] sm:$0xff] %v15883_v52  ;;  %v5391_v51 = vpop.f32.mrb[175].mxu0 }
 0x4df   : > { %8837 = vmatmul.mubr.bf16.gmra.mrb[196].mxu1 %v7354_v21  ;;  %v6024_v14 = vsel %vm18311_vm2, %v5760_v0, 0.0  ;;  %v6271_v35 = vsel %vm3173_vm9, %v6266_v60, %v6270_v13  ;;  %v7367_v8 = vrot.slane %v15816_v19, 3  ;;  %v6453_v23 = vor.u32 %v6452_v1, %v6451_v30 }
 0x4e0   : > { %v6025_v47 = vsel %vm18310_vm3, %v5761_v56, 0.0  ;;  %v5668_v7 = vmul.f32 %v15510_v54, %v5596_v46  ;;  %v5599_v59 = vadd.f32 %v14615_v49, %v5389_v18  ;;  %v7369_v21 = vrot.slane %v6271_v35, 3 }
 0x4e1   : > { %vm18313_vm15 = vcmp.eq.s32.totalorder %v15883_v52, 1  ;;  %v15890_v0 = vpack.c.bf16 %v6025_v47, %v6024_v14  ;;  %v6454_v60 = vsel %vm3472_vm10, %v6449_v42, %v6453_v23  ;;  %v7371_v19 = vrot.slane %v15877_v55, 3 }
 0x4e2   : > { %v5718_v1 = vadd.f32 %v15537_v31, %v5668_v7  ;;  %v5669_v30 = vmul.f32 %v15510_v54, %v5599_v59  ;;  %v7370_v56 = vsel %vm4403_vm13, %v7351_v11, %v7369_v21  ;;  %v7373_v41 = vrot.slane %v6454_v60, 3  ;;  %v15904_v11 = vpop.permute.xlu0 %5926  ;;  %v5394_v59 = vpop.f32.mrb[176].mxu0 }
 0x4e3   : > { %6073 = vst [vmem:[#allocation3 + $0x90] sm:$0xff] %v15890_v0  ;;  %8593 = vmatprep.mubr.bf16.mxu0 %v7370_v56  ;;  %v7368_v49 = vsel %vm4403_vm13, %v7349_v53, %v7367_v8  ;;  %v6276_v46 = vshll.u32 %v15890_v0, 16  ;;  %v6280_v14 = vshrl.u32 %v15890_v0, 16  ;;  %v6373_v42 = vrot.slane %v15890_v0, 1  ;;  %18581 = vst [vmem:[#allocation44_spill] sm:$0xff] %v15904_v11 }
 0x4e4   : > { %v5762_v18 = vmax.f32 %v5718_v1, 0.0  ;;  %v5719_v35 = vadd.f32 %v15537_v31, %v5669_v30  ;;  %8594 = vmatmul.mubr.bf16.gmra.mrb[248].mxu0 %v7368_v49  ;;  %v7374_v47 = vsel %vm4403_vm13, %v7355_v58, %v7373_v41  ;;  %v6274_v7 = vor.u32 %v6272_v24, %v6270_v13  ;;  %v5396_v58 = vpop.f32.mrb[177].mxu0 }
 0x4e5   : > { %8846 = vmatprep.mubr.bf16.mxu1 %v7374_v47  ;;  %v7372_v53 = vsel %vm4403_vm13, %v7353_v36, %v7371_v19  ;;  %v6278_v51 = vrot.slane %v6276_v46, 1  ;;  %v6455_v60 = vrot.slane %v6280_v14, 4  ;;  %v6456_v56 = vrot.slane %v6276_v46, 5  ;;  %v5397_v49 = vpop.f32.mrb[178].mxu0  ;;  %v15920_v46 = vpop.permute.xlu1 %5929 }
 0x4e6   : > { %vm18312_vm3 = vcmp.eq.s32.totalorder %v15904_v11, 1  ;;  %v5763_v1 = vmax.f32 %v5719_v35, 0.0  ;;  %v5604_v30 = vadd.f32 %v14598_v26, %v5394_v59  ;;  %v15914_v24 = vsel %vm2069_vm6, %v6371_v57, %v6373_v42  ;;  %18582 = vst [vmem:[#allocation45_spill] sm:$0xff] %v15920_v46  ;;  %v5399_v57 = vpop.f32.mrb[179].mxu0 }
 0x4e7   : > { %8847 = vmatmul.mubr.bf16.gmra.mrb[200].mxu1 %v7372_v53  ;;  %v6026_v13 = vsel %vm18313_vm15, %v5762_v18, 0.0  ;;  %v6279_v27 = vsel %vm3173_vm9, %v6274_v7, %v6278_v51  ;;  %v7385_v36 = vrot.slane %v15853_v2, 3  ;;  %v6457_v47 = vor.u32 %v6456_v56, %v6455_v60 }
 0x4e8   : > { %v6027_v35 = vsel %vm18312_vm3, %v5763_v1, 0.0  ;;  %v5670_v26 = vmul.f32 %v15510_v54, %v5604_v30  ;;  %v5607_v59 = vadd.f32 %v14606_v48, %v5397_v49  ;;  %v7387_v53 = vrot.slane %v6279_v27, 3 }
 0x4e9   : > { %vm5984_vm2 = vcmp.eq.s32.totalorder %v15920_v46, 1  ;;  %v15927_v18 = vpack.c.bf16 %v6027_v35, %v6026_v13  ;;  %v6458_v7 = vsel %vm3472_vm10, %v6453_v23, %v6457_v47  ;;  %v18314_v2 = vrot.slane %v15914_v24, 3 }
 0x4ea   : > { %v5720_v60 = vadd.f32 %v15537_v31, %v5670_v26  ;;  %v5671_v56 = vmul.f32 %v15510_v54, %v5607_v59  ;;  %v7388_v1 = vsel %vm4403_vm13, %v7369_v21, %v7387_v53  ;;  %v7391_v58 = vrot.slane %v6458_v7, 3  ;;  %v15941_v21 = vpop.permute.xlu0 %5932  ;;  %v5402_v59 = vpop.f32.mrb[180].mxu0 }
 0x4eb   : > { %6074 = vst [vmem:[#allocation3 + $0x98] sm:$0xff] %v15927_v18  ;;  %8603 = vmatprep.mubr.bf16.mxu0 %v7388_v1  ;;  %v7386_v48 = vsel %vm4403_vm13, %v7367_v8, %v7385_v36  ;;  %v6284_v30 = vshll.u32 %v15927_v18, 16  ;;  %v6288_v13 = vshrl.u32 %v15927_v18, 16  ;;  %v6375_v23 = vrot.slane %v15927_v18, 1  ;;  %18583 = vst [vmem:[#allocation46_spill] sm:$0xff] %v15941_v21 }
 0x4ec   : > { %v5764_v49 = vmax.f32 %v5720_v60, 0.0  ;;  %v5721_v27 = vadd.f32 %v15537_v31, %v5671_v56  ;;  %8604 = vmatmul.mubr.bf16.gmra.mrb[252].mxu0 %v7386_v48  ;;  %v7392_v35 = vsel %vm4403_vm13, %v7373_v41, %v7391_v58  ;;  %v6282_v26 = vor.u32 %v6280_v14, %v6278_v51  ;;  %v5404_v41 = vpop.f32.mrb[181].mxu0 }
 0x4ed   : > { %8856 = vmatprep.mubr.bf16.mxu1 %v7392_v35  ;;  %v7390_v8 = vsel %vm4403_vm13, %v7371_v19, %v18314_v2  ;;  %v6286_v57 = vrot.slane %v6284_v30, 1  ;;  %v6459_v7 = vrot.slane %v6288_v13, 4  ;;  %v6460_v1 = vrot.slane %v6284_v30, 5  ;;  %v5405_v48 = vpop.f32.mrb[182].mxu0  ;;  %v15957_v30 = vpop.permute.xlu1 %5935 }
 0x4ee   : > { %vm18315_vm3 = vcmp.eq.s32.totalorder %v15941_v21, 1  ;;  %v5765_v60 = vmax.f32 %v5721_v27, 0.0  ;;  %v5612_v56 = vadd.f32 %v14626_v63, %v5402_v59  ;;  %v15951_v14 = vsel %vm2069_vm6, %v6373_v42, %v6375_v23  ;;  %18584 = vst [vmem:[#allocation47_spill] sm:$0xff] %v15957_v30  ;;  %v18585_v59 = vld [vmem:[#allocation27_spill] sm:$0xff]  ;;  %v5407_v42 = vpop.f32.mrb[183].mxu0  ;;  %v18588_v21 = vld [vmem:[#allocation24_spill] sm:$0xff] }
 0x4ef   : > { %8857 = vmatmul.mubr.bf16.gmra.mrb[204].mxu1 %v7390_v8  ;;  %v6028_v51 = vsel %vm5984_vm2, %v5764_v49, 0.0  ;;  %v7403_v55 = vrot.slane %v15890_v0, 3  ;;  %v6287_v19 = vsel %vm3173_vm9, %v6282_v26, %v6286_v57  ;;  %v6461_v35 = vor.u32 %v6460_v1, %v6459_v7 }
 0x4f0   : > { %v6029_v27 = vsel %vm18315_vm3, %v5765_v60, 0.0  ;;  %v5672_v63 = vmul.f32 %v15510_v54, %v5612_v56  ;;  %v5615_v8 = vadd.f32 %v18585_v59, %v5405_v48  ;;  %v7405_v41 = vrot.slane %v6287_v19, 3  ;;  %v5410_v59 = vpop.f32.mrb[184].mxu0 }
 0x4f1   : > { %vm18321_vm15 = vcmp.eq.s32.totalorder %v15957_v30, 1  ;;  %v15964_v49 = vpack.c.bf16 %v6029_v27, %v6028_v51  ;;  %v6462_v0 = vsel %vm3472_vm10, %v6457_v47, %v6461_v35  ;;  %v7407_v26 = vrot.slane %v15951_v14, 3 }
 0x4f2   : > { %v5722_v7 = vadd.f32 %v15537_v31, %v5672_v63  ;;  %v5673_v1 = vmul.f32 %v15510_v54, %v5615_v8  ;;  %v7406_v60 = vsel %vm4403_vm13, %v7387_v53, %v7405_v41  ;;  %v7409_v2 = vrot.slane %v6462_v0, 3  ;;  %v15978_v53 = vpop.permute.xlu0 %5938 }
 0x4f3   : > { %6075 = vst [vmem:[#allocation3 + $0xa0] sm:$0xff] %v15964_v49  ;;  %v7404_v56 = vsel %vm4403_vm13, %v7385_v36, %v7403_v55  ;;  %8613 = vmatprep.mubr.bf16.mxu0 %v7406_v60  ;;  %v6292_v48 = vshll.u32 %v15964_v49, 16  ;;  %v6296_v51 = vshrl.u32 %v15964_v49, 16  ;;  %v6377_v47 = vrot.slane %v15964_v49, 1  ;;  %18586 = vst [vmem:[#allocation27_spill] sm:$0xff] %v15978_v53 }
 0x4f4   : > { %v5766_v19 = vmax.f32 %v5722_v7, 0.0  ;;  %v5723_v14 = vadd.f32 %v15537_v31, %v5673_v1  ;;  %8614 = vmatmul.mubr.bf16.gmra.mrb[0].mxu0 %v7404_v56  ;;  %v7410_v27 = vsel %vm4403_vm13, %v7391_v58, %v7409_v2  ;;  %v6290_v63 = vor.u32 %v6288_v13, %v6286_v57  ;;  %v5412_v56 = vpop.f32.mrb[185].mxu0 }
 0x4f5   : > { %8866 = vmatprep.mubr.bf16.mxu1 %v7410_v27  ;;  %v18587_v36 = vrot.slane %v15914_v24, 3  ;;  %v6294_v42 = vrot.slane %v6292_v48, 1  ;;  %v6463_v0 = vrot.slane %v6296_v51, 4  ;;  %v6464_v60 = vrot.slane %v6292_v48, 5  ;;  %v5413_v57 = vpop.f32.mrb[186].mxu0 }
 0x4f6   : > { %vm18320_vm3 = vcmp.eq.s32.totalorder %v15978_v53, 1  ;;  %v5767_v7 = vmax.f32 %v5723_v14, 0.0  ;;  %v5620_v1 = vadd.f32 %v18588_v21, %v5410_v59  ;;  %v15986_v58 = vsel %vm2069_vm6, %v6375_v23, %v6377_v47  ;;  %v18589_v21 = vld [vmem:[#allocation26_spill] sm:$0xff] }
 0x4f7   : > { %v7408_v8 = vsel %vm4403_vm13, %v18587_v36, %v7407_v26  ;;  %v6030_v13 = vsel %vm18321_vm15, %v5766_v19, 0.0  ;;  %v6295_v24 = vsel %vm3173_vm9, %v6290_v63, %v6294_v42  ;;  %v7421_v27 = vrot.slane %v15927_v18, 3 }
 0x4f8   : > { %8867 = vmatmul.mubr.bf16.gmra.mrb[208].mxu1 %v7408_v8  ;;  %v6465_v36 = vor.u32 %v6464_v60, %v6463_v0  ;;  %v6031_v48 = vsel %vm18320_vm3, %v5767_v7, 0.0  ;;  %v5674_v14 = vmul.f32 %v15510_v54, %v5620_v1  ;;  %v5623_v59 = vadd.f32 %v18589_v21, %v5413_v57  ;;  %v5415_v8 = vpop.f32.mrb[187].mxu0  ;;  %v16003_v7 = vpop.permute.xlu1 %5941 }
 0x4f9   : > { %v7423_v56 = vrot.slane %v6295_v24, 3  ;;  %v15996_v23 = vpack.c.bf16 %v6031_v48, %v6030_v13  ;;  %v7425_v19 = vrot.slane %v15986_v58, 3  ;;  %18590 = vst [vmem:[#allocation24_spill] sm:$0xff] %v16003_v7  ;;  %v7422_v1 = vsel %vm4403_vm13, %v7403_v55, %v7421_v27  ;;  %v16010_v57 = vpop.permute.xlu0 %5944 }
 0x4fa   : > { %v6466_v30 = vsel %vm3472_vm10, %v6461_v35, %v6465_v36  ;;  %v5724_v63 = vadd.f32 %v15537_v31, %v5674_v14  ;;  %v5675_v18 = vmul.f32 %v15510_v54, %v5623_v59  ;;  %18591 = vst [vmem:[#allocation26_spill] sm:$0xff] %v16010_v57  ;;  %vm5988_vm3 = vcmp.eq.s32.totalorder %v16003_v7, 1 }
 0x4fb   : > { %v7424_v0 = vsel %vm4403_vm13, %v7405_v41, %v7423_v56  ;;  %v7427_v60 = vrot.slane %v6466_v30, 3  ;;  %6076 = vst [vmem:[#allocation3 + $0xa8] sm:$0xff] %v15996_v23  ;;  %v6300_v13 = vshll.u32 %v15996_v23, 16  ;;  %v18325_v35 = vshrl.u32 %v15996_v23, 16 }
 0x4fc   : > { %8623 = vmatprep.mubr.bf16.mxu0 %v7424_v0  ;;  %v18324_v58 = vrot.slane %v15996_v23, 1  ;;  %v5768_v24 = vmax.f32 %v5724_v63, 0.0  ;;  %v5725_v54 = vadd.f32 %v15537_v31, %v5675_v18  ;;  %v6298_v41 = vor.u32 %v6296_v51, %v6294_v42 }
 0x4fd   : > { %8624 = vmatmul.mubr.bf16.gmra.mrb[4].mxu0 %v7422_v1  ;;  %v7428_v30 = vsel %vm4403_vm13, %v7409_v2, %v7427_v60  ;;  %v7426_v48 = vsel %vm4403_vm13, %v7407_v26, %v7425_v19  ;;  %v6302_v14 = vrot.slane %v6300_v13, 1  ;;  %v6467_v55 = vrot.slane %v18325_v35, 4  ;;  %v16035_v1 = vld [vmem:[#allocation3 + $0x8] sm:$0xf0] }
 0x4fe   : > { %8876 = vmatprep.mubr.bf16.mxu1 %v7428_v30  ;;  %v6468_v21 = vrot.slane %v6300_v13, 5  ;;  %v5769_v59 = vmax.f32 %v5725_v54, 0.0  ;;  %v16021_v31 = vsel %vm2069_vm6, %v6377_v47, %v18324_v58  ;;  %vm5989_vm15 = vcmp.eq.s32.totalorder %v16010_v57, 1  ;;  %v16040_v30 = vld [vmem:[#allocation3 + $0x18] sm:$0xff] }
 0x4ff   : > { %v16025_v2 = vsel %vm3173_vm9, %v6298_v41, %v6302_v14  ;;  %v18322_v26 = vrot.slane %v15964_v49, 3  ;;  %v6032_v42 = vsel %vm5988_vm3, %v5768_v24, 0.0  ;;  %v7443_v0 = vrot.slane %v16021_v31, 3 }
 0x500   : > { %8877 = vmatmul.mubr.bf16.gmra.mrb[212].mxu1 %v7426_v48  ;;  %v6469_v51 = vor.u32 %v6468_v21, %v6467_v55  ;;  %v6033_v8 = vsel %vm5989_vm15, %v5769_v59, 0.0  ;;  %v18323_v63 = vrot.slane %v16025_v2, 3  ;;  %v6795_v21 = vshrl.u32 %v16035_v1, 16  ;;  %v6105_v59 = vld [vmem:[#allocation3 + $0x8] sm:$0xff] }
 0x501   : > { %v6055_v18 = vpack.c.bf16 %v6033_v8, %v6032_v42  ;;  %v7440_v24 = vsel %vm4403_vm13, %v7421_v27, %v18322_v26  ;;  %v6542_v8 = vshrl.u32 %v16040_v30, 16  ;;  %v18593_v17 = vrot.slane %v15996_v23, 1 }
 0x502   : > { %v6470_v47 = vsel %vm3472_vm10, %v6465_v36, %v6469_v51  ;;  %v7442_v13 = vsel %vm4403_vm13, %v7423_v56, %v18323_v63  ;;  %v16045_v36 = vld [vmem:[#allocation3 + $0x10] sm:$0xff]  ;;  %v7444_v56 = vsel %vm4403_vm13, %v7425_v19, %v7443_v0  ;;  %v16055_v63 = vrot.slane %v6795_v21, 1 }
 0x503   : > { %v7445_v54 = vrot.slane %v6470_v47, 3  ;;  %6077 = vst [vmem:[#allocation3 + $0xb0] sm:$0xff] %v6055_v18  ;;  %8633 = vmatprep.mubr.bf16.mxu0 %v7442_v13  ;;  %v6472_v41 = vshrl.u32 %v6055_v18, 16  ;;  %v6475_v48 = vshll.u32 %v6055_v18, 16  ;;  %v6533_v27 = vshrl.u32 %v16045_v36, 16 }
 0x504   : > { %v6536_v18 = vshll.u32 %v16045_v36, 16  ;;  %v6545_v47 = vshll.u32 %v16040_v30, 16  ;;  %v6798_v19 = vshll.u32 %v16035_v1, 16 }
 0x505   : > { %8634 = vmatmul.mubr.bf16.gmra.mrb[8].mxu0 %v7440_v24  ;;  %v7446_v55 = vsel %vm4403_vm13, %v7427_v60, %v7445_v54  ;;  %v6474_v31 = vrot.slane %v6472_v41, 4  ;;  %v6477_v42 = vrot.slane %v6475_v48, 5  ;;  %v6525_v24 = vshrl.u32 %v6105_v59, 16 }
 0x506   : > { %8886 = vmatprep.mubr.bf16.mxu1 %v7446_v55  ;;  %v6528_v60 = vshll.u32 %v6105_v59, 16  ;;  %v6806_v41 = vrot.slane %v6542_v8, 1  ;;  %v6807_v58 = vrot.slane %v6545_v47, 2  ;;  %v6538_v35 = vrot.slane %v6536_v18, 6 }
 0x507   : > { %v6478_v13 = vor.u32 %v6477_v42, %v6474_v31  ;;  %v6527_v53 = vrot.slane %v6525_v24, 5  ;;  %v18592_v31 = vshrl.u32 %v15996_v23, 16  ;;  %v6803_v21 = vrot.slane %v6536_v18, 2 }
 0x508   : > { %8887 = vmatmul.mubr.bf16.gmra.mrb[216].mxu1 %v7444_v56  ;;  %v6535_v56 = vrot.slane %v6533_v27, 5  ;;  %v6530_v46 = vrot.slane %v6528_v60, 6  ;;  %v6800_v24 = vrot.slane %v6798_v19, 2  ;;  %v6808_v60 = vor.u32 %v6807_v58, %v6806_v41  ;;  %v11775_v41 = vld [vmem:[#allocation3 + $0x10] sm:$0xff] }
 0x509   : > { %v6479_v26 = vsel %vm3472_vm10, %v6469_v51, %v6478_v13  ;;  %v6306_v42 = vor.u32 %v18592_v31, %v6302_v14  ;;  %v6802_v51 = vrot.slane %v6533_v27, 1  ;;  %v7481_v3 = vrot.slane %v6478_v13, 3 }
 0x50a   : > { %v6101_v48 = vld [vmem:[#allocation3 + $0xb0] sm:$0xf]  ;;  %v7463_v55 = vrot.slane %v6479_v26, 3  ;;  %v6539_v10 = vor.u32 %v6538_v35, %v6535_v56  ;;  %v6531_v18 = vor.u32 %v6530_v46, %v6527_v53  ;;  %v6551_v31 = vshrl.u32 %v16064_v61, 16 }
 0x50b   : > { %v6308_v57 = vshll.u32 %v6101_v48, 16  ;;  %v6381_v7 = vrot.slane %v6101_v48, 1  ;;  %v6312_v52 = vshrl.u32 %v6101_v48, 16  ;;  %v6804_v19 = vor.u32 %v6803_v21, %v6802_v51 }
 0x50c   : > { %v7464_v59 = vsel %vm4403_vm13, %v7445_v54, %v7463_v55  ;;  %v7457_v54 = vrot.slane %v15996_v23, 3  ;;  %v18594_v35 = vrot.slane %v16025_v2, 3  ;;  %v6547_v46 = vrot.slane %v6545_v47, 6  ;;  %v6100_v2 = vld [vmem:[#allocation3 + $0xb0] sm:$0x7] }
 0x50d   : > { %v6310_v11 = vrot.slane %v6308_v57, 1  ;;  %8896 = vmatprep.mubr.bf16.mxu1 %v7464_v59  ;;  %v6382_v26 = vsel %vm2069_vm6, %v18593_v17, %v6381_v7  ;;  %v6554_v17 = vshll.u32 %v16064_v61, 16  ;;  %v7482_v59 = vsel %vm4403_vm13, %v7463_v55, %v7481_v3 }
 0x50e   : > { %v7461_v9 = vrot.slane %v6382_v26, 3  ;;  %v18595_v53 = vrot.slane %v15964_v49, 3  ;;  %v6801_v3 = vor.u32 %v6800_v24, %v16055_v63  ;;  %v6482_v55 = vrot.slane %v11775_v41, 5  ;;  %v11776_v49 = vld [vmem:[#allocation3 + $0x8] sm:$0xff] }
 0x50f   : > { %v6311_v14 = vsel %vm3173_vm9, %v6306_v42, %v6310_v11  ;;  %v6314_v27 = vor.u32 %v6312_v52, %v6310_v11  ;;  %v16076_v52 = vsel %vm3661_vm12, %v6531_v18, %v6539_v10  ;;  %v6544_v11 = vrot.slane %v6542_v8, 5  ;;  %v16087_v26 = vld [vmem:[#allocation3 + $0x28] sm:$0xff] }
 0x510   : > { %v7459_v57 = vrot.slane %v6311_v14, 3  ;;  %v7462_v48 = vsel %vm4403_vm13, %v7443_v0, %v7461_v9  ;;  %v7458_v23 = vsel %vm4403_vm13, %v18595_v53, %v7457_v54  ;;  %v16084_v56 = vsel %vm3808_vm14, %v6804_v19, %v6808_v60 }
 0x511   : > { %v7477_v13 = vrot.slane %v6314_v27, 3  ;;  %8897 = vmatmul.mubr.bf16.gmra.mrb[220].mxu1 %v7462_v48  ;;  %v7479_v42 = vrot.slane %v6381_v7, 3  ;;  %v6810_v51 = vrot.slane %v6551_v31, 1  ;;  %v6811_v8 = vrot.slane %v6554_v17, 2 }
 0x512   : > { %v7460_v58 = vsel %vm4403_vm13, %v18594_v35, %v7459_v57  ;;  %8906 = vmatprep.mubr.bf16.mxu1 %v7482_v59  ;;  %v7104_v47 = vrot.slane %v16076_v52, 3  ;;  %v6481_v21 = vrot.slane %v11776_v49, 5  ;;  %v6752_v14 = vrot.slane %v16040_v30, 1 }
 0x513   : > { %8643 = vmatprep.mubr.bf16.mxu0 %v7460_v58  ;;  %v7478_v0 = vsel %vm4403_vm13, %v7459_v57, %v7477_v13  ;;  %v6805_v63 = vsel %vm3808_vm14, %v6801_v3, %v6804_v19  ;;  %v6548_v24 = vor.u32 %v6547_v46, %v6544_v11  ;;  %v7475_v27 = vrot.slane %v6100_v2, 3  ;;  %v11777_v2 = vld [vmem:[#allocation3 + $0x18] sm:$0xff] }
 0x514   : > { %8644 = vmatmul.mubr.bf16.gmra.mrb[12].mxu0 %v7458_v23  ;;  %v7110_v57 = vrot.slane %v16084_v56, 3  ;;  %v7103_v48 = vrot.slane %v6531_v18, 3  ;;  %v16093_v7 = vsel %vm910_vm0, %v6481_v21, %v6482_v55  ;;  %v7480_v13 = vsel %vm4403_vm13, %v7461_v9, %v7479_v42 }
 0x515   : > { %8653 = vmatprep.mubr.bf16.mxu0 %v7478_v0  ;;  %v6812_v59 = vor.u32 %v6811_v8, %v6810_v51  ;;  %v6560_v35 = vshrl.u32 %v16087_v26, 16  ;;  %v6563_v58 = vshll.u32 %v16087_v26, 16  ;;  %v6750_v52 = vrot.slane %v16045_v36, 1 }
 0x516   : > { %v7109_v30 = vrot.slane %v6805_v63, 3  ;;  %v7105_v19 = vsel %vm4403_vm13, %v7103_v48, %v7104_v47  ;;  %v6749_v11 = vrot.slane %v16035_v1, 1  ;;  %v16102_v18 = vsel %vm3661_vm12, %v6539_v10, %v6548_v24 }
 0x517   : > { %v6553_v46 = vrot.slane %v6551_v31, 5  ;;  %v6556_v53 = vrot.slane %v6554_v17, 6  ;;  %v7476_v9 = vsel %vm4403_vm13, %v7457_v54, %v7475_v27  ;;  %v16107_v0 = vsel %vm2069_vm6, %v6750_v52, %v6752_v14  ;;  %v16114_v54 = vld [vmem:[#allocation3 + $0x30] sm:$0xff] }
 0x518   : > { %v7111_v23 = vsel %vm4403_vm13, %v7109_v30, %v7110_v57  ;;  %v7101_v36 = vrot.slane %v16093_v7, 3  ;;  %v16111_v3 = vsel %vm3808_vm14, %v6808_v60, %v6812_v59  ;;  %v6814_v1 = vrot.slane %v6560_v35, 1 }
 0x519   : > { %8907 = vmatmul.mubr.bf16.gmra.mrb[224].mxu1 %v7480_v13  ;;  %v6815_v41 = vrot.slane %v6563_v58, 2  ;;  %v6484_v10 = vrot.slane %v11777_v2, 5  ;;  %v7100_v31 = vrot.slane %v6481_v21, 3  ;;  %v7125_v17 = vrot.slane %v16102_v18, 3  ;;  %v11782_v2 = vld [vmem:[%s18203_s8 + $0x324] ss:$8 sps:$4 sm:$0xff]  }
 0x51a   : > { %8949 = vmatprep.mubr.bf16.mxu1 %v7105_v19  ;;  %v6751_v56 = vsel %vm2069_vm6, %v6749_v11, %v6750_v52  ;;  %v6557_v42 = vor.u32 %v6556_v53, %v6553_v46  ;;  %v7107_v51 = vrot.slane %v16107_v0, 3  ;;  %v7129_v8 = vrot.slane %v16111_v3, 3  ;;  %v11778_v52 = vld [vmem:[%s18203_s8 + $0x300] ss:$8 sps:$4 sm:$0xff]   ;;  %v11779_v46 = vld [vmem:[%s18203_s8 + $0x314] ss:$8 sps:$4 sm:$0xff]  }
 0x51b   : > { %v7102_v60 = vsel %vm4403_vm13, %v7100_v31, %v7101_v36  ;;  %v6754_v49 = vrot.slane %v16064_v61, 1  ;;  %v6816_v63 = vor.u32 %v6815_v41, %v6814_v1  ;;  %v16122_v27 = vsel %vm910_vm0, %v6482_v55, %v6484_v10  ;;  %v11780_v53 = vld [vmem:[#allocation3 + $0x20] sm:$0xff] }
 0x51c   : > { %8654 = vmatmul.mubr.bf16.gmra.mrb[16].mxu0 %v7476_v9  ;;  %v6569_v21 = vshrl.u32 %v16114_v54, 16  ;;  %v6572_v48 = vshll.u32 %v16114_v54, 16  ;;  %v7106_v7 = vrot.slane %v6751_v56, 3  ;;  %v7126_v13 = vsel %vm4403_vm13, %v7104_v47, %v7125_v17 }
 0x51d   : > { %9202 = vmatprep.mubr.bf16.mxu0 %v7111_v23  ;;  %v16131_v61 = vsel %vm3661_vm12, %v6548_v24, %v6557_v42  ;;  %v6562_v30 = vrot.slane %v6560_v35, 5  ;;  %v6565_v55 = vrot.slane %v6563_v58, 6  ;;  %v7130_v11 = vsel %vm4403_vm13, %v7110_v57, %v7129_v8  ;;  %v11781_v23 = vld [vmem:[%s18203_s8 + $0x310] ss:$8 sps:$4 sm:$0xff]  }
 0x51e   : > { %v7108_v19 = vsel %vm4403_vm13, %v7106_v7, %v7107_v51  ;;  %v16136_v18 = vsel %vm2069_vm6, %v6752_v14, %v6754_v49  ;;  %v7123_v47 = vrot.slane %v16122_v27, 3  ;;  %v16143_v24 = vsel %vm3808_vm14, %v6812_v59, %v6816_v63  ;;  %v16146_v14 = vld [vmem:[#allocation3 + $0x38] sm:$0xff] }
 0x51f   : > { %v6818_v35 = vrot.slane %v6569_v21, 1  ;;  %v6819_v58 = vrot.slane %v6572_v48, 2  ;;  %v6486_v9 = vrot.slane %v11780_v53, 5  ;;  %v7143_v57 = vrot.slane %v16131_v61, 3 }
 0x520   : > { %v6566_v0 = vor.u32 %v6565_v55, %v6562_v30  ;;  %v7127_v3 = vrot.slane %v16136_v18, 3  ;;  %v7147_v59 = vrot.slane %v16143_v24, 3  ;;  %v7124_v1 = vsel %vm4403_vm13, %v7101_v36, %v7123_v47  ;;  %v11786_v18 = vld [vmem:[%s18203_s8 + $0x330] ss:$8 sps:$4 sm:$0xff]  }
 0x521   : > { %8950 = vmatmul.mubr.bf16.vlgmr.msra.gmra.mrb[140].mxu1 %v7102_v60  ;;  %v6756_v41 = vrot.slane %v16087_v26, 1  ;;  %v6820_v31 = vor.u32 %v6819_v58, %v6818_v35  ;;  %v16159_v56 = vsel %vm910_vm0, %v6484_v10, %v6486_v9  ;;  %v6578_v60 = vshrl.u32 %v16146_v14, 16  ;;  %v11783_v26 = vld [vmem:[%s18203_s8 + $0x320] ss:$8 sps:$4 sm:$0xff]   ;;  %v11787_v58 = vld [vmem:[%s18203_s8 + $0x344] ss:$8 sps:$4 sm:$0xff]  }
 0x522   : > { %8959 = vmatprep.mubr.bf16.mxu1 %v7126_v13  ;;  %10981 = vmatpush1.bf16.msra.mxu1 %v11778_v52  ;;  %v6581_v27 = vshll.u32 %v16146_v14, 16  ;;  %v7144_v7 = vsel %vm4403_vm13, %v7125_v17, %v7143_v57  ;;  %v16165_v36 = vsel %vm3661_vm12, %v6557_v42, %v6566_v0  ;;  %v6571_v13 = vrot.slane %v6569_v21, 5  ;;  %v11784_v42 = vld [vmem:[%s18203_s8 + $0x334] ss:$8 sps:$4 sm:$0xff]  }
 0x523   : > { %10966 = vmatprep.subr.bf16.mxu1 %v11779_v46  ;;  %v6574_v52 = vrot.slane %v6572_v48, 6  ;;  %v7128_v10 = vsel %vm4403_vm13, %v7107_v51, %v7127_v3  ;;  %v7148_v61 = vsel %vm4403_vm13, %v7129_v8, %v7147_v59  ;;  %v16173_v30 = vsel %vm2069_vm6, %v6754_v49, %v6756_v41  ;;  %v16183_v49 = vld [vmem:[#allocation3 + $0x40] sm:$0xff] }
 0x524   : > { %9203 = vmatmul.mubr.bf16.vlgmr.msra.gmra.mrb[20].mxu0 %v7108_v19  ;;  %v7141_v17 = vrot.slane %v16159_v56, 3  ;;  %v16180_v55 = vsel %vm3808_vm14, %v6816_v63, %v6820_v31  ;;  %v6822_v21 = vrot.slane %v6578_v60, 1  ;;  %v6823_v48 = vrot.slane %v6581_v27, 2  ;;  %v11785_v19 = vld [vmem:[#allocation3 + $0x28] sm:$0xff] }
 0x525   : > { %9212 = vmatprep.mubr.bf16.mxu0 %v7130_v11  ;;  %v6488_v51 = vrot.slane %v11785_v19, 5  ;;  %v7161_v8 = vrot.slane %v16165_v36, 3  ;;  %v6575_v11 = vor.u32 %v6574_v52, %v6571_v13  ;;  %v7145_v46 = vrot.slane %v16173_v30, 3  ;;  %v11788_v36 = vld [vmem:[%s18203_s8 + $0x340] ss:$8 sps:$4 sm:$0xff]  }
 0x526   : > { %10982 = vmatpush1.bf16.msra.mxu1 %v11781_v23  ;;  %v7165_v63 = vrot.slane %v16180_v55, 3  ;;  %v7142_v24 = vsel %vm4403_vm13, %v7123_v47, %v7141_v17  ;;  %v6758_v35 = vrot.slane %v16114_v54, 1  ;;  %v6824_v53 = vor.u32 %v6823_v48, %v6822_v21  ;;  %v11792_v21 = vld [vmem:[%s18203_s8 + $0x364] ss:$8 sps:$4 sm:$0xff]  }
 0x527   : > { %10967 = vmatprep.subr.bf16.mxu1 %v11782_v2  ;;  %v16196_v23 = vsel %vm910_vm0, %v6486_v9, %v6488_v51  ;;  %v6590_v2 = vshll.u32 %v16183_v49, 16  ;;  %v7162_v56 = vsel %vm4403_vm13, %v7143_v57, %v7161_v8  ;;  %v16202_v47 = vsel %vm3661_vm12, %v6566_v0, %v6575_v11  ;;  %v11789_v57 = vld [vmem:[%s18203_s8 + $0x354] ss:$8 sps:$4 sm:$0xff]  }
 0x528   : > { %v6580_v54 = vrot.slane %v6578_v60, 5  ;;  %v7146_v9 = vsel %vm4403_vm13, %v7127_v3, %v7145_v46  ;;  %v7159_v13 = vrot.slane %v16196_v23, 3  ;;  %v7166_v0 = vsel %vm4403_vm13, %v7147_v59, %v7165_v63 }
 0x529   : > { %8960 = vmatmul.mubr.bf16.gmra.mrb[144].mxu1 %v7124_v1  ;;  %v6587_v1 = vshrl.u32 %v16183_v49, 16  ;;  %v16217_v60 = vsel %vm3808_vm14, %v6820_v31, %v6824_v53  ;;  %v6827_v52 = vrot.slane %v6590_v2, 2  ;;  %v7179_v3 = vrot.slane %v16202_v47, 3 }
 0x52a   : > { %8969 = vmatprep.mubr.bf16.mxu1 %v7144_v7  ;;  %10983 = vmatpush1.bf16.msra.mxu1 %v11783_v26  ;;  %v6583_v7 = vrot.slane %v6581_v27, 6  ;;  %v16209_v26 = vsel %vm2069_vm6, %v6756_v41, %v6758_v35  ;;  %v11790_v41 = vld [vmem:[#allocation3 + $0x30] sm:$0xff]  ;;  %v7183_v31 = vrot.slane %v16217_v60, 3  ;;  %v6760_v55 = vrot.slane %v16146_v14, 1 }
 0x52b   : > { %10968 = vmatprep.subr.bf16.mxu1 %v11784_v42  ;;  %v6826_v27 = vrot.slane %v6587_v1, 1  ;;  %v11791_v42 = vld [vmem:[%s18203_s8 + $0x350] ss:$8 sps:$4 sm:$0xff]   ;;  %v7163_v59 = vrot.slane %v16209_v26, 3  ;;  %v7160_v48 = vsel %vm4403_vm13, %v7141_v17, %v7159_v13  ;;  %v6592_v47 = vrot.slane %v6590_v2, 6 }
 0x52c   : > { %9213 = vmatmul.mubr.bf16.gmra.mrb[24].mxu0 %v7128_v10  ;;  %v6490_v10 = vrot.slane %v11790_v41, 5  ;;  %v6584_v30 = vor.u32 %v6583_v7, %v6580_v54  ;;  %v11793_v17 = vld [vmem:[%s18203_s8 + $0x360] ss:$8 sps:$4 sm:$0xff]   ;;  %v7184_v7 = vsel %vm4403_vm13, %v7165_v63, %v7183_v31  ;;  %v11795_v63 = vld [vmem:[#allocation3 + $0x38] sm:$0xff] }
 0x52d   : > { %9222 = vmatprep.mubr.bf16.mxu0 %v7148_v61  ;;  %v16220_v61 = vld [vmem:[#allocation3 + $0x48] sm:$0xff]  ;;  %v6828_v19 = vor.u32 %v6827_v52, %v6826_v27  ;;  %v7164_v54 = vsel %vm4403_vm13, %v7145_v46, %v7163_v59  ;;  %v6762_v27 = vrot.slane %v16183_v49, 1 }
 0x52e   : > { %10984 = vmatpush1.bf16.msra.mxu1 %v11786_v18  ;;  %v6596_v18 = vshrl.u32 %v16220_v61, 16  ;;  %v16236_v23 = vsel %vm910_vm0, %v6488_v51, %v6490_v10  ;;  %v16239_v14 = vsel %vm3661_vm12, %v6575_v11, %v6584_v30  ;;  %v11794_v51 = vld [vmem:[%s18203_s8 + $0x374] ss:$8 sps:$4 sm:$0xff]   ;;  %v11797_v52 = vld [vmem:[%s18203_s8 + $0x384] ss:$8 sps:$4 sm:$0xff]  }
 0x52f   : > { %10969 = vmatprep.subr.bf16.mxu1 %v11787_v58  ;;  %v7180_v58 = vsel %vm4403_vm13, %v7161_v8, %v7179_v3  ;;  %v16247_v8 = vsel %vm2069_vm6, %v6758_v35, %v6760_v55  ;;  %v16253_v11 = vsel %vm3808_vm14, %v6824_v53, %v6828_v19  ;;  %v7197_v46 = vrot.slane %v16239_v14, 3  ;;  %v16257_v35 = vld [vmem:[#allocation3 + $0x50] sm:$0xff] }
 0x530   : > { %v6830_v2 = vrot.slane %v6596_v18, 1  ;;  %v7181_v53 = vrot.slane %v16247_v8, 3 }
 0x531   : > { %8970 = vmatmul.mubr.bf16.gmra.mrb[148].mxu1 %v7142_v24  ;;  %v6599_v24 = vshll.u32 %v16220_v61, 16 }
 0x532   : > { %8979 = vmatprep.mubr.bf16.mxu1 %v7162_v56  ;;  %10985 = vmatpush1.bf16.msra.mxu1 %v11788_v36  ;;  %v6589_v56 = vrot.slane %v6587_v1, 5  ;;  %v7177_v1 = vrot.slane %v16236_v23, 3  ;;  %v7198_v23 = vsel %vm4403_vm13, %v7179_v3, %v7197_v46  ;;  %v7182_v3 = vsel %vm4403_vm13, %v7163_v59, %v7181_v53 }
 0x533   : > { %10970 = vmatprep.subr.bf16.mxu1 %v11789_v57  ;;  %v6831_v36 = vrot.slane %v6599_v24, 2  ;;  %v11796_v57 = vld [vmem:[%s18203_s8 + $0x370] ss:$8 sps:$4 sm:$0xff]  }
 0x534   : > { %9223 = vmatmul.mubr.bf16.gmra.mrb[28].mxu0 %v7146_v9  ;;  %v6492_v9 = vrot.slane %v11795_v63, 5  ;;  %v6593_v26 = vor.u32 %v6592_v47, %v6589_v56  ;;  %v7178_v41 = vsel %vm4403_vm13, %v7159_v13, %v7177_v1  ;;  %v6598_v47 = vrot.slane %v6596_v18, 5 }
 0x535   : > { %9232 = vmatprep.mubr.bf16.mxu0 %v7166_v0  ;;  %v7201_v0 = vrot.slane %v16253_v11, 3 }
 0x536   : > { %10986 = vmatpush1.bf16.msra.mxu1 %v11791_v42  ;;  %v16279_v49 = vsel %vm910_vm0, %v6490_v10, %v6492_v9  ;;  %v16284_v13 = vsel %vm3661_vm12, %v6584_v30, %v6593_v26  ;;  %v11799_v30 = vld [vmem:[%s18203_s8 + $0x394] ss:$8 sps:$4 sm:$0xff]  }
 0x537   : > { %10971 = vmatprep.subr.bf16.mxu1 %v11792_v21  ;;  %v6832_v21 = vor.u32 %v6831_v36, %v6830_v2  ;;  %v7202_v10 = vsel %vm4403_vm13, %v7183_v31, %v7201_v0  ;;  %v7215_v2 = vrot.slane %v16284_v13, 3  ;;  %v11800_v31 = vld [vmem:[#allocation3 + $0x40] sm:$0xff] }
 0x538   : > { %v16264_v60 = vpop.f32.mrb[188].mxu0  ;;  %v6494_v36 = vrot.slane %v11800_v31, 5 }
 0x539   : > { %8980 = vmatmul.mubr.bf16.gmra.mrb[152].mxu1 %v7160_v48  ;;  %v16271_v42 = vpop.f32.mrb[189].mxu0  ;;  %v6605_v48 = vshrl.u32 %v16257_v35, 16  ;;  %v16302_v18 = vsel %vm3808_vm14, %v6828_v19, %v6832_v21 }
 0x53a   : > { %8989 = vmatprep.mubr.bf16.mxu1 %v7180_v58  ;;  %10987 = vmatpush1.bf16.msra.mxu1 %v11793_v17  ;;  %v6608_v58 = vshll.u32 %v16257_v35, 16  ;;  %v16276_v14 = vpop.f32.mrb[190].mxu0  ;;  %v6601_v17 = vrot.slane %v6599_v24, 6  ;;  %v7195_v24 = vrot.slane %v16279_v49, 3  ;;  %v11802_v49 = vld [vmem:[%s18203_s8 + $0x3a4] ss:$8 sps:$4 sm:$0xff]  }
 0x53b   : > { %10972 = vmatprep.subr.bf16.mxu1 %v11794_v51  ;;  %v16281_v56 = vpop.f32.mrb[191].mxu0  ;;  %v6834_v51 = vrot.slane %v6605_v48, 1 }
 0x53c   : > { %9233 = vmatmul.mubr.bf16.gmra.mrb[32].mxu0 %v7164_v54  ;;  %v11798_v54 = vld [vmem:[%s18203_s8 + $0x380] ss:$8 sps:$4 sm:$0xff]   ;;  %v6835_v59 = vrot.slane %v6608_v58, 2  ;;  %v6602_v63 = vor.u32 %v6601_v17, %v6598_v47  ;;  %v7196_v13 = vsel %vm4403_vm13, %v7177_v1, %v7195_v24 }
 0x53d   : > { %9242 = vmatprep.mubr.bf16.mxu0 %v7184_v7  ;;  %v16296_v7 = vsel %vm2069_vm6, %v6760_v55, %v6762_v27  ;;  %v16306_v55 = vld [vmem:[#allocation3 + $0x58] sm:$0xff] }
 0x53e   : > { %10988 = vmatpush1.bf16.msra.mxu1 %v11796_v57  ;;  %v11801_v57 = vld [vmem:[%s18203_s8 + $0x390] ss:$8 sps:$4 sm:$0xff]   ;;  %v18349_v19 = vrot.slane %v16296_v7, 3  ;;  %v6836_v17 = vor.u32 %v6835_v59, %v6834_v51  ;;  %v16333_v1 = vsel %vm3661_vm12, %v6593_v26, %v6602_v63  ;;  %v6610_v51 = vrot.slane %v6608_v58, 6  ;;  %v11803_v59 = vld [vmem:[%s18203_s8 + $0x3a0] ss:$8 sps:$4 sm:$0xff]  }
 0x53f   : > { %10973 = vmatprep.subr.bf16.mxu1 %v11797_v52  ;;  %v18348_v52 = vrot.slane %v16302_v18, 3  ;;  %v7233_v11 = vrot.slane %v16333_v1, 3  ;;  %v11807_v1 = vld [vmem:[%s18203_s8 + $0x3c4] ss:$8 sps:$4 sm:$0xff]  }
 0x540   : > { %v16355_v58 = vsel %vm3808_vm14, %v6832_v21, %v6836_v17 }
 0x541   : > { %8990 = vmatmul.mubr.bf16.gmra.mrb[156].mxu1 %v7178_v41  ;;  %v16313_v41 = vpop.f32.mrb[192].mxu0 }
 0x542   : > { %8999 = vmatprep.mubr.bf16.mxu1 %v7198_v23  ;;  %10989 = vmatpush1.bf16.msra.mxu1 %v11798_v54  ;;  %v6764_v23 = vrot.slane %v16220_v61, 1  ;;  %v16320_v47 = vpop.f32.mrb[193].mxu0  ;;  %v6614_v54 = vshrl.u32 %v16306_v55, 16  ;;  %v16328_v61 = vsel %vm910_vm0, %v6492_v9, %v6494_v36  ;;  %v7220_v9 = vsel %vm4403_vm13, %v7201_v0, %v18348_v52  ;;  %v11805_v0 = vld [vmem:[#allocation3 + $0x48] sm:$0xff] }
 0x543   : > { %10974 = vmatprep.subr.bf16.mxu1 %v11799_v30  ;;  %v16325_v30 = vpop.f32.mrb[194].mxu0  ;;  %v7213_v8 = vrot.slane %v16328_v61, 3  ;;  %v7234_v52 = vsel %vm4403_vm13, %v7215_v2, %v7233_v11 }
 0x544   : > { %9243 = vmatmul.mubr.bf16.gmra.mrb[36].mxu0 %v7182_v3  ;;  %v6617_v3 = vshll.u32 %v16306_v55, 16  ;;  %v16330_v31 = vpop.f32.mrb[195].mxu0  ;;  %v16349_v26 = vsel %vm2069_vm6, %v6762_v27, %v6764_v23  ;;  %v16359_v27 = vld [vmem:[#allocation3 + $0x60] sm:$0xff] }
 0x545   : > { %9252 = vmatprep.mubr.bf16.mxu0 %v7202_v10  ;;  %v7216_v10 = vsel %vm4403_vm13, %v7197_v46, %v7215_v2  ;;  %v7200_v46 = vsel %vm4403_vm13, %v7181_v53, %v18349_v19  ;;  %v6838_v53 = vrot.slane %v6614_v54, 1  ;;  %v18350_v21 = vrot.slane %v16349_v26, 3 }
 0x546   : > { %10990 = vmatpush1.bf16.msra.mxu1 %v11801_v57  ;;  %v6607_v57 = vrot.slane %v6605_v48, 5  ;;  %v11804_v48 = vld [vmem:[%s18203_s8 + $0x3b4] ss:$8 sps:$4 sm:$0xff]   ;;  %v18596_v2 = vrot.slane %v16296_v7, 3 }
 0x547   : > { %10975 = vmatprep.subr.bf16.mxu1 %v11802_v49  ;;  %v6839_v49 = vrot.slane %v6617_v3, 2 }
 0x548   : > { %v16366_v61 = vpop.f32.mrb[196].mxu0 }
 0x549   : > { %9000 = vmatmul.mubr.bf16.gmra.mrb[160].mxu1 %v7196_v13  ;;  %v6496_v13 = vrot.slane %v11805_v0, 5  ;;  %v6623_v0 = vshrl.u32 %v16359_v27, 16 }
 0x54a   : > { %9009 = vmatprep.mubr.bf16.mxu1 %v7216_v10  ;;  %10991 = vmatpush1.bf16.msra.mxu1 %v11803_v59  ;;  %v6611_v10 = vor.u32 %v6610_v51, %v6607_v57  ;;  %v11806_v59 = vld [vmem:[%s18203_s8 + $0x3b0] ss:$8 sps:$4 sm:$0xff]   ;;  %v7214_v57 = vsel %vm4403_vm13, %v7195_v24, %v7213_v8  ;;  %v16373_v51 = vpop.f32.mrb[197].mxu0 }
 0x54b   : > { %10976 = vmatprep.subr.bf16.mxu1 %v11804_v48  ;;  %v6840_v48 = vor.u32 %v6839_v49, %v6838_v53  ;;  %v6619_v53 = vrot.slane %v6617_v3, 6  ;;  %v11808_v49 = vld [vmem:[%s18203_s8 + $0x3c0] ss:$8 sps:$4 sm:$0xff]   ;;  %v11809_v3 = vld [vmem:[%s18203_s8 + $0x3d4] ss:$8 sps:$4 sm:$0xff]  }
 0x54c   : > { %9253 = vmatmul.mubr.bf16.gmra.mrb[40].mxu0 %v7200_v46  ;;  %v16378_v46 = vpop.f32.mrb[198].mxu0  ;;  %v16386_v24 = vsel %vm3661_vm12, %v6602_v63, %v6611_v10 }
 0x54d   : > { %9262 = vmatprep.mubr.bf16.mxu0 %v7220_v9  ;;  %v6766_v9 = vrot.slane %v16257_v35, 1  ;;  %v16381_v35 = vsel %vm910_vm0, %v6494_v36, %v6496_v13  ;;  %v16383_v19 = vpop.f32.mrb[199].mxu0  ;;  %v7218_v36 = vsel %vm4403_vm13, %v18596_v2, %v18350_v21  ;;  %v6842_v2 = vrot.slane %v6623_v0, 1 }
 0x54e   : > { %10992 = vmatpush1.bf16.msra.mxu1 %v11806_v59  ;;  %v6626_v59 = vshll.u32 %v16359_v27, 16  ;;  %v7231_v7 = vrot.slane %v16381_v35, 3 }
 0x54f   : > { %10977 = vmatprep.subr.bf16.mxu1 %v11807_v1  ;;  %v6616_v1 = vrot.slane %v6614_v54, 5  ;;  %v16402_v54 = vsel %vm2069_vm6, %v6764_v23, %v6766_v9  ;;  %v16412_v23 = vld [vmem:[#allocation3 + $0x68] sm:$0xff] }
 0x550   : > { %v6843_v21 = vrot.slane %v6626_v59, 2 }
 0x551   : > { %9010 = vmatmul.mubr.bf16.gmra.mrb[164].mxu1 %v7214_v57  ;;  %v18598_v57 = vrot.slane %v16302_v18, 3  ;;  %v7251_v18 = vrot.slane %v16386_v24, 3  ;;  %v6620_v4 = vor.u32 %v6619_v53, %v6616_v1  ;;  %v16419_v35 = vpop.f32.mrb[200].mxu0  ;;  %v11812_v24 = vld [vmem:[%s18203_s8 + $0x3e4] ss:$8 sps:$4 sm:$0xff]   ;;  %v7232_v1 = vsel %vm4403_vm13, %v7213_v8, %v7231_v7 }
 0x552   : > { %9019 = vmatprep.mubr.bf16.mxu1 %v7234_v52  ;;  %10993 = vmatpush1.bf16.msra.mxu1 %v11808_v49  ;;  %v18597_v52 = vrot.slane %v16355_v58, 3  ;;  %v16408_v49 = vsel %vm3808_vm14, %v6836_v17, %v6840_v48  ;;  %v7235_v17 = vrot.slane %v16402_v54, 3  ;;  %v16426_v53 = vpop.f32.mrb[201].mxu0  ;;  %v6635_v54 = vshll.u32 %v16412_v23, 16 }
 0x553   : > { %10978 = vmatprep.subr.bf16.mxu1 %v11809_v3  ;;  %v11811_v3 = vld [vmem:[%s18203_s8 + $0x3d0] ss:$8 sps:$4 sm:$0xff]   ;;  %v16431_v45 = vpop.f32.mrb[202].mxu0  ;;  %v16439_v8 = vsel %vm3661_vm12, %v6611_v10, %v6620_v4  ;;  %v11814_v10 = vld [vmem:[%s18203_s8 + $0x3f4] ss:$8 sps:$4 sm:$0xff]  }
 0x554   : > { %v7238_v63 = vsel %vm4403_vm13, %v18598_v57, %v18597_v52  ;;  %9263 = vmatmul.mubr.bf16.gmra.mrb[44].mxu0 %v7218_v36  ;;  %v11810_v52 = vld [vmem:[#allocation3 + $0x50] sm:$0xff]  ;;  %v7255_v36 = vrot.slane %v16408_v49, 3  ;;  %v7252_v49 = vsel %vm4403_vm13, %v7233_v11, %v7251_v18  ;;  %v16436_v50 = vpop.f32.mrb[203].mxu0  ;;  %v18599_v11 = vrot.slane %v16349_v26, 3 }
 0x555   : > { %9272 = vmatprep.mubr.bf16.mxu0 %v7238_v63  ;;  %v6498_v57 = vrot.slane %v11810_v52, 5  ;;  %v6768_v63 = vrot.slane %v16306_v55, 1  ;;  %v6844_v52 = vor.u32 %v6843_v21, %v6842_v2  ;;  %v6628_v21 = vrot.slane %v6626_v59, 6  ;;  %v11813_v2 = vld [vmem:[%s18203_s8 + $0x3e0] ss:$8 sps:$4 sm:$0xff]  }
 0x556   : > { %10994 = vmatpush1.bf16.msra.mxu1 %v11811_v3  ;;  %v6632_v3 = vshrl.u32 %v16412_v23, 16 }
 0x557   : > { %10979 = vmatprep.subr.bf16.mxu1 %v11812_v24  ;;  %v16434_v55 = vsel %vm910_vm0, %v6496_v13, %v6498_v57  ;;  %v6625_v24 = vrot.slane %v6623_v0, 5  ;;  %v18600_v13 = vrot.slane %v16355_v58, 3  ;;  %v16451_v16 = vsel %vm2069_vm6, %v6766_v9, %v6768_v63  ;;  %v11698_v0 = vld [vmem:[%s18203_s8 + $0x404] ss:$8 sps:$4 sm:$0xff]  }
 0x558   : > { %v16460_v26 = vsel %vm3808_vm14, %v6840_v48, %v6844_v52  ;;  %v7249_v58 = vrot.slane %v16434_v55, 3  ;;  %v6846_v59 = vrot.slane %v6632_v3, 1  ;;  %v7269_v9 = vrot.slane %v16439_v8, 3 }
 0x559   : > { %9020 = vmatmul.mubr.bf16.gmra.mrb[168].mxu1 %v7232_v1  ;;  %v7236_v1 = vsel %vm4403_vm13, %v18599_v11, %v7235_v17  ;;  %v11815_v11 = vld [vmem:[#allocation3 + $0x58] sm:$0xff]  ;;  %v7253_v48 = vrot.slane %v16451_v16, 3 }
 0x55a   : > { %9029 = vmatprep.mubr.bf16.mxu1 %v7252_v49  ;;  %10995 = vmatpush1.bf16.msra.mxu1 %v11813_v2  ;;  %v7256_v49 = vsel %vm4403_vm13, %v18600_v13, %v7255_v36  ;;  %v6847_v2 = vrot.slane %v6635_v54, 2  ;;  %v6500_v13 = vrot.slane %v11815_v11, 5  ;;  %v16471_v55 = vpop.f32.mrb[204].mxu0  ;;  %v7250_v8 = vsel %vm4403_vm13, %v7231_v7, %v7249_v58 }
 0x55b   : > { %10980 = vmatprep.subr.bf16.mxu1 %v11814_v10  ;;  %v6629_v10 = vor.u32 %v6628_v21, %v6625_v24  ;;  %v16475_v11 = vpop.f32.mrb[205].mxu0  ;;  %v6641_v24 = vshrl.u32 %v16464_v28, 16  ;;  %v6644_v21 = vshll.u32 %v16464_v28, 16  ;;  %v6634_v7 = vrot.slane %v6632_v3, 5  ;;  %v16494_v3 = vld [vmem:[#allocation3 + $0x78] sm:$0xff] }
 0x55c   : > { %9273 = vmatmul.mubr.bf16.gmra.mrb[48].mxu0 %v7236_v1  ;;  %v7273_v1 = vrot.slane %v16460_v26, 3  ;;  %v6848_v38 = vor.u32 %v6847_v2, %v6846_v59  ;;  %v16480_v16 = vpop.f32.mrb[206].mxu0  ;;  %v6501_v26 = vsel %vm910_vm0, %v6498_v57, %v6500_v13  ;;  %v7254_v59 = vsel %vm4403_vm13, %v7235_v17, %v7253_v48  ;;  %18601 = vst [vmem:[#allocation48_spill] sm:$0xff] %v16494_v3 }
 0x55d   : > { %9282 = vmatprep.mubr.bf16.mxu0 %v7256_v49  ;;  %v6770_v49 = vrot.slane %v16359_v27, 1  ;;  %v16483_v6 = vpop.f32.mrb[207].mxu0  ;;  %v6630_v27 = vsel %vm3661_vm12, %v6620_v4, %v6629_v10  ;;  %v6850_v57 = vrot.slane %v6641_v24, 1  ;;  %v6502_v4 = vrot.slane %v11817_v39, 5 }
 0x55e   : > { %10996 = vmatpush1.bf16.msra.mxu1 %v11816_v33  ;;  %v7270_v33 = vsel %vm4403_vm13, %v7251_v18, %v7269_v9  ;;  %v7274_v2 = vsel %vm4403_vm13, %v7255_v36, %v7273_v1  ;;  %v16492_v18 = vsel %vm3808_vm14, %v6844_v52, %v6848_v38  ;;  %v7287_v37 = vrot.slane %v6630_v27, 3 }
 0x55f   : > { %9423 = vmatprep.subr.bf16.mxu1 %v11698_v0  ;;  %v6637_v0 = vrot.slane %v6635_v54, 6  ;;  %v16489_v12 = vsel %vm2069_vm6, %v6768_v63, %v6770_v49  ;;  %v7291_v36 = vrot.slane %v16492_v18, 3  ;;  %v6650_v27 = vshrl.u32 %v16494_v3, 16 }
 0x560   : > { %v7271_v17 = vrot.slane %v16489_v12, 3  ;;  %v6653_v39 = vshll.u32 %v16494_v3, 16  ;;  %v6503_v12 = vsel %vm910_vm0, %v6500_v13, %v6502_v4  ;;  %v6646_v18 = vrot.slane %v6644_v21, 6 }
 0x561   : > { %9030 = vmatmul.mubr.bf16.gmra.mrb[172].mxu1 %v7250_v8  ;;  %v7267_v8 = vrot.slane %v6501_v26, 3  ;;  %v6638_v54 = vor.u32 %v6637_v0, %v6634_v7  ;;  %v7288_v7 = vsel %vm4403_vm13, %v7269_v9, %v7287_v37  ;;  %v6854_v13 = vrot.slane %v6650_v27, 1 }
 0x562   : > { %9039 = vmatprep.mubr.bf16.mxu1 %v7270_v33  ;;  %v6851_v33 = vrot.slane %v6644_v21, 2  ;;  %v16521_v21 = vld [vmem:[#allocation3 + $0x80] sm:$0xff] }
 0x563   : > { %v16498_v63 = vpop.f32.mrb[208].mxu0  ;;  %v7268_v52 = vsel %vm4403_vm13, %v7249_v58, %v7267_v8  ;;  %v6643_v58 = vrot.slane %v6641_v24, 5 }
 0x564   : > { %9283 = vmatmul.mubr.bf16.gmra.mrb[52].mxu0 %v7254_v59  ;;  %v6772_v59 = vrot.slane %v16412_v23, 1  ;;  %v16502_v26 = vpop.f32.mrb[209].mxu0  ;;  %v6852_v22 = vor.u32 %v6851_v33, %v6850_v57  ;;  %v6639_v23 = vsel %vm3661_vm12, %v6629_v10, %v6638_v54  ;;  %v7272_v57 = vsel %vm4403_vm13, %v7253_v48, %v7271_v17 }
 0x565   : > { %9292 = vmatprep.mubr.bf16.mxu0 %v7274_v2  ;;  %v16507_v0 = vpop.f32.mrb[210].mxu0  ;;  %v7292_v33 = vsel %vm4403_vm13, %v7273_v1, %v7291_v36  ;;  %v7305_v20 = vrot.slane %v6639_v23, 3  ;;  %v6504_v10 = vrot.slane %v11818_v29, 5  ;;  %v6647_v24 = vor.u32 %v6646_v18, %v6643_v58 }
 0x566   : > { %v16510_v2 = vpop.f32.mrb[211].mxu0  ;;  %v16516_v44 = vsel %vm2069_vm6, %v6770_v49, %v6772_v59  ;;  %v16519_v9 = vsel %vm3808_vm14, %v6848_v38, %v6852_v22  ;;  %v6662_v18 = vshll.u32 %v16521_v21, 16 }
 0x567   : > { %v7289_v48 = vrot.slane %v16516_v44, 3  ;;  %v7309_v1 = vrot.slane %v16519_v9, 3  ;;  %v7306_v23 = vsel %vm4403_vm13, %v7287_v37, %v7305_v20  ;;  %v16535_v58 = vsel %vm910_vm0, %v6502_v4, %v6504_v10 }
 0x568   : > { %v6659_v44 = vshrl.u32 %v16521_v21, 16  ;;  %v6652_v9 = vrot.slane %v6650_v27, 5 }
 0x569   : > { %9040 = vmatmul.mubr.bf16.gmra.mrb[176].mxu1 %v7268_v52  ;;  %v7285_v52 = vrot.slane %v6503_v12, 3  ;;  %v7290_v37 = vsel %vm4403_vm13, %v7271_v17, %v7289_v48  ;;  %v6859_v17 = vrot.slane %v6662_v18, 2 }
 0x56a   : > { %9049 = vmatprep.mubr.bf16.mxu1 %v7288_v7  ;;  %v6855_v7 = vrot.slane %v6653_v39, 2 }
 0x56b   : > { %v7286_v38 = vsel %vm4403_vm13, %v7267_v8, %v7285_v52  ;;  %v16544_v8 = vsel %vm3661_vm12, %v6638_v54, %v6647_v24 }
 0x56c   : > { %9293 = vmatmul.mubr.bf16.gmra.mrb[56].mxu0 %v7272_v57  ;;  %v16525_v49 = vpop.f32.mrb[212].mxu0  ;;  %v6774_v57 = vrot.slane %v16464_v28, 1  ;;  %v6856_v25 = vor.u32 %v6855_v7, %v6854_v13  ;;  %v6655_v13 = vrot.slane %v6653_v39, 6  ;;  %v7310_v7 = vsel %vm4403_vm13, %v7291_v36, %v7309_v1 }
 0x56d   : > { %9302 = vmatprep.mubr.bf16.mxu0 %v7292_v33  ;;  %v16529_v12 = vpop.f32.mrb[213].mxu0  ;;  %v16539_v33 = vld [vmem:[#allocation3 + $0x88] sm:$0xff]  ;;  %v7323_v27 = vrot.slane %v16544_v8, 3  ;;  %v6858_v39 = vrot.slane %v6659_v44, 1  ;;  %v6506_v36 = vrot.slane %v11819_v5, 5 }
 0x56e   : > { %v16532_v29 = vpop.f32.mrb[214].mxu0  ;;  %v16549_v4 = vsel %vm2069_vm6, %v6772_v59, %v6774_v57  ;;  %v6668_v32 = vshrl.u32 %v16539_v33, 16  ;;  %v6671_v54 = vshll.u32 %v16539_v33, 16  ;;  %v6656_v43 = vor.u32 %v6655_v13, %v6652_v9 }
 0x56f   : > { %18602 = vst [vmem:[#allocation49_spill] sm:$0xff] %v16532_v29  ;;  %v16541_v28 = vpop.f32.mrb[215].mxu0  ;;  %v7307_v59 = vrot.slane %v16549_v4, 3  ;;  %v7324_v8 = vsel %vm4403_vm13, %v7305_v20, %v7323_v27  ;;  %v6860_v5 = vor.u32 %v6859_v17, %v6858_v39  ;;  %v6507_v9 = vsel %vm910_vm0, %v6504_v10, %v6506_v36 }
 0x570   : > { %18603 = vst [vmem:[#allocation50_spill] sm:$0xff] %v16541_v28  ;;  %v6863_v34 = vrot.slane %v6671_v54, 2  ;;  %v6778_v13 = vrot.slane %v16521_v21, 1  ;;  %v7321_v10 = vrot.slane %v6507_v9, 3 }
 0x571   : > { %9050 = vmatmul.mubr.bf16.gmra.mrb[180].mxu1 %v7286_v38  ;;  %v16552_v38 = vsel %vm3808_vm14, %v6852_v22, %v6856_v25  ;;  %v6776_v22 = vrot.slane %v16494_v3, 1 }
 0x572   : > { %9059 = vmatprep.mubr.bf16.mxu1 %v7306_v23  ;;  %v7303_v23 = vrot.slane %v16535_v58, 3  ;;  %v7327_v58 = vrot.slane %v16552_v38, 3  ;;  %v16574_v38 = vsel %vm3661_vm12, %v6647_v24, %v6656_v43  ;;  %v6861_v24 = vsel %vm3808_vm14, %v6856_v25, %v6860_v5 }
 0x573   : > { %v6777_v39 = vsel %vm2069_vm6, %v6774_v57, %v6776_v22 }
 0x574   : > { %9303 = vmatmul.mubr.bf16.gmra.mrb[60].mxu0 %v7290_v37  ;;  %v7304_v62 = vsel %vm4403_vm13, %v7285_v52, %v7303_v23  ;;  %v6661_v52 = vrot.slane %v6659_v44, 5  ;;  %v7328_v20 = vsel %vm4403_vm13, %v7309_v1, %v7327_v58  ;;  %v7341_v44 = vrot.slane %v16574_v38, 3 }
 0x575   : > { %9312 = vmatprep.mubr.bf16.mxu0 %v7310_v7  ;;  %v16559_v37 = vpop.f32.mrb[216].mxu0  ;;  %v6862_v7 = vrot.slane %v6668_v32, 1  ;;  %v7322_v9 = vsel %vm4403_vm13, %v7303_v23, %v7321_v10 }
 0x576   : > { %18604 = vst [vmem:[#allocation51_spill] sm:$0xff] %v16559_v37  ;;  %v16564_v40 = vpop.f32.mrb[217].mxu0  ;;  %v7308_v37 = vsel %vm4403_vm13, %v7289_v48, %v7307_v59 }
 0x577   : > { %18605 = vst [vmem:[#allocation52_spill] sm:$0xff] %v16564_v40  ;;  %v16567_v15 = vpop.f32.mrb[218].mxu0  ;;  %v6664_v40 = vrot.slane %v6662_v18, 6  ;;  %v16579_v17 = vor.u32 %v6863_v34, %v6862_v7  ;;  %v16586_v18 = vsel %vm2069_vm6, %v6776_v22, %v6778_v13  ;;  %v7345_v7 = vrot.slane %v6861_v24, 3 }
 0x578   : > { %18606 = vst [vmem:[#allocation53_spill] sm:$0xff] %v16567_v15  ;;  %v16571_v4 = vpop.f32.mrb[219].mxu0  ;;  %v7342_v22 = vsel %vm4403_vm13, %v7323_v27, %v7341_v44 }
 0x579   : > { %9060 = vmatmul.mubr.bf16.gmra.mrb[184].mxu1 %v7304_v62  ;;  %18607 = vst [vmem:[#allocation54_spill] sm:$0xff] %v16571_v4  ;;  %v11820_v62 = vld [vmem:[#allocation3 + $0x78] sm:$0xff]  ;;  %v6665_v48 = vor.u32 %v6664_v40, %v6661_v52  ;;  %v16601_v40 = vsel %vm3808_vm14, %v6860_v5, %v16579_v17  ;;  %v18613_v5 = vrot.slane %v16539_v33, 1 }
 0x57a   : > { %9069 = vmatprep.mubr.bf16.mxu1 %v7324_v8  ;;  %v6508_v28 = vrot.slane %v11820_v62, 5  ;;  %v16581_v8 = vld [vmem:[#allocation3 + $0x90] sm:$0xff]  ;;  %v7325_v62 = vrot.slane %v6777_v39, 3  ;;  %v6673_v39 = vrot.slane %v6671_v54, 6  ;;  %v16619_v54 = vld [vmem:[#allocation3 + $0x98] sm:$0xff] }
 0x57b   : > { %v6677_v34 = vshrl.u32 %v16581_v8, 16  ;;  %v6680_v57 = vshll.u32 %v16581_v8, 16  ;;  %v16611_v38 = vsel %vm3661_vm12, %v6656_v43, %v6665_v48 }
 0x57c   : > { %9313 = vmatmul.mubr.bf16.gmra.mrb[64].mxu0 %v7308_v37  ;;  %v16591_v1 = vsel %vm910_vm0, %v6506_v36, %v6508_v28  ;;  %v7326_v27 = vsel %vm4403_vm13, %v7307_v59, %v7325_v62  ;;  %v16628_v59 = vsel %vm2069_vm6, %v6778_v13, %v18613_v5  ;;  %v6930_v5 = vrot.slane %v16581_v8, 2 }
 0x57d   : > { %9322 = vmatprep.mubr.bf16.mxu0 %v7328_v20  ;;  %v6670_v20 = vrot.slane %v6668_v32, 5  ;;  %v7339_v23 = vrot.slane %v16591_v1, 3  ;;  %v6867_v52 = vrot.slane %v6680_v57, 2  ;;  %v7346_v32 = vsel %vm4403_vm13, %v7327_v58, %v7345_v7 }
 0x57e   : > { %v16588_v37 = vpop.f32.mrb[220].mxu0  ;;  %v18612_v1 = vrot.slane %v16586_v18, 3 }
 0x57f   : > { %18608 = vst [vmem:[#allocation55_spill] sm:$0xff] %v16588_v37  ;;  %v16596_v25 = vpop.f32.mrb[221].mxu0 }
 0x580   : > { %18609 = vst [vmem:[#allocation56_spill] sm:$0xff] %v16596_v25  ;;  %v16604_v36 = vpop.f32.mrb[222].mxu0  ;;  %v16613_v25 = vld [vmem:[#allocation3 + $0x80] sm:$0xff]  ;;  %v7344_v43 = vsel %vm4403_vm13, %v7325_v62, %v18612_v1  ;;  %v6926_v62 = vrot.slane %v16521_v21, 2  ;;  %v6928_v21 = vrot.slane %v16539_v33, 2 }
 0x581   : > { %9070 = vmatmul.mubr.bf16.gmra.mrb[188].mxu1 %v7322_v9  ;;  %18610 = vst [vmem:[#allocation57_spill] sm:$0xff] %v16604_v36  ;;  %v16607_v24 = vpop.f32.mrb[223].mxu0  ;;  %v6866_v36 = vrot.slane %v6677_v34, 1  ;;  %v16630_v9 = vor.u32 %v6673_v39, %v6670_v20  ;;  %v18614_v58 = vrot.slane %v16613_v25, 5  ;;  %v6686_v20 = vshrl.u32 %v16619_v54, 16 }
 0x582   : > { %9079 = vmatprep.mubr.bf16.mxu1 %v7342_v22  ;;  %18611 = vst [vmem:[#allocation58_spill] sm:$0xff] %v16607_v24  ;;  %v7359_v22 = vrot.slane %v16611_v38, 3  ;;  %v18615_v38 = vrot.slane %v16601_v40, 3  ;;  %v6931_v4 = vsel %vm3958_vm11, %v6928_v21, %v6930_v5 }
 0x583   : > { %v16636_v24 = vsel %vm910_vm0, %v6508_v28, %v18614_v58  ;;  %v16645_v13 = vor.u32 %v6867_v52, %v6866_v36  ;;  %v7383_v15 = vrot.slane %v6931_v4, 3 }
 0x584   : > { %9323 = vmatmul.mubr.bf16.gmra.mrb[68].mxu0 %v7326_v27  ;;  %v7340_v27 = vsel %vm4403_vm13, %v7321_v10, %v7339_v23  ;;  %v7364_v1 = vsel %vm4403_vm13, %v7345_v7, %v18615_v38  ;;  %v6689_v10 = vshll.u32 %v16619_v54, 16  ;;  %v6932_v7 = vrot.slane %v16619_v54, 2 }
 0x585   : > { %9332 = vmatprep.mubr.bf16.mxu0 %v7346_v32  ;;  %v18398_v32 = vrot.slane %v16494_v3, 2  ;;  %v7360_v36 = vsel %vm4403_vm13, %v7341_v44, %v7359_v22  ;;  %v16665_v38 = vsel %vm3661_vm12, %v6665_v48, %v16630_v9  ;;  %v6679_v3 = vrot.slane %v6677_v34, 5  ;;  %v16672_v44 = vld [vmem:[#allocation3 + $0xa0] sm:$0xff] }
 0x586   : > { %v16643_v37 = vpop.f32.mrb[224].mxu0  ;;  %v16678_v48 = vsel %vm3808_vm14, %v16579_v17, %v16645_v13  ;;  %v6870_v34 = vrot.slane %v6686_v20, 1 }
 0x587   : > { %18616 = vst [vmem:[#allocation59_spill] sm:$0xff] %v16643_v37  ;;  %v16649_v39 = vpop.f32.mrb[225].mxu0  ;;  %v16654_v28 = vsel %vm3958_vm11, %v18398_v32, %v6926_v62  ;;  %v6929_v37 = vsel %vm3958_vm11, %v6926_v62, %v6928_v21  ;;  %v11822_v62 = vld [vmem:[#allocation3 + $0x88] sm:$0xff]  ;;  %v7377_v21 = vrot.slane %v16665_v38, 3 }
 0x588   : > { %18617 = vst [vmem:[#allocation60_spill] sm:$0xff] %v16649_v39  ;;  %18618 = vst [vmem:[#allocation61_spill] sm:$0xff] %v16654_v28  ;;  %v16660_v52 = vpop.f32.mrb[226].mxu0  ;;  %v6682_v39 = vrot.slane %v6680_v57, 6  ;;  %v7365_v58 = vrot.slane %v6929_v37, 3  ;;  %v6871_v57 = vrot.slane %v6689_v10, 2 }
 0x589   : > { %9080 = vmatmul.mubr.bf16.gmra.mrb[192].mxu1 %v7340_v27  ;;  %18619 = vst [vmem:[#allocation62_spill] sm:$0xff] %v16660_v52  ;;  %v16667_v32 = vpop.f32.mrb[227].mxu0  ;;  %v6933_v27 = vsel %vm3958_vm11, %v6930_v5, %v6932_v7  ;;  %v18399_v52 = vrot.slane %v16654_v28, 3 }
 0x58a   : > { %9089 = vmatprep.mubr.bf16.mxu1 %v7360_v36  ;;  %v7401_v29 = vrot.slane %v6933_v27, 3  ;;  %v6512_v36 = vrot.slane %v11822_v62, 5  ;;  %v16687_v4 = vsel %vm4403_vm13, %v7365_v58, %v7383_v15  ;;  %v6683_v17 = vor.u32 %v6682_v39, %v6679_v3 }
 0x58b   : > { %v16684_v5 = vsel %vm4403_vm13, %v18399_v52, %v7365_v58  ;;  %18621 = vst [vmem:[#allocation64_spill] sm:$0xff] %v16687_v4  ;;  %v7361_v27 = vrot.slane %v16628_v59, 3  ;;  %v6782_v52 = vrot.slane %v16581_v8, 1  ;;  %v6698_v3 = vshll.u32 %v16672_v44, 16 }
 0x58c   : > { %9333 = vmatmul.mubr.bf16.gmra.mrb[72].mxu0 %v7344_v43  ;;  %18620 = vst [vmem:[#allocation63_spill] sm:$0xff] %v16684_v5  ;;  %v16690_v37 = vsel %vm4403_vm13, %v7383_v15, %v7401_v29  ;;  %v6934_v43 = vrot.slane %v16672_v44, 2  ;;  %v7381_v5 = vrot.slane %v16678_v48, 3  ;;  %v6695_v15 = vshrl.u32 %v16672_v44, 16 }
 0x58d   : > { %9342 = vmatprep.mubr.bf16.mxu0 %v7364_v1  ;;  %18622 = vst [vmem:[#allocation65_spill] sm:$0xff] %v16690_v37  ;;  %v18623_v1 = vrot.slane %v16636_v24, 3  ;;  %v7378_v59 = vsel %vm4403_vm13, %v7359_v22, %v7377_v21  ;;  %v16718_v28 = vsel %vm3661_vm12, %v16630_v9, %v6683_v17  ;;  %v18627_v22 = vrot.slane %v16586_v18, 3 }
 0x58e   : > { %v16697_v62 = vpop.f32.mrb[228].mxu0  ;;  %v6935_v39 = vsel %vm3958_vm11, %v6932_v7, %v6934_v43  ;;  %v6688_v7 = vrot.slane %v6686_v20, 5  ;;  %v18630_v9 = vrot.slane %v16601_v40, 3  ;;  %v6874_v18 = vrot.slane %v6695_v15, 1 }
 0x58f   : > { %v7358_v38 = vsel %vm4403_vm13, %v7339_v23, %v18623_v1  ;;  %v16701_v58 = vpop.f32.mrb[229].mxu0  ;;  %v6872_v23 = vor.u32 %v6871_v57, %v6870_v34  ;;  %v18625_v1 = vrot.slane %v16613_v25, 5  ;;  %v7419_v48 = vrot.slane %v6935_v39, 3  ;;  %v16728_v57 = vld [vmem:[#allocation3 + $0xa8] sm:$0xff] }
 0x590   : > { %v16707_v37 = vpop.f32.mrb[230].mxu0  ;;  %v18628_v34 = vrot.slane %v16539_v33, 1  ;;  %v7382_v20 = vsel %vm4403_vm13, %v18630_v9, %v7381_v5 }
 0x591   : > { %9090 = vmatmul.mubr.bf16.gmra.mrb[196].mxu1 %v7358_v38  ;;  %18624 = vst [vmem:[#allocation66_spill] sm:$0xff] %v16707_v37  ;;  %v16712_v8 = vsel %vm910_vm0, %v18625_v1, %v6512_v36  ;;  %v16714_v4 = vpop.f32.mrb[231].mxu0  ;;  %v6691_v38 = vrot.slane %v6689_v10, 6  ;;  %v7362_v37 = vsel %vm4403_vm13, %v18627_v22, %v7361_v27  ;;  %v16731_v39 = vsel %vm4403_vm13, %v7401_v29, %v7419_v48  ;;  %v11823_v22 = vld [vmem:[#allocation3 + $0x90] sm:$0xff] }
 0x592   : > { %9099 = vmatprep.mubr.bf16.mxu1 %v7378_v59  ;;  %18626 = vst [vmem:[#allocation67_spill] sm:$0xff] %v16714_v4  ;;  %v16726_v25 = vsel %vm2069_vm6, %v18628_v34, %v6782_v52  ;;  %18629 = vst [vmem:[#allocation68_spill] sm:$0xff] %v16731_v39  ;;  %v7375_v10 = vrot.slane %v16712_v8, 3  ;;  %v6875_v59 = vrot.slane %v6698_v3, 2  ;;  %v16739_v33 = vsel %vm3808_vm14, %v16645_v13, %v6872_v23 }
 0x593   : > { %v7395_v1 = vrot.slane %v16718_v28, 3  ;;  %v6514_v34 = vrot.slane %v11823_v22, 5  ;;  %v6692_v29 = vor.u32 %v6691_v38, %v6688_v7  ;;  %v7379_v40 = vrot.slane %v16726_v25, 3 }
 0x594   : > { %9343 = vmatmul.mubr.bf16.gmra.mrb[76].mxu0 %v7362_v37  ;;  %v6936_v37 = vrot.slane %v16728_v57, 2  ;;  %v6784_v8 = vrot.slane %v16619_v54, 1  ;;  %v7399_v9 = vrot.slane %v16739_v33, 3  ;;  %v16753_v28 = vor.u32 %v6875_v59, %v6874_v18 }
 0x595   : > { %9352 = vmatprep.mubr.bf16.mxu0 %v7382_v20  ;;  %v18631_v20 = vrot.slane %v16636_v24, 3  ;;  %v7396_v38 = vsel %vm4403_vm13, %v7377_v21, %v7395_v1  ;;  %v16760_v22 = vsel %vm910_vm0, %v6512_v36, %v6514_v34  ;;  %v16765_v24 = vsel %vm3661_vm12, %v6683_v17, %v6692_v29  ;;  %v16771_v21 = vld [vmem:[#allocation3 + $0xb0] sm:$0xff] }
 0x596   : > { %v16744_v39 = vpop.f32.mrb[232].mxu0  ;;  %v6937_v7 = vsel %vm3958_vm11, %v6934_v43, %v6936_v37  ;;  %v6700_v18 = vrot.slane %v6698_v3, 6  ;;  %v7380_v59 = vsel %vm4403_vm13, %v7361_v27, %v7379_v40  ;;  %v16769_v43 = vsel %vm2069_vm6, %v6782_v52, %v6784_v8  ;;  %v11824_v27 = vld [vmem:[#allocation3 + $0x98] sm:$0xff] }
 0x597   : > { %v7376_v13 = vsel %vm4403_vm13, %v18631_v20, %v7375_v10  ;;  %v16751_v4 = vpop.f32.mrb[233].mxu0  ;;  %v7437_v54 = vrot.slane %v6937_v7, 3  ;;  %v6697_v20 = vrot.slane %v6695_v15, 5  ;;  %v7400_v7 = vsel %vm4403_vm13, %v7381_v5, %v7399_v9 }
 0x598   : > { %18632 = vst [vmem:[#allocation69_spill] sm:$0xff] %v16751_v4  ;;  %v16757_v25 = vpop.f32.mrb[234].mxu0  ;;  %v16781_v17 = vsel %vm3808_vm14, %v6872_v23, %v16753_v28  ;;  %v7393_v15 = vrot.slane %v16760_v22, 3  ;;  %v6516_v3 = vrot.slane %v11824_v27, 5  ;;  %v7413_v52 = vrot.slane %v16765_v24, 3 }
 0x599   : > { %9100 = vmatmul.mubr.bf16.gmra.mrb[200].mxu1 %v7376_v13  ;;  %18633 = vst [vmem:[#allocation70_spill] sm:$0xff] %v16757_v25  ;;  %v16762_v33 = vpop.f32.mrb[235].mxu0  ;;  %v16773_v13 = vld [vmem:[#allocation3 + $0xb8] sm:$0x1f]  ;;  %v16776_v36 = vsel %vm4403_vm13, %v7419_v48, %v7437_v54 }
 0x59a   : > { %9109 = vmatprep.mubr.bf16.mxu1 %v7396_v38  ;;  %18634 = vst [vmem:[#allocation71_spill] sm:$0xff] %v16762_v33  ;;  %18635 = vst [vmem:[#allocation72_spill] sm:$0xff] %v16776_v36  ;;  %v6701_v33 = vor.u32 %v6700_v18, %v6697_v20  ;;  %v6940_v5 = vrot.slane %v16773_v13, 2  ;;  %v7397_v36 = vrot.slane %v16769_v43, 3  ;;  %v6517_v20 = vsel %vm910_vm0, %v6514_v34, %v6516_v3 }
 0x59b   : > { %v7414_v48 = vsel %vm4403_vm13, %v7395_v1, %v7413_v52 }
 0x59c   : > { %9353 = vmatmul.mubr.bf16.gmra.mrb[80].mxu0 %v7380_v59  ;;  %v6938_v59 = vrot.slane %v16771_v21, 2 }
 0x59d   : > { %9362 = vmatprep.mubr.bf16.mxu0 %v7400_v7  ;;  %v7394_v7 = vsel %vm4403_vm13, %v7375_v10, %v7393_v15  ;;  %v6702_v10 = vsel %vm3661_vm12, %v6692_v29, %v6701_v33  ;;  %v18643_v29 = vrot.slane %v16781_v17, 3 }
 0x59e   : > { %v16791_v25 = vpop.f32.mrb[236].mxu0  ;;  %v6939_v18 = vsel %vm3958_vm11, %v6936_v37, %v6938_v59  ;;  %v6941_v27 = vsel %vm3958_vm11, %v6938_v59, %v6940_v5  ;;  %v18639_v37 = vshll.u32 %v16728_v57, 16  ;;  %v7398_v59 = vsel %vm4403_vm13, %v7379_v40, %v7397_v36 }
 0x59f   : > { %18636 = vst [vmem:[#allocation73_spill] sm:$0xff] %v16791_v25  ;;  %v16795_v24 = vpop.f32.mrb[237].mxu0  ;;  %v7455_v23 = vrot.slane %v6939_v18, 3  ;;  %v7473_v38 = vrot.slane %v6941_v27, 3  ;;  %v7491_v25 = vrot.slane %v6940_v5, 3  ;;  %v7418_v5 = vsel %vm4403_vm13, %v7399_v9, %v18643_v29  ;;  %v11825_v27 = vld [vmem:[#allocation3 + $0xa0] sm:$0xff] }
 0x5a0   : > { %18637 = vst [vmem:[#allocation74_spill] sm:$0xff] %v16795_v24  ;;  %v16801_v43 = vpop.f32.mrb[238].mxu0  ;;  %v18638_v24 = vshrl.u32 %v16728_v57, 16  ;;  %v6709_v4 = vrot.slane %v18639_v37, 6  ;;  %v7411_v40 = vrot.slane %v6517_v20, 3  ;;  %v6518_v37 = vrot.slane %v11825_v27, 5 }
 0x5a1   : > { %9110 = vmatmul.mubr.bf16.gmra.mrb[204].mxu1 %v7394_v7  ;;  %v16803_v22 = vpop.f32.mrb[239].mxu0  ;;  %v16812_v1 = vsel %vm4403_vm13, %v7437_v54, %v7455_v23  ;;  %v16815_v7 = vsel %vm4403_vm13, %v7455_v23, %v7473_v38  ;;  %v7431_v54 = vrot.slane %v6702_v10, 3 }
 0x5a2   : > { %9119 = vmatprep.mubr.bf16.mxu1 %v7414_v48  ;;  %v6706_v34 = vrot.slane %v18638_v24, 5  ;;  %18640 = vst [vmem:[#allocation75_spill] sm:$0xff] %v16812_v1  ;;  %18641 = vst [vmem:[#allocation76_spill] sm:$0xff] %v16815_v7  ;;  %v16818_v48 = vsel %vm4403_vm13, %v7473_v38, %v7491_v25  ;;  %v18644_v24 = vrot.slane %v16672_v44, 1  ;;  %v18402_v7 = vshrl.u32 %v16771_v21, 16 }
 0x5a3   : > { %18642 = vst [vmem:[#allocation77_spill] sm:$0xff] %v16818_v48  ;;  %v18401_v25 = vshll.u32 %v16771_v21, 16  ;;  %v7412_v9 = vsel %vm4403_vm13, %v7393_v15, %v7411_v40  ;;  %v6519_v10 = vsel %vm910_vm0, %v6516_v3, %v6518_v37  ;;  %v6127_v1 = vld [vmem:[#allocation3 + $0xb8] sm:$0x1] }
 0x5a4   : > { %9363 = vmatmul.mubr.bf16.gmra.mrb[84].mxu0 %v7398_v59  ;;  %v16826_v18 = vsel %vm2069_vm6, %v6784_v8, %v18644_v24  ;;  %v6710_v23 = vor.u32 %v6709_v4, %v6706_v34  ;;  %v7432_v8 = vsel %vm4403_vm13, %v7413_v52, %v7431_v54  ;;  %v7429_v52 = vrot.slane %v6519_v10, 3 }
 0x5a5   : > { %9372 = vmatprep.mubr.bf16.mxu0 %v7418_v5  ;;  %v18403_v38 = vrot.slane %v16826_v18, 3  ;;  %v6715_v5 = vrot.slane %v18402_v7, 5  ;;  %v6718_v15 = vrot.slane %v18401_v25, 6 }
 0x5a6   : > { %v16831_v59 = vpop.f32.mrb[240].mxu0  ;;  %v6711_v34 = vsel %vm3661_vm12, %v6701_v33, %v6710_v23  ;;  %v7430_v33 = vsel %vm4403_vm13, %v7411_v40, %v7429_v52 }
 0x5a7   : > { %v16834_v29 = vpop.f32.mrb[241].mxu0  ;;  %v7416_v24 = vsel %vm4403_vm13, %v7397_v36, %v18403_v38  ;;  %v7449_v27 = vrot.slane %v6711_v34, 3 }
 0x5a8   : > { %v16837_v20 = vpop.f32.mrb[242].mxu0 }
 0x5a9   : > { %9120 = vmatmul.mubr.bf16.gmra.mrb[208].mxu1 %v7412_v9  ;;  %v16840_v4 = vpop.f32.mrb[243].mxu0  ;;  %v11826_v9 = vld [vmem:[#allocation3 + $0xa8] sm:$0xff]  ;;  %v7450_v25 = vsel %vm4403_vm13, %v7431_v54, %v7449_v27 }
 0x5aa   : > { %9129 = vmatprep.mubr.bf16.mxu1 %v7432_v8  ;;  %18645 = vst [vmem:[#allocation78_spill] sm:$0xff] %v16840_v4  ;;  %v6520_v3 = vrot.slane %v11826_v9, 5  ;;  %v6719_v8 = vor.u32 %v6718_v15, %v6715_v5  ;;  %v6722_v5 = vshll.u32 %v6127_v1, 16  ;;  %v11827_v9 = vld [vmem:[#allocation3 + $0xb0] sm:$0xff] }
 0x5ab   : > { %v6522_v38 = vrot.slane %v11827_v9, 5 }
 0x5ac   : > { %9373 = vmatmul.mubr.bf16.gmra.mrb[88].mxu0 %v7416_v24  ;;  %v6521_v36 = vsel %vm910_vm0, %v6518_v37, %v6520_v3  ;;  %v6720_v34 = vsel %vm3661_vm12, %v6710_v23, %v6719_v8  ;;  %v6724_v40 = vrot.slane %v6722_v5, 6  ;;  %v18654_v5 = vshll.u32 %v16728_v57, 16 }
 0x5ad   : > { %v7447_v15 = vrot.slane %v6521_v36, 3  ;;  %v7467_v24 = vrot.slane %v6720_v34, 3  ;;  %v18653_v36 = vshrl.u32 %v16728_v57, 16 }
 0x5ae   : > { %v6725_v23 = vsel %vm3661_vm12, %v6719_v8, %v6724_v40 }
 0x5af   : > { %v16850_v48 = vpop.f32.mrb[244].mxu0  ;;  %v7468_v37 = vsel %vm4403_vm13, %v7449_v27, %v7467_v24  ;;  %v6878_v34 = vrot.slane %v18653_v36, 1  ;;  %v18660_v36 = vshll.u32 %v16771_v21, 16 }
 0x5b0   : > { %18646 = vst [vmem:[#allocation79_spill] sm:$0xff] %v16850_v48  ;;  %v16853_v4 = vpop.f32.mrb[245].mxu0 }
 0x5b1   : > { %9130 = vmatmul.mubr.bf16.gmra.mrb[212].mxu1 %v7430_v33  ;;  %v16856_v7 = vpop.f32.mrb[246].mxu0  ;;  %v7448_v33 = vsel %vm4403_vm13, %v7429_v52, %v7447_v15  ;;  %v6879_v52 = vrot.slane %v18654_v5, 2 }
 0x5b2   : > { %18647 = vst [vmem:[#allocation80_spill] sm:$0xff] %v16856_v7  ;;  %9139 = vmatprep.mubr.bf16.mxu1 %v7450_v25  ;;  %v16859_v10 = vpop.f32.mrb[247].mxu0 }
 0x5b3   : > { %18648 = vst [vmem:[#allocation81_spill] sm:$0xff] %v16859_v10  ;;  %v6523_v10 = vsel %vm910_vm0, %v6520_v3, %v6522_v38 }
 0x5b4   : > { %v7465_v9 = vrot.slane %v6523_v10, 3  ;;  %v18659_v10 = vshrl.u32 %v16771_v21, 16 }
 0x5b6   : > { %v7466_v27 = vsel %vm4403_vm13, %v7447_v15, %v7465_v9  ;;  %v7483_v15 = vrot.slane %v6522_v38, 3 }
 0x5b7   : > { %v16862_v48 = vpop.f32.mrb[248].mxu0 }
 0x5b8   : > { %18649 = vst [vmem:[#allocation82_spill] sm:$0xff] %v16862_v48  ;;  %v16865_v54 = vpop.f32.mrb[249].mxu0 }
 0x5b9   : > { %18650 = vst [vmem:[#allocation83_spill] sm:$0xff] %v16865_v54  ;;  %9140 = vmatmul.mubr.bf16.gmra.mrb[216].mxu1 %v7448_v33  ;;  %v16868_v25 = vpop.f32.mrb[250].mxu0  ;;  %v7485_v54 = vrot.slane %v6725_v23, 3  ;;  %v6880_v33 = vor.u32 %v6879_v52, %v6878_v34  ;;  %v6882_v23 = vrot.slane %v18659_v10, 1  ;;  %v6883_v34 = vrot.slane %v18660_v36, 2 }
 0x5ba   : > { %18651 = vst [vmem:[#allocation84_spill] sm:$0xff] %v16868_v25  ;;  %9149 = vmatprep.mubr.bf16.mxu1 %v7468_v37  ;;  %v16871_v1 = vpop.f32.mrb[251].mxu0  ;;  %v6788_v52 = vrot.slane %v16728_v57, 1  ;;  %v18663_v10 = vrot.slane %v16781_v17, 3  ;;  %v18665_v57 = vrot.slane %v16672_v44, 1 }
 0x5bb   : > { %18652 = vst [vmem:[#allocation85_spill] sm:$0xff] %v16871_v1  ;;  %v7486_v3 = vsel %vm4403_vm13, %v7467_v24, %v7485_v54  ;;  %v6881_v40 = vsel %vm3808_vm14, %v16753_v28, %v6880_v33  ;;  %v6887_v24 = vshrl.u32 %v16773_v13, 16  ;;  %v6890_v54 = vshll.u32 %v16773_v13, 16  ;;  %v11696_v17 = vld [vmem:[%s18203_s8 + $0x400] ss:$8 sps:$4 sm:$0xff]  }
 0x5bc   : > { %v7435_v5 = vrot.slane %v6881_v40, 3  ;;  %v6789_v40 = vsel %vm2069_vm6, %v18665_v57, %v6788_v52  ;;  %v11701_v44 = vld [vmem:[%s18203_s8 + $0x414] ss:$8 sps:$4 sm:$0xff]  }
 0x5be   : > { %v7436_v36 = vsel %vm4403_vm13, %v18663_v10, %v7435_v5 }
 0x5bf   : > { %v16878_v48 = vpop.f32.mrb[252].mxu0 }
 0x5c0   : > { %18655 = vst [vmem:[#allocation86_spill] sm:$0xff] %v16878_v48  ;;  %v16881_v25 = vpop.f32.mrb[253].mxu0  ;;  %v11835_v48 = vld [vmem:[#allocation3 + $0x40] sm:$0xff] }
 0x5c1   : > { %18656 = vst [vmem:[#allocation87_spill] sm:$0xff] %v16881_v25  ;;  %9150 = vmatmul.mubr.bf16.gmra.mrb[220].mxu1 %v7466_v27  ;;  %v16884_v37 = vpop.f32.mrb[254].mxu0  ;;  %v6884_v27 = vor.u32 %v6883_v34, %v6882_v23  ;;  %v6889_v34 = vrot.slane %v6887_v24, 1 }
 0x5c2   : > { %18657 = vst [vmem:[#allocation88_spill] sm:$0xff] %v16884_v37  ;;  %9159 = vmatprep.mubr.bf16.mxu1 %v7486_v3  ;;  %v16886_v8 = vpop.f32.mrb[255].mxu0 }
 0x5c3   : > { %18658 = vst [vmem:[#allocation89_spill] sm:$0xff] %v16886_v8  ;;  %v7484_v8 = vsel %vm4403_vm13, %v7465_v9, %v7483_v15  ;;  %v6885_v13 = vsel %vm3808_vm14, %v6880_v33, %v6884_v27  ;;  %v6892_v9 = vrot.slane %v6890_v54, 2  ;;  %v7433_v15 = vrot.slane %v6789_v40, 3 }
 0x5c5   : > { %v6893_v10 = vor.u32 %v6892_v9, %v6889_v34  ;;  %v6129_v34 = vld [vmem:[#allocation3 + $0xb8] sm:$0xf] }
 0x5c7   : > { %v16897_v3 = vpop.f32.mrb[0].mxu0 }
 0x5c8   : > { %18661 = vst [vmem:[#allocation90_spill] sm:$0xff] %v16897_v3  ;;  %v16900_v28 = vpop.f32.mrb[1].mxu0 }
 0x5c9   : > { %18662 = vst [vmem:[#allocation91_spill] sm:$0xff] %v16900_v28  ;;  %9160 = vmatmul.mubr.bf16.gmra.mrb[224].mxu1 %v7484_v8  ;;  %v16905_v38 = vpop.f32.mrb[2].mxu0  ;;  %v7453_v28 = vrot.slane %v6885_v13, 3  ;;  %v6790_v8 = vrot.slane %v16771_v21, 1  ;;  %v11699_v13 = vld [vmem:[%s18203_s8 + $0x410] ss:$8 sps:$4 sm:$0xff]  }
 0x5ca   : > { %18664 = vst [vmem:[#allocation92_spill] sm:$0xff] %v16905_v38  ;;  %9382 = vmatprep.mubr.bf16.mxu1 %v7436_v36  ;;  %v16910_v23 = vpop.f32.mrb[3].mxu0  ;;  %v18668_v36 = vrot.slane %v16826_v18, 3  ;;  %v6894_v18 = vsel %vm3808_vm14, %v6884_v27, %v6893_v10  ;;  %v11707_v27 = vld [vmem:[%s18203_s8 + $0x434] ss:$8 sps:$4 sm:$0xff]  }
 0x5cb   : > { %18666 = vst [vmem:[#allocation93_spill] sm:$0xff] %v16910_v23  ;;  %v7454_v21 = vsel %vm4403_vm13, %v7435_v5, %v7453_v28  ;;  %v6791_v57 = vsel %vm2069_vm6, %v6788_v52, %v6790_v8  ;;  %v11704_v5 = vld [vmem:[%s18203_s8 + $0x424] ss:$8 sps:$4 sm:$0xff]   ;;  %v11702_v52 = vld [vmem:[%s18203_s8 + $0x420] ss:$8 sps:$4 sm:$0xff]   ;;  %v11834_v23 = vld [vmem:[#allocation3 + $0x38] sm:$0xff] }
 0x5cc   : > { %v7434_v33 = vsel %vm4403_vm13, %v18668_v36, %v7433_v15  ;;  %v7451_v9 = vrot.slane %v6791_v57, 3  ;;  %v7471_v36 = vrot.slane %v6894_v18, 3 }
 0x5ce   : > { %v7472_v57 = vsel %vm4403_vm13, %v7453_v28, %v7471_v36  ;;  %v11708_v28 = vld [vmem:[%s18203_s8 + $0x440] ss:$8 sps:$4 sm:$0xff]  }
 0x5d0   : > { %v16917_v38 = vpop.f32.mrb[4].mxu0 }
 0x5d1   : > { %18667 = vst [vmem:[#allocation94_spill] sm:$0xff] %v16917_v38  ;;  %v16925_v24 = vpop.f32.mrb[5].mxu0  ;;  %9383 = vmatmul.mubr.bf16.vlgmr.msra.gmra.mrb[212].mxu1 %v7434_v33  ;;  %v6792_v33 = vrot.slane %v6129_v34, 1 }
 0x5d2   : > { %18669 = vst [vmem:[#allocation95_spill] sm:$0xff] %v16925_v24  ;;  %v16928_v54 = vpop.f32.mrb[6].mxu0  ;;  %9392 = vmatprep.mubr.bf16.mxu1 %v7454_v21  ;;  %9424 = vmatpush1.bf16.msra.mxu1 %v11696_v17 }
 0x5d3   : > { %18670 = vst [vmem:[#allocation96_spill] sm:$0xff] %v16928_v54  ;;  %v16931_v40 = vpop.f32.mrb[7].mxu0  ;;  %9425 = vmatprep.subr.bf16.mxu1 %v11701_v44  ;;  %v7452_v44 = vsel %vm4403_vm13, %v7433_v15, %v7451_v9  ;;  %v11710_v15 = vld [vmem:[%s18203_s8 + $0x444] ss:$8 sps:$4 sm:$0xff]  }
 0x5d4   : > { %18671 = vst [vmem:[#allocation97_spill] sm:$0xff] %v16931_v40 }
 0x5d6   : > { %9426 = vmatpush1.bf16.msra.mxu1 %v11699_v13  ;;  %v6793_v13 = vsel %vm2069_vm6, %v6790_v8, %v6792_v33  ;;  %v11713_v8 = vld [vmem:[%s18203_s8 + $0x454] ss:$8 sps:$4 sm:$0xff]  }
 0x5d7   : > { %9427 = vmatprep.subr.bf16.mxu1 %v11704_v5  ;;  %v11705_v5 = vld [vmem:[%s18203_s8 + $0x430] ss:$8 sps:$4 sm:$0xff]  }
 0x5d8   : > { %v16943_v17 = vpop.f32.mrb[8].mxu0 }
 0x5d9   : > { %18672 = vst [vmem:[#allocation98_spill] sm:$0xff] %v16943_v17  ;;  %v16949_v21 = vpop.f32.mrb[9].mxu0  ;;  %9393 = vmatmul.mubr.bf16.gmra.mrb[216].mxu1 %v7452_v44  ;;  %v7469_v44 = vrot.slane %v6793_v13, 3  ;;  %v7487_v13 = vrot.slane %v6792_v33, 3 }
 0x5da   : > { %18673 = vst [vmem:[#allocation99_spill] sm:$0xff] %v16949_v21  ;;  %v16952_v18 = vpop.f32.mrb[10].mxu0  ;;  %9402 = vmatprep.mubr.bf16.mxu1 %v7472_v57  ;;  %9428 = vmatpush1.bf16.msra.mxu1 %v11702_v52  ;;  %v7489_v21 = vrot.slane %v6893_v10, 3  ;;  %v11711_v10 = vld [vmem:[%s18203_s8 + $0x450] ss:$8 sps:$4 sm:$0xff]  }
 0x5db   : > { %18674 = vst [vmem:[#allocation100_spill] sm:$0xff] %v16952_v18  ;;  %v16955_v34 = vpop.f32.mrb[11].mxu0  ;;  %9429 = vmatprep.subr.bf16.mxu1 %v11707_v27  ;;  %v7470_v52 = vsel %vm4403_vm13, %v7451_v9, %v7469_v44  ;;  %v11716_v57 = vld [vmem:[%s18203_s8 + $0x464] ss:$8 sps:$4 sm:$0xff]   ;;  %v11714_v9 = vld [vmem:[%s18203_s8 + $0x460] ss:$8 sps:$4 sm:$0xff]   ;;  %v7488_v33 = vsel %vm4403_vm13, %v7469_v44, %v7487_v13 }
 0x5dc   : > { %18675 = vst [vmem:[#allocation101_spill] sm:$0xff] %v16955_v34  ;;  %v7490_v27 = vsel %vm4403_vm13, %v7471_v36, %v7489_v21  ;;  %v6131_v36 = vld [vmem:[#allocation3 + $0x8] sm:$0xe0] }
 0x5de   : > { %9430 = vmatpush1.bf16.msra.mxu1 %v11705_v5  ;;  %v11828_v5 = vld [vmem:[#allocation3 + $0x18] sm:$0xff] }
 0x5df   : > { %9431 = vmatprep.subr.bf16.mxu1 %v11710_v15  ;;  %v6900_v15 = vrot.slane %v11828_v5, 2 }
 0x5e1   : > { %9403 = vmatmul.mubr.bf16.gmra.mrb[220].mxu1 %v7470_v52 }
 0x5e2   : > { %9412 = vmatprep.mubr.bf16.mxu1 %v7490_v27  ;;  %9432 = vmatpush1.bf16.msra.mxu1 %v11708_v28  ;;  %v11719_v28 = vld [vmem:[%s18203_s8 + $0x474] ss:$8 sps:$4 sm:$0xff]  }
 0x5e3   : > { %9433 = vmatprep.subr.bf16.mxu1 %v11713_v8  ;;  %v11829_v8 = vld [vmem:[#allocation3 + $0x10] sm:$0xff] }
 0x5e4   : > { %v6898_v52 = vrot.slane %v11829_v8, 2  ;;  %v11831_v8 = vld [vmem:[#allocation3 + $0x20] sm:$0xff] }
 0x5e6   : > { %9434 = vmatpush1.bf16.msra.mxu1 %v11711_v10  ;;  %v6897_v10 = vrot.slane %v6131_v36, 2  ;;  %v6901_v34 = vsel %vm3958_vm11, %v6898_v52, %v6900_v15 }
 0x5e7   : > { %v16980_v21 = vpop.f32.mrb[12].mxu0  ;;  %9435 = vmatprep.subr.bf16.mxu1 %v11716_v57  ;;  %v11717_v57 = vld [vmem:[%s18203_s8 + $0x470] ss:$8 sps:$4 sm:$0xff]   ;;  %v7113_v13 = vrot.slane %v6901_v34, 3 }
 0x5e8   : > { %18676 = vst [vmem:[#allocation102_spill] sm:$0xff] %v16980_v21  ;;  %v16985_v27 = vpop.f32.mrb[13].mxu0  ;;  %v16996_v21 = vld [vmem:[#allocation3] sm:$0xff]  ;;  %v6899_v44 = vsel %vm3958_vm11, %v6897_v10, %v6898_v52 }
 0x5e9   : > { %18677 = vst [vmem:[#allocation103_spill] sm:$0xff] %v16985_v27  ;;  %v16988_v5 = vpop.f32.mrb[14].mxu0  ;;  %9413 = vmatmul.mubr.bf16.gmra.mrb[224].mxu1 %v7488_v33  ;;  %v6902_v33 = vrot.slane %v11831_v8, 2  ;;  %v7112_v36 = vrot.slane %v6899_v44, 3 }
 0x5ea   : > { %18678 = vst [vmem:[#allocation104_spill] sm:$0xff] %v16988_v5  ;;  %v16991_v18 = vpop.f32.mrb[15].mxu0  ;;  %9436 = vmatpush1.bf16.msra.mxu1 %v11714_v9  ;;  %9455 = vmatprep.mubr.bf16.mxu1 %v16996_v21 }
 0x5eb   : > { %18679 = vst [vmem:[#allocation105_spill] sm:$0xff] %v16991_v18  ;;  %9437 = vmatprep.subr.bf16.mxu1 %v11719_v28  ;;  %v7114_v9 = vsel %vm4403_vm13, %v7112_v36, %v7113_v13  ;;  %v6903_v17 = vsel %vm3958_vm11, %v6900_v15, %v6902_v33 }
 0x5ec   : > { %v7131_v28 = vrot.slane %v6903_v17, 3 }
 0x5ee   : > { %9438 = vmatpush1.bf16.msra.mxu1 %v11717_v57  ;;  %v11832_v57 = vld [vmem:[#allocation3 + $0x28] sm:$0xff] }
 0x5ef   : > { %v17000_v5 = vpop.f32.mrb[16].mxu0  ;;  %v6904_v44 = vrot.slane %v11832_v57, 2 }
 0x5f0   : > { %18680 = vst [vmem:[#allocation106_spill] sm:$0xff] %v17000_v5  ;;  %v17002_v18 = vpop.f32.mrb[17].mxu0  ;;  %v11833_v5 = vld [vmem:[#allocation3 + $0x30] sm:$0xff] }
 0x5f1   : > { %18681 = vst [vmem:[#allocation107_spill] sm:$0xff] %v17002_v18  ;;  %v17005_v27 = vpop.f32.mrb[18].mxu0  ;;  %9456 = vmatmul.mubr.bf16.vlgmr.msra.gmra.mrb[228].mxu1 %v7114_v9 }
 0x5f2   : > { %18682 = vst [vmem:[#allocation108_spill] sm:$0xff] %v17005_v27  ;;  %v17008_v40 = vpop.f32.mrb[19].mxu0  ;;  %9465 = vmatprep.mubr.bf16.mxu1 %v16996_v21 }
 0x5f3   : > { %18683 = vst [vmem:[#allocation109_spill] sm:$0xff] %v17008_v40 }
 0x5f4   : > { %v8951_v34 = vpop.f32.mrb[140].mxu1 }
 0x5f5   : > { %v17012_v52 = vadd.f32 %v8951_v34, %v16264_v60  ;;  %v8953_v10 = vpop.f32.mrb[141].mxu1  ;;  %v7132_v60 = vsel %vm4403_vm13, %v7113_v13, %v7131_v28 }
 0x5f6   : > { %v17015_v8 = vadd.f32 %v8953_v10, %v16271_v42  ;;  %v8955_v36 = vpop.f32.mrb[142].mxu1  ;;  %v6905_v42 = vsel %vm3958_vm11, %v6902_v33, %v6904_v44 }
 0x5f7   : > { %v17017_v27 = vpop.f32.mrb[20].mxu0  ;;  %v17020_v15 = vadd.f32 %v8955_v36, %v16276_v14  ;;  %v8957_v9 = vpop.f32.mrb[143].mxu1  ;;  %v7149_v14 = vrot.slane %v6905_v42, 3 }
 0x5f8   : > { %v17022_v40 = vpop.f32.mrb[21].mxu0  ;;  %v17025_v17 = vadd.f32 %v8957_v9, %v16281_v56  ;;  %v6906_v56 = vrot.slane %v11833_v5, 2 }
 0x5f9   : > { %v17028_v34 = vpop.f32.mrb[22].mxu0  ;;  %9466 = vmatmul.mubr.bf16.gmra.mrb[232].mxu1 %v7132_v60 }
 0x5fa   : > { %v17031_v10 = vpop.f32.mrb[23].mxu0  ;;  %9475 = vmatprep.mubr.bf16.mxu1 %v16996_v21 }
 0x5fc   : > { %v8961_v57 = vpop.f32.mrb[144].mxu1 }
 0x5fd   : > { %v17035_v36 = vadd.f32 %v8961_v57, %v16313_v41  ;;  %v8963_v18 = vpop.f32.mrb[145].mxu1  ;;  %v7150_v41 = vsel %vm4403_vm13, %v7131_v28, %v7149_v14 }
 0x5fe   : > { %v17038_v9 = vadd.f32 %v8963_v18, %v16320_v47  ;;  %v8965_v13 = vpop.f32.mrb[146].mxu1  ;;  %v6907_v47 = vsel %vm3958_vm11, %v6904_v44, %v6906_v56 }
 0x5ff   : > { %v17040_v54 = vpop.f32.mrb[24].mxu0  ;;  %v17043_v33 = vadd.f32 %v8965_v13, %v16325_v30  ;;  %v8967_v60 = vpop.f32.mrb[147].mxu1  ;;  %v7167_v30 = vrot.slane %v6907_v47, 3 }
 0x600   : > { %v17045_v24 = vpop.f32.mrb[25].mxu0  ;;  %v17048_v42 = vadd.f32 %v8967_v60, %v16330_v31  ;;  %v6908_v31 = vrot.slane %v11834_v23, 2 }
 0x601   : > { %v17051_v57 = vpop.f32.mrb[26].mxu0  ;;  %9476 = vmatmul.mubr.bf16.gmra.mrb[236].mxu1 %v7150_v41 }
 0x602   : > { %v17054_v18 = vpop.f32.mrb[27].mxu0  ;;  %9485 = vmatprep.mubr.bf16.mxu1 %v16996_v21 }
 0x604   : > { %v8971_v5 = vpop.f32.mrb[148].mxu1 }
 0x605   : > { %v17058_v13 = vadd.f32 %v8971_v5, %v16366_v61  ;;  %v8973_v38 = vpop.f32.mrb[149].mxu1  ;;  %v7168_v61 = vsel %vm4403_vm13, %v7149_v14, %v7167_v30 }
 0x606   : > { %v17061_v60 = vadd.f32 %v8973_v38, %v16373_v51  ;;  %v8975_v28 = vpop.f32.mrb[150].mxu1  ;;  %v6909_v51 = vsel %vm3958_vm11, %v6906_v56, %v6908_v31 }
 0x607   : > { %v17063_v3 = vpop.f32.mrb[28].mxu0  ;;  %v17066_v44 = vadd.f32 %v8975_v28, %v16378_v46  ;;  %v8977_v41 = vpop.f32.mrb[151].mxu1  ;;  %v7185_v46 = vrot.slane %v6909_v51, 3 }
 0x608   : > { %v17068_v37 = vpop.f32.mrb[29].mxu0  ;;  %v17071_v47 = vadd.f32 %v8977_v41, %v16383_v19  ;;  %v6910_v19 = vrot.slane %v11835_v48, 2 }
 0x609   : > { %v17074_v5 = vpop.f32.mrb[30].mxu0  ;;  %9486 = vmatmul.mubr.bf16.gmra.mrb[240].mxu1 %v7168_v61 }
 0x60a   : > { %v17077_v38 = vpop.f32.mrb[31].mxu0  ;;  %9495 = vmatprep.mubr.bf16.mxu1 %v16996_v21 }
 0x60c   : > { %v8981_v23 = vpop.f32.mrb[152].mxu1 }
 0x60d   : > { %v17081_v28 = vadd.f32 %v8981_v23, %v16419_v35  ;;  %v8983_v25 = vpop.f32.mrb[153].mxu1  ;;  %v7186_v35 = vsel %vm4403_vm13, %v7167_v30, %v7185_v46 }
 0x60e   : > { %v17084_v41 = vadd.f32 %v8983_v25, %v16426_v53  ;;  %v8985_v14 = vpop.f32.mrb[154].mxu1  ;;  %v6911_v53 = vsel %vm3958_vm11, %v6908_v31, %v6910_v19 }
 0x60f   : > { %v17086_v1 = vpop.f32.mrb[32].mxu0  ;;  %v17089_v56 = vadd.f32 %v8985_v14, %v16431_v45  ;;  %v8987_v61 = vpop.f32.mrb[155].mxu1  ;;  %v7203_v45 = vrot.slane %v6911_v53, 3 }
 0x610   : > { %18684 = vst [vmem:[#allocation110_spill] sm:$0xff] %v17084_v41  ;;  %v17091_v7 = vpop.f32.mrb[33].mxu0  ;;  %v17094_v51 = vadd.f32 %v8987_v61, %v16436_v50  ;;  %v11836_v41 = vld [vmem:[#allocation3 + $0x48] sm:$0xff] }
 0x611   : > { %18685 = vst [vmem:[#allocation111_spill] sm:$0xff] %v17089_v56  ;;  %v17097_v23 = vpop.f32.mrb[34].mxu0  ;;  %9496 = vmatmul.mubr.bf16.gmra.mrb[244].mxu1 %v7186_v35  ;;  %v6912_v50 = vrot.slane %v11836_v41, 2 }
 0x612   : > { %18686 = vst [vmem:[#allocation112_spill] sm:$0xff] %v17094_v51  ;;  %v17100_v48 = vpop.f32.mrb[35].mxu0  ;;  %9505 = vmatprep.mubr.bf16.mxu1 %v16996_v21 }
 0x613   : > { %18687 = vst [vmem:[#allocation113_spill] sm:$0xff] %v17100_v48 }
 0x614   : > { %v8991_v25 = vpop.f32.mrb[156].mxu1 }
 0x615   : > { %v17104_v14 = vadd.f32 %v8991_v25, %v16471_v55  ;;  %v8993_v56 = vpop.f32.mrb[157].mxu1  ;;  %v7204_v55 = vsel %vm4403_vm13, %v7185_v46, %v7203_v45 }
 0x616   : > { %v17107_v61 = vadd.f32 %v8993_v56, %v16475_v11  ;;  %v8995_v30 = vpop.f32.mrb[158].mxu1  ;;  %v6913_v11 = vsel %vm3958_vm11, %v6910_v19, %v6912_v50 }
 0x617   : > { %v17109_v51 = vpop.f32.mrb[36].mxu0  ;;  %v17112_v31 = vadd.f32 %v8995_v30, %v16480_v16  ;;  %v8997_v35 = vpop.f32.mrb[159].mxu1  ;;  %v7221_v16 = vrot.slane %v6913_v11, 3 }
 0x618   : > { %18688 = vst [vmem:[#allocation114_spill] sm:$0xff] %v17107_v61  ;;  %v17114_v48 = vpop.f32.mrb[37].mxu0  ;;  %v17117_v53 = vadd.f32 %v8997_v35, %v16483_v6  ;;  %v11837_v61 = vld [vmem:[#allocation3 + $0x50] sm:$0xff] }
 0x619   : > { %18689 = vst [vmem:[#allocation115_spill] sm:$0xff] %v17112_v31  ;;  %v17120_v25 = vpop.f32.mrb[38].mxu0  ;;  %9506 = vmatmul.mubr.bf16.gmra.mrb[248].mxu1 %v7204_v55  ;;  %v6914_v6 = vrot.slane %v11837_v61, 2 }
 0x61a   : > { %18690 = vst [vmem:[#allocation116_spill] sm:$0xff] %v17117_v53  ;;  %v17123_v41 = vpop.f32.mrb[39].mxu0  ;;  %9515 = vmatprep.mubr.bf16.mxu1 %v16996_v21 }
 0x61b   : > { %18691 = vst [vmem:[#allocation117_spill] sm:$0xff] %v17123_v41  ;;  %v6915_v61 = vsel %vm3958_vm11, %v6912_v50, %v6914_v6  ;;  %v18701_v50 = vld [vmem:[#allocation49_spill] sm:$0xff] }
 0x61c   : > { %v9001_v56 = vpop.f32.mrb[160].mxu1 }
 0x61d   : > { %v17127_v30 = vadd.f32 %v9001_v56, %v16498_v63  ;;  %v9003_v31 = vpop.f32.mrb[161].mxu1  ;;  %v7222_v63 = vsel %vm4403_vm13, %v7203_v45, %v7221_v16 }
 0x61e   : > { %v17130_v35 = vadd.f32 %v9003_v31, %v16502_v26  ;;  %v9005_v46 = vpop.f32.mrb[162].mxu1  ;;  %v7239_v31 = vrot.slane %v6915_v61, 3 }
 0x61f   : > { %v17132_v53 = vpop.f32.mrb[40].mxu0  ;;  %v17135_v19 = vadd.f32 %v9005_v46, %v16507_v0  ;;  %v9007_v55 = vpop.f32.mrb[163].mxu1 }
 0x620   : > { %18692 = vst [vmem:[#allocation118_spill] sm:$0xff] %v17130_v35  ;;  %v17137_v41 = vpop.f32.mrb[41].mxu0  ;;  %v17140_v11 = vadd.f32 %v9007_v55, %v16510_v2  ;;  %v11838_v35 = vld [vmem:[#allocation3 + $0x58] sm:$0xff] }
 0x621   : > { %18693 = vst [vmem:[#allocation119_spill] sm:$0xff] %v17135_v19  ;;  %18694 = vst [vmem:[#allocation120_spill] sm:$0xff] %v17137_v41  ;;  %v17143_v56 = vpop.f32.mrb[42].mxu0  ;;  %9516 = vmatmul.mubr.bf16.gmra.mrb[252].mxu1 %v7222_v63  ;;  %v6916_v2 = vrot.slane %v11838_v35, 2  ;;  %v18704_v41 = vld [vmem:[#allocation50_spill] sm:$0xff] }
 0x622   : > { %18695 = vst [vmem:[#allocation121_spill] sm:$0xff] %v17140_v11  ;;  %18696 = vst [vmem:[#allocation122_spill] sm:$0xff] %v17143_v56  ;;  %v17146_v26 = vpop.f32.mrb[43].mxu0  ;;  %9525 = vmatprep.mubr.bf16.mxu1 %v16996_v21  ;;  %v7240_v56 = vsel %vm4403_vm13, %v7221_v16, %v7239_v31 }
 0x623   : > { %18697 = vst [vmem:[#allocation123_spill] sm:$0xff] %v17146_v26 }
 0x624   : > { %v9011_v0 = vpop.f32.mrb[164].mxu1 }
 0x625   : > { %v17150_v46 = vadd.f32 %v9011_v0, %v16525_v49  ;;  %v9013_v19 = vpop.f32.mrb[165].mxu1 }
 0x626   : > { %v17153_v55 = vadd.f32 %v9013_v19, %v16529_v12  ;;  %v9015_v45 = vpop.f32.mrb[166].mxu1  ;;  %v6917_v12 = vsel %vm3958_vm11, %v6914_v6, %v6916_v2 }
 0x627   : > { %18698 = vst [vmem:[#allocation124_spill] sm:$0xff] %v17150_v46  ;;  %v17155_v11 = vpop.f32.mrb[44].mxu0  ;;  %v17158_v63 = vadd.f32 %v9015_v45, %v18701_v50  ;;  %v9017_v26 = vpop.f32.mrb[167].mxu1  ;;  %v7257_v45 = vrot.slane %v6917_v12, 3  ;;  %v18708_v50 = vld [vmem:[#allocation51_spill] sm:$0xff]  ;;  %v18710_v46 = vld [vmem:[#allocation52_spill] sm:$0xff] }
 0x628   : > { %18699 = vst [vmem:[#allocation125_spill] sm:$0xff] %v17153_v55  ;;  %18700 = vst [vmem:[#allocation126_spill] sm:$0xff] %v17155_v11  ;;  %v17161_v61 = vpop.f32.mrb[45].mxu0  ;;  %v17164_v49 = vadd.f32 %v9017_v26, %v18704_v41  ;;  %v11839_v55 = vld [vmem:[#allocation3 + $0x60] sm:$0xff]  ;;  %v18716_v11 = vld [vmem:[#allocation54_spill] sm:$0xff] }
 0x629   : > { %18702 = vst [vmem:[#allocation49_spill] sm:$0xff] %v17158_v63  ;;  %18703 = vst [vmem:[#allocation127_spill] sm:$0xff] %v17161_v61  ;;  %v17166_v0 = vpop.f32.mrb[46].mxu0  ;;  %9526 = vmatmul.mubr.bf16.gmra.mrb[0].mxu1 %v7240_v56  ;;  %v6918_v61 = vrot.slane %v11839_v55, 2  ;;  %v18713_v56 = vld [vmem:[#allocation53_spill] sm:$0xff] }
 0x62a   : > { %18705 = vst [vmem:[#allocation50_spill] sm:$0xff] %v17164_v49  ;;  %18706 = vst [vmem:[#allocation128_spill] sm:$0xff] %v17166_v0  ;;  %v17169_v35 = vpop.f32.mrb[47].mxu0  ;;  %9535 = vmatprep.mubr.bf16.mxu1 %v16996_v21 }
 0x62b   : > { %18707 = vst [vmem:[#allocation129_spill] sm:$0xff] %v17169_v35 }
 0x62c   : > { %v9021_v19 = vpop.f32.mrb[168].mxu1 }
 0x62d   : > { %v17173_v63 = vadd.f32 %v9021_v19, %v18708_v50  ;;  %v9023_v16 = vpop.f32.mrb[169].mxu1  ;;  %v7258_v19 = vsel %vm4403_vm13, %v7239_v31, %v7257_v45 }
 0x62e   : > { %v17176_v41 = vadd.f32 %v9023_v16, %v18710_v46  ;;  %v9025_v26 = vpop.f32.mrb[170].mxu1  ;;  %v6919_v46 = vsel %vm3958_vm11, %v6916_v2, %v6918_v61 }
 0x62f   : > { %18709 = vst [vmem:[#allocation51_spill] sm:$0xff] %v17173_v63  ;;  %v17178_v49 = vpop.f32.mrb[48].mxu0  ;;  %v17181_v6 = vadd.f32 %v9025_v26, %v18713_v56  ;;  %v9027_v35 = vpop.f32.mrb[171].mxu1  ;;  %v7275_v26 = vrot.slane %v6919_v46, 3  ;;  %v18720_v56 = vld [vmem:[#allocation55_spill] sm:$0xff] }
 0x630   : > { %18711 = vst [vmem:[#allocation52_spill] sm:$0xff] %v17176_v41  ;;  %18712 = vst [vmem:[#allocation130_spill] sm:$0xff] %v17178_v49  ;;  %v17183_v0 = vpop.f32.mrb[49].mxu0  ;;  %v17186_v12 = vadd.f32 %v9027_v35, %v18716_v11  ;;  %v18722_v35 = vld [vmem:[#allocation56_spill] sm:$0xff]  ;;  %v18727_v49 = vld [vmem:[#allocation58_spill] sm:$0xff] }
 0x631   : > { %18714 = vst [vmem:[#allocation53_spill] sm:$0xff] %v17181_v6  ;;  %18715 = vst [vmem:[#allocation131_spill] sm:$0xff] %v17183_v0  ;;  %v17189_v50 = vpop.f32.mrb[50].mxu0  ;;  %9536 = vmatmul.mubr.bf16.gmra.mrb[4].mxu1 %v7258_v19  ;;  %v11840_v0 = vld [vmem:[#allocation3 + $0x68] sm:$0xff] }
 0x632   : > { %18717 = vst [vmem:[#allocation54_spill] sm:$0xff] %v17186_v12  ;;  %18718 = vst [vmem:[#allocation132_spill] sm:$0xff] %v17189_v50  ;;  %v17192_v55 = vpop.f32.mrb[51].mxu0  ;;  %9545 = vmatprep.mubr.bf16.mxu1 %v16996_v21  ;;  %v6920_v11 = vrot.slane %v11840_v0, 2  ;;  %v18724_v19 = vld [vmem:[#allocation57_spill] sm:$0xff] }
 0x633   : > { %18719 = vst [vmem:[#allocation133_spill] sm:$0xff] %v17192_v55 }
 0x634   : > { %v9031_v16 = vpop.f32.mrb[172].mxu1  ;;  %v6921_v0 = vsel %vm3958_vm11, %v6918_v61, %v6920_v11 }
 0x635   : > { %v17196_v6 = vadd.f32 %v9031_v16, %v18720_v56  ;;  %v9033_v41 = vpop.f32.mrb[173].mxu1  ;;  %v7276_v16 = vsel %vm4403_vm13, %v7257_v45, %v7275_v26 }
 0x636   : > { %v17199_v12 = vadd.f32 %v9033_v41, %v18722_v35  ;;  %v9035_v31 = vpop.f32.mrb[174].mxu1 }
 0x637   : > { %18721 = vst [vmem:[#allocation55_spill] sm:$0xff] %v17196_v6  ;;  %v17201_v50 = vpop.f32.mrb[52].mxu0  ;;  %v17204_v2 = vadd.f32 %v9035_v31, %v18724_v19  ;;  %v9037_v55 = vpop.f32.mrb[175].mxu1  ;;  %v7293_v31 = vrot.slane %v6921_v0, 3  ;;  %v18731_v19 = vld [vmem:[#allocation59_spill] sm:$0xff] }
 0x638   : > { %18723 = vst [vmem:[#allocation56_spill] sm:$0xff] %v17199_v12  ;;  %v17206_v63 = vpop.f32.mrb[53].mxu0  ;;  %v17209_v46 = vadd.f32 %v9037_v55, %v18727_v49  ;;  %v18732_v55 = vld [vmem:[#allocation60_spill] sm:$0xff] }
 0x639   : > { %18725 = vst [vmem:[#allocation57_spill] sm:$0xff] %v17204_v2  ;;  %18726 = vst [vmem:[#allocation134_spill] sm:$0xff] %v17206_v63  ;;  %v17212_v56 = vpop.f32.mrb[54].mxu0  ;;  %9546 = vmatmul.mubr.bf16.gmra.mrb[8].mxu1 %v7276_v16  ;;  %v11841_v63 = vld [vmem:[#allocation3 + $0x70] sm:$0xff] }
 0x63a   : > { %18728 = vst [vmem:[#allocation58_spill] sm:$0xff] %v17209_v46  ;;  %18729 = vst [vmem:[#allocation135_spill] sm:$0xff] %v17212_v56  ;;  %v17215_v41 = vpop.f32.mrb[55].mxu0  ;;  %9555 = vmatprep.mubr.bf16.mxu1 %v16996_v21  ;;  %v6922_v49 = vrot.slane %v11841_v63, 2  ;;  %v18734_v16 = vld [vmem:[#allocation62_spill] sm:$0xff] }
 0x63b   : > { %18730 = vst [vmem:[#allocation136_spill] sm:$0xff] %v17215_v41 }
 0x63c   : > { %v9041_v35 = vpop.f32.mrb[176].mxu1  ;;  %v6923_v63 = vsel %vm3958_vm11, %v6920_v11, %v6922_v49  ;;  %v18740_v11 = vld [vmem:[#allocation66_spill] sm:$0xff] }
 0x63d   : > { %v17219_v2 = vadd.f32 %v9041_v35, %v18731_v19  ;;  %v9043_v12 = vpop.f32.mrb[177].mxu1  ;;  %v7294_v35 = vsel %vm4403_vm13, %v7275_v26, %v7293_v31 }
 0x63e   : > { %v17222_v46 = vadd.f32 %v9043_v12, %v18732_v55  ;;  %v9045_v45 = vpop.f32.mrb[178].mxu1 }
 0x63f   : > { %v17224_v56 = vpop.f32.mrb[56].mxu0  ;;  %v17227_v61 = vadd.f32 %v9045_v45, %v18734_v16  ;;  %v9047_v41 = vpop.f32.mrb[179].mxu1  ;;  %v7311_v45 = vrot.slane %v6923_v63, 3  ;;  %v17243_v16 = vadd.f32 %v17012_v52, %v17017_v27  ;;  %v18741_v63 = vld [vmem:[#allocation67_spill] sm:$0xff]  ;;  %v18743_v52 = vld [vmem:[#allocation48_spill] sm:$0xff] }
 0x640   : > { %18733 = vst [vmem:[#allocation59_spill] sm:$0xff] %v17222_v46  ;;  %v17229_v6 = vpop.f32.mrb[57].mxu0  ;;  %v17232_v0 = vadd.f32 %v9047_v41, %v16667_v32 }
 0x641   : > { %18735 = vst [vmem:[#allocation60_spill] sm:$0xff] %v17227_v61  ;;  %v17235_v19 = vpop.f32.mrb[58].mxu0  ;;  %9556 = vmatmul.mubr.bf16.gmra.mrb[12].mxu1 %v7294_v35  ;;  %18739 = vst [vmem:[#allocation139_spill] sm:$0xff] %v17243_v16  ;;  %v7312_v27 = vsel %vm4403_vm13, %v7293_v31, %v7311_v45  ;;  %v17275_v31 = vadd.f32 %v17015_v8, %v17022_v40  ;;  %v17297_v8 = vadd.f32 %v17025_v17, %v17031_v10 }
 0x642   : > { %18736 = vst [vmem:[#allocation62_spill] sm:$0xff] %v17232_v0  ;;  %18737 = vst [vmem:[#allocation137_spill] sm:$0xff] %v17235_v19  ;;  %v17238_v12 = vpop.f32.mrb[59].mxu0  ;;  %9565 = vmatprep.mubr.bf16.mxu1 %v16996_v21  ;;  %v17316_v10 = vadd.f32 %v17038_v9, %v17045_v24  ;;  %v17337_v9 = vadd.f32 %v17048_v42, %v17054_v18  ;;  %v17356_v18 = vadd.f32 %v17061_v60, %v17068_v37  ;;  %v18765_v60 = vld [vmem:[#allocation63_spill] sm:$0xff] }
 0x643   : > { %18738 = vst [vmem:[#allocation138_spill] sm:$0xff] %v17238_v12 }
 0x644   : > { %v9051_v55 = vpop.f32.mrb[180].mxu1  ;;  %18761 = vst [vmem:[#allocation141_spill] sm:$0xff] %v17356_v18 }
 0x645   : > { %v17246_v32 = vadd.f32 %v9051_v55, %v16697_v62  ;;  %v9053_v41 = vpop.f32.mrb[181].mxu1 }
 0x646   : > { %v17249_v26 = vadd.f32 %v9053_v41, %v16701_v58  ;;  %v9055_v35 = vpop.f32.mrb[182].mxu1  ;;  %v18744_v58 = vrot.slane %v18743_v52, 2 }
 0x647   : > { %v17251_v0 = vpop.f32.mrb[60].mxu0  ;;  %v17254_v12 = vadd.f32 %v9055_v35, %v18740_v11  ;;  %v9057_v61 = vpop.f32.mrb[183].mxu1 }
 0x648   : > { %v17256_v19 = vpop.f32.mrb[61].mxu0  ;;  %v17259_v46 = vadd.f32 %v9057_v61, %v18741_v63  ;;  %v6925_v55 = vsel %vm3958_vm11, %v6922_v49, %v18744_v58  ;;  %v18747_v63 = vld [vmem:[#allocation69_spill] sm:$0xff]  ;;  %v17282_v49 = vadd.f32 %v17020_v15, %v17028_v34  ;;  %v17303_v15 = vadd.f32 %v17035_v36, %v17040_v54 }
 0x649   : > { %v17262_v62 = vpop.f32.mrb[62].mxu0  ;;  %9566 = vmatmul.mubr.bf16.gmra.mrb[16].mxu1 %v7312_v27  ;;  %v7329_v11 = vrot.slane %v6925_v55, 3 }
 0x64a   : > { %18742 = vst [vmem:[#allocation66_spill] sm:$0xff] %v17259_v46  ;;  %v17267_v41 = vpop.f32.mrb[63].mxu0  ;;  %9575 = vmatprep.mubr.bf16.mxu1 %v16996_v21  ;;  %18748 = vst [vmem:[#allocation69_spill] sm:$0xff] %v17282_v49  ;;  %v18749_v46 = vld [vmem:[#allocation70_spill] sm:$0xff] }
 0x64b   : > { %18745 = vst [vmem:[#allocation67_spill] sm:$0xff] %v17267_v41  ;;  %v7330_v40 = vsel %vm4403_vm13, %v7311_v45, %v7329_v11  ;;  %18751 = vst [vmem:[#allocation70_spill] sm:$0xff] %v17297_v8  ;;  %v18790_v8 = vld [vmem:[#allocation116_spill] sm:$0xff] }
 0x64c   : > { %v9061_v35 = vpop.f32.mrb[184].mxu1 }
 0x64d   : > { %v17271_v16 = vadd.f32 %v9061_v35, %v16744_v39  ;;  %v9063_v61 = vpop.f32.mrb[185].mxu1 }
 0x64e   : > { %v17278_v27 = vadd.f32 %v9063_v61, %v18747_v63  ;;  %v9065_v52 = vpop.f32.mrb[186].mxu1 }
 0x64f   : > { %18746 = vst [vmem:[#allocation48_spill] sm:$0xff] %v17271_v16  ;;  %v17284_v58 = vpop.f32.mrb[64].mxu0  ;;  %v17287_v55 = vadd.f32 %v9065_v52, %v18749_v46  ;;  %v9067_v39 = vpop.f32.mrb[187].mxu1  ;;  %v18750_v16 = vld [vmem:[#allocation71_spill] sm:$0xff]  ;;  %v18754_v52 = vld [vmem:[#allocation74_spill] sm:$0xff] }
 0x650   : > { %v17289_v35 = vpop.f32.mrb[65].mxu0  ;;  %v17292_v41 = vadd.f32 %v9067_v39, %v18750_v16  ;;  %18752 = vst [vmem:[#allocation71_spill] sm:$0xff] %v17303_v15  ;;  %v18753_v16 = vld [vmem:[#allocation73_spill] sm:$0xff]  ;;  %v17325_v15 = vadd.f32 %v17043_v33, %v17051_v57  ;;  %v17343_v33 = vadd.f32 %v17058_v13, %v17063_v3 }
 0x651   : > { %v17299_v61 = vpop.f32.mrb[66].mxu0  ;;  %9576 = vmatmul.mubr.bf16.gmra.mrb[20].mxu1 %v7330_v40  ;;  %18755 = vst [vmem:[#allocation73_spill] sm:$0xff] %v17316_v10 }
 0x652   : > { %v17305_v34 = vpop.f32.mrb[67].mxu0  ;;  %9585 = vmatprep.mubr.bf16.mxu1 %v16996_v21  ;;  %18756 = vst [vmem:[#allocation74_spill] sm:$0xff] %v17325_v15  ;;  %18760 = vst [vmem:[#allocation140_spill] sm:$0xff] %v17343_v33  ;;  %v18775_v33 = vld [vmem:[#allocation112_spill] sm:$0xff]  ;;  %v18785_v15 = vld [vmem:[#allocation115_spill] sm:$0xff] }
 0x653   : > { %v17441_v10 = vadd.f32 %v18785_v15, %v17120_v25  ;;  %v18796_v15 = vld [vmem:[#allocation86_spill] sm:$0xff] }
 0x654   : > { %v9071_v46 = vpop.f32.mrb[188].mxu1 }
 0x655   : > { %v17309_v63 = vadd.f32 %v9071_v46, %v18753_v16  ;;  %v9073_v45 = vpop.f32.mrb[189].mxu1  ;;  %18786 = vst [vmem:[#allocation112_spill] sm:$0xff] %v17441_v10  ;;  %v18798_v10 = vld [vmem:[#allocation87_spill] sm:$0xff] }
 0x656   : > { %v17312_v39 = vadd.f32 %v9073_v45, %v18754_v52  ;;  %v9075_v17 = vpop.f32.mrb[190].mxu1  ;;  %v18757_v45 = vld [vmem:[#allocation61_spill] sm:$0xff] }
 0x657   : > { %v17318_v40 = vpop.f32.mrb[68].mxu0  ;;  %v17321_v54 = vadd.f32 %v9075_v17, %v16801_v43  ;;  %v9077_v36 = vpop.f32.mrb[191].mxu1  ;;  %v18758_v52 = vrot.slane %v18757_v45, 3  ;;  %18759 = vst [vmem:[#allocation61_spill] sm:$0xff] %v17337_v9 }
 0x658   : > { %v17327_v46 = vpop.f32.mrb[69].mxu0  ;;  %v17330_v16 = vadd.f32 %v9077_v36, %v16803_v22 }
 0x659   : > { %v7348_v24 = vsel %vm4403_vm13, %v7329_v11, %v18758_v52  ;;  %v17339_v43 = vpop.f32.mrb[70].mxu0  ;;  %v17365_v52 = vadd.f32 %v17066_v44, %v17074_v5  ;;  %v18767_v5 = vld [vmem:[#allocation79_spill] sm:$0xff] }
 0x65a   : > { %9586 = vmatmul.mubr.bf16.gmra.mrb[24].mxu1 %v7348_v24  ;;  %v17345_v57 = vpop.f32.mrb[71].mxu0  ;;  %v18763_v24 = vld [vmem:[#allocation78_spill] sm:$0xff] }
 0x65b   : > { %9595 = vmatprep.mubr.bf16.mxu1 %v16996_v21  ;;  %18762 = vst [vmem:[#allocation142_spill] sm:$0xff] %v17365_v52  ;;  %v18771_v52 = vld [vmem:[#allocation111_spill] sm:$0xff] }
 0x65c   : > { %v9081_v22 = vpop.f32.mrb[192].mxu1  ;;  %v17403_v18 = vadd.f32 %v18771_v52, %v17097_v23  ;;  %v18779_v52 = vld [vmem:[#allocation82_spill] sm:$0xff] }
 0x65d   : > { %v17349_v17 = vadd.f32 %v9081_v22, %v16831_v59  ;;  %v9083_v11 = vpop.f32.mrb[193].mxu1  ;;  %v17374_v22 = vadd.f32 %v17071_v47, %v17077_v38 }
 0x65e   : > { %v17352_v36 = vadd.f32 %v9083_v11, %v16834_v29  ;;  %v9085_v42 = vpop.f32.mrb[194].mxu1 }
 0x65f   : > { %v17358_v45 = vpop.f32.mrb[72].mxu0  ;;  %v17361_v3 = vadd.f32 %v9085_v42, %v16837_v20  ;;  %v9087_v13 = vpop.f32.mrb[195].mxu1  ;;  %18764 = vst [vmem:[#allocation78_spill] sm:$0xff] %v17374_v22  ;;  %v17381_v20 = vadd.f32 %v17081_v28, %v17086_v1  ;;  %v18770_v1 = vld [vmem:[#allocation80_spill] sm:$0xff] }
 0x660   : > { %v17367_v59 = vpop.f32.mrb[73].mxu0  ;;  %v17370_v29 = vadd.f32 %v9087_v13, %v18763_v24  ;;  %v18768_v24 = vld [vmem:[#allocation110_spill] sm:$0xff] }
 0x661   : > { %v17376_v37 = vpop.f32.mrb[74].mxu0  ;;  %18766 = vst [vmem:[#allocation63_spill] sm:$0xff] %v17381_v20  ;;  %18772 = vst [vmem:[#allocation110_spill] sm:$0xff] %v17403_v18  ;;  %v18780_v18 = vld [vmem:[#allocation83_spill] sm:$0xff] }
 0x662   : > { %9596 = vmatmul.mubr.bf16.gmra.mrb[28].mxu1 %v18765_v60  ;;  %v17383_v11 = vpop.f32.mrb[75].mxu0  ;;  %v17394_v60 = vadd.f32 %v18768_v24, %v17091_v7  ;;  %v18777_v24 = vld [vmem:[#allocation64_spill] sm:$0xff] }
 0x663   : > { %9605 = vmatprep.mubr.bf16.mxu1 %v16996_v21 }
 0x664   : > { %v9091_v44 = vpop.f32.mrb[196].mxu1  ;;  %18769 = vst [vmem:[#allocation79_spill] sm:$0xff] %v17394_v60 }
 0x665   : > { %v17387_v42 = vadd.f32 %v9091_v44, %v18767_v5  ;;  %v9093_v13 = vpop.f32.mrb[197].mxu1  ;;  %v18773_v5 = vld [vmem:[#allocation81_spill] sm:$0xff] }
 0x666   : > { %v17390_v47 = vadd.f32 %v9093_v13, %v16853_v4  ;;  %v9095_v38 = vpop.f32.mrb[198].mxu1  ;;  %v18774_v13 = vld [vmem:[#allocation113_spill] sm:$0xff] }
 0x667   : > { %v17396_v22 = vpop.f32.mrb[76].mxu0  ;;  %v17399_v28 = vadd.f32 %v9095_v38, %v18770_v1  ;;  %v9097_v20 = vpop.f32.mrb[199].mxu1  ;;  %v17412_v9 = vadd.f32 %v18775_v33, %v18774_v13  ;;  %v17419_v38 = vadd.f32 %v17104_v14, %v17109_v51  ;;  %v18783_v51 = vld [vmem:[#allocation84_spill] sm:$0xff] }
 0x668   : > { %v17405_v44 = vpop.f32.mrb[77].mxu0  ;;  %v17408_v4 = vadd.f32 %v9097_v20, %v18773_v5 }
 0x669   : > { %18776 = vst [vmem:[#allocation80_spill] sm:$0xff] %v17412_v9  ;;  %v17414_v7 = vpop.f32.mrb[78].mxu0  ;;  %18778 = vst [vmem:[#allocation111_spill] sm:$0xff] %v17419_v38  ;;  %v18781_v9 = vld [vmem:[#allocation114_spill] sm:$0xff] }
 0x66a   : > { %9606 = vmatmul.mubr.bf16.gmra.mrb[32].mxu1 %v18777_v24  ;;  %v17421_v1 = vpop.f32.mrb[79].mxu0  ;;  %v17432_v24 = vadd.f32 %v18781_v9, %v17114_v48  ;;  %v18793_v9 = vld [vmem:[#allocation65_spill] sm:$0xff] }
 0x66b   : > { %9615 = vmatprep.mubr.bf16.mxu1 %v16996_v21 }
 0x66c   : > { %v9101_v23 = vpop.f32.mrb[200].mxu1  ;;  %18782 = vst [vmem:[#allocation81_spill] sm:$0xff] %v17432_v24 }
 0x66d   : > { %v17425_v20 = vadd.f32 %v9101_v23, %v18779_v52  ;;  %v9103_v5 = vpop.f32.mrb[201].mxu1  ;;  %v18787_v52 = vld [vmem:[#allocation85_spill] sm:$0xff] }
 0x66e   : > { %v17428_v33 = vadd.f32 %v9103_v5, %v18780_v18  ;;  %v9105_v13 = vpop.f32.mrb[202].mxu1  ;;  %v18789_v5 = vld [vmem:[#allocation117_spill] sm:$0xff] }
 0x66f   : > { %v17434_v60 = vpop.f32.mrb[80].mxu0  ;;  %v17437_v14 = vadd.f32 %v9105_v13, %v18783_v51  ;;  %v9107_v38 = vpop.f32.mrb[203].mxu1  ;;  %v17450_v49 = vadd.f32 %v18790_v8, %v18789_v5  ;;  %v17457_v13 = vadd.f32 %v17127_v30, %v17132_v53 }
 0x670   : > { %v17443_v23 = vpop.f32.mrb[81].mxu0  ;;  %v17446_v18 = vadd.f32 %v9107_v38, %v18787_v52 }
 0x671   : > { %18784 = vst [vmem:[#allocation113_spill] sm:$0xff] %v17437_v14  ;;  %18791 = vst [vmem:[#allocation82_spill] sm:$0xff] %v17450_v49  ;;  %v17452_v48 = vpop.f32.mrb[82].mxu0  ;;  %v18836_v14 = vld [vmem:[#allocation128_spill] sm:$0xff] }
 0x672   : > { %18788 = vst [vmem:[#allocation64_spill] sm:$0xff] %v17446_v18  ;;  %18792 = vst [vmem:[#allocation83_spill] sm:$0xff] %v17452_v48  ;;  %9616 = vmatmul.mubr.bf16.gmra.mrb[36].mxu1 %v18793_v9  ;;  %v17459_v51 = vpop.f32.mrb[83].mxu0  ;;  %v18801_v9 = vld [vmem:[#allocation88_spill] sm:$0xff]  ;;  %v18837_v48 = vld [vmem:[#allocation49_spill] sm:$0xff] }
 0x673   : > { %18794 = vst [vmem:[#allocation114_spill] sm:$0xff] %v17457_v13  ;;  %18795 = vst [vmem:[#allocation84_spill] sm:$0xff] %v17459_v51  ;;  %9625 = vmatprep.mubr.bf16.mxu1 %v16996_v21  ;;  %v18804_v13 = vld [vmem:[#allocation89_spill] sm:$0xff] }
 0x674   : > { %v9111_v25 = vpop.f32.mrb[204].mxu1 }
 0x675   : > { %v17463_v38 = vadd.f32 %v9111_v25, %v18796_v15  ;;  %v9113_v52 = vpop.f32.mrb[205].mxu1  ;;  %v18807_v25 = vld [vmem:[#allocation68_spill] sm:$0xff] }
 0x676   : > { %v17466_v8 = vadd.f32 %v9113_v52, %v18798_v10  ;;  %v9115_v5 = vpop.f32.mrb[206].mxu1  ;;  %v18809_v52 = vld [vmem:[#allocation90_spill] sm:$0xff] }
 0x677   : > { %18797 = vst [vmem:[#allocation115_spill] sm:$0xff] %v17463_v38  ;;  %v17468_v49 = vpop.f32.mrb[84].mxu0  ;;  %v17471_v24 = vadd.f32 %v9115_v5, %v18801_v9  ;;  %v9117_v53 = vpop.f32.mrb[207].mxu1  ;;  %v18811_v9 = vld [vmem:[#allocation91_spill] sm:$0xff] }
 0x678   : > { %18799 = vst [vmem:[#allocation85_spill] sm:$0xff] %v17466_v8  ;;  %18800 = vst [vmem:[#allocation117_spill] sm:$0xff] %v17468_v49  ;;  %v17473_v30 = vpop.f32.mrb[85].mxu0  ;;  %v17476_v18 = vadd.f32 %v9117_v53, %v18804_v13  ;;  %v18814_v13 = vld [vmem:[#allocation92_spill] sm:$0xff] }
 0x679   : > { %18802 = vst [vmem:[#allocation116_spill] sm:$0xff] %v17471_v24  ;;  %18803 = vst [vmem:[#allocation65_spill] sm:$0xff] %v17473_v30  ;;  %v17478_v51 = vpop.f32.mrb[86].mxu0 }
 0x67a   : > { %18805 = vst [vmem:[#allocation86_spill] sm:$0xff] %v17476_v18  ;;  %18806 = vst [vmem:[#allocation87_spill] sm:$0xff] %v17478_v51  ;;  %9626 = vmatmul.mubr.bf16.gmra.mrb[40].mxu1 %v18807_v25  ;;  %v17481_v15 = vpop.f32.mrb[87].mxu0 }
 0x67b   : > { %18808 = vst [vmem:[#allocation88_spill] sm:$0xff] %v17481_v15  ;;  %9635 = vmatprep.mubr.bf16.mxu1 %v16996_v21  ;;  %v18817_v15 = vld [vmem:[#allocation93_spill] sm:$0xff] }
 0x67c   : > { %v9121_v10 = vpop.f32.mrb[208].mxu1 }
 0x67d   : > { %v17485_v8 = vadd.f32 %v9121_v10, %v18809_v52  ;;  %v9123_v5 = vpop.f32.mrb[209].mxu1  ;;  %v18820_v10 = vld [vmem:[#allocation72_spill] sm:$0xff] }
 0x67e   : > { %v17488_v24 = vadd.f32 %v9123_v5, %v18811_v9  ;;  %v9125_v30 = vpop.f32.mrb[210].mxu1  ;;  %v18822_v5 = vld [vmem:[#allocation120_spill] sm:$0xff]  ;;  %v18823_v9 = vld [vmem:[#allocation118_spill] sm:$0xff] }
 0x67f   : > { %18810 = vst [vmem:[#allocation89_spill] sm:$0xff] %v17485_v8  ;;  %v17490_v38 = vpop.f32.mrb[88].mxu0  ;;  %v17493_v53 = vadd.f32 %v9125_v30, %v18814_v13  ;;  %v9127_v18 = vpop.f32.mrb[211].mxu1  ;;  %v18825_v30 = vld [vmem:[#allocation122_spill] sm:$0xff]  ;;  %v18826_v13 = vld [vmem:[#allocation119_spill] sm:$0xff]  ;;  %v18829_v8 = vld [vmem:[#allocation121_spill] sm:$0xff] }
 0x680   : > { %18812 = vst [vmem:[#allocation68_spill] sm:$0xff] %v17488_v24  ;;  %18813 = vst [vmem:[#allocation90_spill] sm:$0xff] %v17490_v38  ;;  %v17495_v25 = vpop.f32.mrb[89].mxu0  ;;  %v17498_v51 = vadd.f32 %v9127_v18, %v18817_v15  ;;  %v17508_v24 = vadd.f32 %v18823_v9, %v18822_v5  ;;  %v18831_v15 = vld [vmem:[#allocation126_spill] sm:$0xff]  ;;  %v17528_v5 = vadd.f32 %v18837_v48, %v18836_v14  ;;  %v18838_v9 = vld [vmem:[#allocation129_spill] sm:$0xff] }
 0x681   : > { %18815 = vst [vmem:[#allocation91_spill] sm:$0xff] %v17493_v53  ;;  %18816 = vst [vmem:[#allocation92_spill] sm:$0xff] %v17495_v25  ;;  %v17500_v49 = vpop.f32.mrb[90].mxu0  ;;  %v17512_v53 = vadd.f32 %v18826_v13, %v18825_v30  ;;  %v18828_v25 = vld [vmem:[#allocation123_spill] sm:$0xff]  ;;  %v18841_v13 = vld [vmem:[#allocation130_spill] sm:$0xff] }
 0x682   : > { %18818 = vst [vmem:[#allocation93_spill] sm:$0xff] %v17498_v51  ;;  %18819 = vst [vmem:[#allocation143_spill] sm:$0xff] %v17500_v49  ;;  %9636 = vmatmul.mubr.bf16.gmra.mrb[212].mxu1 %v18820_v10  ;;  %v17503_v52 = vpop.f32.mrb[91].mxu0  ;;  %v17516_v18 = vadd.f32 %v18829_v8, %v18828_v25  ;;  %v18832_v51 = vld [vmem:[#allocation124_spill] sm:$0xff]  ;;  %v18833_v10 = vld [vmem:[#allocation127_spill] sm:$0xff] }
 0x683   : > { %18821 = vst [vmem:[#allocation72_spill] sm:$0xff] %v17503_v52  ;;  %9645 = vmatprep.mubr.bf16.mxu1 %v16996_v21  ;;  %18824 = vst [vmem:[#allocation120_spill] sm:$0xff] %v17508_v24  ;;  %v17520_v49 = vadd.f32 %v18832_v51, %v18831_v15  ;;  %v18834_v52 = vld [vmem:[#allocation125_spill] sm:$0xff]  ;;  %v18839_v24 = vld [vmem:[#allocation50_spill] sm:$0xff] }
 0x684   : > { %18827 = vst [vmem:[#allocation118_spill] sm:$0xff] %v17512_v53  ;;  %18830 = vst [vmem:[#allocation122_spill] sm:$0xff] %v17516_v18  ;;  %v17524_v38 = vadd.f32 %v18834_v52, %v18833_v10  ;;  %v17532_v30 = vadd.f32 %v18839_v24, %v18838_v9  ;;  %v18842_v53 = vld [vmem:[#allocation51_spill] sm:$0xff]  ;;  %v18845_v18 = vld [vmem:[#allocation52_spill] sm:$0xff] }
 0x685   : > { %v17536_v8 = vadd.f32 %v18842_v53, %v18841_v13  ;;  %v18844_v25 = vld [vmem:[#allocation131_spill] sm:$0xff]  ;;  %v18848_v52 = vld [vmem:[#allocation132_spill] sm:$0xff]  ;;  %v18849_v10 = vld [vmem:[#allocation53_spill] sm:$0xff] }
 0x686   : > { %18835 = vst [vmem:[#allocation119_spill] sm:$0xff] %v17524_v38  ;;  %18840 = vst [vmem:[#allocation123_spill] sm:$0xff] %v17532_v30  ;;  %v17540_v51 = vadd.f32 %v18845_v18, %v18844_v25  ;;  %v18847_v15 = vld [vmem:[#allocation75_spill] sm:$0xff]  ;;  %v17545_v38 = vadd.f32 %v18849_v10, %v18848_v52  ;;  %v18851_v14 = vld [vmem:[#allocation133_spill] sm:$0xff] }
 0x687   : > { %18843 = vst [vmem:[#allocation121_spill] sm:$0xff] %v17536_v8  ;;  %v18852_v48 = vld [vmem:[#allocation54_spill] sm:$0xff]  ;;  %v18853_v9 = vld [vmem:[#allocation55_spill] sm:$0xff]  ;;  %v18855_v8 = vld [vmem:[#allocation56_spill] sm:$0xff] }
 0x688   : > { %18846 = vst [vmem:[#allocation126_spill] sm:$0xff] %v17540_v51  ;;  %18850 = vst [vmem:[#allocation124_spill] sm:$0xff] %v17545_v38  ;;  %v17550_v24 = vadd.f32 %v18852_v48, %v18851_v14  ;;  %v17554_v53 = vadd.f32 %v18853_v9, %v17201_v50  ;;  %v18854_v13 = vld [vmem:[#allocation134_spill] sm:$0xff]  ;;  %v18856_v25 = vld [vmem:[#allocation135_spill] sm:$0xff]  ;;  %v17571_v14 = vadd.f32 %v17219_v2, %v17224_v56 }
 0x689   : > { %v17558_v18 = vadd.f32 %v18855_v8, %v18854_v13  ;;  %v18858_v52 = vld [vmem:[#allocation136_spill] sm:$0xff]  ;;  %v18859_v10 = vld [vmem:[#allocation58_spill] sm:$0xff]  ;;  %v18861_v50 = vld [vmem:[#allocation59_spill] sm:$0xff]  ;;  %v17589_v2 = vadd.f32 %v17246_v32, %v17251_v0  ;;  %v17609_v0 = vadd.f32 %v17278_v27, %v17289_v35  ;;  %v17621_v32 = vadd.f32 %v17309_v63, %v17318_v40 }
 0x68a   : > { %9646 = vmatmul.mubr.bf16.gmra.mrb[216].mxu1 %v18847_v15  ;;  %v18857_v15 = vld [vmem:[#allocation57_spill] sm:$0xff]  ;;  %v17566_v38 = vadd.f32 %v18859_v10, %v18858_v52  ;;  %v18860_v30 = vld [vmem:[#allocation76_spill] sm:$0xff]  ;;  %v17576_v8 = vadd.f32 %v18861_v50, %v17229_v6  ;;  %v17597_v6 = vadd.f32 %v17254_v12, %v17262_v62  ;;  %v18867_v56 = vld [vmem:[#allocation67_spill] sm:$0xff]  ;;  %v17617_v12 = vadd.f32 %v17292_v41, %v17305_v34 }
 0x68b   : > { %9655 = vmatprep.mubr.bf16.mxu1 %v16996_v21  ;;  %v17562_v51 = vadd.f32 %v18857_v15, %v18856_v25  ;;  %v18862_v48 = vld [vmem:[#allocation137_spill] sm:$0xff]  ;;  %v18863_v9 = vld [vmem:[#allocation60_spill] sm:$0xff]  ;;  %v18864_v25 = vld [vmem:[#allocation138_spill] sm:$0xff]  ;;  %v17629_v62 = vadd.f32 %v17321_v54, %v17339_v43  ;;  %v17633_v27 = vadd.f32 %v17330_v16, %v17345_v57  ;;  %v17637_v41 = vadd.f32 %v17349_v17, %v17358_v45 }
 0x68c   : > { %v17580_v13 = vadd.f32 %v18863_v9, %v18862_v48  ;;  %v18865_v15 = vld [vmem:[#allocation62_spill] sm:$0xff]  ;;  %v18866_v10 = vld [vmem:[#allocation77_spill] sm:$0xff]  ;;  %v18869_v48 = vld [vmem:[#allocation48_spill] sm:$0xff]  ;;  %v17645_v35 = vadd.f32 %v17361_v3, %v17376_v37  ;;  %v17653_v34 = vadd.f32 %v17387_v42, %v17396_v22  ;;  %v17661_v54 = vadd.f32 %v17399_v28, %v17414_v7 }
 0x68d   : > { %v17584_v52 = vadd.f32 %v18865_v15, %v18864_v25  ;;  %v17605_v9 = vadd.f32 %v18869_v48, %v17284_v58  ;;  %v17641_v58 = vadd.f32 %v17352_v36, %v17367_v59  ;;  %v17668_v43 = vadd.f32 %v17408_v4, %v17421_v1  ;;  %v493_v17 = vld [vmem:[%s18205_s10] sm:$0x3]  ;;  %v18870_v59 = vld [vmem:[#allocation139_spill] sm:$0xff] }
 0x68e   : > { %v17672_v57 = vadd.f32 %v17425_v20, %v17434_v60  ;;  %v17689_v60 = vadd.f32 %v17428_v33, %v17443_v23  ;;  %v18872_v1 = vld [vmem:[#allocation83_spill] sm:$0xff]  ;;  %v18873_v20 = vld [vmem:[#allocation113_spill] sm:$0xff] }
 0x68f   : > { %v17695_v25 = vadd.f32 %v18873_v20, %v18872_v1  ;;  %v18883_v20 = vld [vmem:[#allocation73_spill] sm:$0xff] }
 0x692   : > { %9656 = vmatmul.mubr.bf16.gmra.mrb[220].mxu1 %v18860_v30  ;;  %v18868_v30 = vld [vmem:[#allocation66_spill] sm:$0xff] }
 0x693   : > { %9665 = vmatprep.mubr.bf16.mxu1 %v16996_v21  ;;  %v17593_v21 = vadd.f32 %v17249_v26, %v17256_v19  ;;  %v17601_v50 = vadd.f32 %v18868_v30, %v18867_v56  ;;  %v17613_v19 = vadd.f32 %v17287_v55, %v17299_v61  ;;  %v17625_v26 = vadd.f32 %v17312_v39, %v17327_v46  ;;  %v492_v46 = vld [vmem:[%s18204_s9] sm:$0x3] }
 0x694   : > { %v9677_v55 = vlaneseq  ;;  %v17649_v61 = vadd.f32 %v17370_v29, %v17383_v11  ;;  %v17657_v39 = vadd.f32 %v17390_v47, %v17405_v44  ;;  %v18871_v44 = vld [vmem:[#allocation69_spill] sm:$0xff]  ;;  %v18875_v56 = vld [vmem:[#allocation84_spill] sm:$0xff] }
 0x695   : > { %v18876_v30 = vld [vmem:[#allocation64_spill] sm:$0xff] }
 0x696   : > { %v9678_v63 = vshrl.u32 %v9677_v55, 7  ;;  %v17701_v48 = vadd.f32 %v18876_v30, %v18875_v56  ;;  %v18878_v55 = vld [vmem:[#allocation117_spill] sm:$0xff] }
 0x698   : > { %v9679_v40 = vsub.s32 0, %v9678_v63  ;;  %v9683_v16 = vsub.s32 1, %v9678_v63  ;;  %18877 = vst [vmem:[#allocation127_spill] sm:$0xff] %v17701_v48  ;;  %v18879_v63 = vld [vmem:[#allocation115_spill] sm:$0xff] }
 0x69a   : > { %9666 = vmatmul.mubr.bf16.gmra.mrb[224].mxu1 %v18866_v10  ;;  %v17677_v36 = vrot.slane %v492_v46, %v9679_v40  ;;  %v17679_v3 = vrot.slane %v492_v46, %v9683_v16  ;;  %v17682_v22 = vrot.slane %v493_v17, %v9679_v40  ;;  %v17685_v42 = vrot.slane %v493_v17, %v9683_v16  ;;  %v18874_v10 = vld [vmem:[#allocation70_spill] sm:$0xff] }
 0x69b   : > { %v17707_v40 = vadd.f32 %v18879_v63, %v18878_v55 }
 0x69d   : > { %18880 = vst [vmem:[#allocation125_spill] sm:$0xff] %v17707_v40 }
 0x6c4   : > { %v9457_v45 = vpop.f32.mrb[228].mxu1 }
 0x6c5   : > { %v10999_v29 = vadd.f32 %v18870_v59, %v9457_v45  ;;  %v9459_v37 = vpop.f32.mrb[229].mxu1 }
 0x6c6   : > { %v11002_v11 = vadd.f32 %v17275_v31, %v9459_v37  ;;  %v9461_v47 = vpop.f32.mrb[230].mxu1 }
 0x6c7   : > { %v9687_v28 = vmul.f32 %v10999_v29, %v17677_v36  ;;  %v11005_v4 = vadd.f32 %v18871_v44, %v9461_v47  ;;  %v9463_v7 = vpop.f32.mrb[231].mxu1  ;;  %v18881_v47 = vld [vmem:[#allocation71_spill] sm:$0xff] }
 0x6c8   : > { %v9688_v15 = vmul.f32 %v11002_v11, %v17679_v3  ;;  %v11008_v31 = vadd.f32 %v18874_v10, %v9463_v7 }
 0x6c9   : > { %v9786_v33 = vadd.f32 %v17682_v22, %v9687_v28  ;;  %v9689_v23 = vmul.f32 %v11005_v4, %v17677_v36 }
 0x6ca   : > { %v9787_v46 = vadd.f32 %v17685_v42, %v9688_v15  ;;  %v9690_v16 = vmul.f32 %v11008_v31, %v17679_v3 }
 0x6cb   : > { %v9874_v17 = vmax.f32 %v9786_v33, 0.0  ;;  %v9788_v45 = vadd.f32 %v17682_v22, %v9689_v23  ;;  %v18885_v23 = vld [vmem:[#allocation74_spill] sm:$0xff] }
 0x6cc   : > { %v9875_v59 = vmax.f32 %v9787_v46, 0.0  ;;  %v9789_v29 = vadd.f32 %v17685_v42, %v9690_v16  ;;  %v9467_v37 = vpop.f32.mrb[232].mxu1 }
 0x6cd   : > { %v9876_v11 = vmax.f32 %v9788_v45, 0.0  ;;  %v11011_v28 = vadd.f32 %v18881_v47, %v9467_v37  ;;  %v9469_v44 = vpop.f32.mrb[233].mxu1  ;;  %v9962_v7 = vsel %vm5946_vm8, %v9874_v17, 0.0  ;;  %v18886_v45 = vld [vmem:[#allocation61_spill] sm:$0xff] }
 0x6ce   : > { %v9877_v1 = vmax.f32 %v9789_v29, 0.0  ;;  %v11014_v10 = vadd.f32 %v18883_v20, %v9469_v44  ;;  %v9471_v15 = vpop.f32.mrb[234].mxu1  ;;  %v9963_v31 = vsel %vm5946_vm8, %v9875_v59, 0.0 }
 0x6cf   : > { %v9964_v30 = vsel %vm5947_vm4, %v9876_v11, 0.0  ;;  %v9691_v33 = vmul.f32 %v11011_v28, %v17677_v36  ;;  %v11017_v55 = vadd.f32 %v18885_v23, %v9471_v15  ;;  %v9473_v63 = vpop.f32.mrb[235].mxu1 }
 0x6d0   : > { %v10050_v46 = vmax.f32 %v9962_v7, %v9964_v30  ;;  %v9965_v16 = vsel %vm5947_vm4, %v9877_v1, 0.0  ;;  %v9692_v17 = vmul.f32 %v11014_v10, %v17679_v3  ;;  %v11020_v29 = vadd.f32 %v18886_v45, %v9473_v63 }
 0x6d1   : > { %v10066_v37 = vmax.f32 %v9963_v31, %v9965_v16  ;;  %v9790_v47 = vadd.f32 %v17682_v22, %v9691_v33  ;;  %v9693_v59 = vmul.f32 %v11017_v55, %v17677_v36  ;;  %v18888_v31 = vld [vmem:[#allocation140_spill] sm:$0xff]  ;;  %v18889_v16 = vld [vmem:[#allocation141_spill] sm:$0xff] }
 0x6d2   : > { %v9791_v11 = vadd.f32 %v17685_v42, %v9692_v17  ;;  %v9694_v28 = vmul.f32 %v11020_v29, %v17679_v3 }
 0x6d3   : > { %v9878_v44 = vmax.f32 %v9790_v47, 0.0  ;;  %v9792_v4 = vadd.f32 %v17682_v22, %v9693_v59 }
 0x6d4   : > { %v9879_v7 = vmax.f32 %v9791_v11, 0.0  ;;  %v9793_v20 = vadd.f32 %v17685_v42, %v9694_v28  ;;  %v9477_v1 = vpop.f32.mrb[236].mxu1  ;;  %v18891_v28 = vld [vmem:[#allocation142_spill] sm:$0xff] }
 0x6d5   : > { %v9966_v10 = vsel %vm5948_vm5, %v9878_v44, 0.0  ;;  %v9880_v56 = vmax.f32 %v9792_v4, 0.0  ;;  %v11023_v30 = vadd.f32 %v18888_v31, %v9477_v1  ;;  %v9479_v33 = vpop.f32.mrb[237].mxu1 }
 0x6d6   : > { %v10051_v23 = vmax.f32 %v10050_v46, %v9966_v10  ;;  %v9967_v55 = vsel %vm5948_vm5, %v9879_v7, 0.0  ;;  %v9881_v63 = vmax.f32 %v9793_v20, 0.0  ;;  %v11026_v17 = vadd.f32 %v18889_v16, %v9479_v33  ;;  %v9481_v45 = vpop.f32.mrb[238].mxu1  ;;  %v18892_v7 = vld [vmem:[#allocation78_spill] sm:$0xff]  ;;  %v18894_v33 = vld [vmem:[#allocation85_spill] sm:$0xff] }
 0x6d7   : > { %v10067_v29 = vmax.f32 %v10066_v37, %v9967_v55  ;;  %v9968_v59 = vsel %vm5949_vm7, %v9880_v56, 0.0  ;;  %v9695_v11 = vmul.f32 %v11023_v30, %v17677_v36  ;;  %v11029_v44 = vadd.f32 %v18891_v28, %v9481_v45  ;;  %v9483_v4 = vpop.f32.mrb[239].mxu1  ;;  %v18893_v30 = vld [vmem:[#allocation65_spill] sm:$0xff] }
 0x6d8   : > { %v10052_v40 = vmax.f32 %v10051_v23, %v9968_v59  ;;  %v9969_v46 = vsel %vm5949_vm7, %v9881_v63, 0.0  ;;  %v9696_v1 = vmul.f32 %v11026_v17, %v17679_v3  ;;  %v11032_v20 = vadd.f32 %v18892_v7, %v9483_v4  ;;  %v18898_v7 = vld [vmem:[#allocation79_spill] sm:$0xff] }
 0x6d9   : > { %v10068_v15 = vmax.f32 %v10067_v29, %v9969_v46  ;;  %v9794_v10 = vadd.f32 %v17682_v22, %v9695_v11  ;;  %v9697_v37 = vmul.f32 %v11029_v44, %v17677_v36  ;;  %v17753_v55 = vadd.f32 %v18894_v33, %v18893_v30  ;;  %v18897_v11 = vld [vmem:[#allocation63_spill] sm:$0xff]  ;;  %v18901_v33 = vld [vmem:[#allocation110_spill] sm:$0xff] }
 0x6da   : > { %v9795_v56 = vadd.f32 %v17685_v42, %v9696_v1  ;;  %v9698_v31 = vmul.f32 %v11032_v20, %v17679_v3 }
 0x6db   : > { %18895 = vst [vmem:[#allocation128_spill] sm:$0xff] %v17753_v55  ;;  %v9882_v23 = vmax.f32 %v9794_v10, 0.0  ;;  %v9796_v63 = vadd.f32 %v17682_v22, %v9697_v37 }
 0x6dc   : > { %v9883_v16 = vmax.f32 %v9795_v56, 0.0  ;;  %v9797_v17 = vadd.f32 %v17685_v42, %v9698_v31  ;;  %v9487_v45 = vpop.f32.mrb[240].mxu1  ;;  %v18899_v56 = vld [vmem:[#allocation25_spill] sm:$0xff] }
 0x6dd   : > { %v9970_v47 = vsel %vm5950_vm1, %v9882_v23, 0.0  ;;  %v9884_v59 = vmax.f32 %v9796_v63, 0.0  ;;  %v11035_v28 = vadd.f32 %v18897_v11, %v9487_v45  ;;  %v9489_v44 = vpop.f32.mrb[241].mxu1  ;;  %vm18900_vm0 = vcmp.eq.s32.totalorder %v18899_v56, 1  ;;  %v18911_v56 = vld [vmem:[#allocation89_spill] sm:$0xff] }
 0x6de   : > { %v10053_v4 = vmax.f32 %v10052_v40, %v9970_v47  ;;  %v9971_v46 = vsel %vm5950_vm1, %v9883_v16, 0.0  ;;  %v9885_v1 = vmax.f32 %v9797_v17, 0.0  ;;  %v11038_v20 = vadd.f32 %v18898_v7, %v9489_v44  ;;  %v9491_v10 = vpop.f32.mrb[242].mxu1  ;;  %vm18902_vm6 = vmmov %vm18900_vm0  ;;  %v18903_v16 = vld [vmem:[#allocation80_spill] sm:$0xff] }
 0x6df   : > { %v10069_v37 = vmax.f32 %v10068_v15, %v9971_v46  ;;  %v9972_v31 = vsel %vm18900_vm0, %v9884_v59, 0.0  ;;  %v9699_v30 = vmul.f32 %v11035_v28, %v17677_v36  ;;  %v11041_v23 = vadd.f32 %v18901_v33, %v9491_v10  ;;  %v9493_v63 = vpop.f32.mrb[243].mxu1  ;;  %v18904_v28 = vld [vmem:[#allocation87_spill] sm:$0xff]  ;;  %v18905_v44 = vld [vmem:[#allocation116_spill] sm:$0xff] }
 0x6e0   : > { %v10054_v55 = vmax.f32 %v10053_v4, %v9972_v31  ;;  %v9973_v40 = vsel %vm18902_vm6, %v9885_v1, 0.0  ;;  %v9700_v45 = vmul.f32 %v11038_v20, %v17679_v3  ;;  %v11044_v17 = vadd.f32 %v18903_v16, %v9493_v63  ;;  %v18907_v7 = vld [vmem:[#allocation88_spill] sm:$0xff]  ;;  %v18908_v20 = vld [vmem:[#allocation86_spill] sm:$0xff]  ;;  %v18916_v16 = vld [vmem:[#allocation143_spill] sm:$0xff] }
 0x6e1   : > { %v10070_v29 = vmax.f32 %v10069_v37, %v9973_v40  ;;  %v9798_v47 = vadd.f32 %v17682_v22, %v9699_v30  ;;  %v9701_v15 = vmul.f32 %v11041_v23, %v17677_v36  ;;  %v17777_v46 = vadd.f32 %v18905_v44, %v18904_v28  ;;  %v18910_v37 = vld [vmem:[#allocation90_spill] sm:$0xff]  ;;  %v18913_v63 = vld [vmem:[#allocation92_spill] sm:$0xff] }
 0x6e2   : > { %v9799_v59 = vadd.f32 %v17685_v42, %v9700_v45  ;;  %v9702_v11 = vmul.f32 %v11044_v17, %v17679_v3  ;;  %v17782_v10 = vadd.f32 %v18908_v20, %v18907_v7  ;;  %v17786_v31 = vadd.f32 %v18911_v56, %v18910_v37  ;;  %v18914_v40 = vld [vmem:[#allocation68_spill] sm:$0xff]  ;;  %v18917_v17 = vld [vmem:[#allocation91_spill] sm:$0xff] }
 0x6e3   : > { %18906 = vst [vmem:[#allocation49_spill] sm:$0xff] %v17777_v46  ;;  %v9886_v4 = vmax.f32 %v9798_v47, 0.0  ;;  %v9800_v1 = vadd.f32 %v17682_v22, %v9701_v15  ;;  %v17791_v45 = vadd.f32 %v18914_v40, %v18913_v63  ;;  %v17795_v47 = vadd.f32 %v18917_v17, %v18916_v16  ;;  %v18919_v15 = vld [vmem:[#allocation30_spill] sm:$0xff]  ;;  %v18921_v7 = vld [vmem:[#allocation111_spill] sm:$0xff]  ;;  %v18922_v56 = vld [vmem:[#allocation72_spill] sm:$0xff] }
 0x6e4   : > { %18909 = vst [vmem:[#allocation129_spill] sm:$0xff] %v17782_v10  ;;  %18912 = vst [vmem:[#allocation50_spill] sm:$0xff] %v17786_v31  ;;  %v9887_v30 = vmax.f32 %v9799_v59, 0.0  ;;  %v9801_v33 = vadd.f32 %v17685_v42, %v9702_v11  ;;  %v9497_v23 = vpop.f32.mrb[244].mxu1  ;;  %vm18920_vm9 = vcmp.eq.s32.totalorder %v18919_v15, 1  ;;  %v18923_v59 = vld [vmem:[#allocation93_spill] sm:$0xff] }
 0x6e5   : > { %18915 = vst [vmem:[#allocation130_spill] sm:$0xff] %v17791_v45  ;;  %18918 = vst [vmem:[#allocation51_spill] sm:$0xff] %v17795_v47  ;;  %v9974_v28 = vsel %vm18920_vm9, %v9886_v4, 0.0  ;;  %v9888_v44 = vmax.f32 %v9800_v1, 0.0  ;;  %v11047_v20 = vadd.f32 %v18921_v7, %v9497_v23  ;;  %v9499_v37 = vpop.f32.mrb[245].mxu1  ;;  %v17802_v31 = vadd.f32 %v18923_v59, %v18922_v56  ;;  %v18926_v45 = vld [vmem:[#allocation81_spill] sm:$0xff] }
 0x6e6   : > { %v10055_v11 = vmax.f32 %v10054_v55, %v9974_v28  ;;  %vm18925_vm10 = vmmov %vm18920_vm9  ;;  %v9889_v40 = vmax.f32 %v9801_v33, 0.0  ;;  %v11050_v10 = vadd.f32 %v18926_v45, %v9499_v37  ;;  %v9501_v16 = vpop.f32.mrb[246].mxu1  ;;  %v18927_v47 = vld [vmem:[#allocation8_spill] sm:$0xff] }
 0x6e7   : > { %18924 = vst [vmem:[#allocation131_spill] sm:$0xff] %v17802_v31  ;;  %v9975_v63 = vsel %vm18925_vm10, %v9887_v30, 0.0  ;;  %vm18928_vm11 = vcmp.eq.s32.totalorder %v18927_v47, 1  ;;  %v9703_v1 = vmul.f32 %v11047_v20, %v17677_v36  ;;  %v18929_v23 = vld [vmem:[#allocation112_spill] sm:$0xff]  ;;  %v9503_v46 = vpop.f32.mrb[247].mxu1  ;;  %v18931_v30 = vld [vmem:[#allocation82_spill] sm:$0xff] }
 0x6e8   : > { %v10071_v17 = vmax.f32 %v10070_v29, %v9975_v63  ;;  %v9976_v4 = vsel %vm18928_vm11, %v9888_v44, 0.0  ;;  %v11053_v7 = vadd.f32 %v18929_v23, %v9501_v16  ;;  %vm18930_vm12 = vmmov %vm18928_vm11  ;;  %v9704_v15 = vmul.f32 %v11050_v10, %v17679_v3  ;;  %v18932_v63 = vld [vmem:[#allocation4_spill] sm:$0xff] }
 0x6e9   : > { %v10056_v48 = vmax.f32 %v10055_v11, %v9976_v4  ;;  %v9977_v55 = vsel %vm18930_vm12, %v9889_v40, 0.0  ;;  %v11056_v33 = vadd.f32 %v18931_v30, %v9503_v46  ;;  %v9802_v45 = vadd.f32 %v17682_v22, %v9703_v1  ;;  %v18934_v40 = vld [vmem:[#allocation114_spill] sm:$0xff] }
 0x6ea   : > { %v10072_v28 = vmax.f32 %v10071_v17, %v9977_v55  ;;  %v9705_v29 = vmul.f32 %v11053_v7, %v17677_v36  ;;  %v9803_v44 = vadd.f32 %v17685_v42, %v9704_v15  ;;  %vm18933_vm13 = vcmp.eq.s32.totalorder %v18932_v63, 1  ;;  %v18936_v7 = vld [vmem:[#allocation120_spill] sm:$0xff] }
 0x6eb   : > { %v9706_v20 = vmul.f32 %v11056_v33, %v17679_v3  ;;  %v9890_v37 = vmax.f32 %v9802_v45, 0.0  ;;  %vm18935_vm14 = vmmov %vm18933_vm13  ;;  %v18937_v33 = vld [vmem:[#allocation11_spill] sm:$0xff] }
 0x6ec   : > { %v9804_v56 = vadd.f32 %v17682_v22, %v9705_v29  ;;  %v9891_v59 = vmax.f32 %v9803_v44, 0.0  ;;  %v9507_v11 = vpop.f32.mrb[248].mxu1  ;;  %vm18938_vm8 = vcmp.eq.s32.totalorder %v18937_v33, 1  ;;  %v18939_v44 = vld [vmem:[#allocation118_spill] sm:$0xff] }
 0x6ed   : > { %v9805_v47 = vadd.f32 %v17685_v42, %v9706_v20  ;;  %v9978_v10 = vsel %vm18933_vm13, %v9890_v37, 0.0  ;;  %v11059_v16 = vadd.f32 %v18934_v40, %v9507_v11  ;;  %v9509_v17 = vpop.f32.mrb[249].mxu1  ;;  %vm18940_vm4 = vmmov %vm18938_vm8 }
 0x6ee   : > { %v9892_v46 = vmax.f32 %v9804_v56, 0.0  ;;  %v10057_v4 = vmax.f32 %v10056_v48, %v9978_v10  ;;  %v9979_v1 = vsel %vm18935_vm14, %v9891_v59, 0.0  ;;  %v11062_v55 = vadd.f32 %v18936_v7, %v9509_v17  ;;  %v9511_v15 = vpop.f32.mrb[250].mxu1  ;;  %v18941_v59 = vld [vmem:[#allocation122_spill] sm:$0xff] }
 0x6ef   : > { %v9893_v23 = vmax.f32 %v9805_v47, 0.0  ;;  %v10073_v30 = vmax.f32 %v10072_v28, %v9979_v1  ;;  %v9707_v29 = vmul.f32 %v11059_v16, %v17677_v36  ;;  %v11065_v20 = vadd.f32 %v18939_v44, %v9511_v15  ;;  %v9513_v37 = vpop.f32.mrb[251].mxu1  ;;  %v18942_v7 = vld [vmem:[#allocation14_spill] sm:$0xff] }
 0x6f0   : > { %v9980_v45 = vsel %vm18938_vm8, %v9892_v46, 0.0  ;;  %v9708_v11 = vmul.f32 %v11062_v55, %v17679_v3  ;;  %v11068_v47 = vadd.f32 %v18941_v59, %v9513_v37  ;;  %vm18943_vm5 = vcmp.eq.s32.totalorder %v18942_v7, 1 }
 0x6f1   : > { %v10058_v56 = vmax.f32 %v10057_v4, %v9980_v45  ;;  %v9981_v48 = vsel %vm18940_vm4, %v9893_v23, 0.0  ;;  %v9806_v10 = vadd.f32 %v17682_v22, %v9707_v29  ;;  %v9709_v28 = vmul.f32 %v11065_v20, %v17677_v36  ;;  %vm18944_vm7 = vmmov %vm18943_vm5  ;;  %v18945_v29 = vld [vmem:[#allocation119_spill] sm:$0xff] }
 0x6f2   : > { %v10074_v63 = vmax.f32 %v10073_v30, %v9981_v48  ;;  %v9807_v46 = vadd.f32 %v17685_v42, %v9708_v11  ;;  %v9710_v40 = vmul.f32 %v11068_v47, %v17679_v3 }
 0x6f3   : > { %v9894_v16 = vmax.f32 %v9806_v10, 0.0  ;;  %v9808_v17 = vadd.f32 %v17682_v22, %v9709_v28 }
 0x6f4   : > { %v9895_v4 = vmax.f32 %v9807_v46, 0.0  ;;  %v9809_v1 = vadd.f32 %v17685_v42, %v9710_v40  ;;  %v9517_v23 = vpop.f32.mrb[252].mxu1 }
 0x6f5   : > { %v9982_v55 = vsel %vm18943_vm5, %v9894_v16, 0.0  ;;  %v11071_v15 = vadd.f32 %v17520_v49, %v9517_v23  ;;  %v9519_v30 = vpop.f32.mrb[253].mxu1  ;;  %v9896_v48 = vmax.f32 %v9808_v17, 0.0  ;;  %v18946_v49 = vld [vmem:[#allocation123_spill] sm:$0xff] }
 0x6f6   : > { %v10059_v33 = vmax.f32 %v10058_v56, %v9982_v55  ;;  %v9983_v45 = vsel %vm18944_vm7, %v9895_v4, 0.0  ;;  %v11074_v44 = vadd.f32 %v18945_v29, %v9519_v30  ;;  %v9521_v20 = vpop.f32.mrb[254].mxu1  ;;  %v9897_v28 = vmax.f32 %v9809_v1, 0.0  ;;  %v18947_v55 = vld [vmem:[#allocation19_spill] sm:$0xff] }
 0x6f7   : > { %v10075_v37 = vmax.f32 %v10074_v63, %v9983_v45  ;;  %v9711_v11 = vmul.f32 %v11071_v15, %v17677_v36  ;;  %v11077_v59 = vadd.f32 %v17528_v5, %v9521_v20  ;;  %v9523_v47 = vpop.f32.mrb[255].mxu1  ;;  %vm18948_vm1 = vcmp.eq.s32.totalorder %v18947_v55, 1 }
 0x6f8   : > { %v10060_v10 = vrot.slane %v10059_v33, 4  ;;  %v9712_v46 = vmul.f32 %v11074_v44, %v17679_v3  ;;  %v11080_v40 = vadd.f32 %v18946_v49, %v9523_v47  ;;  %v9984_v5 = vsel %vm18948_vm1, %v9896_v48, 0.0  ;;  %vm18949_vm0 = vmmov %vm18948_vm1 }
 0x6f9   : > { %v10076_v56 = vrot.slane %v10075_v37, 4  ;;  %v9810_v16 = vadd.f32 %v17682_v22, %v9711_v11  ;;  %v9713_v4 = vmul.f32 %v11077_v59, %v17677_v36  ;;  %v9985_v45 = vsel %vm18949_vm0, %v9897_v28, 0.0  ;;  %v18950_v11 = vld [vmem:[#allocation20_spill] sm:$0xff] }
 0x6fa   : > { %v10061_v23 = vmax.f32 %v10059_v33, %v10060_v10  ;;  %v9811_v63 = vadd.f32 %v17685_v42, %v9712_v46  ;;  %v9714_v17 = vmul.f32 %v11080_v40, %v17679_v3  ;;  %vm18951_vm6 = vcmp.eq.s32.totalorder %v18950_v11, 1 }
 0x6fb   : > { %v10077_v7 = vmax.f32 %v10075_v37, %v10076_v56  ;;  %v9898_v15 = vmax.f32 %v9810_v16, 0.0  ;;  %v9812_v1 = vadd.f32 %v17682_v22, %v9713_v4  ;;  %v18952_v37 = vld [vmem:[#allocation121_spill] sm:$0xff]  ;;  %vm18953_vm9 = vmmov %vm18951_vm6 }
 0x6fc   : > { %v10062_v30 = vrot.slane %v10061_v23, 2  ;;  %v9899_v29 = vmax.f32 %v9811_v63, 0.0  ;;  %v9813_v44 = vadd.f32 %v17685_v42, %v9714_v17  ;;  %v9527_v20 = vpop.f32.mrb[0].mxu1  ;;  %v18954_v63 = vld [vmem:[#allocation22_spill] sm:$0xff] }
 0x6fd   : > { %v10078_v33 = vrot.slane %v10077_v7, 2  ;;  %v9986_v59 = vsel %vm18951_vm6, %v9898_v15, 0.0  ;;  %v9900_v47 = vmax.f32 %v9812_v1, 0.0  ;;  %v11083_v10 = vadd.f32 %v18952_v37, %v9527_v20  ;;  %v9529_v46 = vpop.f32.mrb[1].mxu1 }
 0x6fe   : > { %v10063_v48 = vmax.f32 %v10061_v23, %v10062_v30  ;;  %v10082_v49 = vmax.f32 %v9984_v5, %v9986_v59  ;;  %v9987_v40 = vsel %vm18953_vm9, %v9899_v29, 0.0  ;;  %v9901_v56 = vmax.f32 %v9813_v44, 0.0  ;;  %v9531_v16 = vpop.f32.mrb[2].mxu1  ;;  %v18957_v23 = vld [vmem:[#allocation126_spill] sm:$0xff]  ;;  %v18958_v44 = vld [vmem:[#allocation124_spill] sm:$0xff] }
 0x6ff   : > { %v10079_v28 = vmax.f32 %v10077_v7, %v10078_v33  ;;  %v10098_v4 = vmax.f32 %v9985_v45, %v9987_v40  ;;  %vm18955_vm10 = vcmp.eq.s32.totalorder %v18954_v63, 1  ;;  %v9715_v55 = vmul.f32 %v11083_v10, %v17677_v36  ;;  %v9533_v31 = vpop.f32.mrb[3].mxu1 }
 0x700   : > { %v9988_v17 = vsel %vm18955_vm10, %v9900_v47, 0.0  ;;  %v10064_v15 = vrot.slane %v10063_v48, 1  ;;  %vm18956_vm11 = vmmov %vm18955_vm10  ;;  %v11086_v5 = vadd.f32 %v18957_v23, %v9529_v46  ;;  %v11089_v7 = vadd.f32 %v18958_v44, %v9531_v16  ;;  %v18959_v16 = vld [vmem:[#allocation32_spill] sm:$0xff] }
 0x701   : > { %v10083_v1 = vmax.f32 %v10082_v49, %v9988_v17  ;;  %v9989_v20 = vsel %vm18956_vm11, %v9901_v56, 0.0  ;;  %v10080_v30 = vrot.slane %v10079_v28, 1  ;;  %v9814_v29 = vadd.f32 %v17682_v22, %v9715_v55 }
 0x702   : > { %v10099_v11 = vmax.f32 %v10098_v4, %v9989_v20  ;;  %v17874_v45 = vmax.f32 %v10063_v48, %v10064_v15  ;;  %v9716_v33 = vmul.f32 %v11086_v5, %v17679_v3  ;;  %v11092_v59 = vadd.f32 %v17550_v24, %v9533_v31 }
 0x703   : > { %v17878_v47 = vmax.f32 %v10079_v28, %v10080_v30  ;;  %v9902_v37 = vmax.f32 %v9814_v29, 0.0  ;;  %v9717_v10 = vmul.f32 %v11089_v7, %v17677_v36  ;;  %vm18960_vm12 = vcmp.eq.s32.totalorder %v18959_v16, 1 }
 0x704   : > { %v9815_v49 = vadd.f32 %v17685_v42, %v9716_v33  ;;  %v9718_v46 = vmul.f32 %v11092_v59, %v17679_v3  ;;  %v9537_v40 = vpop.f32.mrb[4].mxu1  ;;  %vm18961_vm13 = vmmov %vm18960_vm12  ;;  %v18962_v33 = vld [vmem:[#allocation33_spill] sm:$0xff] }
 0x705   : > { %v10186_v56 = vcombine.low %v17874_v45, %v17878_v47  ;;  %v9990_v48 = vsel %vm18960_vm12, %v9902_v37, 0.0  ;;  %v9816_v4 = vadd.f32 %v17682_v22, %v9717_v10  ;;  %v11095_v24 = vadd.f32 %v17554_v53, %v9537_v40  ;;  %v9539_v31 = vpop.f32.mrb[5].mxu1 }
 0x706   : > { %v10084_v28 = vmax.f32 %v10083_v1, %v9990_v48  ;;  %v9903_v63 = vmax.f32 %v9815_v49, 0.0  ;;  %v9817_v17 = vadd.f32 %v17685_v42, %v9718_v46  ;;  %v11098_v55 = vadd.f32 %v17558_v18, %v9539_v31  ;;  %v9541_v15 = vpop.f32.mrb[6].mxu1 }
 0x707   : > { %v9904_v20 = vmax.f32 %v9816_v4, 0.0  ;;  %v9719_v23 = vmul.f32 %v11095_v24, %v17677_v36  ;;  %v11101_v5 = vadd.f32 %v17562_v51, %v9541_v15  ;;  %v9543_v30 = vpop.f32.mrb[7].mxu1  ;;  %vm18963_vm14 = vcmp.eq.s32.totalorder %v18962_v33, 1  ;;  %v18965_v24 = vld [vmem:[#allocation34_spill] sm:$0xff] }
 0x708   : > { %v9991_v29 = vsel %vm18961_vm13, %v9903_v63, 0.0  ;;  %v9905_v44 = vmax.f32 %v9817_v17, 0.0  ;;  %v9720_v53 = vmul.f32 %v11098_v55, %v17679_v3  ;;  %v11104_v1 = vadd.f32 %v17566_v38, %v9543_v30  ;;  %vm18964_vm8 = vmmov %vm18963_vm14 }
 0x709   : > { %v10100_v7 = vmax.f32 %v10099_v11, %v9991_v29  ;;  %v9992_v59 = vsel %vm18963_vm14, %v9904_v20, 0.0  ;;  %v9818_v18 = vadd.f32 %v17682_v22, %v9719_v23  ;;  %v9721_v37 = vmul.f32 %v11101_v5, %v17677_v36  ;;  %v18968_v29 = vld [vmem:[#allocation35_spill] sm:$0xff] }
 0x70a   : > { %v10085_v10 = vmax.f32 %v10084_v28, %v9992_v59  ;;  %v9993_v51 = vsel %vm18964_vm8, %v9905_v44, 0.0  ;;  %v9819_v49 = vadd.f32 %v17685_v42, %v9720_v53  ;;  %v9722_v46 = vmul.f32 %v11104_v1, %v17679_v3 }
 0x70b   : > { %v10101_v40 = vmax.f32 %v10100_v7, %v9993_v51  ;;  %v9906_v16 = vmax.f32 %v9818_v18, 0.0  ;;  %v9820_v38 = vadd.f32 %v17682_v22, %v9721_v37  ;;  %vm18966_vm4 = vcmp.eq.s32.totalorder %v18965_v24, 1 }
 0x70c   : > { %v9907_v11 = vmax.f32 %v9819_v49, 0.0  ;;  %v9821_v48 = vadd.f32 %v17685_v42, %v9722_v46  ;;  %v9547_v4 = vpop.f32.mrb[8].mxu1  ;;  %vm18967_vm5 = vmmov %vm18966_vm4  ;;  %vm18969_vm7 = vcmp.eq.s32.totalorder %v18968_v29, 1 }
 0x70d   : > { %v9994_v31 = vsel %vm18966_vm4, %v9906_v16, 0.0  ;;  %v9908_v63 = vmax.f32 %v9820_v38, 0.0  ;;  %v11107_v28 = vadd.f32 %v17571_v14, %v9547_v4  ;;  %v9549_v17 = vpop.f32.mrb[9].mxu1  ;;  %vm18970_vm1 = vmmov %vm18969_vm7 }
 0x70e   : > { %v10086_v55 = vmax.f32 %v10085_v10, %v9994_v31  ;;  %v9995_v15 = vsel %vm18967_vm5, %v9907_v11, 0.0  ;;  %v9909_v20 = vmax.f32 %v9821_v48, 0.0  ;;  %v11110_v23 = vadd.f32 %v17576_v8, %v9549_v17  ;;  %v9551_v5 = vpop.f32.mrb[10].mxu1  ;;  %v18971_v11 = vld [vmem:[#allocation36_spill] sm:$0xff] }
 0x70f   : > { %v10102_v30 = vmax.f32 %v10101_v40, %v9995_v15  ;;  %v9996_v44 = vsel %vm18969_vm7, %v9908_v63, 0.0  ;;  %v9723_v53 = vmul.f32 %v11107_v28, %v17677_v36  ;;  %v11113_v1 = vadd.f32 %v17580_v13, %v9551_v5  ;;  %v9553_v7 = vpop.f32.mrb[11].mxu1 }
 0x710   : > { %v10087_v33 = vmax.f32 %v10086_v55, %v9996_v44  ;;  %v9997_v14 = vsel %vm18970_vm1, %v9909_v20, 0.0  ;;  %v9724_v59 = vmul.f32 %v11110_v23, %v17679_v3  ;;  %v11116_v18 = vadd.f32 %v17584_v52, %v9553_v7  ;;  %v18974_v20 = vld [vmem:[#allocation37_spill] sm:$0xff] }
 0x711   : > { %v10103_v37 = vmax.f32 %v10102_v30, %v9997_v14  ;;  %v9822_v8 = vadd.f32 %v17682_v22, %v9723_v53  ;;  %v9725_v10 = vmul.f32 %v11113_v1, %v17677_v36  ;;  %vm18972_vm0 = vcmp.eq.s32.totalorder %v18971_v11, 1 }
 0x712   : > { %v9823_v51 = vadd.f32 %v17685_v42, %v9724_v59  ;;  %v9726_v49 = vmul.f32 %v11116_v18, %v17679_v3  ;;  %vm18973_vm6 = vmmov %vm18972_vm0  ;;  %vm18975_vm9 = vcmp.eq.s32.totalorder %v18974_v20, 1  ;;  %vm10191_vm1 = vcmask 1041409  }
 0x713   : > { %v9910_v46 = vmax.f32 %v9822_v8, 0.0  ;;  %v9824_v13 = vadd.f32 %v17682_v22, %v9725_v10  ;;  %vm18976_vm10 = vmmov %vm18975_vm9 }
 0x714   : > { %v9911_v40 = vmax.f32 %v9823_v51, 0.0  ;;  %v9825_v16 = vadd.f32 %v17685_v42, %v9726_v49  ;;  %v9557_v38 = vpop.f32.mrb[12].mxu1  ;;  %v18977_v51 = vld [vmem:[#allocation38_spill] sm:$0xff] }
 0x715   : > { %v9998_v48 = vsel %vm18972_vm0, %v9910_v46, 0.0  ;;  %v9912_v52 = vmax.f32 %v9824_v13, 0.0  ;;  %v11119_v4 = vadd.f32 %v17589_v2, %v9557_v38  ;;  %v9559_v24 = vpop.f32.mrb[13].mxu1  ;;  %vm18978_vm11 = vcmp.eq.s32.totalorder %v18977_v51, 1 }
 0x716   : > { %v10088_v31 = vmax.f32 %v10087_v33, %v9998_v48  ;;  %v9999_v63 = vsel %vm18973_vm6, %v9911_v40, 0.0  ;;  %v9913_v28 = vmax.f32 %v9825_v16, 0.0  ;;  %v11122_v17 = vadd.f32 %v17593_v21, %v9559_v24  ;;  %v9561_v55 = vpop.f32.mrb[14].mxu1  ;;  %vm18979_vm12 = vmmov %vm18978_vm11 }
 0x717   : > { %v10104_v15 = vmax.f32 %v10103_v37, %v9999_v63  ;;  %v10000_v23 = vsel %vm18975_vm9, %v9912_v52, 0.0  ;;  %v9727_v5 = vmul.f32 %v11119_v4, %v17677_v36  ;;  %v11125_v30 = vadd.f32 %v17597_v6, %v9561_v55  ;;  %v9563_v29 = vpop.f32.mrb[15].mxu1  ;;  %v18980_v4 = vld [vmem:[#allocation39_spill] sm:$0xff] }
 0x718   : > { %v10089_v44 = vmax.f32 %v10088_v31, %v10000_v23  ;;  %v10001_v2 = vsel %vm18976_vm10, %v9913_v28, 0.0  ;;  %v9728_v53 = vmul.f32 %v11122_v17, %v17679_v3  ;;  %v11128_v1 = vadd.f32 %v17601_v50, %v9563_v29 }
 0x719   : > { %v10105_v7 = vmax.f32 %v10104_v15, %v10001_v2  ;;  %v9826_v21 = vadd.f32 %v17682_v22, %v9727_v5  ;;  %v9729_v33 = vmul.f32 %v11125_v30, %v17677_v36  ;;  %vm18981_vm13 = vcmp.eq.s32.totalorder %v18980_v4, 1 }
 0x71a   : > { %v9827_v14 = vadd.f32 %v17685_v42, %v9728_v53  ;;  %v9730_v59 = vmul.f32 %v11128_v1, %v17679_v3  ;;  %vm18982_vm14 = vmmov %vm18981_vm13  ;;  %vm10193_vm10 = vcmask 1045509  }
 0x71b   : > { %v9914_v18 = vmax.f32 %v9826_v21, 0.0  ;;  %v9828_v6 = vadd.f32 %v17682_v22, %v9729_v33  ;;  %v18983_v33 = vld [vmem:[#allocation40_spill] sm:$0xff] }
 0x71c   : > { %v9915_v37 = vmax.f32 %v9827_v14, 0.0  ;;  %v9829_v8 = vadd.f32 %v17685_v42, %v9730_v59  ;;  %v9567_v10 = vpop.f32.mrb[16].mxu1  ;;  %vm18984_vm8 = vcmp.eq.s32.totalorder %v18983_v33, 1 }
 0x71d   : > { %v10002_v49 = vsel %vm18978_vm11, %v9914_v18, 0.0  ;;  %v9916_v50 = vmax.f32 %v9828_v6, 0.0  ;;  %v11131_v46 = vadd.f32 %v17605_v9, %v9567_v10  ;;  %v9569_v13 = vpop.f32.mrb[17].mxu1  ;;  %vm18985_vm4 = vmmov %vm18984_vm8 }
 0x71e   : > { %v10090_v40 = vmax.f32 %v10089_v44, %v10002_v49  ;;  %v10003_v16 = vsel %vm18979_vm12, %v9915_v37, 0.0  ;;  %v9917_v38 = vmax.f32 %v9829_v8, 0.0  ;;  %v11134_v11 = vadd.f32 %v17609_v0, %v9569_v13  ;;  %v9571_v48 = vpop.f32.mrb[18].mxu1 }
 0x71f   : > { %v10106_v52 = vmax.f32 %v10105_v7, %v10003_v16  ;;  %v10004_v24 = vsel %vm18981_vm13, %v9916_v50, 0.0  ;;  %v9731_v31 = vmul.f32 %v11131_v46, %v17677_v36  ;;  %v11137_v63 = vadd.f32 %v17613_v19, %v9571_v48  ;;  %v9573_v28 = vpop.f32.mrb[19].mxu1  ;;  %v18986_v46 = vld [vmem:[#allocation41_spill] sm:$0xff] }
 0x720   : > { %v10091_v17 = vmax.f32 %v10090_v40, %v10004_v24  ;;  %v10005_v9 = vsel %vm18982_vm14, %v9917_v38, 0.0  ;;  %v9732_v55 = vmul.f32 %v11134_v11, %v17679_v3  ;;  %v11140_v15 = vadd.f32 %v17617_v12, %v9573_v28 }
 0x721   : > { %v10107_v20 = vmax.f32 %v10106_v52, %v10005_v9  ;;  %v9830_v0 = vadd.f32 %v17682_v22, %v9731_v31  ;;  %v9733_v23 = vmul.f32 %v11137_v63, %v17677_v36  ;;  %vm18987_vm5 = vcmp.eq.s32.totalorder %v18986_v46, 1 }
 0x722   : > { %v10092_v5 = vrot.slane %v10091_v17, 4  ;;  %v9831_v30 = vadd.f32 %v17685_v42, %v9732_v55  ;;  %v9734_v29 = vmul.f32 %v11140_v15, %v17679_v3  ;;  %vm18988_vm7 = vmmov %vm18987_vm5 }
 0x723   : > { %v10108_v19 = vrot.slane %v10107_v20, 4  ;;  %v9918_v44 = vmax.f32 %v9830_v0, 0.0  ;;  %v9832_v2 = vadd.f32 %v17682_v22, %v9733_v23 }
 0x724   : > { %v10093_v53 = vmax.f32 %v10091_v17, %v10092_v5  ;;  %v9919_v1 = vmax.f32 %v9831_v30, 0.0  ;;  %v9833_v7 = vadd.f32 %v17685_v42, %v9734_v29  ;;  %v9577_v21 = vpop.f32.mrb[20].mxu1  ;;  %v18989_v30 = vld [vmem:[#allocation42_spill] sm:$0xff] }
 0x725   : > { %v10109_v12 = vmax.f32 %v10107_v20, %v10108_v19  ;;  %v10006_v14 = vsel %vm18984_vm8, %v9918_v44, 0.0  ;;  %v9920_v59 = vmax.f32 %v9832_v2, 0.0  ;;  %v11143_v18 = vadd.f32 %v17621_v32, %v9577_v21  ;;  %v9579_v6 = vpop.f32.mrb[21].mxu1 }
 0x726   : > { %v10094_v37 = vrot.slane %v10093_v53, 2  ;;  %v10007_v8 = vsel %vm18985_vm4, %v9919_v1, 0.0  ;;  %v9921_v10 = vmax.f32 %v9833_v7, 0.0  ;;  %v11146_v51 = vadd.f32 %v17625_v26, %v9579_v6  ;;  %v9581_v49 = vpop.f32.mrb[22].mxu1 }
 0x727   : > { %v10110_v50 = vrot.slane %v10109_v12, 2  ;;  %v10008_v13 = vsel %vm18987_vm5, %v9920_v59, 0.0  ;;  %v9735_v40 = vmul.f32 %v11143_v18, %v17677_v36  ;;  %v11149_v16 = vadd.f32 %v17629_v62, %v9581_v49  ;;  %v9583_v38 = vpop.f32.mrb[23].mxu1 }
 0x728   : > { %v10095_v11 = vmax.f32 %v10093_v53, %v10094_v37  ;;  %v10114_v32 = vmax.f32 %v10006_v14, %v10008_v13  ;;  %v10009_v48 = vsel %vm18988_vm7, %v9921_v10, 0.0  ;;  %v9736_v52 = vmul.f32 %v11146_v51, %v17679_v3  ;;  %v18992_v14 = vld [vmem:[#allocation7_spill] sm:$0xff] }
 0x729   : > { %v10111_v4 = vmax.f32 %v10109_v12, %v10110_v50  ;;  %v10130_v24 = vmax.f32 %v10007_v8, %v10009_v48  ;;  %v9834_v26 = vadd.f32 %v17682_v22, %v9735_v40  ;;  %v9737_v31 = vmul.f32 %v11149_v16, %v17677_v36 }
 0x72a   : > { %v10096_v63 = vrot.slane %v10095_v11, 1  ;;  %v9835_v28 = vadd.f32 %v17685_v42, %v9736_v52  ;;  %v11152_v17 = vadd.f32 %v17633_v27, %v9583_v38  ;;  %vm18990_vm0 = vcmp.eq.s32.totalorder %v18989_v30, 1  ;;  %v18995_v52 = vld [vmem:[#allocation5_spill] sm:$0xff] }
 0x72b   : > { %v10112_v62 = vrot.slane %v10111_v4, 1  ;;  %v9922_v9 = vmax.f32 %v9834_v26, 0.0  ;;  %v9836_v55 = vadd.f32 %v17682_v22, %v9737_v31  ;;  %vm18991_vm6 = vmmov %vm18990_vm0  ;;  %vm18993_vm9 = vcmp.eq.s32.totalorder %v18992_v14, 1 }
 0x72c   : > { %v10097_v15 = vmax.f32 %v10095_v11, %v10096_v63  ;;  %v9923_v20 = vmax.f32 %v9835_v28, 0.0  ;;  %v9738_v0 = vmul.f32 %v11152_v17, %v17679_v3  ;;  %vm18994_vm11 = vmmov %vm18993_vm9  ;;  %vm18996_vm12 = vcmp.eq.s32.totalorder %v18995_v52, 1 }
 0x72d   : > { %v9587_v23 = vpop.f32.mrb[24].mxu1  ;;  %v10113_v5 = vmax.f32 %v10111_v4, %v10112_v62  ;;  %v10010_v29 = vsel %vm18990_vm0, %v9922_v9, 0.0  ;;  %v9924_v19 = vmax.f32 %v9836_v55, 0.0  ;;  %vm18997_vm13 = vmmov %vm18996_vm12 }
 0x72e   : > { %v11155_v44 = vadd.f32 %v17637_v41, %v9587_v23  ;;  %v9589_v2 = vpop.f32.mrb[25].mxu1  ;;  %v10115_v53 = vmax.f32 %v10114_v32, %v10010_v29  ;;  %v10011_v27 = vsel %vm18991_vm6, %v9923_v20, 0.0  ;;  %v9837_v1 = vadd.f32 %v17685_v42, %v9738_v0  ;;  %v18998_v20 = vld [vmem:[#allocation6_spill] sm:$0xff] }
 0x72f   : > { %v11158_v7 = vadd.f32 %v17641_v58, %v9589_v2  ;;  %v9591_v21 = vpop.f32.mrb[26].mxu1  ;;  %v10187_v12 = vcombine.low %v10097_v15, %v10113_v5  ;;  %v10131_v33 = vmax.f32 %v10130_v24, %v10011_v27  ;;  %v10012_v59 = vsel %vm18993_vm9, %v9924_v19, 0.0 }
 0x730   : > { %v9739_v18 = vmul.f32 %v11155_v44, %v17677_v36  ;;  %v9593_v6 = vpop.f32.mrb[27].mxu1  ;;  %v10116_v37 = vmax.f32 %v10115_v53, %v10012_v59  ;;  %v9925_v41 = vmax.f32 %v9837_v1, 0.0  ;;  %v11161_v10 = vadd.f32 %v17645_v35, %v9591_v21 }
 0x731   : > { %v9740_v8 = vmul.f32 %v11158_v7, %v17679_v3  ;;  %v10190_v51 = vrot.slane %v10187_v12, 7  ;;  %v11164_v58 = vadd.f32 %v17649_v61, %v9593_v6  ;;  %vm18999_vm14 = vcmp.eq.s32.totalorder %v18998_v20, 1  ;;  %v19001_v7 = vld [vmem:[#allocation10_spill] sm:$0xff] }
 0x732   : > { %v9838_v49 = vadd.f32 %v17682_v22, %v9739_v18  ;;  %v10013_v50 = vsel %vm18994_vm11, %v9925_v41, 0.0  ;;  %v9741_v13 = vmul.f32 %v11161_v10, %v17677_v36  ;;  %vm19000_vm8 = vmmov %vm18999_vm14  ;;  %vm19002_vm4 = vcmp.eq.s32.totalorder %v19001_v7, 1  ;;  %v19004_v10 = vld [vmem:[#allocation13_spill] sm:$0xff] }
 0x733   : > { %v9839_v46 = vadd.f32 %v17685_v42, %v9740_v8  ;;  %v10192_v40 = vsel %vm10191_vm1, %v10190_v51, %v10186_v56  ;;  %v10132_v16 = vmax.f32 %v10131_v33, %v10013_v50  ;;  %v9742_v38 = vmul.f32 %v11164_v58, %v17679_v3  ;;  %vm19003_vm5 = vmmov %vm19002_vm4 }
 0x734   : > { %v9926_v35 = vmax.f32 %v9838_v49, 0.0  ;;  %v18009_v11 = vsel %vm10193_vm10, %v10190_v51, %v10192_v40  ;;  %v9840_v61 = vadd.f32 %v17682_v22, %v9741_v13  ;;  %vm19005_vm7 = vcmp.eq.s32.totalorder %v19004_v10, 1  ;;  %v19007_v40 = vld [vmem:[#allocation127_spill] sm:$0xff] }
 0x735   : > { %v9927_v32 = vmax.f32 %v9839_v46, 0.0  ;;  %v9597_v48 = vpop.f32.mrb[28].mxu1  ;;  %v9841_v24 = vadd.f32 %v17685_v42, %v9742_v38  ;;  %vm19006_vm1 = vmmov %vm19005_vm7 }
 0x736   : > { %v10014_v4 = vsel %vm18996_vm12, %v9926_v35, 0.0  ;;  %v11167_v26 = vadd.f32 %v17653_v34, %v9597_v48  ;;  %v9599_v45 = vpop.f32.mrb[29].mxu1  ;;  %v9928_v31 = vmax.f32 %v9840_v61, 0.0 }
 0x737   : > { %v10117_v47 = vmax.f32 %v10116_v37, %v10014_v4  ;;  %v10015_v56 = vsel %vm18997_vm13, %v9927_v32, 0.0  ;;  %v11170_v63 = vadd.f32 %v17657_v39, %v9599_v45  ;;  %v9601_v28 = vpop.f32.mrb[30].mxu1  ;;  %v9929_v62 = vmax.f32 %v9841_v24, 0.0 }
 0x738   : > { %v10133_v17 = vmax.f32 %v10132_v16, %v10015_v56  ;;  %v9743_v9 = vmul.f32 %v11167_v26, %v17677_v36  ;;  %v11173_v55 = vadd.f32 %v17661_v54, %v9601_v28  ;;  %v9603_v15 = vpop.f32.mrb[31].mxu1  ;;  %v10016_v0 = vsel %vm18999_vm14, %v9928_v31, 0.0  ;;  %v19008_v26 = vld [vmem:[#allocation9_spill] sm:$0xff] }
 0x739   : > { %v9744_v34 = vmul.f32 %v11170_v63, %v17679_v3  ;;  %v11176_v23 = vadd.f32 %v17668_v43, %v9603_v15  ;;  %v10118_v5 = vmax.f32 %v10117_v47, %v10016_v0  ;;  %v10017_v30 = vsel %vm19000_vm8, %v9929_v62, 0.0  ;;  %v19010_v56 = vld [vmem:[#allocation125_spill] sm:$0xff]  ;;  %v19013_v0 = vld [vmem:[#allocation12_spill] sm:$0xff] }
 0x73a   : > { %v9842_v39 = vadd.f32 %v17682_v22, %v9743_v9  ;;  %v9745_v29 = vmul.f32 %v11173_v55, %v17677_v36  ;;  %v10134_v19 = vmax.f32 %v10133_v17, %v10017_v30  ;;  %vm19009_vm0 = vcmp.eq.s32.totalorder %v19008_v26, 1  ;;  %v19012_v9 = vld [vmem:[#allocation128_spill] sm:$0xff] }
 0x73b   : > { %v9843_v44 = vadd.f32 %v17685_v42, %v9744_v34  ;;  %v9746_v54 = vmul.f32 %v11176_v23, %v17679_v3  ;;  %vm19011_vm6 = vmmov %vm19009_vm0  ;;  %vm19014_vm9 = vcmp.eq.s32.totalorder %v19013_v0, 1  ;;  %v19028_v0 = vld [vmem:[#allocation16_spill] sm:$0xff] }
 0x73c   : > { %v9930_v2 = vmax.f32 %v9842_v39, 0.0  ;;  %v9844_v53 = vadd.f32 %v17682_v22, %v9745_v29  ;;  %vm19016_vm10 = vmmov %vm19014_vm9  ;;  %vm19029_vm8 = vcmp.eq.s32.totalorder %v19028_v0, 1  ;;  %v19044_v0 = vld [vmem:[#allocation101_spill] sm:$0xff] }
 0x73d   : > { %v9931_v27 = vmax.f32 %v9843_v44, 0.0  ;;  %v9845_v1 = vadd.f32 %v17685_v42, %v9746_v54  ;;  %v9607_v43 = vpop.f32.mrb[32].mxu1  ;;  %v19017_v54 = vld [vmem:[#allocation129_spill] sm:$0xff] }
 0x73e   : > { %v10018_v21 = vsel %vm19002_vm4, %v9930_v2, 0.0  ;;  %v9932_v12 = vmax.f32 %v9844_v53, 0.0  ;;  %v11179_v33 = vadd.f32 %v17672_v57, %v9607_v43  ;;  %v9609_v14 = vpop.f32.mrb[33].mxu1  ;;  %vm19031_vm4 = vmmov %vm19029_vm8 }
 0x73f   : > { %v10119_v59 = vmax.f32 %v10118_v5, %v10018_v21  ;;  %v10019_v18 = vsel %vm19003_vm5, %v9931_v27, 0.0  ;;  %v9933_v6 = vmax.f32 %v9845_v1, 0.0  ;;  %v11182_v37 = vadd.f32 %v17689_v60, %v9609_v14  ;;  %v9611_v41 = vpop.f32.mrb[34].mxu1  ;;  %v19015_v5 = vld [vmem:[#allocation49_spill] sm:$0xff] }
 0x740   : > { %v10135_v8 = vmax.f32 %v10134_v19, %v10019_v18  ;;  %v10020_v51 = vsel %vm19005_vm7, %v9932_v12, 0.0  ;;  %v9747_v49 = vmul.f32 %v11179_v33, %v17677_v36  ;;  %v11185_v58 = vadd.f32 %v17695_v25, %v9611_v41  ;;  %v9613_v50 = vpop.f32.mrb[35].mxu1  ;;  %v19018_v18 = vld [vmem:[#allocation18_spill] sm:$0xff] }
 0x741   : > { %v10120_v46 = vmax.f32 %v10119_v59, %v10020_v51  ;;  %v10021_v57 = vsel %vm19006_vm1, %v9933_v6, 0.0  ;;  %v9748_v13 = vmul.f32 %v11182_v37, %v17679_v3  ;;  %v11188_v16 = vadd.f32 %v19007_v40, %v9613_v50  ;;  %v19020_v37 = vld [vmem:[#allocation50_spill] sm:$0xff]  ;;  %v19023_v40 = vld [vmem:[#allocation51_spill] sm:$0xff] }
 0x742   : > { %v10136_v35 = vmax.f32 %v10135_v8, %v10021_v57  ;;  %v9846_v60 = vadd.f32 %v17682_v22, %v9747_v49  ;;  %v9749_v38 = vmul.f32 %v11185_v58, %v17677_v36  ;;  %vm19019_vm11 = vcmp.eq.s32.totalorder %v19018_v18, 1  ;;  %v19022_v49 = vld [vmem:[#allocation130_spill] sm:$0xff] }
 0x743   : > { %v9847_v32 = vadd.f32 %v17685_v42, %v9748_v13  ;;  %v9750_v61 = vmul.f32 %v11188_v16, %v17679_v3  ;;  %vm19021_vm12 = vmmov %vm19019_vm11  ;;  %vm10196_vm1 = vcmask 1042434  }
 0x744   : > { %v9934_v48 = vmax.f32 %v9846_v60, 0.0  ;;  %v9848_v25 = vadd.f32 %v17682_v22, %v9749_v38 }
 0x745   : > { %v9935_v52 = vmax.f32 %v9847_v32, 0.0  ;;  %v9849_v4 = vadd.f32 %v17685_v42, %v9750_v61  ;;  %v9617_v24 = vpop.f32.mrb[36].mxu1  ;;  %v19024_v61 = vld [vmem:[#allocation131_spill] sm:$0xff] }
 0x746   : > { %v10022_v45 = vsel %vm19009_vm0, %v9934_v48, 0.0  ;;  %v9936_v47 = vmax.f32 %v9848_v25, 0.0  ;;  %v11191_v31 = vadd.f32 %v19010_v56, %v9617_v24  ;;  %v9619_v63 = vpop.f32.mrb[37].mxu1  ;;  %v19025_v56 = vld [vmem:[#allocation23_spill] sm:$0xff]  ;;  %vm10198_vm0 = vcmask 1046534  }
 0x747   : > { %v10121_v28 = vmax.f32 %v10120_v46, %v10022_v45  ;;  %v10023_v17 = vsel %vm19011_vm6, %v9935_v52, 0.0  ;;  %v9937_v62 = vmax.f32 %v9849_v4, 0.0  ;;  %v11194_v55 = vadd.f32 %v19012_v9, %v9619_v63  ;;  %v9621_v15 = vpop.f32.mrb[38].mxu1 }
 0x748   : > { %v10137_v20 = vmax.f32 %v10136_v35, %v10023_v17  ;;  %v10024_v34 = vsel %vm19014_vm9, %v9936_v47, 0.0  ;;  %v9751_v23 = vmul.f32 %v11191_v31, %v17677_v36  ;;  %v11197_v30 = vadd.f32 %v19015_v5, %v9621_v15  ;;  %v9623_v39 = vpop.f32.mrb[39].mxu1  ;;  %v19030_v5 = vld [vmem:[#allocation94_spill] sm:$0xff] }
 0x749   : > { %v10122_v29 = vmax.f32 %v10121_v28, %v10024_v34  ;;  %v10025_v19 = vsel %vm19016_vm10, %v9937_v62, 0.0  ;;  %v9752_v44 = vmul.f32 %v11194_v55, %v17679_v3  ;;  %v11200_v2 = vadd.f32 %v19017_v54, %v9623_v39 }
 0x74a   : > { %v10138_v53 = vmax.f32 %v10137_v20, %v10025_v19  ;;  %v9850_v27 = vadd.f32 %v17682_v22, %v9751_v23  ;;  %v9753_v1 = vmul.f32 %v11197_v30, %v17677_v36  ;;  %vm19026_vm13 = vcmp.eq.s32.totalorder %v19025_v56, 1 }
 0x74b   : > { %v9851_v43 = vadd.f32 %v17685_v42, %v9752_v44  ;;  %v9754_v7 = vmul.f32 %v11200_v2, %v17679_v3  ;;  %vm19027_vm14 = vmmov %vm19026_vm13 }
 0x74c   : > { %v9938_v21 = vmax.f32 %v9850_v27, 0.0  ;;  %v9852_v12 = vadd.f32 %v17682_v22, %v9753_v1  ;;  %v19032_v1 = vld [vmem:[#allocation15_spill] sm:$0xff] }
 0x74d   : > { %v9939_v33 = vmax.f32 %v9851_v43, 0.0  ;;  %v9853_v14 = vadd.f32 %v17685_v42, %v9754_v7  ;;  %v9627_v59 = vpop.f32.mrb[40].mxu1  ;;  %vm19033_vm5 = vcmp.eq.s32.totalorder %v19032_v1, 1 }
 0x74e   : > { %v10026_v6 = vsel %vm19019_vm11, %v9938_v21, 0.0  ;;  %v11203_v41 = vadd.f32 %v19020_v37, %v9627_v59  ;;  %v9629_v8 = vpop.f32.mrb[41].mxu1  ;;  %v9940_v57 = vmax.f32 %v9852_v12, 0.0  ;;  %vm19034_vm7 = vmmov %vm19033_vm5  ;;  %v19035_v59 = vld [vmem:[#allocation95_spill] sm:$0xff] }
 0x74f   : > { %v10123_v10 = vmax.f32 %v10122_v29, %v10026_v6  ;;  %v10027_v51 = vsel %vm19021_vm12, %v9939_v33, 0.0  ;;  %v11206_v58 = vadd.f32 %v19022_v49, %v9629_v8  ;;  %v9631_v50 = vpop.f32.mrb[42].mxu1  ;;  %v9941_v38 = vmax.f32 %v9853_v14, 0.0  ;;  %v19036_v8 = vld [vmem:[#allocation96_spill] sm:$0xff] }
 0x750   : > { %v10139_v46 = vmax.f32 %v10138_v53, %v10027_v51  ;;  %v9755_v13 = vmul.f32 %v11203_v41, %v17677_v36  ;;  %v11209_v16 = vadd.f32 %v19023_v40, %v9631_v50  ;;  %v9633_v35 = vpop.f32.mrb[43].mxu1  ;;  %v10028_v31 = vsel %vm19026_vm13, %v9940_v57, 0.0 }
 0x751   : > { %v10124_v60 = vrot.slane %v10123_v10, 4  ;;  %v9756_v32 = vmul.f32 %v11206_v58, %v17679_v3  ;;  %v11212_v48 = vadd.f32 %v19024_v61, %v9633_v35  ;;  %v10029_v62 = vsel %vm19027_vm14, %v9941_v38, 0.0  ;;  %v19037_v58 = vld [vmem:[#allocation97_spill] sm:$0xff]  ;;  %v19038_v38 = vld [vmem:[#allocation43_spill] sm:$0xff] }
 0x752   : > { %v10140_v25 = vrot.slane %v10139_v46, 4  ;;  %v9854_v52 = vadd.f32 %v17682_v22, %v9755_v13  ;;  %v9757_v4 = vmul.f32 %v11209_v16, %v17677_v36  ;;  %vm19039_vm6 = vcmp.eq.s32.totalorder %v19038_v38, 1  ;;  %v19053_v38 = vld [vmem:[#allocation46_spill] sm:$0xff] }
 0x753   : > { %v10125_v24 = vmax.f32 %v10123_v10, %v10124_v60  ;;  %v9855_v26 = vadd.f32 %v17685_v42, %v9756_v32  ;;  %v9758_v45 = vmul.f32 %v11212_v48, %v17679_v3  ;;  %v19040_v48 = vld [vmem:[#allocation98_spill] sm:$0xff]  ;;  %vm19043_vm9 = vmmov %vm19039_vm6  ;;  %vm19054_vm12 = vcmp.eq.s32.totalorder %v19053_v38, 1 }
 0x754   : > { %v10141_v47 = vmax.f32 %v10139_v46, %v10140_v25  ;;  %v9942_v63 = vmax.f32 %v9854_v52, 0.0  ;;  %v9856_v28 = vadd.f32 %v17682_v22, %v9757_v4 }
 0x755   : > { %v10126_v17 = vrot.slane %v10125_v24, 2  ;;  %v9943_v9 = vmax.f32 %v9855_v26, 0.0  ;;  %v9857_v55 = vadd.f32 %v17685_v42, %v9758_v45  ;;  %v9637_v15 = vpop.f32.mrb[212].mxu1  ;;  %v19041_v45 = vld [vmem:[#allocation99_spill] sm:$0xff] }
 0x756   : > { %v10142_v20 = vrot.slane %v10141_v47, 2  ;;  %v10030_v34 = vsel %vm19029_vm8, %v9942_v63, 0.0  ;;  %v9944_v23 = vmax.f32 %v9856_v28, 0.0  ;;  %v11213_v30 = vadd.f32 %v9637_v15, %v19030_v5  ;;  %v9639_v39 = vpop.f32.mrb[213].mxu1 }
 0x757   : > { %v10127_v29 = vmax.f32 %v10125_v24, %v10126_v17  ;;  %v10146_v19 = vmax.f32 %v10028_v31, %v10030_v34  ;;  %v10031_v44 = vsel %vm19031_vm4, %v9943_v9, 0.0  ;;  %v9945_v54 = vmax.f32 %v9857_v55, 0.0  ;;  %v9641_v2 = vpop.f32.mrb[214].mxu1  ;;  %v19042_v17 = vld [vmem:[#allocation100_spill] sm:$0xff] }
 0x758   : > { %v10143_v53 = vmax.f32 %v10141_v47, %v10142_v20  ;;  %v10162_v27 = vmax.f32 %v10029_v62, %v10031_v44  ;;  %v10032_v43 = vsel %vm19033_vm5, %v9944_v23, 0.0  ;;  %v9759_v7 = vmul.f32 %v11213_v30, %v17677_v36  ;;  %v9643_v21 = vpop.f32.mrb[215].mxu1  ;;  %v19045_v30 = vld [vmem:[#allocation44_spill] sm:$0xff] }
 0x759   : > { %v10128_v12 = vrot.slane %v10127_v29, 1  ;;  %v10147_v33 = vmax.f32 %v10146_v19, %v10032_v43  ;;  %v10033_v14 = vsel %vm19034_vm7, %v9945_v54, 0.0  ;;  %v11214_v18 = vadd.f32 %v9639_v39, %v19035_v59  ;;  %v19049_v59 = vld [vmem:[#allocation102_spill] sm:$0xff] }
 0x75a   : > { %v10144_v6 = vrot.slane %v10143_v53, 1  ;;  %v10163_v37 = vmax.f32 %v10162_v27, %v10033_v14  ;;  %v9858_v41 = vadd.f32 %v17682_v22, %v9759_v7  ;;  %v11215_v10 = vadd.f32 %v9641_v2, %v19036_v8  ;;  %v19050_v8 = vld [vmem:[#allocation103_spill] sm:$0xff] }
 0x75b   : > { %v10129_v51 = vmax.f32 %v10127_v29, %v10128_v12  ;;  %v9760_v49 = vmul.f32 %v11214_v18, %v17679_v3  ;;  %v11216_v50 = vadd.f32 %v9643_v21, %v19037_v58  ;;  %vm19046_vm10 = vcmp.eq.s32.totalorder %v19045_v30, 1 }
 0x75c   : > { %v10145_v46 = vmax.f32 %v10143_v53, %v10144_v6  ;;  %v9946_v57 = vmax.f32 %v9858_v41, 0.0  ;;  %v9761_v13 = vmul.f32 %v11215_v10, %v17677_v36  ;;  %vm19047_vm11 = vmmov %vm19046_vm10 }
 0x75d   : > { %v9859_v40 = vadd.f32 %v17685_v42, %v9760_v49  ;;  %v9762_v16 = vmul.f32 %v11216_v50, %v17679_v3  ;;  %v9647_v35 = vpop.f32.mrb[216].mxu1 }
 0x75e   : > { %v10188_v60 = vcombine.low %v10129_v51, %v10145_v46  ;;  %v10034_v32 = vsel %vm19039_vm6, %v9946_v57, 0.0  ;;  %v9860_v61 = vadd.f32 %v17682_v22, %v9761_v13  ;;  %v11217_v25 = vadd.f32 %v9647_v35, %v19040_v48  ;;  %v9649_v52 = vpop.f32.mrb[217].mxu1  ;;  %v19052_v35 = vld [vmem:[#allocation105_spill] sm:$0xff] }
 0x75f   : > { %v10148_v4 = vmax.f32 %v10147_v33, %v10034_v32  ;;  %v9947_v24 = vmax.f32 %v9859_v40, 0.0  ;;  %v9861_v26 = vadd.f32 %v17685_v42, %v9762_v16  ;;  %v11218_v47 = vadd.f32 %v9649_v52, %v19041_v45  ;;  %v9651_v56 = vpop.f32.mrb[218].mxu1  ;;  %v19051_v40 = vld [vmem:[#allocation104_spill] sm:$0xff] }
 0x760   : > { %v10195_v31 = vrot.slane %v10188_v60, 6  ;;  %v9948_v63 = vmax.f32 %v9860_v61, 0.0  ;;  %v9763_v28 = vmul.f32 %v11217_v25, %v17677_v36  ;;  %v11219_v62 = vadd.f32 %v9651_v56, %v19042_v17  ;;  %v9653_v9 = vpop.f32.mrb[219].mxu1 }
 0x761   : > { %v10035_v55 = vsel %vm19043_vm9, %v9947_v24, 0.0  ;;  %v9949_v15 = vmax.f32 %v9861_v26, 0.0  ;;  %v9764_v20 = vmul.f32 %v11218_v47, %v17679_v3  ;;  %v11220_v34 = vadd.f32 %v9653_v9, %v19044_v0 }
 0x762   : > { %v10197_v23 = vsel %vm10196_vm1, %v10195_v31, %v18009_v11  ;;  %v10164_v5 = vmax.f32 %v10163_v37, %v10035_v55  ;;  %v10036_v39 = vsel %vm19046_vm10, %v9948_v63, 0.0  ;;  %v9862_v29 = vadd.f32 %v17682_v22, %v9763_v28  ;;  %v19056_v63 = vld [vmem:[#allocation47_spill] sm:$0xff] }
 0x763   : > { %v18129_v19 = vsel %vm10198_vm0, %v10195_v31, %v10197_v23  ;;  %v10149_v44 = vmax.f32 %v10148_v4, %v10036_v39  ;;  %v10037_v54 = vsel %vm19047_vm11, %v9949_v15, 0.0  ;;  %v9863_v2 = vadd.f32 %v17685_v42, %v9764_v20 }
 0x764   : > { %v10165_v53 = vmax.f32 %v10164_v5, %v10037_v54  ;;  %v9950_v27 = vmax.f32 %v9862_v29, 0.0  ;;  %v9765_v1 = vmul.f32 %v11219_v62, %v17677_v36  ;;  %v9766_v11 = vmul.f32 %v11220_v34, %v17679_v3  ;;  %v19058_v62 = vld [vmem:[#allocation106_spill] sm:$0xff]  ;;  %v19060_v34 = vld [vmem:[#allocation107_spill] sm:$0xff] }
 0x765   : > { %v9951_v43 = vmax.f32 %v9863_v2, 0.0  ;;  %v9657_v7 = vpop.f32.mrb[220].mxu1  ;;  %vm19057_vm13 = vcmp.eq.s32.totalorder %v19056_v63, 1 }
 0x766   : > { %v10038_v12 = vsel %vm5984_vm2, %v9950_v27, 0.0  ;;  %v9864_v33 = vadd.f32 %v17682_v22, %v9765_v1  ;;  %v9865_v14 = vadd.f32 %v17685_v42, %v9766_v11  ;;  %v11221_v18 = vadd.f32 %v9657_v7, %v19049_v59  ;;  %v9659_v6 = vpop.f32.mrb[221].mxu1  ;;  %vm19059_vm14 = vmmov %vm19057_vm13  ;;  %v19064_v11 = vld [vmem:[#allocation109_spill] sm:$0xff] }
 0x767   : > { %v10150_v37 = vmax.f32 %v10149_v44, %v10038_v12  ;;  %v10039_v41 = vsel %vm5984_vm2, %v9951_v43, 0.0  ;;  %v11222_v10 = vadd.f32 %v9659_v6, %v19050_v8  ;;  %v9661_v51 = vpop.f32.mrb[222].mxu1  ;;  %vm19055_vm2 = vmmov %vm19054_vm12  ;;  %v19061_v44 = vld [vmem:[#allocation108_spill] sm:$0xff] }
 0x768   : > { %v10166_v49 = vmax.f32 %v10165_v53, %v10039_v41  ;;  %v9952_v58 = vmax.f32 %v9864_v33, 0.0  ;;  %v9953_v50 = vmax.f32 %v9865_v14, 0.0  ;;  %v9767_v46 = vmul.f32 %v11221_v18, %v17677_v36  ;;  %v9663_v57 = vpop.f32.mrb[223].mxu1  ;;  %v19062_v53 = vld [vmem:[#allocation27_spill] sm:$0xff] }
 0x769   : > { %v9768_v13 = vmul.f32 %v11222_v10, %v17679_v3  ;;  %v11223_v16 = vadd.f32 %v9661_v51, %v19051_v40  ;;  %v11224_v60 = vadd.f32 %v9663_v57, %v19052_v35  ;;  %vm19063_vm8 = vcmp.eq.s32.totalorder %v19062_v53, 1 }
 0x76a   : > { %v10040_v32 = vsel %vm19054_vm12, %v9952_v58, 0.0  ;;  %v10041_v61 = vsel %vm19055_vm2, %v9953_v50, 0.0  ;;  %v9866_v48 = vadd.f32 %v17682_v22, %v9767_v46  ;;  %vm19065_vm4 = vmmov %vm19063_vm8 }
 0x76b   : > { %v10151_v25 = vmax.f32 %v10150_v37, %v10040_v32  ;;  %v10167_v52 = vmax.f32 %v10166_v49, %v10041_v61  ;;  %v9867_v4 = vadd.f32 %v17685_v42, %v9768_v13  ;;  %v9769_v24 = vmul.f32 %v11223_v16, %v17677_v36 }
 0x76c   : > { %v9954_v26 = vmax.f32 %v9866_v48, 0.0  ;;  %v9770_v45 = vmul.f32 %v11224_v60, %v17679_v3 }
 0x76d   : > { %v9955_v47 = vmax.f32 %v9867_v4, 0.0  ;;  %v9868_v56 = vadd.f32 %v17682_v22, %v9769_v24  ;;  %v9667_v31 = vpop.f32.mrb[224].mxu1 }
 0x76e   : > { %v10042_v28 = vsel %vm19057_vm13, %v9954_v26, 0.0  ;;  %v9869_v17 = vadd.f32 %v17685_v42, %v9770_v45  ;;  %v11225_v9 = vadd.f32 %v9667_v31, %v19058_v62  ;;  %v9669_v55 = vpop.f32.mrb[225].mxu1 }
 0x76f   : > { %v10152_v15 = vmax.f32 %v10151_v25, %v10042_v28  ;;  %v10043_v20 = vsel %vm19059_vm14, %v9955_v47, 0.0  ;;  %v9956_v0 = vmax.f32 %v9868_v56, 0.0  ;;  %v11226_v23 = vadd.f32 %v9669_v55, %v19060_v34  ;;  %v9671_v5 = vpop.f32.mrb[226].mxu1 }
 0x770   : > { %v10168_v30 = vmax.f32 %v10167_v52, %v10043_v20  ;;  %v9957_v39 = vmax.f32 %v9869_v17, 0.0  ;;  %v9771_v29 = vmul.f32 %v11225_v9, %v17677_v36  ;;  %v11227_v54 = vadd.f32 %v9671_v5, %v19061_v44  ;;  %v9673_v2 = vpop.f32.mrb[227].mxu1 }
 0x771   : > { %v10044_v27 = vsel %vm19063_vm8, %v9956_v0, 0.0  ;;  %v9772_v1 = vmul.f32 %v11226_v23, %v17679_v3  ;;  %v11228_v43 = vadd.f32 %v9673_v2, %v19064_v11 }
 0x772   : > { %v10153_v7 = vmax.f32 %v10152_v15, %v10044_v27  ;;  %v10045_v21 = vsel %vm19065_vm4, %v9957_v39, 0.0  ;;  %v9870_v12 = vadd.f32 %v17682_v22, %v9771_v29  ;;  %v9773_v33 = vmul.f32 %v11227_v54, %v17677_v36 }
 0x773   : > { %v10169_v14 = vmax.f32 %v10168_v30, %v10045_v21  ;;  %v9871_v59 = vadd.f32 %v17685_v42, %v9772_v1  ;;  %v9774_v18 = vmul.f32 %v11228_v43, %v17679_v3 }
 0x774   : > { %v9958_v6 = vmax.f32 %v9870_v12, 0.0  ;;  %v9872_v37 = vadd.f32 %v17682_v22, %v9773_v33 }
 0x775   : > { %v9959_v41 = vmax.f32 %v9871_v59, 0.0  ;;  %v9873_v8 = vadd.f32 %v17685_v42, %v9774_v18 }
 0x776   : > { %v10046_v51 = vsel %vm5988_vm3, %v9958_v6, 0.0  ;;  %v9960_v49 = vmax.f32 %v9872_v37, 0.0 }
 0x777   : > { %v10154_v58 = vmax.f32 %v10153_v7, %v10046_v51  ;;  %v10047_v36 = vsel %vm5988_vm3, %v9959_v41, 0.0  ;;  %v9961_v50 = vmax.f32 %v9873_v8, 0.0  ;;  %vm10201_vm3 = vcmask 1043459  }
 0x778   : > { %v10170_v46 = vmax.f32 %v10169_v14, %v10047_v36  ;;  %v10048_v3 = vsel %vm5989_vm15, %v9960_v49, 0.0 }
 0x779   : > { %v10155_v13 = vmax.f32 %v10154_v58, %v10048_v3  ;;  %v10049_v22 = vsel %vm5989_vm15, %v9961_v50, 0.0  ;;  %vm10203_vm15 = vcmask 1047559  }
 0x77a   : > { %v10171_v42 = vmax.f32 %v10170_v46, %v10049_v22 }
 0x77b   : > { %v10156_v40 = vrot.slane %v10155_v13, 4 }
 0x77c   : > { %v10172_v16 = vrot.slane %v10171_v42, 4 }
 0x77d   : > { %v10157_v35 = vmax.f32 %v10155_v13, %v10156_v40 }
 0x77e   : > { %v10173_v60 = vmax.f32 %v10171_v42, %v10172_v16 }
 0x77f   : > { %v10158_v38 = vrot.slane %v10157_v35, 2 }
 0x780   : > { %v10174_v32 = vrot.slane %v10173_v60, 2 }
 0x781   : > { %v10159_v61 = vmax.f32 %v10157_v35, %v10158_v38 }
 0x782   : > { %v10175_v48 = vmax.f32 %v10173_v60, %v10174_v32 }
 0x783   : > { %v10160_v25 = vrot.slane %v10159_v61, 1 }
 0x784   : > { %v10176_v52 = vrot.slane %v10175_v48, 1 }
 0x785   : > { %v10161_v4 = vmax.f32 %v10159_v61, %v10160_v25 }
 0x786   : > { %v10177_v24 = vmax.f32 %v10175_v48, %v10176_v52 }
 0x788   : > { %v10189_v26 = vcombine.low %v10161_v4, %v10177_v24 }
 0x78a   : > { %v10200_v45 = vrot.slane %v10189_v26, 5 }
 0x78c   : > { %v10202_v47 = vsel %vm10201_vm3, %v10200_v45, %v18129_v19 }
 0x78d   : > { %v10204_v56 = vsel %vm10203_vm15, %v10200_v45, %v10202_v47 }
 0x78e   : > { %10206 = vst [vmem:[%s388_s29] sm:$0xff] %v10204_v56 }
 0x78f PF: > { %s21_s17 = sadd.s32 1, %s11848_s17  }
 0x790   : > { %p18_p5 = scmp.ge.s32.totalorder %s21_s17, 4  }
 0x792   :  { %20 = sbr.rel (!%p18_p5) target bundleno = 1 (0x1), region = 94 }

</bundles_post_ra>
